<compile_context>
chip_gen: v7x
topology: tpu7x:2x2x1
jax: 0.10.0
libtpu: 0.0.40
codegen_flags: <defaults>
</compile_context>

<pallas_src>
import functools

import jax
import jax.numpy as jnp
from jax.experimental import pallas as pl
from jax.experimental.pallas import tpu as pltpu


def transformer_block_kernel(x_ref, g1_ref, bt1_ref, wqkv_ref, wp_ref, bp_ref,
                             g2_ref, bt2_ref, w1_ref, bb1_ref, w2_ref, bb2_ref,
                             o_ref, *, num_heads):
    bb, N, C = x_ref.shape
    H = num_heads
    hd = C // H
    M = bb * N
    eps = 1e-5
    sqrt_2_over_pi = 0.7978845608028654

    # ---- hoisted loads (params read exactly once per invocation) ----
    x = x_ref[...].astype(jnp.float32).reshape(M, C)           # (M, C) f32
    g1, bt1 = g1_ref[0], bt1_ref[0]
    g2, bt2 = g2_ref[0], bt2_ref[0]
    bp, b1, b2 = bp_ref[0], bb1_ref[0], bb2_ref[0]
    wqkv = wqkv_ref[...]                                        # bf16 (C, 3C), scale folded into Q cols
    wp = wp_ref[...]                                            # bf16 (C, C)
    w1 = w1_ref[...]                                            # bf16 (C, hidden)
    w2 = w2_ref[...]                                            # bf16 (hidden, C)

    def layer_norm(t, g, b):
        # single pass: E[t] and E[t^2] together; var = E[t^2] - mean^2 (f32 statistics)
        mean = jnp.mean(t, axis=-1, keepdims=True)
        mean_sq = jnp.mean(t * t, axis=-1, keepdims=True)
        var = mean_sq - mean * mean
        return (t - mean) * jax.lax.rsqrt(var + eps) * g + b

    # ---- LayerNorm 1 ----
    h = layer_norm(x, g1, bt1)

    # ---- fused QKV projection: one wide bf16 MXU matmul, f32 accumulation ----
    # (attention scale already folded into wqkv[:, :C] at weight-prep time)
    qkv = jnp.dot(h.astype(jnp.bfloat16), wqkv,
                  preferred_element_type=jnp.float32)           # (M, 3C) f32
    q_all = qkv[:, 0:C].astype(jnp.bfloat16)
    k_all = qkv[:, C:2 * C].astype(jnp.bfloat16)
    v_all = qkv[:, 2 * C:3 * C].astype(jnp.bfloat16)

    # ---- per-head attention (static unroll; batched over the batch block) ----
    # TODO(synk): at N=64 the softmax lane-dim is only half a vreg wide; pack two
    # heads/batches side-by-side if softmax ever becomes the critical path.
    ctx_heads = []
    for hh in range(H):
        lo = hh * hd
        qh = q_all[:, lo:lo + hd].reshape(bb, N, hd)
        kh = k_all[:, lo:lo + hd].reshape(bb, N, hd)
        vh = v_all[:, lo:lo + hd].reshape(bb, N, hd)
        s = jnp.einsum('bnd,bmd->bnm', qh, kh,
                       preferred_element_type=jnp.float32)      # (bb, N, N) f32
        s = s - jnp.max(s, axis=-1, keepdims=True)
        p = jnp.exp(s)
        p = p * pl.reciprocal(jnp.sum(p, axis=-1, keepdims=True), approx=True)
        oh = jnp.einsum('bnm,bmd->bnd', p.astype(jnp.bfloat16), vh,
                        preferred_element_type=jnp.float32)     # (bb, N, hd) f32
        ctx_heads.append(oh.reshape(M, hd))

    # assemble the lane-contiguous (M, C) context once -> single full-depth projection
    ctx = jnp.concatenate(ctx_heads, axis=-1).astype(jnp.bfloat16)   # (M, C)
    x1 = x + bp + jnp.dot(ctx, wp, preferred_element_type=jnp.float32)

    # ---- LayerNorm 2 ----
    h2 = layer_norm(x1, g2, bt2)

    # ---- MLP: fc1 -> tanh-approximate GELU (EUP) -> fc2 ----
    z = jnp.dot(h2.astype(jnp.bfloat16), w1,
                preferred_element_type=jnp.float32) + b1
    z = 0.5 * z * (1.0 + jnp.tanh(sqrt_2_over_pi * (z + 0.044715 * z * z * z)))
    z = jnp.dot(z.astype(jnp.bfloat16), w2,
                preferred_element_type=jnp.float32) + b2

    o_ref[...] = (x1 + z).reshape(bb, N, C).astype(o_ref.dtype)


def _tpu_resources():
    """Trace-time hardware query with conservative fallbacks (v7x-safe)."""
    vmem_cap = 64 * 1024 * 1024   # conservative default: v7x per-TC VMEM
    num_tc = 2                    # conservative: assume 2 TCs so grid >= 2 when possible
    try:
        info = pltpu.get_tpu_info()
        vmem_cap = int(getattr(info, "vmem_capacity_bytes", vmem_cap))
        for name in ("num_cores", "core_count", "num_tensorcores"):
            v = getattr(info, name, None)
            if v:
                num_tc = int(v)
                break
    except Exception:
        pass
    return vmem_cap, num_tc


def _vmem_bytes(bb, N, C, hidden, io_itemsize):
    """Conservative per-grid-step VMEM footprint (bytes): I/O blocks, weights, activations."""
    M = bb * N
    # pipelined x-in and out blocks, double-buffered by the Pallas pipeline
    io = 2 * 2 * M * C * io_itemsize
    # bf16 weights; counted double-buffered even though we request Buffered(1)
    w_elems = C * 3 * C + C * C + C * hidden + hidden * C
    weights = 2 * 2 * w_elems
    # small f32 params (gammas / betas / biases)
    small = 4 * (6 * C + hidden)
    # in-kernel activations, "all live" conservative sum
    act = 4 * M * (C            # x f32 copy
                   + C          # LN output / h2
                   + 3 * C      # qkv f32 accumulate
                   + C          # x1 residual accumulator
                   + C          # per-head contexts before concat (H*hd = C)
                   + hidden)    # MLP hidden f32
    act += 2 * M * (3 * C + C + hidden)   # bf16 casts: q/k/v, ctx, MLP hidden
    act += 4 * 2 * bb * N * N             # scores/probs f32 (allow 2 heads live)
    return io + weights + small + act


def _pick_batch_block(B, N, C, hidden, budget, io_itemsize, min_steps):
    divisors = sorted((d for d in range(1, B + 1) if B % d == 0), reverse=True)
    # prefer the largest bb that fits VMEM AND leaves >= min_steps parallel grid steps
    for bb in divisors:
        if B // bb >= min_steps and _vmem_bytes(bb, N, C, hidden, io_itemsize) <= budget:
            return bb
    for bb in divisors:
        if _vmem_bytes(bb, N, C, hidden, io_itemsize) <= budget:
            return bb
    return 1


def transformer_block(x, params, num_heads, *, batch_block=None):
    B, N, C = x.shape
    hidden = params["w1"].shape[1]
    H = num_heads
    hd = C // H
    scale = float(hd ** (-0.5))

    # --- generation-aware resource policy ---
    vmem_cap, num_tc = _tpu_resources()
    vmem_limit = int(min(vmem_cap * 3 // 4, 100 * 1024 * 1024))   # ~96 MiB v5e/v6e, ~48 MiB v7x
    budget = int(vmem_limit * 0.85)                                # headroom for compiler scratch
    io_itemsize = jnp.dtype(x.dtype).itemsize

    if batch_block is None:
        bb = _pick_batch_block(B, N, C, hidden, budget, io_itemsize,
                               min_steps=min(num_tc, B))
    else:
        bb = batch_block
        assert B % bb == 0, "batch_block must divide B"
    grid = (B // bb,)

    # --- one-time weight transform: fold attention scale into Q columns, feed MXU in bf16 ---
    wqkv = params["wqkv"].at[:, :C].multiply(scale).astype(jnp.bfloat16)
    wp = params["wp"].astype(jnp.bfloat16)
    w1 = params["w1"].astype(jnp.bfloat16)
    w2 = params["w2"].astype(jnp.bfloat16)

    kernel = functools.partial(transformer_block_kernel, num_heads=H)

    args = (x, params["g1"], params["bt1"], wqkv, wp, params["bp"],
            params["g2"], params["bt2"], w1, params["bb1"], w2, params["bb2"])

    def call(single_buffer_consts):
        def cspec(shape):
            n = len(shape)

            def zmap(b):
                return (0,) * n

            if single_buffer_consts:
                # constant index_map -> no DMA to hide; don't double-buffer the weights
                return pl.BlockSpec(shape, zmap, pipeline_mode=pl.Buffered(1))
            return pl.BlockSpec(shape, zmap)

        in_specs = [
            pl.BlockSpec((bb, N, C), lambda b: (b, 0, 0)),   # x
            cspec((1, C)),            # norm1 gamma
            cspec((1, C)),            # norm1 beta
            cspec((C, 3 * C)),        # qkv weight (qkv_bias=False; scale pre-folded)
            cspec((C, C)),            # proj weight
            cspec((1, C)),            # proj bias
            cspec((1, C)),            # norm2 gamma
            cspec((1, C)),            # norm2 beta
            cspec((C, hidden)),       # fc1 weight
            cspec((1, hidden)),       # fc1 bias
            cspec((hidden, C)),       # fc2 weight
            cspec((1, C)),            # fc2 bias
        ]

        return pl.pallas_call(
            kernel,
            out_shape=jax.ShapeDtypeStruct((B, N, C), x.dtype),
            grid_spec=pltpu.PrefetchScalarGridSpec(
                num_scalar_prefetch=0,
                grid=grid,
                in_specs=in_specs,
                out_specs=pl.BlockSpec((bb, N, C), lambda b: (b, 0, 0)),
            ),
            compiler_params=pltpu.CompilerParams(
                dimension_semantics=("parallel",),
                vmem_limit_bytes=vmem_limit,
            ),
        )(*args)

    try:
        return jax.block_until_ready(call(True))
    except Exception:
        # pipeline_mode / Buffered(1) not supported on this runtime: default buffering
        return call(False)


def reference_block(x, p, num_heads):
    """Pure-JAX f32 reference mirroring the PyTorch forward pass (exact-erf GELU)."""
    B, N, C = x.shape
    hd = C // num_heads
    scale = hd ** (-0.5)
    eps = 1e-5

    def ln(t, g, b):
        mu = jnp.mean(t, axis=-1, keepdims=True)
        var = jnp.mean((t - mu) ** 2, axis=-1, keepdims=True)
        return (t - mu) / jnp.sqrt(var + eps) * g + b

    h = ln(x, p["g1"][0], p["bt1"][0])
    qkv = h @ p["wqkv"]
    qkv = qkv.reshape(B, N, 3, num_heads, hd).transpose(2, 0, 3, 1, 4)
    q, k, v = qkv[0], qkv[1], qkv[2]
    attn = (q @ jnp.swapaxes(k, -2, -1)) * scale
    attn = jax.nn.softmax(attn, axis=-1)
    o = (attn @ v).transpose(0, 2, 1, 3).reshape(B, N, C)
    o = o @ p["wp"] + p["bp"][0]
    x1 = x + o

    h2 = ln(x1, p["g2"][0], p["bt2"][0])
    z = h2 @ p["w1"] + p["bb1"][0]
    z = jax.nn.gelu(z, approximate=False)
    z = z @ p["w2"] + p["bb2"][0]
    return x1 + z


if __name__ == "__main__":
    # chess-transformer-sized toy config: 64 board tokens, lane-dense channels
    B, N, C = 2, 64, 128
    num_heads = 4
    mlp_ratio = 4.0
    hidden = int(C * mlp_ratio)

    key = jax.random.PRNGKey(0)
    keys = jax.random.split(key, 8)

    params = {
        "g1":   jnp.ones((1, C), jnp.float32),
        "bt1":  jnp.zeros((1, C), jnp.float32),
        "wqkv": 0.05 * jax.random.normal(keys[0], (C, 3 * C), jnp.float32),
        "wp":   0.05 * jax.random.normal(keys[1], (C, C), jnp.float32),
        "bp":   0.05 * jax.random.normal(keys[2], (1, C), jnp.float32),
        "g2":   jnp.ones((1, C), jnp.float32),
        "bt2":  jnp.zeros((1, C), jnp.float32),
        "w1":   0.05 * jax.random.normal(keys[3], (C, hidden), jnp.float32),
        "bb1":  0.05 * jax.random.normal(keys[4], (1, hidden), jnp.float32),
        "w2":   0.05 * jax.random.normal(keys[5], (hidden, C), jnp.float32),
        "bb2":  0.05 * jax.random.normal(keys[6], (1, C), jnp.float32),
    }

    x = jax.random.normal(keys[7], (B, N, C), jnp.float32)

    out = jax.block_until_ready(transformer_block(x, params, num_heads))
    ref = reference_block(x, params, num_heads)

    assert out.shape == (B, N, C)
    # bf16 MXU matmuls (f32 accumulation) + approx softmax reciprocal + tanh-GELU
    # vs the exact f32 / erf-GELU reference
    err = float(jnp.max(jnp.abs(out - ref)))
    assert jnp.allclose(out, ref, atol=2e-2, rtol=2e-2), f"mismatch vs reference: {err}"

    print("KERNEL_OK")
</pallas_src>

<mosaic_0001>
module attributes {stable_mosaic.version = 11 : i64} {
  func.func @transformer_block_kernel(%arg0: i32, %arg1: memref<1x64x128xf32, #tpu.memory_space<vmem>>, %arg2: memref<1x128xf32, #tpu.memory_space<vmem>>, %arg3: memref<1x128xf32, #tpu.memory_space<vmem>>, %arg4: memref<128x384xbf16, #tpu.memory_space<vmem>>, %arg5: memref<128x128xbf16, #tpu.memory_space<vmem>>, %arg6: memref<1x128xf32, #tpu.memory_space<vmem>>, %arg7: memref<1x128xf32, #tpu.memory_space<vmem>>, %arg8: memref<1x128xf32, #tpu.memory_space<vmem>>, %arg9: memref<128x512xbf16, #tpu.memory_space<vmem>>, %arg10: memref<1x512xf32, #tpu.memory_space<vmem>>, %arg11: memref<512x128xbf16, #tpu.memory_space<vmem>>, %arg12: memref<1x128xf32, #tpu.memory_space<vmem>>, %arg13: memref<1x64x128xf32, #tpu.memory_space<vmem>>) attributes {dimension_semantics = [#tpu.dimension_semantics<parallel>], iteration_bounds = array<i64: 2>, scalar_prefetch = 0 : i64, scratch_operands = 0 : i64, tpu.core_type = #tpu.core_type<tc>, window_params = [{transform_indices = @transform_0, window_bounds = array<i64: 1, 64, 128>}, {pipeline_mode = #tpu.pipeline_mode<synchronous>, transform_indices = @transform_1, window_bounds = array<i64: 1, 128>}, {pipeline_mode = #tpu.pipeline_mode<synchronous>, transform_indices = @transform_2, window_bounds = array<i64: 1, 128>}, {pipeline_mode = #tpu.pipeline_mode<synchronous>, transform_indices = @transform_3, window_bounds = array<i64: 128, 384>}, {pipeline_mode = #tpu.pipeline_mode<synchronous>, transform_indices = @transform_4, window_bounds = array<i64: 128, 128>}, {pipeline_mode = #tpu.pipeline_mode<synchronous>, transform_indices = @transform_5, window_bounds = array<i64: 1, 128>}, {pipeline_mode = #tpu.pipeline_mode<synchronous>, transform_indices = @transform_6, window_bounds = array<i64: 1, 128>}, {pipeline_mode = #tpu.pipeline_mode<synchronous>, transform_indices = @transform_7, window_bounds = array<i64: 1, 128>}, {pipeline_mode = #tpu.pipeline_mode<synchronous>, transform_indices = @transform_8, window_bounds = array<i64: 128, 512>}, {pipeline_mode = #tpu.pipeline_mode<synchronous>, transform_indices = @transform_9, window_bounds = array<i64: 1, 512>}, {pipeline_mode = #tpu.pipeline_mode<synchronous>, transform_indices = @transform_10, window_bounds = array<i64: 512, 128>}, {pipeline_mode = #tpu.pipeline_mode<synchronous>, transform_indices = @transform_11, window_bounds = array<i64: 1, 128>}, {transform_indices = @transform_12, window_bounds = array<i64: 1, 64, 128>}]} {
    %c0 = arith.constant 0 : index
    %c0_0 = arith.constant 0 : index
    %c0_1 = arith.constant 0 : index
    %0 = vector.load %arg1[%c0, %c0_0, %c0_1] : memref<1x64x128xf32, #tpu.memory_space<vmem>>, vector<1x64x128xf32>
    %1 = vector.shape_cast %0 : vector<1x64x128xf32> to vector<64x128xf32>
    %c0_2 = arith.constant 0 : index
    %c0_3 = arith.constant 0 : index
    %2 = vector.load %arg2[%c0_2, %c0_3] : memref<1x128xf32, #tpu.memory_space<vmem>>, vector<1x128xf32>
    %3 = vector.shape_cast %2 : vector<1x128xf32> to vector<128xf32>
    %c0_4 = arith.constant 0 : index
    %c0_5 = arith.constant 0 : index
    %4 = vector.load %arg3[%c0_4, %c0_5] : memref<1x128xf32, #tpu.memory_space<vmem>>, vector<1x128xf32>
    %5 = vector.shape_cast %4 : vector<1x128xf32> to vector<128xf32>
    %c0_6 = arith.constant 0 : index
    %c0_7 = arith.constant 0 : index
    %6 = vector.load %arg7[%c0_6, %c0_7] : memref<1x128xf32, #tpu.memory_space<vmem>>, vector<1x128xf32>
    %7 = vector.shape_cast %6 : vector<1x128xf32> to vector<128xf32>
    %c0_8 = arith.constant 0 : index
    %c0_9 = arith.constant 0 : index
    %8 = vector.load %arg8[%c0_8, %c0_9] : memref<1x128xf32, #tpu.memory_space<vmem>>, vector<1x128xf32>
    %9 = vector.shape_cast %8 : vector<1x128xf32> to vector<128xf32>
    %c0_10 = arith.constant 0 : index
    %c0_11 = arith.constant 0 : index
    %10 = vector.load %arg6[%c0_10, %c0_11] : memref<1x128xf32, #tpu.memory_space<vmem>>, vector<1x128xf32>
    %11 = vector.shape_cast %10 : vector<1x128xf32> to vector<128xf32>
    %c0_12 = arith.constant 0 : index
    %c0_13 = arith.constant 0 : index
    %12 = vector.load %arg10[%c0_12, %c0_13] : memref<1x512xf32, #tpu.memory_space<vmem>>, vector<1x512xf32>
    %13 = vector.shape_cast %12 : vector<1x512xf32> to vector<512xf32>
    %c0_14 = arith.constant 0 : index
    %c0_15 = arith.constant 0 : index
    %14 = vector.load %arg12[%c0_14, %c0_15] : memref<1x128xf32, #tpu.memory_space<vmem>>, vector<1x128xf32>
    %15 = vector.shape_cast %14 : vector<1x128xf32> to vector<128xf32>
    %c0_16 = arith.constant 0 : index
    %c0_17 = arith.constant 0 : index
    %16 = vector.load %arg4[%c0_16, %c0_17] : memref<128x384xbf16, #tpu.memory_space<vmem>>, vector<128x384xbf16>
    %c0_18 = arith.constant 0 : index
    %c0_19 = arith.constant 0 : index
    %17 = vector.load %arg5[%c0_18, %c0_19] : memref<128x128xbf16, #tpu.memory_space<vmem>>, vector<128x128xbf16>
    %c0_20 = arith.constant 0 : index
    %c0_21 = arith.constant 0 : index
    %18 = vector.load %arg9[%c0_20, %c0_21] : memref<128x512xbf16, #tpu.memory_space<vmem>>, vector<128x512xbf16>
    %c0_22 = arith.constant 0 : index
    %c0_23 = arith.constant 0 : index
    %19 = vector.load %arg11[%c0_22, %c0_23] : memref<512x128xbf16, #tpu.memory_space<vmem>>, vector<512x128xbf16>
    %cst = arith.constant dense<0.000000e+00> : vector<64xf32>
    %20 = vector.multi_reduction <add>, %1, %cst [1] : vector<64x128xf32> to vector<64xf32>
    %21 = vector.shape_cast %20 : vector<64xf32> to vector<64x1xf32>
    %cst_24 = arith.constant 1.280000e+02 : f32
    %22 = vector.broadcast %cst_24 : f32 to vector<64x1xf32>
    %23 = arith.divf %21, %22 : vector<64x1xf32>
    %24 = arith.mulf %1, %1 : vector<64x128xf32>
    %cst_25 = arith.constant dense<0.000000e+00> : vector<64xf32>
    %25 = vector.multi_reduction <add>, %24, %cst_25 [1] : vector<64x128xf32> to vector<64xf32>
    %26 = vector.shape_cast %25 : vector<64xf32> to vector<64x1xf32>
    %cst_26 = arith.constant 1.280000e+02 : f32
    %27 = vector.broadcast %cst_26 : f32 to vector<64x1xf32>
    %28 = arith.divf %26, %27 : vector<64x1xf32>
    %29 = arith.mulf %23, %23 : vector<64x1xf32>
    %30 = arith.subf %28, %29 : vector<64x1xf32>
    %31 = vector.broadcast %23 : vector<64x1xf32> to vector<64x128xf32>
    %32 = arith.subf %1, %31 : vector<64x128xf32>
    %cst_27 = arith.constant 9.99999974E-6 : f32
    %33 = vector.broadcast %cst_27 : f32 to vector<64x1xf32>
    %34 = arith.addf %30, %33 : vector<64x1xf32>
    %35 = math.rsqrt %34 : vector<64x1xf32>
    %36 = vector.broadcast %35 : vector<64x1xf32> to vector<64x128xf32>
    %37 = arith.mulf %32, %36 : vector<64x128xf32>
    %38 = vector.shape_cast %3 : vector<128xf32> to vector<1x128xf32>
    %39 = vector.broadcast %38 : vector<1x128xf32> to vector<64x128xf32>
    %40 = arith.mulf %37, %39 : vector<64x128xf32>
    %41 = vector.shape_cast %5 : vector<128xf32> to vector<1x128xf32>
    %42 = vector.broadcast %41 : vector<1x128xf32> to vector<64x128xf32>
    %43 = arith.addf %40, %42 : vector<64x128xf32>
    %44 = arith.truncf %43 : vector<64x128xf32> to vector<64x128xbf16>
    %cst_28 = arith.constant dense<0.000000e+00> : vector<64x384xf32>
    %45 = tpu.matmul %44, %16, %cst_28 {dimension_numbers = #tpu.dot_dimension_numbers<[1], [0], [0], [1], [0, 0, 1, 1], [], []>} : vector<64x128xbf16>, vector<128x384xbf16>, vector<64x384xf32> -> vector<64x384xf32>
    %46 = vector.extract_strided_slice %45 {offsets = [0, 0], sizes = [64, 128], strides = [1, 1]} : vector<64x384xf32> to vector<64x128xf32>
    %47 = arith.truncf %46 : vector<64x128xf32> to vector<64x128xbf16>
    %48 = vector.extract_strided_slice %45 {offsets = [0, 128], sizes = [64, 128], strides = [1, 1]} : vector<64x384xf32> to vector<64x128xf32>
    %49 = arith.truncf %48 : vector<64x128xf32> to vector<64x128xbf16>
    %50 = vector.extract_strided_slice %45 {offsets = [0, 256], sizes = [64, 128], strides = [1, 1]} : vector<64x384xf32> to vector<64x128xf32>
    %51 = arith.truncf %50 : vector<64x128xf32> to vector<64x128xbf16>
    %52 = vector.extract_strided_slice %47 {offsets = [0, 0], sizes = [64, 32], strides = [1, 1]} : vector<64x128xbf16> to vector<64x32xbf16>
    %53 = vector.shape_cast %52 : vector<64x32xbf16> to vector<1x64x32xbf16>
    %54 = vector.extract_strided_slice %49 {offsets = [0, 0], sizes = [64, 32], strides = [1, 1]} : vector<64x128xbf16> to vector<64x32xbf16>
    %55 = vector.shape_cast %54 : vector<64x32xbf16> to vector<1x64x32xbf16>
    %56 = vector.extract_strided_slice %51 {offsets = [0, 0], sizes = [64, 32], strides = [1, 1]} : vector<64x128xbf16> to vector<64x32xbf16>
    %57 = vector.shape_cast %56 : vector<64x32xbf16> to vector<1x64x32xbf16>
    "tpu.trace_start"() <{level = 10 : i32, message = "bnd,bmd->bnm"}> : () -> ()
    %cst_29 = arith.constant dense<0.000000e+00> : vector<1x64x64xf32>
    %58 = tpu.matmul %53, %55, %cst_29 {dimension_numbers = #tpu.dot_dimension_numbers<[2], [2], [1], [1], [0, 0, 0, 1, 1, 1], [0], [0]>} : vector<1x64x32xbf16>, vector<1x64x32xbf16>, vector<1x64x64xf32> -> vector<1x64x64xf32>
    "tpu.trace_stop"() : () -> ()
    %cst_30 = arith.constant dense<0xFF800000> : vector<1x64xf32>
    %59 = vector.multi_reduction <maximumf>, %58, %cst_30 [2] : vector<1x64x64xf32> to vector<1x64xf32>
    %60 = vector.shape_cast %59 : vector<1x64xf32> to vector<1x64x1xf32>
    %61 = vector.broadcast %60 : vector<1x64x1xf32> to vector<1x64x64xf32>
    %62 = arith.subf %58, %61 : vector<1x64x64xf32>
    %63 = math.exp %62 : vector<1x64x64xf32>
    %cst_31 = arith.constant dense<0.000000e+00> : vector<1x64xf32>
    %64 = vector.multi_reduction <add>, %63, %cst_31 [2] : vector<1x64x64xf32> to vector<1x64xf32>
    %65 = vector.shape_cast %64 : vector<1x64xf32> to vector<1x64x1xf32>
    %66 = tpu.reciprocal %65 {approx = true} : vector<1x64x1xf32> -> vector<1x64x1xf32>
    %67 = vector.broadcast %66 : vector<1x64x1xf32> to vector<1x64x64xf32>
    %68 = arith.mulf %63, %67 : vector<1x64x64xf32>
    %69 = arith.truncf %68 : vector<1x64x64xf32> to vector<1x64x64xbf16>
    "tpu.trace_start"() <{level = 10 : i32, message = "bnm,bmd->bnd"}> : () -> ()
    %cst_32 = arith.constant dense<0.000000e+00> : vector<1x64x32xf32>
    %70 = tpu.matmul %69, %57, %cst_32 {dimension_numbers = #tpu.dot_dimension_numbers<[2], [1], [1], [2], [0, 0, 0, 1, 1, 2], [0], [0]>} : vector<1x64x64xbf16>, vector<1x64x32xbf16>, vector<1x64x32xf32> -> vector<1x64x32xf32>
    "tpu.trace_stop"() : () -> ()
    %71 = vector.shape_cast %70 : vector<1x64x32xf32> to vector<64x32xf32>
    %72 = vector.extract_strided_slice %47 {offsets = [0, 32], sizes = [64, 32], strides = [1, 1]} : vector<64x128xbf16> to vector<64x32xbf16>
    %73 = vector.shape_cast %72 : vector<64x32xbf16> to vector<1x64x32xbf16>
    %74 = vector.extract_strided_slice %49 {offsets = [0, 32], sizes = [64, 32], strides = [1, 1]} : vector<64x128xbf16> to vector<64x32xbf16>
    %75 = vector.shape_cast %74 : vector<64x32xbf16> to vector<1x64x32xbf16>
    %76 = vector.extract_strided_slice %51 {offsets = [0, 32], sizes = [64, 32], strides = [1, 1]} : vector<64x128xbf16> to vector<64x32xbf16>
    %77 = vector.shape_cast %76 : vector<64x32xbf16> to vector<1x64x32xbf16>
    "tpu.trace_start"() <{level = 10 : i32, message = "bnd,bmd->bnm"}> : () -> ()
    %cst_33 = arith.constant dense<0.000000e+00> : vector<1x64x64xf32>
    %78 = tpu.matmul %73, %75, %cst_33 {dimension_numbers = #tpu.dot_dimension_numbers<[2], [2], [1], [1], [0, 0, 0, 1, 1, 1], [0], [0]>} : vector<1x64x32xbf16>, vector<1x64x32xbf16>, vector<1x64x64xf32> -> vector<1x64x64xf32>
    "tpu.trace_stop"() : () -> ()
    %cst_34 = arith.constant dense<0xFF800000> : vector<1x64xf32>
    %79 = vector.multi_reduction <maximumf>, %78, %cst_34 [2] : vector<1x64x64xf32> to vector<1x64xf32>
    %80 = vector.shape_cast %79 : vector<1x64xf32> to vector<1x64x1xf32>
    %81 = vector.broadcast %80 : vector<1x64x1xf32> to vector<1x64x64xf32>
    %82 = arith.subf %78, %81 : vector<1x64x64xf32>
    %83 = math.exp %82 : vector<1x64x64xf32>
    %cst_35 = arith.constant dense<0.000000e+00> : vector<1x64xf32>
    %84 = vector.multi_reduction <add>, %83, %cst_35 [2] : vector<1x64x64xf32> to vector<1x64xf32>
    %85 = vector.shape_cast %84 : vector<1x64xf32> to vector<1x64x1xf32>
    %86 = tpu.reciprocal %85 {approx = true} : vector<1x64x1xf32> -> vector<1x64x1xf32>
    %87 = vector.broadcast %86 : vector<1x64x1xf32> to vector<1x64x64xf32>
    %88 = arith.mulf %83, %87 : vector<1x64x64xf32>
    %89 = arith.truncf %88 : vector<1x64x64xf32> to vector<1x64x64xbf16>
    "tpu.trace_start"() <{level = 10 : i32, message = "bnm,bmd->bnd"}> : () -> ()
    %cst_36 = arith.constant dense<0.000000e+00> : vector<1x64x32xf32>
    %90 = tpu.matmul %89, %77, %cst_36 {dimension_numbers = #tpu.dot_dimension_numbers<[2], [1], [1], [2], [0, 0, 0, 1, 1, 2], [0], [0]>} : vector<1x64x64xbf16>, vector<1x64x32xbf16>, vector<1x64x32xf32> -> vector<1x64x32xf32>
    "tpu.trace_stop"() : () -> ()
    %91 = vector.shape_cast %90 : vector<1x64x32xf32> to vector<64x32xf32>
    %92 = vector.extract_strided_slice %47 {offsets = [0, 64], sizes = [64, 32], strides = [1, 1]} : vector<64x128xbf16> to vector<64x32xbf16>
    %93 = vector.shape_cast %92 : vector<64x32xbf16> to vector<1x64x32xbf16>
    %94 = vector.extract_strided_slice %49 {offsets = [0, 64], sizes = [64, 32], strides = [1, 1]} : vector<64x128xbf16> to vector<64x32xbf16>
    %95 = vector.shape_cast %94 : vector<64x32xbf16> to vector<1x64x32xbf16>
    %96 = vector.extract_strided_slice %51 {offsets = [0, 64], sizes = [64, 32], strides = [1, 1]} : vector<64x128xbf16> to vector<64x32xbf16>
    %97 = vector.shape_cast %96 : vector<64x32xbf16> to vector<1x64x32xbf16>
    "tpu.trace_start"() <{level = 10 : i32, message = "bnd,bmd->bnm"}> : () -> ()
    %cst_37 = arith.constant dense<0.000000e+00> : vector<1x64x64xf32>
    %98 = tpu.matmul %93, %95, %cst_37 {dimension_numbers = #tpu.dot_dimension_numbers<[2], [2], [1], [1], [0, 0, 0, 1, 1, 1], [0], [0]>} : vector<1x64x32xbf16>, vector<1x64x32xbf16>, vector<1x64x64xf32> -> vector<1x64x64xf32>
    "tpu.trace_stop"() : () -> ()
    %cst_38 = arith.constant dense<0xFF800000> : vector<1x64xf32>
    %99 = vector.multi_reduction <maximumf>, %98, %cst_38 [2] : vector<1x64x64xf32> to vector<1x64xf32>
    %100 = vector.shape_cast %99 : vector<1x64xf32> to vector<1x64x1xf32>
    %101 = vector.broadcast %100 : vector<1x64x1xf32> to vector<1x64x64xf32>
    %102 = arith.subf %98, %101 : vector<1x64x64xf32>
    %103 = math.exp %102 : vector<1x64x64xf32>
    %cst_39 = arith.constant dense<0.000000e+00> : vector<1x64xf32>
    %104 = vector.multi_reduction <add>, %103, %cst_39 [2] : vector<1x64x64xf32> to vector<1x64xf32>
    %105 = vector.shape_cast %104 : vector<1x64xf32> to vector<1x64x1xf32>
    %106 = tpu.reciprocal %105 {approx = true} : vector<1x64x1xf32> -> vector<1x64x1xf32>
    %107 = vector.broadcast %106 : vector<1x64x1xf32> to vector<1x64x64xf32>
    %108 = arith.mulf %103, %107 : vector<1x64x64xf32>
    %109 = arith.truncf %108 : vector<1x64x64xf32> to vector<1x64x64xbf16>
    "tpu.trace_start"() <{level = 10 : i32, message = "bnm,bmd->bnd"}> : () -> ()
    %cst_40 = arith.constant dense<0.000000e+00> : vector<1x64x32xf32>
    %110 = tpu.matmul %109, %97, %cst_40 {dimension_numbers = #tpu.dot_dimension_numbers<[2], [1], [1], [2], [0, 0, 0, 1, 1, 2], [0], [0]>} : vector<1x64x64xbf16>, vector<1x64x32xbf16>, vector<1x64x32xf32> -> vector<1x64x32xf32>
    "tpu.trace_stop"() : () -> ()
    %111 = vector.shape_cast %110 : vector<1x64x32xf32> to vector<64x32xf32>
    %112 = vector.extract_strided_slice %47 {offsets = [0, 96], sizes = [64, 32], strides = [1, 1]} : vector<64x128xbf16> to vector<64x32xbf16>
    %113 = vector.shape_cast %112 : vector<64x32xbf16> to vector<1x64x32xbf16>
    %114 = vector.extract_strided_slice %49 {offsets = [0, 96], sizes = [64, 32], strides = [1, 1]} : vector<64x128xbf16> to vector<64x32xbf16>
    %115 = vector.shape_cast %114 : vector<64x32xbf16> to vector<1x64x32xbf16>
    %116 = vector.extract_strided_slice %51 {offsets = [0, 96], sizes = [64, 32], strides = [1, 1]} : vector<64x128xbf16> to vector<64x32xbf16>
    %117 = vector.shape_cast %116 : vector<64x32xbf16> to vector<1x64x32xbf16>
    "tpu.trace_start"() <{level = 10 : i32, message = "bnd,bmd->bnm"}> : () -> ()
    %cst_41 = arith.constant dense<0.000000e+00> : vector<1x64x64xf32>
    %118 = tpu.matmul %113, %115, %cst_41 {dimension_numbers = #tpu.dot_dimension_numbers<[2], [2], [1], [1], [0, 0, 0, 1, 1, 1], [0], [0]>} : vector<1x64x32xbf16>, vector<1x64x32xbf16>, vector<1x64x64xf32> -> vector<1x64x64xf32>
    "tpu.trace_stop"() : () -> ()
    %cst_42 = arith.constant dense<0xFF800000> : vector<1x64xf32>
    %119 = vector.multi_reduction <maximumf>, %118, %cst_42 [2] : vector<1x64x64xf32> to vector<1x64xf32>
    %120 = vector.shape_cast %119 : vector<1x64xf32> to vector<1x64x1xf32>
    %121 = vector.broadcast %120 : vector<1x64x1xf32> to vector<1x64x64xf32>
    %122 = arith.subf %118, %121 : vector<1x64x64xf32>
    %123 = math.exp %122 : vector<1x64x64xf32>
    %cst_43 = arith.constant dense<0.000000e+00> : vector<1x64xf32>
    %124 = vector.multi_reduction <add>, %123, %cst_43 [2] : vector<1x64x64xf32> to vector<1x64xf32>
    %125 = vector.shape_cast %124 : vector<1x64xf32> to vector<1x64x1xf32>
    %126 = tpu.reciprocal %125 {approx = true} : vector<1x64x1xf32> -> vector<1x64x1xf32>
    %127 = vector.broadcast %126 : vector<1x64x1xf32> to vector<1x64x64xf32>
    %128 = arith.mulf %123, %127 : vector<1x64x64xf32>
    %129 = arith.truncf %128 : vector<1x64x64xf32> to vector<1x64x64xbf16>
    "tpu.trace_start"() <{level = 10 : i32, message = "bnm,bmd->bnd"}> : () -> ()
    %cst_44 = arith.constant dense<0.000000e+00> : vector<1x64x32xf32>
    %130 = tpu.matmul %129, %117, %cst_44 {dimension_numbers = #tpu.dot_dimension_numbers<[2], [1], [1], [2], [0, 0, 0, 1, 1, 2], [0], [0]>} : vector<1x64x64xbf16>, vector<1x64x32xbf16>, vector<1x64x32xf32> -> vector<1x64x32xf32>
    "tpu.trace_stop"() : () -> ()
    %131 = vector.shape_cast %130 : vector<1x64x32xf32> to vector<64x32xf32>
    %132 = tpu.concatenate %71, %91, %111, %131 in 1 : vector<64x32xf32>, vector<64x32xf32>, vector<64x32xf32>, vector<64x32xf32> -> vector<64x128xf32>
    %133 = arith.truncf %132 : vector<64x128xf32> to vector<64x128xbf16>
    %134 = vector.shape_cast %11 : vector<128xf32> to vector<1x128xf32>
    %135 = vector.broadcast %134 : vector<1x128xf32> to vector<64x128xf32>
    %136 = arith.addf %1, %135 : vector<64x128xf32>
    %cst_45 = arith.constant dense<0.000000e+00> : vector<64x128xf32>
    %137 = tpu.matmul %133, %17, %cst_45 {dimension_numbers = #tpu.dot_dimension_numbers<[1], [0], [0], [1], [0, 0, 1, 1], [], []>} : vector<64x128xbf16>, vector<128x128xbf16>, vector<64x128xf32> -> vector<64x128xf32>
    %138 = arith.addf %136, %137 : vector<64x128xf32>
    %cst_46 = arith.constant dense<0.000000e+00> : vector<64xf32>
    %139 = vector.multi_reduction <add>, %138, %cst_46 [1] : vector<64x128xf32> to vector<64xf32>
    %140 = vector.shape_cast %139 : vector<64xf32> to vector<64x1xf32>
    %cst_47 = arith.constant 1.280000e+02 : f32
    %141 = vector.broadcast %cst_47 : f32 to vector<64x1xf32>
    %142 = arith.divf %140, %141 : vector<64x1xf32>
    %143 = arith.mulf %138, %138 : vector<64x128xf32>
    %cst_48 = arith.constant dense<0.000000e+00> : vector<64xf32>
    %144 = vector.multi_reduction <add>, %143, %cst_48 [1] : vector<64x128xf32> to vector<64xf32>
    %145 = vector.shape_cast %144 : vector<64xf32> to vector<64x1xf32>
    %cst_49 = arith.constant 1.280000e+02 : f32
    %146 = vector.broadcast %cst_49 : f32 to vector<64x1xf32>
    %147 = arith.divf %145, %146 : vector<64x1xf32>
    %148 = arith.mulf %142, %142 : vector<64x1xf32>
    %149 = arith.subf %147, %148 : vector<64x1xf32>
    %150 = vector.broadcast %142 : vector<64x1xf32> to vector<64x128xf32>
    %151 = arith.subf %138, %150 : vector<64x128xf32>
    %cst_50 = arith.constant 9.99999974E-6 : f32
    %152 = vector.broadcast %cst_50 : f32 to vector<64x1xf32>
    %153 = arith.addf %149, %152 : vector<64x1xf32>
    %154 = math.rsqrt %153 : vector<64x1xf32>
    %155 = vector.broadcast %154 : vector<64x1xf32> to vector<64x128xf32>
    %156 = arith.mulf %151, %155 : vector<64x128xf32>
    %157 = vector.shape_cast %7 : vector<128xf32> to vector<1x128xf32>
    %158 = vector.broadcast %157 : vector<1x128xf32> to vector<64x128xf32>
    %159 = arith.mulf %156, %158 : vector<64x128xf32>
    %160 = vector.shape_cast %9 : vector<128xf32> to vector<1x128xf32>
    %161 = vector.broadcast %160 : vector<1x128xf32> to vector<64x128xf32>
    %162 = arith.addf %159, %161 : vector<64x128xf32>
    %163 = arith.truncf %162 : vector<64x128xf32> to vector<64x128xbf16>
    %cst_51 = arith.constant dense<0.000000e+00> : vector<64x512xf32>
    %164 = tpu.matmul %163, %18, %cst_51 {dimension_numbers = #tpu.dot_dimension_numbers<[1], [0], [0], [1], [0, 0, 1, 1], [], []>} : vector<64x128xbf16>, vector<128x512xbf16>, vector<64x512xf32> -> vector<64x512xf32>
    %165 = vector.shape_cast %13 : vector<512xf32> to vector<1x512xf32>
    %166 = vector.broadcast %165 : vector<1x512xf32> to vector<64x512xf32>
    %167 = arith.addf %164, %166 : vector<64x512xf32>
    %cst_52 = arith.constant 5.000000e-01 : f32
    %168 = vector.broadcast %cst_52 : f32 to vector<64x512xf32>
    %169 = arith.mulf %168, %167 : vector<64x512xf32>
    %cst_53 = arith.constant 4.471500e-02 : f32
    %170 = vector.broadcast %cst_53 : f32 to vector<64x512xf32>
    %171 = arith.mulf %170, %167 : vector<64x512xf32>
    %172 = arith.mulf %171, %167 : vector<64x512xf32>
    %173 = arith.mulf %172, %167 : vector<64x512xf32>
    %174 = arith.addf %167, %173 : vector<64x512xf32>
    %cst_54 = arith.constant 0.797884583 : f32
    %175 = vector.broadcast %cst_54 : f32 to vector<64x512xf32>
    %176 = arith.mulf %175, %174 : vector<64x512xf32>
    %177 = math.tanh %176 : vector<64x512xf32>
    %cst_55 = arith.constant 1.000000e+00 : f32
    %178 = vector.broadcast %cst_55 : f32 to vector<64x512xf32>
    %179 = arith.addf %178, %177 : vector<64x512xf32>
    %180 = arith.mulf %169, %179 : vector<64x512xf32>
    %181 = arith.truncf %180 : vector<64x512xf32> to vector<64x512xbf16>
    %cst_56 = arith.constant dense<0.000000e+00> : vector<64x128xf32>
    %182 = tpu.matmul %181, %19, %cst_56 {dimension_numbers = #tpu.dot_dimension_numbers<[1], [0], [0], [1], [0, 0, 1, 1], [], []>} : vector<64x512xbf16>, vector<512x128xbf16>, vector<64x128xf32> -> vector<64x128xf32>
    %183 = vector.shape_cast %15 : vector<128xf32> to vector<1x128xf32>
    %184 = vector.broadcast %183 : vector<1x128xf32> to vector<64x128xf32>
    %185 = arith.addf %182, %184 : vector<64x128xf32>
    %186 = arith.addf %138, %185 : vector<64x128xf32>
    %187 = vector.shape_cast %186 : vector<64x128xf32> to vector<1x64x128xf32>
    %c0_57 = arith.constant 0 : index
    %c0_58 = arith.constant 0 : index
    %c0_59 = arith.constant 0 : index
    %188 = vector.load %arg13[%c0_57, %c0_58, %c0_59] : memref<1x64x128xf32, #tpu.memory_space<vmem>>, vector<1x64x128xf32>
    tpu.vector_store %arg13[%c0_57, %c0_58, %c0_59], %187 {strides = array<i32>} : memref<1x64x128xf32, #tpu.memory_space<vmem>>, vector<1x64x128xf32>,
    return
  }
  func.func @transform_0(%arg0: i32) -> (i32, i32, i32) {
    %c0_i32 = arith.constant 0 : i32
    %c0_i32_0 = arith.constant 0 : i32
    %c0_i32_1 = arith.constant 0 : i32
    return %arg0, %c0_i32, %c0_i32_0 : i32, i32, i32
  }
  func.func @transform_1(%arg0: i32) -> (i32, i32) {
    %c0_i32 = arith.constant 0 : i32
    %c0_i32_0 = arith.constant 0 : i32
    %c0_i32_1 = arith.constant 0 : i32
    return %c0_i32, %c0_i32_0 : i32, i32
  }
  func.func @transform_2(%arg0: i32) -> (i32, i32) {
    %c0_i32 = arith.constant 0 : i32
    %c0_i32_0 = arith.constant 0 : i32
    %c0_i32_1 = arith.constant 0 : i32
    return %c0_i32, %c0_i32_0 : i32, i32
  }
  func.func @transform_3(%arg0: i32) -> (i32, i32) {
    %c0_i32 = arith.constant 0 : i32
    %c0_i32_0 = arith.constant 0 : i32
    %c0_i32_1 = arith.constant 0 : i32
    return %c0_i32, %c0_i32_0 : i32, i32
  }
  func.func @transform_4(%arg0: i32) -> (i32, i32) {
    %c0_i32 = arith.constant 0 : i32
    %c0_i32_0 = arith.constant 0 : i32
    %c0_i32_1 = arith.constant 0 : i32
    return %c0_i32, %c0_i32_0 : i32, i32
  }
  func.func @transform_5(%arg0: i32) -> (i32, i32) {
    %c0_i32 = arith.constant 0 : i32
    %c0_i32_0 = arith.constant 0 : i32
    %c0_i32_1 = arith.constant 0 : i32
    return %c0_i32, %c0_i32_0 : i32, i32
  }
  func.func @transform_6(%arg0: i32) -> (i32, i32) {
    %c0_i32 = arith.constant 0 : i32
    %c0_i32_0 = arith.constant 0 : i32
    %c0_i32_1 = arith.constant 0 : i32
    return %c0_i32, %c0_i32_0 : i32, i32
  }
  func.func @transform_7(%arg0: i32) -> (i32, i32) {
    %c0_i32 = arith.constant 0 : i32
    %c0_i32_0 = arith.constant 0 : i32
    %c0_i32_1 = arith.constant 0 : i32
    return %c0_i32, %c0_i32_0 : i32, i32
  }
  func.func @transform_8(%arg0: i32) -> (i32, i32) {
    %c0_i32 = arith.constant 0 : i32
    %c0_i32_0 = arith.constant 0 : i32
    %c0_i32_1 = arith.constant 0 : i32
    return %c0_i32, %c0_i32_0 : i32, i32
  }
  func.func @transform_9(%arg0: i32) -> (i32, i32) {
    %c0_i32 = arith.constant 0 : i32
    %c0_i32_0 = arith.constant 0 : i32
    %c0_i32_1 = arith.constant 0 : i32
    return %c0_i32, %c0_i32_0 : i32, i32
  }
  func.func @transform_10(%arg0: i32) -> (i32, i32) {
    %c0_i32 = arith.constant 0 : i32
    %c0_i32_0 = arith.constant 0 : i32
    %c0_i32_1 = arith.constant 0 : i32
    return %c0_i32, %c0_i32_0 : i32, i32
  }
  func.func @transform_11(%arg0: i32) -> (i32, i32) {
    %c0_i32 = arith.constant 0 : i32
    %c0_i32_0 = arith.constant 0 : i32
    %c0_i32_1 = arith.constant 0 : i32
    return %c0_i32, %c0_i32_0 : i32, i32
  }
  func.func @transform_12(%arg0: i32) -> (i32, i32, i32) {
    %c0_i32 = arith.constant 0 : i32
    %c0_i32_0 = arith.constant 0 : i32
    %c0_i32_1 = arith.constant 0 : i32
    return %arg0, %c0_i32, %c0_i32_0 : i32, i32, i32
  }
}

module attributes {stable_mosaic.version = 11 : i64} {
  func.func @transformer_block_kernel(%arg0: i32, %arg1: memref<1x64x128xf32, #tpu.memory_space<vmem>>, %arg2: memref<1x128xf32, #tpu.memory_space<vmem>>, %arg3: memref<1x128xf32, #tpu.memory_space<vmem>>, %arg4: memref<128x384xbf16, #tpu.memory_space<vmem>>, %arg5: memref<128x128xbf16, #tpu.memory_space<vmem>>, %arg6: memref<1x128xf32, #tpu.memory_space<vmem>>, %arg7: memref<1x128xf32, #tpu.memory_space<vmem>>, %arg8: memref<1x128xf32, #tpu.memory_space<vmem>>, %arg9: memref<128x512xbf16, #tpu.memory_space<vmem>>, %arg10: memref<1x512xf32, #tpu.memory_space<vmem>>, %arg11: memref<512x128xbf16, #tpu.memory_space<vmem>>, %arg12: memref<1x128xf32, #tpu.memory_space<vmem>>, %arg13: memref<1x64x128xf32, #tpu.memory_space<vmem>>) attributes {dimension_semantics = [#tpu.dimension_semantics<parallel>], iteration_bounds = array<i64: 2>, scalar_prefetch = 0 : i64, scratch_operands = 0 : i64, tpu.core_type = #tpu.core_type<tc>, window_params = [{transform_indices = @transform_0, window_bounds = array<i64: 1, 64, 128>}, {pipeline_mode = #tpu.pipeline_mode<synchronous>, transform_indices = @transform_1, window_bounds = array<i64: 1, 128>}, {pipeline_mode = #tpu.pipeline_mode<synchronous>, transform_indices = @transform_2, window_bounds = array<i64: 1, 128>}, {pipeline_mode = #tpu.pipeline_mode<synchronous>, transform_indices = @transform_3, window_bounds = array<i64: 128, 384>}, {pipeline_mode = #tpu.pipeline_mode<synchronous>, transform_indices = @transform_4, window_bounds = array<i64: 128, 128>}, {pipeline_mode = #tpu.pipeline_mode<synchronous>, transform_indices = @transform_5, window_bounds = array<i64: 1, 128>}, {pipeline_mode = #tpu.pipeline_mode<synchronous>, transform_indices = @transform_6, window_bounds = array<i64: 1, 128>}, {pipeline_mode = #tpu.pipeline_mode<synchronous>, transform_indices = @transform_7, window_bounds = array<i64: 1, 128>}, {pipeline_mode = #tpu.pipeline_mode<synchronous>, transform_indices = @transform_8, window_bounds = array<i64: 128, 512>}, {pipeline_mode = #tpu.pipeline_mode<synchronous>, transform_indices = @transform_9, window_bounds = array<i64: 1, 512>}, {pipeline_mode = #tpu.pipeline_mode<synchronous>, transform_indices = @transform_10, window_bounds = array<i64: 512, 128>}, {pipeline_mode = #tpu.pipeline_mode<synchronous>, transform_indices = @transform_11, window_bounds = array<i64: 1, 128>}, {transform_indices = @transform_12, window_bounds = array<i64: 1, 64, 128>}]} {
    %c0 = arith.constant 0 : index
    %c0_0 = arith.constant 0 : index
    %c0_1 = arith.constant 0 : index
    %0 = vector.load %arg1[%c0, %c0_0, %c0_1] : memref<1x64x128xf32, #tpu.memory_space<vmem>>, vector<1x64x128xf32>
    %1 = vector.shape_cast %0 : vector<1x64x128xf32> to vector<64x128xf32>
    %c0_2 = arith.constant 0 : index
    %c0_3 = arith.constant 0 : index
    %2 = vector.load %arg2[%c0_2, %c0_3] : memref<1x128xf32, #tpu.memory_space<vmem>>, vector<1x128xf32>
    %3 = vector.shape_cast %2 : vector<1x128xf32> to vector<128xf32>
    %c0_4 = arith.constant 0 : index
    %c0_5 = arith.constant 0 : index
    %4 = vector.load %arg3[%c0_4, %c0_5] : memref<1x128xf32, #tpu.memory_space<vmem>>, vector<1x128xf32>
    %5 = vector.shape_cast %4 : vector<1x128xf32> to vector<128xf32>
    %c0_6 = arith.constant 0 : index
    %c0_7 = arith.constant 0 : index
    %6 = vector.load %arg7[%c0_6, %c0_7] : memref<1x128xf32, #tpu.memory_space<vmem>>, vector<1x128xf32>
    %7 = vector.shape_cast %6 : vector<1x128xf32> to vector<128xf32>
    %c0_8 = arith.constant 0 : index
    %c0_9 = arith.constant 0 : index
    %8 = vector.load %arg8[%c0_8, %c0_9] : memref<1x128xf32, #tpu.memory_space<vmem>>, vector<1x128xf32>
    %9 = vector.shape_cast %8 : vector<1x128xf32> to vector<128xf32>
    %c0_10 = arith.constant 0 : index
    %c0_11 = arith.constant 0 : index
    %10 = vector.load %arg6[%c0_10, %c0_11] : memref<1x128xf32, #tpu.memory_space<vmem>>, vector<1x128xf32>
    %11 = vector.shape_cast %10 : vector<1x128xf32> to vector<128xf32>
    %c0_12 = arith.constant 0 : index
    %c0_13 = arith.constant 0 : index
    %12 = vector.load %arg10[%c0_12, %c0_13] : memref<1x512xf32, #tpu.memory_space<vmem>>, vector<1x512xf32>
    %13 = vector.shape_cast %12 : vector<1x512xf32> to vector<512xf32>
    %c0_14 = arith.constant 0 : index
    %c0_15 = arith.constant 0 : index
    %14 = vector.load %arg12[%c0_14, %c0_15] : memref<1x128xf32, #tpu.memory_space<vmem>>, vector<1x128xf32>
    %15 = vector.shape_cast %14 : vector<1x128xf32> to vector<128xf32>
    %c0_16 = arith.constant 0 : index
    %c0_17 = arith.constant 0 : index
    %16 = vector.load %arg4[%c0_16, %c0_17] : memref<128x384xbf16, #tpu.memory_space<vmem>>, vector<128x384xbf16>
    %c0_18 = arith.constant 0 : index
    %c0_19 = arith.constant 0 : index
    %17 = vector.load %arg5[%c0_18, %c0_19] : memref<128x128xbf16, #tpu.memory_space<vmem>>, vector<128x128xbf16>
    %c0_20 = arith.constant 0 : index
    %c0_21 = arith.constant 0 : index
    %18 = vector.load %arg9[%c0_20, %c0_21] : memref<128x512xbf16, #tpu.memory_space<vmem>>, vector<128x512xbf16>
    %c0_22 = arith.constant 0 : index
    %c0_23 = arith.constant 0 : index
    %19 = vector.load %arg11[%c0_22, %c0_23] : memref<512x128xbf16, #tpu.memory_space<vmem>>, vector<512x128xbf16>
    %cst = arith.constant dense<0.000000e+00> : vector<64xf32>
    %20 = vector.multi_reduction <add>, %1, %cst [1] : vector<64x128xf32> to vector<64xf32>
    %21 = vector.shape_cast %20 : vector<64xf32> to vector<64x1xf32>
    %cst_24 = arith.constant 1.280000e+02 : f32
    %22 = vector.broadcast %cst_24 : f32 to vector<64x1xf32>
    %23 = arith.divf %21, %22 : vector<64x1xf32>
    %24 = arith.mulf %1, %1 : vector<64x128xf32>
    %cst_25 = arith.constant dense<0.000000e+00> : vector<64xf32>
    %25 = vector.multi_reduction <add>, %24, %cst_25 [1] : vector<64x128xf32> to vector<64xf32>
    %26 = vector.shape_cast %25 : vector<64xf32> to vector<64x1xf32>
    %cst_26 = arith.constant 1.280000e+02 : f32
    %27 = vector.broadcast %cst_26 : f32 to vector<64x1xf32>
    %28 = arith.divf %26, %27 : vector<64x1xf32>
    %29 = arith.mulf %23, %23 : vector<64x1xf32>
    %30 = arith.subf %28, %29 : vector<64x1xf32>
    %31 = vector.broadcast %23 : vector<64x1xf32> to vector<64x128xf32>
    %32 = arith.subf %1, %31 : vector<64x128xf32>
    %cst_27 = arith.constant 9.99999974E-6 : f32
    %33 = vector.broadcast %cst_27 : f32 to vector<64x1xf32>
    %34 = arith.addf %30, %33 : vector<64x1xf32>
    %35 = math.rsqrt %34 : vector<64x1xf32>
    %36 = vector.broadcast %35 : vector<64x1xf32> to vector<64x128xf32>
    %37 = arith.mulf %32, %36 : vector<64x128xf32>
    %38 = vector.shape_cast %3 : vector<128xf32> to vector<1x128xf32>
    %39 = vector.broadcast %38 : vector<1x128xf32> to vector<64x128xf32>
    %40 = arith.mulf %37, %39 : vector<64x128xf32>
    %41 = vector.shape_cast %5 : vector<128xf32> to vector<1x128xf32>
    %42 = vector.broadcast %41 : vector<1x128xf32> to vector<64x128xf32>
    %43 = arith.addf %40, %42 : vector<64x128xf32>
    %44 = arith.truncf %43 : vector<64x128xf32> to vector<64x128xbf16>
    %cst_28 = arith.constant dense<0.000000e+00> : vector<64x384xf32>
    %45 = tpu.matmul %44, %16, %cst_28 {dimension_numbers = #tpu.dot_dimension_numbers<[1], [0], [0], [1], [0, 0, 1, 1], [], []>} : vector<64x128xbf16>, vector<128x384xbf16>, vector<64x384xf32> -> vector<64x384xf32>
    %46 = vector.extract_strided_slice %45 {offsets = [0, 0], sizes = [64, 128], strides = [1, 1]} : vector<64x384xf32> to vector<64x128xf32>
    %47 = arith.truncf %46 : vector<64x128xf32> to vector<64x128xbf16>
    %48 = vector.extract_strided_slice %45 {offsets = [0, 128], sizes = [64, 128], strides = [1, 1]} : vector<64x384xf32> to vector<64x128xf32>
    %49 = arith.truncf %48 : vector<64x128xf32> to vector<64x128xbf16>
    %50 = vector.extract_strided_slice %45 {offsets = [0, 256], sizes = [64, 128], strides = [1, 1]} : vector<64x384xf32> to vector<64x128xf32>
    %51 = arith.truncf %50 : vector<64x128xf32> to vector<64x128xbf16>
    %52 = vector.extract_strided_slice %47 {offsets = [0, 0], sizes = [64, 32], strides = [1, 1]} : vector<64x128xbf16> to vector<64x32xbf16>
    %53 = vector.shape_cast %52 : vector<64x32xbf16> to vector<1x64x32xbf16>
    %54 = vector.extract_strided_slice %49 {offsets = [0, 0], sizes = [64, 32], strides = [1, 1]} : vector<64x128xbf16> to vector<64x32xbf16>
    %55 = vector.shape_cast %54 : vector<64x32xbf16> to vector<1x64x32xbf16>
    %56 = vector.extract_strided_slice %51 {offsets = [0, 0], sizes = [64, 32], strides = [1, 1]} : vector<64x128xbf16> to vector<64x32xbf16>
    %57 = vector.shape_cast %56 : vector<64x32xbf16> to vector<1x64x32xbf16>
    "tpu.trace_start"() <{level = 10 : i32, message = "bnd,bmd->bnm"}> : () -> ()
    %cst_29 = arith.constant dense<0.000000e+00> : vector<1x64x64xf32>
    %58 = tpu.matmul %53, %55, %cst_29 {dimension_numbers = #tpu.dot_dimension_numbers<[2], [2], [1], [1], [0, 0, 0, 1, 1, 1], [0], [0]>} : vector<1x64x32xbf16>, vector<1x64x32xbf16>, vector<1x64x64xf32> -> vector<1x64x64xf32>
    "tpu.trace_stop"() : () -> ()
    %cst_30 = arith.constant dense<0xFF800000> : vector<1x64xf32>
    %59 = vector.multi_reduction <maximumf>, %58, %cst_30 [2] : vector<1x64x64xf32> to vector<1x64xf32>
    %60 = vector.shape_cast %59 : vector<1x64xf32> to vector<1x64x1xf32>
    %61 = vector.broadcast %60 : vector<1x64x1xf32> to vector<1x64x64xf32>
    %62 = arith.subf %58, %61 : vector<1x64x64xf32>
    %63 = math.exp %62 : vector<1x64x64xf32>
    %cst_31 = arith.constant dense<0.000000e+00> : vector<1x64xf32>
    %64 = vector.multi_reduction <add>, %63, %cst_31 [2] : vector<1x64x64xf32> to vector<1x64xf32>
    %65 = vector.shape_cast %64 : vector<1x64xf32> to vector<1x64x1xf32>
    %66 = tpu.reciprocal %65 {approx = true} : vector<1x64x1xf32> -> vector<1x64x1xf32>
    %67 = vector.broadcast %66 : vector<1x64x1xf32> to vector<1x64x64xf32>
    %68 = arith.mulf %63, %67 : vector<1x64x64xf32>
    %69 = arith.truncf %68 : vector<1x64x64xf32> to vector<1x64x64xbf16>
    "tpu.trace_start"() <{level = 10 : i32, message = "bnm,bmd->bnd"}> : () -> ()
    %cst_32 = arith.constant dense<0.000000e+00> : vector<1x64x32xf32>
    %70 = tpu.matmul %69, %57, %cst_32 {dimension_numbers = #tpu.dot_dimension_numbers<[2], [1], [1], [2], [0, 0, 0, 1, 1, 2], [0], [0]>} : vector<1x64x64xbf16>, vector<1x64x32xbf16>, vector<1x64x32xf32> -> vector<1x64x32xf32>
    "tpu.trace_stop"() : () -> ()
    %71 = vector.shape_cast %70 : vector<1x64x32xf32> to vector<64x32xf32>
    %72 = vector.extract_strided_slice %47 {offsets = [0, 32], sizes = [64, 32], strides = [1, 1]} : vector<64x128xbf16> to vector<64x32xbf16>
    %73 = vector.shape_cast %72 : vector<64x32xbf16> to vector<1x64x32xbf16>
    %74 = vector.extract_strided_slice %49 {offsets = [0, 32], sizes = [64, 32], strides = [1, 1]} : vector<64x128xbf16> to vector<64x32xbf16>
    %75 = vector.shape_cast %74 : vector<64x32xbf16> to vector<1x64x32xbf16>
    %76 = vector.extract_strided_slice %51 {offsets = [0, 32], sizes = [64, 32], strides = [1, 1]} : vector<64x128xbf16> to vector<64x32xbf16>
    %77 = vector.shape_cast %76 : vector<64x32xbf16> to vector<1x64x32xbf16>
    "tpu.trace_start"() <{level = 10 : i32, message = "bnd,bmd->bnm"}> : () -> ()
    %cst_33 = arith.constant dense<0.000000e+00> : vector<1x64x64xf32>
    %78 = tpu.matmul %73, %75, %cst_33 {dimension_numbers = #tpu.dot_dimension_numbers<[2], [2], [1], [1], [0, 0, 0, 1, 1, 1], [0], [0]>} : vector<1x64x32xbf16>, vector<1x64x32xbf16>, vector<1x64x64xf32> -> vector<1x64x64xf32>
    "tpu.trace_stop"() : () -> ()
    %cst_34 = arith.constant dense<0xFF800000> : vector<1x64xf32>
    %79 = vector.multi_reduction <maximumf>, %78, %cst_34 [2] : vector<1x64x64xf32> to vector<1x64xf32>
    %80 = vector.shape_cast %79 : vector<1x64xf32> to vector<1x64x1xf32>
    %81 = vector.broadcast %80 : vector<1x64x1xf32> to vector<1x64x64xf32>
    %82 = arith.subf %78, %81 : vector<1x64x64xf32>
    %83 = math.exp %82 : vector<1x64x64xf32>
    %cst_35 = arith.constant dense<0.000000e+00> : vector<1x64xf32>
    %84 = vector.multi_reduction <add>, %83, %cst_35 [2] : vector<1x64x64xf32> to vector<1x64xf32>
    %85 = vector.shape_cast %84 : vector<1x64xf32> to vector<1x64x1xf32>
    %86 = tpu.reciprocal %85 {approx = true} : vector<1x64x1xf32> -> vector<1x64x1xf32>
    %87 = vector.broadcast %86 : vector<1x64x1xf32> to vector<1x64x64xf32>
    %88 = arith.mulf %83, %87 : vector<1x64x64xf32>
    %89 = arith.truncf %88 : vector<1x64x64xf32> to vector<1x64x64xbf16>
    "tpu.trace_start"() <{level = 10 : i32, message = "bnm,bmd->bnd"}> : () -> ()
    %cst_36 = arith.constant dense<0.000000e+00> : vector<1x64x32xf32>
    %90 = tpu.matmul %89, %77, %cst_36 {dimension_numbers = #tpu.dot_dimension_numbers<[2], [1], [1], [2], [0, 0, 0, 1, 1, 2], [0], [0]>} : vector<1x64x64xbf16>, vector<1x64x32xbf16>, vector<1x64x32xf32> -> vector<1x64x32xf32>
    "tpu.trace_stop"() : () -> ()
    %91 = vector.shape_cast %90 : vector<1x64x32xf32> to vector<64x32xf32>
    %92 = vector.extract_strided_slice %47 {offsets = [0, 64], sizes = [64, 32], strides = [1, 1]} : vector<64x128xbf16> to vector<64x32xbf16>
    %93 = vector.shape_cast %92 : vector<64x32xbf16> to vector<1x64x32xbf16>
    %94 = vector.extract_strided_slice %49 {offsets = [0, 64], sizes = [64, 32], strides = [1, 1]} : vector<64x128xbf16> to vector<64x32xbf16>
    %95 = vector.shape_cast %94 : vector<64x32xbf16> to vector<1x64x32xbf16>
    %96 = vector.extract_strided_slice %51 {offsets = [0, 64], sizes = [64, 32], strides = [1, 1]} : vector<64x128xbf16> to vector<64x32xbf16>
    %97 = vector.shape_cast %96 : vector<64x32xbf16> to vector<1x64x32xbf16>
    "tpu.trace_start"() <{level = 10 : i32, message = "bnd,bmd->bnm"}> : () -> ()
    %cst_37 = arith.constant dense<0.000000e+00> : vector<1x64x64xf32>
    %98 = tpu.matmul %93, %95, %cst_37 {dimension_numbers = #tpu.dot_dimension_numbers<[2], [2], [1], [1], [0, 0, 0, 1, 1, 1], [0], [0]>} : vector<1x64x32xbf16>, vector<1x64x32xbf16>, vector<1x64x64xf32> -> vector<1x64x64xf32>
    "tpu.trace_stop"() : () -> ()
    %cst_38 = arith.constant dense<0xFF800000> : vector<1x64xf32>
    %99 = vector.multi_reduction <maximumf>, %98, %cst_38 [2] : vector<1x64x64xf32> to vector<1x64xf32>
    %100 = vector.shape_cast %99 : vector<1x64xf32> to vector<1x64x1xf32>
    %101 = vector.broadcast %100 : vector<1x64x1xf32> to vector<1x64x64xf32>
    %102 = arith.subf %98, %101 : vector<1x64x64xf32>
    %103 = math.exp %102 : vector<1x64x64xf32>
    %cst_39 = arith.constant dense<0.000000e+00> : vector<1x64xf32>
    %104 = vector.multi_reduction <add>, %103, %cst_39 [2] : vector<1x64x64xf32> to vector<1x64xf32>
    %105 = vector.shape_cast %104 : vector<1x64xf32> to vector<1x64x1xf32>
    %106 = tpu.reciprocal %105 {approx = true} : vector<1x64x1xf32> -> vector<1x64x1xf32>
    %107 = vector.broadcast %106 : vector<1x64x1xf32> to vector<1x64x64xf32>
    %108 = arith.mulf %103, %107 : vector<1x64x64xf32>
    %109 = arith.truncf %108 : vector<1x64x64xf32> to vector<1x64x64xbf16>
    "tpu.trace_start"() <{level = 10 : i32, message = "bnm,bmd->bnd"}> : () -> ()
    %cst_40 = arith.constant dense<0.000000e+00> : vector<1x64x32xf32>
    %110 = tpu.matmul %109, %97, %cst_40 {dimension_numbers = #tpu.dot_dimension_numbers<[2], [1], [1], [2], [0, 0, 0, 1, 1, 2], [0], [0]>} : vector<1x64x64xbf16>, vector<1x64x32xbf16>, vector<1x64x32xf32> -> vector<1x64x32xf32>
    "tpu.trace_stop"() : () -> ()
    %111 = vector.shape_cast %110 : vector<1x64x32xf32> to vector<64x32xf32>
    %112 = vector.extract_strided_slice %47 {offsets = [0, 96], sizes = [64, 32], strides = [1, 1]} : vector<64x128xbf16> to vector<64x32xbf16>
    %113 = vector.shape_cast %112 : vector<64x32xbf16> to vector<1x64x32xbf16>
    %114 = vector.extract_strided_slice %49 {offsets = [0, 96], sizes = [64, 32], strides = [1, 1]} : vector<64x128xbf16> to vector<64x32xbf16>
    %115 = vector.shape_cast %114 : vector<64x32xbf16> to vector<1x64x32xbf16>
    %116 = vector.extract_strided_slice %51 {offsets = [0, 96], sizes = [64, 32], strides = [1, 1]} : vector<64x128xbf16> to vector<64x32xbf16>
    %117 = vector.shape_cast %116 : vector<64x32xbf16> to vector<1x64x32xbf16>
    "tpu.trace_start"() <{level = 10 : i32, message = "bnd,bmd->bnm"}> : () -> ()
    %cst_41 = arith.constant dense<0.000000e+00> : vector<1x64x64xf32>
    %118 = tpu.matmul %113, %115, %cst_41 {dimension_numbers = #tpu.dot_dimension_numbers<[2], [2], [1], [1], [0, 0, 0, 1, 1, 1], [0], [0]>} : vector<1x64x32xbf16>, vector<1x64x32xbf16>, vector<1x64x64xf32> -> vector<1x64x64xf32>
    "tpu.trace_stop"() : () -> ()
    %cst_42 = arith.constant dense<0xFF800000> : vector<1x64xf32>
    %119 = vector.multi_reduction <maximumf>, %118, %cst_42 [2] : vector<1x64x64xf32> to vector<1x64xf32>
    %120 = vector.shape_cast %119 : vector<1x64xf32> to vector<1x64x1xf32>
    %121 = vector.broadcast %120 : vector<1x64x1xf32> to vector<1x64x64xf32>
    %122 = arith.subf %118, %121 : vector<1x64x64xf32>
    %123 = math.exp %122 : vector<1x64x64xf32>
    %cst_43 = arith.constant dense<0.000000e+00> : vector<1x64xf32>
    %124 = vector.multi_reduction <add>, %123, %cst_43 [2] : vector<1x64x64xf32> to vector<1x64xf32>
    %125 = vector.shape_cast %124 : vector<1x64xf32> to vector<1x64x1xf32>
    %126 = tpu.reciprocal %125 {approx = true} : vector<1x64x1xf32> -> vector<1x64x1xf32>
    %127 = vector.broadcast %126 : vector<1x64x1xf32> to vector<1x64x64xf32>
    %128 = arith.mulf %123, %127 : vector<1x64x64xf32>
    %129 = arith.truncf %128 : vector<1x64x64xf32> to vector<1x64x64xbf16>
    "tpu.trace_start"() <{level = 10 : i32, message = "bnm,bmd->bnd"}> : () -> ()
    %cst_44 = arith.constant dense<0.000000e+00> : vector<1x64x32xf32>
    %130 = tpu.matmul %129, %117, %cst_44 {dimension_numbers = #tpu.dot_dimension_numbers<[2], [1], [1], [2], [0, 0, 0, 1, 1, 2], [0], [0]>} : vector<1x64x64xbf16>, vector<1x64x32xbf16>, vector<1x64x32xf32> -> vector<1x64x32xf32>
    "tpu.trace_stop"() : () -> ()
    %131 = vector.shape_cast %130 : vector<1x64x32xf32> to vector<64x32xf32>
    %132 = tpu.concatenate %71, %91, %111, %131 in 1 : vector<64x32xf32>, vector<64x32xf32>, vector<64x32xf32>, vector<64x32xf32> -> vector<64x128xf32>
    %133 = arith.truncf %132 : vector<64x128xf32> to vector<64x128xbf16>
    %134 = vector.shape_cast %11 : vector<128xf32> to vector<1x128xf32>
    %135 = vector.broadcast %134 : vector<1x128xf32> to vector<64x128xf32>
    %136 = arith.addf %1, %135 : vector<64x128xf32>
    %cst_45 = arith.constant dense<0.000000e+00> : vector<64x128xf32>
    %137 = tpu.matmul %133, %17, %cst_45 {dimension_numbers = #tpu.dot_dimension_numbers<[1], [0], [0], [1], [0, 0, 1, 1], [], []>} : vector<64x128xbf16>, vector<128x128xbf16>, vector<64x128xf32> -> vector<64x128xf32>
    %138 = arith.addf %136, %137 : vector<64x128xf32>
    %cst_46 = arith.constant dense<0.000000e+00> : vector<64xf32>
    %139 = vector.multi_reduction <add>, %138, %cst_46 [1] : vector<64x128xf32> to vector<64xf32>
    %140 = vector.shape_cast %139 : vector<64xf32> to vector<64x1xf32>
    %cst_47 = arith.constant 1.280000e+02 : f32
    %141 = vector.broadcast %cst_47 : f32 to vector<64x1xf32>
    %142 = arith.divf %140, %141 : vector<64x1xf32>
    %143 = arith.mulf %138, %138 : vector<64x128xf32>
    %cst_48 = arith.constant dense<0.000000e+00> : vector<64xf32>
    %144 = vector.multi_reduction <add>, %143, %cst_48 [1] : vector<64x128xf32> to vector<64xf32>
    %145 = vector.shape_cast %144 : vector<64xf32> to vector<64x1xf32>
    %cst_49 = arith.constant 1.280000e+02 : f32
    %146 = vector.broadcast %cst_49 : f32 to vector<64x1xf32>
    %147 = arith.divf %145, %146 : vector<64x1xf32>
    %148 = arith.mulf %142, %142 : vector<64x1xf32>
    %149 = arith.subf %147, %148 : vector<64x1xf32>
    %150 = vector.broadcast %142 : vector<64x1xf32> to vector<64x128xf32>
    %151 = arith.subf %138, %150 : vector<64x128xf32>
    %cst_50 = arith.constant 9.99999974E-6 : f32
    %152 = vector.broadcast %cst_50 : f32 to vector<64x1xf32>
    %153 = arith.addf %149, %152 : vector<64x1xf32>
    %154 = math.rsqrt %153 : vector<64x1xf32>
    %155 = vector.broadcast %154 : vector<64x1xf32> to vector<64x128xf32>
    %156 = arith.mulf %151, %155 : vector<64x128xf32>
    %157 = vector.shape_cast %7 : vector<128xf32> to vector<1x128xf32>
    %158 = vector.broadcast %157 : vector<1x128xf32> to vector<64x128xf32>
    %159 = arith.mulf %156, %158 : vector<64x128xf32>
    %160 = vector.shape_cast %9 : vector<128xf32> to vector<1x128xf32>
    %161 = vector.broadcast %160 : vector<1x128xf32> to vector<64x128xf32>
    %162 = arith.addf %159, %161 : vector<64x128xf32>
    %163 = arith.truncf %162 : vector<64x128xf32> to vector<64x128xbf16>
    %cst_51 = arith.constant dense<0.000000e+00> : vector<64x512xf32>
    %164 = tpu.matmul %163, %18, %cst_51 {dimension_numbers = #tpu.dot_dimension_numbers<[1], [0], [0], [1], [0, 0, 1, 1], [], []>} : vector<64x128xbf16>, vector<128x512xbf16>, vector<64x512xf32> -> vector<64x512xf32>
    %165 = vector.shape_cast %13 : vector<512xf32> to vector<1x512xf32>
    %166 = vector.broadcast %165 : vector<1x512xf32> to vector<64x512xf32>
    %167 = arith.addf %164, %166 : vector<64x512xf32>
    %cst_52 = arith.constant 5.000000e-01 : f32
    %168 = vector.broadcast %cst_52 : f32 to vector<64x512xf32>
    %169 = arith.mulf %168, %167 : vector<64x512xf32>
    %cst_53 = arith.constant 4.471500e-02 : f32
    %170 = vector.broadcast %cst_53 : f32 to vector<64x512xf32>
    %171 = arith.mulf %170, %167 : vector<64x512xf32>
    %172 = arith.mulf %171, %167 : vector<64x512xf32>
    %173 = arith.mulf %172, %167 : vector<64x512xf32>
    %174 = arith.addf %167, %173 : vector<64x512xf32>
    %cst_54 = arith.constant 0.797884583 : f32
    %175 = vector.broadcast %cst_54 : f32 to vector<64x512xf32>
    %176 = arith.mulf %175, %174 : vector<64x512xf32>
    %177 = math.tanh %176 : vector<64x512xf32>
    %cst_55 = arith.constant 1.000000e+00 : f32
    %178 = vector.broadcast %cst_55 : f32 to vector<64x512xf32>
    %179 = arith.addf %178, %177 : vector<64x512xf32>
    %180 = arith.mulf %169, %179 : vector<64x512xf32>
    %181 = arith.truncf %180 : vector<64x512xf32> to vector<64x512xbf16>
    %cst_56 = arith.constant dense<0.000000e+00> : vector<64x128xf32>
    %182 = tpu.matmul %181, %19, %cst_56 {dimension_numbers = #tpu.dot_dimension_numbers<[1], [0], [0], [1], [0, 0, 1, 1], [], []>} : vector<64x512xbf16>, vector<512x128xbf16>, vector<64x128xf32> -> vector<64x128xf32>
    %183 = vector.shape_cast %15 : vector<128xf32> to vector<1x128xf32>
    %184 = vector.broadcast %183 : vector<1x128xf32> to vector<64x128xf32>
    %185 = arith.addf %182, %184 : vector<64x128xf32>
    %186 = arith.addf %138, %185 : vector<64x128xf32>
    %187 = vector.shape_cast %186 : vector<64x128xf32> to vector<1x64x128xf32>
    %c0_57 = arith.constant 0 : index
    %c0_58 = arith.constant 0 : index
    %c0_59 = arith.constant 0 : index
    %188 = vector.load %arg13[%c0_57, %c0_58, %c0_59] : memref<1x64x128xf32, #tpu.memory_space<vmem>>, vector<1x64x128xf32>
    tpu.vector_store %arg13[%c0_57, %c0_58, %c0_59], %187 {strides = array<i32>} : memref<1x64x128xf32, #tpu.memory_space<vmem>>, vector<1x64x128xf32>,
    return
  }
  func.func @transform_0(%arg0: i32) -> (i32, i32, i32) {
    %c0_i32 = arith.constant 0 : i32
    %c0_i32_0 = arith.constant 0 : i32
    %c0_i32_1 = arith.constant 0 : i32
    return %arg0, %c0_i32, %c0_i32_0 : i32, i32, i32
  }
  func.func @transform_1(%arg0: i32) -> (i32, i32) {
    %c0_i32 = arith.constant 0 : i32
    %c0_i32_0 = arith.constant 0 : i32
    %c0_i32_1 = arith.constant 0 : i32
    return %c0_i32, %c0_i32_0 : i32, i32
  }
  func.func @transform_2(%arg0: i32) -> (i32, i32) {
    %c0_i32 = arith.constant 0 : i32
    %c0_i32_0 = arith.constant 0 : i32
    %c0_i32_1 = arith.constant 0 : i32
    return %c0_i32, %c0_i32_0 : i32, i32
  }
  func.func @transform_3(%arg0: i32) -> (i32, i32) {
    %c0_i32 = arith.constant 0 : i32
    %c0_i32_0 = arith.constant 0 : i32
    %c0_i32_1 = arith.constant 0 : i32
    return %c0_i32, %c0_i32_0 : i32, i32
  }
  func.func @transform_4(%arg0: i32) -> (i32, i32) {
    %c0_i32 = arith.constant 0 : i32
    %c0_i32_0 = arith.constant 0 : i32
    %c0_i32_1 = arith.constant 0 : i32
    return %c0_i32, %c0_i32_0 : i32, i32
  }
  func.func @transform_5(%arg0: i32) -> (i32, i32) {
    %c0_i32 = arith.constant 0 : i32
    %c0_i32_0 = arith.constant 0 : i32
    %c0_i32_1 = arith.constant 0 : i32
    return %c0_i32, %c0_i32_0 : i32, i32
  }
  func.func @transform_6(%arg0: i32) -> (i32, i32) {
    %c0_i32 = arith.constant 0 : i32
    %c0_i32_0 = arith.constant 0 : i32
    %c0_i32_1 = arith.constant 0 : i32
    return %c0_i32, %c0_i32_0 : i32, i32
  }
  func.func @transform_7(%arg0: i32) -> (i32, i32) {
    %c0_i32 = arith.constant 0 : i32
    %c0_i32_0 = arith.constant 0 : i32
    %c0_i32_1 = arith.constant 0 : i32
    return %c0_i32, %c0_i32_0 : i32, i32
  }
  func.func @transform_8(%arg0: i32) -> (i32, i32) {
    %c0_i32 = arith.constant 0 : i32
    %c0_i32_0 = arith.constant 0 : i32
    %c0_i32_1 = arith.constant 0 : i32
    return %c0_i32, %c0_i32_0 : i32, i32
  }
  func.func @transform_9(%arg0: i32) -> (i32, i32) {
    %c0_i32 = arith.constant 0 : i32
    %c0_i32_0 = arith.constant 0 : i32
    %c0_i32_1 = arith.constant 0 : i32
    return %c0_i32, %c0_i32_0 : i32, i32
  }
  func.func @transform_10(%arg0: i32) -> (i32, i32) {
    %c0_i32 = arith.constant 0 : i32
    %c0_i32_0 = arith.constant 0 : i32
    %c0_i32_1 = arith.constant 0 : i32
    return %c0_i32, %c0_i32_0 : i32, i32
  }
  func.func @transform_11(%arg0: i32) -> (i32, i32) {
    %c0_i32 = arith.constant 0 : i32
    %c0_i32_0 = arith.constant 0 : i32
    %c0_i32_1 = arith.constant 0 : i32
    return %c0_i32, %c0_i32_0 : i32, i32
  }
  func.func @transform_12(%arg0: i32) -> (i32, i32, i32) {
    %c0_i32 = arith.constant 0 : i32
    %c0_i32_0 = arith.constant 0 : i32
    %c0_i32_1 = arith.constant 0 : i32
    return %arg0, %c0_i32, %c0_i32_0 : i32, i32, i32
  }
}

</mosaic_0001>

<bundles_post_ra>
// kernel: tpu_custom_call.1
= control target key start
LH: loop header
LB: loop body
LE: loop exit
PB: predicated region body
PF: predicated region fallthrough
CT: control target
= control target key end

     0   :  { %s6442_s0 = inlined_call_operand.hbm [shape: f32[2,64,128], index: 0, kind: input, shape index: {}]   ;;  %s6443_s1 = inlined_call_operand.vmem [shape: f32[1,128], index: 1, kind: input, shape index: {}]   ;;  %s6444_s2 = inlined_call_operand.vmem [shape: f32[1,128], index: 2, kind: input, shape index: {}]   ;;  %s6445_s3 = inlined_call_operand.hbm [shape: bf16[128,384], index: 3, kind: input, shape index: {}]   ;;  %s6446_s4 = inlined_call_operand.hbm [shape: bf16[128,128], index: 4, kind: input, shape index: {}]   ;;  %s6447_s5 = inlined_call_operand.vmem [shape: f32[1,128], index: 5, kind: input, shape index: {}]   ;;  %s6448_s6 = inlined_call_operand.vmem [shape: f32[1,128], index: 6, kind: input, shape index: {}]   ;;  %s6449_s7 = inlined_call_operand.vmem [shape: f32[1,128], index: 7, kind: input, shape index: {}]   ;;  %s6450_s8 = inlined_call_operand.hbm [shape: bf16[128,512], index: 8, kind: input, shape index: {}]   ;;  %s6451_s9 = inlined_call_operand.vmem [shape: f32[1,512], index: 9, kind: input, shape index: {}]   ;;  %s6452_s10 = inlined_call_operand.hbm [shape: bf16[512,128], index: 10, kind: input, shape index: {}]   ;;  %s6453_s11 = inlined_call_operand.vmem [shape: f32[1,128], index: 11, kind: input, shape index: {}]   ;;  %s6454_s12 = inlined_call_operand.hbm [shape: f32[2,64,128], index: 12, kind: output, shape index: {}]  }
   0x1   :  { %6477 = sst [smem:[#allocation35_spill]] %s6445_s3 }
   0x2   :  { %6478 = sst [smem:[#allocation36_spill]] %s6451_s9 }
   0x3   :  { %6479 = sst [smem:[#allocation37_spill]] %s6453_s11 }
   0x4   :  { %6480 = sst [smem:[#allocation38_spill]] %s6454_s12 }
   0x5   :  { %17 = vsyncpa [#allocation3], 0 }
   0x6   :  { %19 = vsyncpa [#allocation3 + $0x1], 0 }
   0x7   :  { %20 = vsyncpa [#allocation6], 0 }
   0x8   :  { %21 = vsyncpa [#allocation9], 0 }
   0x9   :  { %22 = vsyncpa [#allocation4], 0 }
   0xa   :  { %24 = vsyncpa [#allocation4 + $0x1], 0  ;;  %s5025_s21 = smov 0   ;;  %s5027_s22 = smov 0  }
   0xb   :  { %s5029_s23 = smov 0   ;;  %s5031_s24 = smov 0  }
   0xc LB: > { %6481 = sst [smem:[#allocation16_spill]] %s4926_s21  ;;  %s5046_s25 = sadd.s32 4294967295, %s4938_s24   ;;  %s4938_s24 = sphi %s5031_s24, %s6542_s24   ;;  %s4934_s23 = sphi %s5029_s23, %s6541_s23   ;;  %s4930_s22 = sphi %s5027_s22, %s6540_s22   ;;  %s4926_s21 = sphi %s5025_s21, %s6539_s21  }
   0xd   : > { %s3691_s26 = sadd.s32 4294967294, %s4938_s24   ;;  %p50_p0 = scmp.ne.s32.totalorder %s4930_s22, %s4926_s21 }
   0xe   : > { %p6456_p1 = scmp.eq.s32.totalorder %s5046_s25, 0  ;;  %p311_p3 = scmp.eq.s32.totalorder %s3691_s26, 1 }
   0xf   : > { %p3692_p5 = scmp.ge.s32.totalorder %s4938_s24, 1  ;;  %p318_p7 = scmp.lt.s32.totalorder %s4938_s24, 3 }
  0x10   : > { %p5055_p4 = por %p6456_p1, %p50_p0  ;;  %p5060_p6 = por %p311_p3, %p50_p0 }
  0x11   : > { %p5065_p8 = pnand %p3692_p5, %p318_p7  ;;  %s4940_s30 = smov [#allocation5]  }
  0x12   : > { %s6482_s27 = scalar_select %p5055_p4, 1, 0 }
  0x13   : > { %s6483_s28 = scalar_select %p5060_p6, 1, 0 }
  0x14   : > { %s6485_s29 = scalar_select %p5065_p8, 1, 0 }
  0x15   : > { %6484 = sst [smem:[#allocation17_spill]] %s6483_s28  ;;  %s336_s13 = sshll.u32 %s4940_s30, 4  ;;  %s5069_s13 = int_to_ptr.vmem [resolvable:$true] %s336_s13 }
  0x16   : > { %p4229_p9 = pneg %p5065_p8  ;;  %s4941_s15 = smov [#allocation8]  }
  0x17   : > { %s371_s16 = sshll.u32 %s4941_s15, 4  ;;  %s6487_s3 = sld [smem:[#allocation35_spill]]  ;;  %s5080_s16 = int_to_ptr.vmem [resolvable:$true] %s371_s16 }
  0x18   : > { %p5076_p11 = pnand %p4229_p9, %p6456_p1 }
  0x1a   : > { %p5090_p13 = pneg %p5076_p11 }
  0x1d   : > { %s4722_s19 = scalar_lea.hbm %s6487_s3, 3072 }
  0x1e   : > { %p4723_p12 = scmp.ne.s32.totalorder %s6487_s3, %s4722_s19  ;;  %p4729_p5 = scmp.lt.u32.totalorder %s4722_s19, %s6487_s3 }
  0x20   : > { %p4725_p0 = pnand %p5090_p13, %p4723_p12 }
  0x22   : > { %p4726_p3 = pneg %p4725_p0 }
  0x24   : > { %p4731_p7 = pnand %p4729_p5, %p4726_p3 }
  0x26   : > { %4734 = shalt.err (!%p4731_p7)
}
  0x27   : > { %s4735_s17 = scalar_lea.vmem %s5069_s13, 3072  ;;  %p4743_p2 = scmp.lt.s32.totalorder %s5069_s13, %s5069_s13 }
  0x28   : > { %p4736_p9 = scmp.ne.s32.totalorder %s5069_s13, %s4735_s17  ;;  %p4744_p6 = scmp.lt.s32.totalorder %s4735_s17, %s4735_s17 }
  0x2a   : > { %p4738_p10 = pnand %p4736_p9, %p5090_p13  ;;  %p4745_p12 = por %p4744_p6, %p4743_p2 }
  0x2c   : > { %p4739_p1 = pneg %p4738_p10 }
  0x2e   : > { %p4746_p0 = pnand %p4745_p12, %p4739_p1 }
  0x30   : > { %4749 = shalt.err (!%p4746_p0)
}
  0x31   : > { %s4942_s18 = smov 192   ;;  %s4943_s28 = smov 12  }
  0x32   : > { %4232 = dma.hbm_to_vmem [thread:$0]  (!%p5076_p11), %s6487_s3, 3072, %s5069_s13, [#allocation6], %s4942_s18, %s4942_s18, %s4943_s28  }
  0x33   : > { %s4750_s21 = scalar_lea.hbm %s6450_s8, 4096 }
  0x34   : > { %p4751_p2 = scmp.ne.s32.totalorder %s6450_s8, %s4750_s21  ;;  %p4757_p10 = scmp.lt.u32.totalorder %s4750_s21, %s6450_s8 }
  0x36   : > { %p4753_p1 = pnand %p4751_p2, %p5090_p13 }
  0x38   : > { %p4754_p6 = pneg %p4753_p1 }
  0x3a   : > { %p4759_p3 = pnand %p4757_p10, %p4754_p6 }
  0x3c   : > { %4762 = shalt.err (!%p4759_p3)
}
  0x3d   : > { %s4763_s13 = scalar_lea.vmem %s5080_s16, 4096  ;;  %p4771_p12 = scmp.lt.s32.totalorder %s5080_s16, %s5080_s16 }
  0x3e   : > { %p4764_p5 = scmp.ne.s32.totalorder %s5080_s16, %s4763_s13  ;;  %p4772_p0 = scmp.lt.s32.totalorder %s4763_s13, %s4763_s13 }
  0x40   : > { %p4766_p7 = pnand %p4764_p5, %p5090_p13  ;;  %p4773_p2 = por %p4772_p0, %p4771_p12 }
  0x42   : > { %p4767_p9 = pneg %p4766_p7 }
  0x44   : > { %p4774_p1 = pnand %p4773_p2, %p4767_p9 }
  0x46   : > { %4777 = shalt.err (!%p4774_p1)
}
  0x47   : > { %s4944_s11 = smov 256   ;;  %s4945_s9 = smov 16  }
  0x48   : > { %4238 = dma.hbm_to_vmem [thread:$0]  (!%p5076_p11), %s6450_s8, 4096, %s5080_s16, [#allocation9], %s4944_s11, %s4944_s11, %s4945_s9  }
  0x49   : > { %s4946_s18 = smov [#allocation7]   ;;  %s4778_s26 = scalar_lea.hbm %s6446_s4, 1024 }
  0x4a   : > { %s349_s28 = sshll.u32 %s4946_s18, 4  ;;  %p4779_p6 = scmp.ne.s32.totalorder %s6446_s4, %s4778_s26  ;;  %s350_s28 = int_to_ptr.vmem [resolvable:$true] %s349_s28 }
  0x4b   : > { %p4785_p5 = scmp.lt.u32.totalorder %s4778_s26, %s6446_s4 }
  0x4c   : > { %p4781_p10 = pnand %p4779_p6, %p5090_p13 }
  0x4e   : > { %p4782_p3 = pneg %p4781_p10 }
  0x50   : > { %p4787_p7 = pnand %p4785_p5, %p4782_p3 }
  0x52   : > { %4790 = shalt.err (!%p4787_p7)
}
  0x53   : > { %s4791_s16 = scalar_lea.vmem %s350_s28, 1024  ;;  %p4799_p2 = scmp.lt.s32.totalorder %s350_s28, %s350_s28 }
  0x54   : > { %p4792_p9 = scmp.ne.s32.totalorder %s350_s28, %s4791_s16  ;;  %p4800_p1 = scmp.lt.s32.totalorder %s4791_s16, %s4791_s16 }
  0x56   : > { %p4794_p12 = pnand %p4792_p9, %p5090_p13  ;;  %p4801_p4 = por %p4800_p1, %p4799_p2 }
  0x58   : > { %p4795_p0 = pneg %p4794_p12 }
  0x5a   : > { %p4802_p8 = pnand %p4801_p4, %p4795_p0 }
  0x5c   : > { %4805 = shalt.err (!%p4802_p8)
}
  0x5d   : > { %s4947_s11 = smov 64   ;;  %s4948_s9 = smov 4  }
  0x5e   : > { %4235 = dma.hbm_to_vmem [thread:$0]  (!%p5076_p11), %s6446_s4, 1024, %s350_s28, [#allocation6], %s4947_s11, %s4947_s11, %s4948_s9  }
  0x5f   : > { %s4949_s21 = smov [#allocation10]   ;;  %s4806_s26 = scalar_lea.hbm %s6452_s10, 4096 }
  0x60   : > { %s387_s18 = sshll.u32 %s4949_s21, 4  ;;  %p4807_p4 = scmp.ne.s32.totalorder %s6452_s10, %s4806_s26  ;;  %s388_s18 = int_to_ptr.vmem [resolvable:$true] %s387_s18 }
  0x61   : > { %p4813_p10 = scmp.lt.u32.totalorder %s4806_s26, %s6452_s10 }
  0x62   : > { %p4809_p8 = pnand %p4807_p4, %p5090_p13 }
  0x64   : > { %p4810_p6 = pneg %p4809_p8 }
  0x66   : > { %p4815_p3 = pnand %p4813_p10, %p4810_p6 }
  0x68   : > { %4818 = shalt.err (!%p4815_p3)
}
  0x69   : > { %s4819_s28 = scalar_lea.vmem %s388_s18, 4096  ;;  %p4827_p12 = scmp.lt.s32.totalorder %s388_s18, %s388_s18 }
  0x6a   : > { %p4820_p5 = scmp.ne.s32.totalorder %s388_s18, %s4819_s28  ;;  %p4828_p0 = scmp.lt.s32.totalorder %s4819_s28, %s4819_s28 }
  0x6c   : > { %p4822_p7 = pnand %p4820_p5, %p5090_p13  ;;  %p4829_p2 = por %p4828_p0, %p4827_p12 }
  0x6e   : > { %p4823_p9 = pneg %p4822_p7 }
  0x70   : > { %p4830_p1 = pnand %p4829_p2, %p4823_p9 }
  0x72   : > { %4833 = shalt.err (!%p4830_p1)
}
  0x73   : > { %4241 = dma.hbm_to_vmem [thread:$0]  (!%p5076_p11), %s6452_s10, 4096, %s388_s18, [#allocation9], %s4947_s11, %s4947_s11, %s4948_s9  }
  0x74   : > { %s5171_s30 = sadd.s32 1, %s4938_s24   ;;  %s37_s21 = sadd.s32 1, %s4934_s23 }
  0x75   : > { %s34_s14 = ssub.s32 %s4938_s24, %s5171_s30  ;;  %p44_p13 = scmp.ne.s32.totalorder %s4934_s23, %s4930_s22 }
  0x76   : > { %p35_p4 = scmp.eq.s32.totalorder %s34_s14, 0  ;;  %p45_p8 = scmp.eq.s32.totalorder %s4938_s24, 0 }
  0x77   : > { %p6489_p6 = scmp.eq.s32.totalorder %s5046_s25, 1  ;;  %p4254_p3 = scmp.lt.s32.totalorder %s4938_s24, 2 }
  0x78   : > { %s5187_s20 = scalar_select %p35_p4, %s4934_s23, %s37_s21  }
  0x79   : > { %p5181_p10 = por %p6489_p6, %p44_p13  ;;  %p46_p5 = por %p45_p8, %p44_p13 }
  0x7a   : > { %s404_s26 = sand.u32 1, %s4934_s23   ;;  %s3847_s11 = sshll.u32 %s4938_s24, 10 }
  0x7b   : > { %s3698_s15 = sshll.u32 %s404_s26, 6  ;;  %s5194_s17 = scalar_lea.hbm %s6442_s0, %s3847_s11 }
  0x7c   : > { %s408_s13 = scalar_lea.vmem [#allocation2], %s3698_s15  ;;  %p5198_p11 = pnand %p4254_p3, %p46_p5 }
  0x7d   : > { %s415_s16 = sshll.u32 %s408_s13, 4  ;;  %s5202_s3 = scalar_lea.sflag [#allocation3], %s404_s26  ;;  %s5196_s16 = int_to_ptr.vmem [resolvable:$true] %s415_s16 }
  0x7e   : > { %s4834_s12 = scalar_lea.hbm %s5194_s17, 1024  ;;  %p4836_p9 = pneg %p5198_p11 }
  0x7f   : > { %p4835_p7 = scmp.ne.s32.totalorder %s5194_s17, %s4834_s12  ;;  %s4839_s15 = scalar_lea.hbm %s6442_s0, 2048 }
  0x80   : > { %p4840_p2 = scmp.lt.u32.totalorder %s5194_s17, %s6442_s0  ;;  %p4841_p1 = scmp.lt.u32.totalorder %s4839_s15, %s4834_s12 }
  0x81   : > { %p4837_p12 = pnand %p4836_p9, %p4835_p7  ;;  %p4843_p4 = scmp.lt.u32.totalorder %s4834_s12, %s5194_s17 }
  0x82   : > { %p4842_p13 = por %p4841_p1, %p4840_p2 }
  0x83   : > { %p4838_p0 = pneg %p4837_p12 }
  0x84   : > { %p4844_p8 = por %p4843_p4, %p4842_p13 }
  0x86   : > { %p4845_p6 = pnand %p4844_p8, %p4838_p0 }
  0x88   : > { %4848 = shalt.err (!%p4845_p6)
}
  0x89   : > { %s4849_s26 = scalar_lea.vmem %s5196_s16, 1024  ;;  %s4950_s18 = smov [#allocation2]  }
  0x8a   : > { %p4850_p3 = scmp.ne.s32.totalorder %s5196_s16, %s4849_s26  ;;  %s4854_s13 = sshll.u32 %s4950_s18, 4  ;;  %s4855_s13 = int_to_ptr.vmem [resolvable:$false] %s4854_s13 }
  0x8b   : > { %s4856_s21 = scalar_lea.vmem %s4855_s13, 2048  ;;  %p4857_p12 = scmp.lt.s32.totalorder %s5196_s16, %s4855_s13 }
  0x8c   : > { %p4852_p5 = pnand %p4850_p3, %p4836_p9  ;;  %p4858_p2 = scmp.lt.s32.totalorder %s4856_s21, %s4849_s26 }
  0x8e   : > { %p4853_p7 = pneg %p4852_p5  ;;  %p4859_p1 = por %p4858_p2, %p4857_p12 }
  0x90   : > { %p4860_p13 = pnand %p4859_p1, %p4853_p7 }
  0x92   : > { %4863 = shalt.err (!%p4860_p13)
}
  0x93   : > { %s4951_s12 = smov 128   ;;  %s4952_s14 = smov 8  }
  0x94   : > { %4245 = dma.hbm_to_vmem [thread:$0]  (!%p5198_p11), %s5194_s17, 1024, %s5196_s16, %s5202_s3, %s4951_s12, %s4951_s12, %s4952_s14  }
  0x95   : > { %p6492_p9 = scmp.ne.s32.totalorder %s6485_s29, 0 }
  0x97   : > { %427 = sbr.rel (%p6492_p9) target bundleno = 3839 (0xeff), region = 68 }
  0x9e   : > { %s5233_s15 = sand.u32 1, %s4930_s22   ;;  %p6493_p0 = scmp.ne.s32.totalorder %s6482_s27, 0 }
  0x9f   : > { %s3702_s11 = sshll.u32 %s5233_s15, 6  ;;  %s430_s9 = scalar_lea.sflag [#allocation3], %s5233_s15 }
  0xa0   : > { %s5239_s26 = scalar_lea.vmem [#allocation2], %s3702_s11 }
  0xa1   : > { %4909 = dma.done.wait (%p6493_p0), %s430_s9, 1024  }
  0xa2   : > { %4911 = vsyncadd (%p6493_p0), %s430_s9, 4294966272  ;;  %p6494_p11 = scmp.eq.s32.totalorder %s5046_s25, 0 }
  0xa4   : > { %4913 = dma.done.wait (%p6494_p11), [#allocation6], 4096   ;;  %p6495_p4 = pmov %p6494_p11 }
  0xa6   : > { %4915 = vsyncadd (%p6495_p4), [#allocation6], 4294963200  ;;  %p6496_p8 = pmov %p6495_p4 }
  0xa7   : > { %p6497_p6 = pmov %p6495_p4 }
  0xa8   : > { %4917 = dma.done.wait (%p6496_p8), [#allocation9], 8192  }
  0xa9   : > { %4919 = vsyncadd (%p6497_p6), [#allocation9], 4294959104  ;;  %v5254_v0 = vld [vmem:[%s5239_s26] sm:$0xff]  ;;  %v5257_v1 = vld [vmem:[%s5239_s26 + $0x8] sm:$0xff]  ;;  %v4953_v39 = vmov 0   ;;  %vm1065_vm0 = vcmask 261120  }
  0xaa   : > { %650 = vadd.xlane.f32.xlu0 %v5254_v0  ;;  %v675_v2 = vmul.f32 %v5254_v0, %v5254_v0  ;;  %v676_v3 = vmul.f32 %v5257_v1, %v5257_v1  ;;  %v4370_v4 = vld [vmem:[#allocation5 + $0x4] ss:$12 sps:$4 sm:$0xff]   ;;  %v5269_v6 = vld [vmem:[%s5239_s26 + $0x18] sm:$0xff]  ;;  %v4372_v10 = vld [vmem:[#allocation5] ss:$12 sps:$4 sm:$0xff]   ;;  %947 = vmatprep.mubr.bf16.mxu0 %v4953_v39  ;;  %vm1155_vm1 = vcmask 523264  }
  0xab   : > { %v5265_v5 = vld [vmem:[%s5239_s26 + $0x10] sm:$0xff]  ;;  %915 = vmatprep.subr.bf16.mxu0 %v4370_v4  ;;  %v678_v8 = vmul.f32 %v5269_v6, %v5269_v6  ;;  %v5278_v9 = vld [vmem:[%s5239_s26 + $0x20] sm:$0xff]  ;;  %v5281_v11 = vld [vmem:[%s5239_s26 + $0x28] sm:$0xff]  ;;  %s4954_s28 = smov 96   ;;  %s4955_s3 = smov 64   ;;  %vm2307_vm2 = vcmask 785408  }
  0xac   : > { %683 = vadd.xlane.f32.xlu1 %v675_v2  ;;  %v677_v7 = vmul.f32 %v5265_v5, %v5265_v5  ;;  %916 = vmatpush1.bf16.msra.mxu0 %v4372_v10  ;;  %v4373_v12 = vld [vmem:[#allocation5 + $0x1c] ss:$12 sps:$4 sm:$0xff]   ;;  %v679_v13 = vmul.f32 %v5278_v9, %v5278_v9  ;;  %v4375_v14 = vld [vmem:[#allocation5 + $0x18] ss:$12 sps:$4 sm:$0xff]   ;;  %v680_v15 = vmul.f32 %v5281_v11, %v5281_v11  ;;  %v5290_v16 = vld [vmem:[%s5239_s26 + $0x30] sm:$0xff]  ;;  %s4956_s18 = smov 32  }
  0xad   : > { %917 = vmatprep.subr.bf16.mxu0 %v4373_v12  ;;  %v4376_v17 = vld [vmem:[#allocation5 + $0x34] ss:$12 sps:$4 sm:$0xff]   ;;  %v4379_v19 = vld [vmem:[#allocation5 + $0x30] ss:$12 sps:$4 sm:$0xff]   ;;  %v4380_v21 = vld [vmem:[#allocation5 + $0x4c] ss:$12 sps:$4 sm:$0xff]   ;;  %v681_v23 = vmul.f32 %v5290_v16, %v5290_v16 }
  0xae   : > { %652 = vadd.xlane.f32.xlu0 %v5257_v1  ;;  %v4378_v18 = vld [vmem:[#allocation5 + $0x8] ss:$12 sps:$4 sm:$0xff]   ;;  %v5293_v20 = vld [vmem:[%s5239_s26 + $0x38] sm:$0xff]  ;;  %v4382_v22 = vld [vmem:[#allocation5 + $0x20] ss:$12 sps:$4 sm:$0xff]   ;;  %s6506_s17 = sld [smem:[#allocation36_spill]] }
  0xaf   : > { %4017 = vmatprep.subr.bf16.mxu1 %v4378_v18  ;;  %v4383_v24 = vld [vmem:[#allocation5 + $0x48] ss:$12 sps:$4 sm:$0xff]   ;;  %v682_v25 = vmul.f32 %v5293_v20, %v5293_v20  ;;  %v4384_v26 = vld [vmem:[#allocation5 + $0x64] ss:$12 sps:$4 sm:$0xff]   ;;  %v4387_v28 = vld [vmem:[#allocation5 + $0x60] ss:$12 sps:$4 sm:$0xff]  }
  0xb0   : > { %685 = vadd.xlane.f32.xlu1 %v676_v3  ;;  %918 = vmatpush1.bf16.msra.mxu0 %v4375_v14  ;;  %v4386_v27 = vld [vmem:[#allocation5 + $0x38] ss:$12 sps:$4 sm:$0xff]   ;;  %v4388_v29 = vld [vmem:[#allocation5 + $0x7c] ss:$12 sps:$4 sm:$0xff]   ;;  %v4392_v32 = vld [vmem:[#allocation5 + $0x94] ss:$12 sps:$4 sm:$0xff]  }
  0xb1   : > { %919 = vmatprep.subr.bf16.mxu0 %v4376_v17  ;;  %4018 = vmatpush3.bf16.msra.mxu1 %v4378_v18  ;;  %v4390_v30 = vld [vmem:[#allocation5 + $0x50] ss:$12 sps:$4 sm:$0xff]   ;;  %v4391_v31 = vld [vmem:[#allocation5 + $0x78] ss:$12 sps:$4 sm:$0xff]   ;;  %v4394_v33 = vld [vmem:[#allocation5 + $0x68] ss:$12 sps:$4 sm:$0xff]  }
  0xb2   : > { %654 = vadd.xlane.f32.xlu0 %v5265_v5  ;;  %4019 = vmatprep.subr.bf16.mxu1 %v4382_v22  ;;  %v4395_v34 = vld [vmem:[#allocation5 + $0x90] ss:$12 sps:$4 sm:$0xff]   ;;  %v4396_v35 = vld [vmem:[#allocation5 + $0xac] ss:$12 sps:$4 sm:$0xff]   ;;  %v4399_v37 = vld [vmem:[#allocation5 + $0xa8] ss:$12 sps:$4 sm:$0xff]  }
  0xb3   : > { %v4398_v36 = vld [vmem:[#allocation5 + $0x80] ss:$12 sps:$4 sm:$0xff]   ;;  %v4400_v38 = vld [vmem:[#allocation5 + $0x98] ss:$12 sps:$4 sm:$0xff]   ;;  %v4401_v40 = vld [vmem:[#allocation5 + $0xb0] ss:$12 sps:$4 sm:$0xff]  }
  0xb4   : > { %656 = vadd.xlane.f32.xlu1 %v5269_v6  ;;  %920 = vmatpush1.bf16.msra.mxu0 %v4379_v19  ;;  %s6533_s14 = sld [smem:[#allocation38_spill]]  ;;  %s4957_s27 = smov [#allocation11]  }
  0xb5   : > { %921 = vmatprep.subr.bf16.mxu0 %v4380_v21  ;;  %4020 = vmatpush3.bf16.msra.mxu1 %v4382_v22  ;;  %s4868_s29 = sshll.u32 %s4957_s27, 4  ;;  %s4869_s29 = int_to_ptr.vmem [resolvable:$false] %s4868_s29 }
  0xb6   : > { %687 = vadd.xlane.f32.xlu0 %v677_v7  ;;  %4021 = vmatprep.subr.bf16.mxu1 %v4386_v27 }
  0xb8   : > { %689 = vadd.xlane.f32.xlu1 %v678_v8  ;;  %922 = vmatpush1.bf16.msra.mxu0 %v4383_v24 }
  0xb9   : > { %923 = vmatprep.subr.bf16.mxu0 %v4384_v26  ;;  %4022 = vmatpush3.bf16.msra.mxu1 %v4386_v27 }
  0xba   : > { %658 = vadd.xlane.f32.xlu0 %v5278_v9  ;;  %4023 = vmatprep.subr.bf16.mxu1 %v4390_v30 }
  0xbc   : > { %660 = vadd.xlane.f32.xlu1 %v5281_v11  ;;  %924 = vmatpush1.bf16.msra.mxu0 %v4387_v28 }
  0xbd   : > { %925 = vmatprep.subr.bf16.mxu0 %v4388_v29  ;;  %4024 = vmatpush3.bf16.msra.mxu1 %v4390_v30 }
  0xbe   : > { %691 = vadd.xlane.f32.xlu0 %v679_v13  ;;  %4025 = vmatprep.subr.bf16.mxu1 %v4394_v33 }
  0xc0   : > { %693 = vadd.xlane.f32.xlu1 %v680_v15  ;;  %926 = vmatpush1.bf16.msra.mxu0 %v4391_v31 }
  0xc1   : > { %927 = vmatprep.subr.bf16.mxu0 %v4392_v32  ;;  %4026 = vmatpush3.bf16.msra.mxu1 %v4394_v33 }
  0xc2   : > { %662 = vadd.xlane.f32.xlu0 %v5290_v16  ;;  %4027 = vmatprep.subr.bf16.mxu1 %v4398_v36 }
  0xc4   : > { %664 = vadd.xlane.f32.xlu1 %v5293_v20  ;;  %928 = vmatpush1.bf16.msra.mxu0 %v4395_v34 }
  0xc5   : > { %929 = vmatprep.subr.bf16.mxu0 %v4396_v35  ;;  %4028 = vmatpush3.bf16.msra.mxu1 %v4398_v36  ;;  %v3709_v35 = vld [vmem:[%s6444_s2] ss:$0 sm:$0xff] }
  0xc6   : > { %695 = vadd.xlane.f32.xlu0 %v681_v23  ;;  %4029 = vmatprep.subr.bf16.mxu1 %v4400_v38  ;;  %v5310_v23 = vld [vmem:[%s6443_s1] ss:$0 sm:$0xff] }
  0xc8   : > { %697 = vadd.xlane.f32.xlu1 %v682_v25  ;;  %930 = vmatpush1.bf16.msra.mxu0 %v4399_v37 }
  0xc9   : > { %4030 = vmatpush3.bf16.msra.mxu1 %v4400_v38 }
  0xca   : > { %4031 = vmatprep.subr.bf16.mxu1 %v4401_v40 }
  0xcd   : > { %4032 = vmatpush3.bf16.msra.mxu1 %v4401_v40 }
 0x137   : > { %v651_v41 = vpop.xlane.xlu0 %650 }
 0x138   : > { %v667_v42 = vmul.f32 0.0078125, %v651_v41 }
 0x139   : > { %v684_v43 = vpop.xlane.xlu1 %683 }
 0x13a   : > { %v707_v44 = vmul.f32 %v667_v42, %v667_v42  ;;  %v699_v45 = vmul.f32 0.0078125, %v684_v43  ;;  %v723_v12 = vsub.f32 %v5254_v0, %v667_v42 }
 0x13b   : > { %v653_v46 = vpop.xlane.xlu0 %652 }
 0x13c   : > { %v715_v47 = vsub.f32 %v699_v45, %v707_v44  ;;  %v668_v48 = vmul.f32 0.0078125, %v653_v46 }
 0x13d   : > { %v686_v49 = vpop.xlane.xlu1 %685 }
 0x13e   : > { %v731_v50 = vadd.f32 1e-05, %v715_v47  ;;  %v708_v51 = vmul.f32 %v668_v48, %v668_v48  ;;  %v700_v52 = vmul.f32 0.0078125, %v686_v49  ;;  %v724_v24 = vsub.f32 %v5257_v1, %v668_v48 }
 0x13f   : > { %v655_v53 = vpop.xlane.xlu0 %654 }
 0x140   : > { %4490 = vrsqrt.f32 %v731_v50  ;;  %v716_v54 = vsub.f32 %v700_v52, %v708_v51  ;;  %v669_v55 = vmul.f32 0.0078125, %v655_v53 }
 0x141   : > { %v657_v56 = vpop.xlane.xlu1 %656 }
 0x142   : > { %v732_v57 = vadd.f32 1e-05, %v716_v54  ;;  %v709_v58 = vmul.f32 %v669_v55, %v669_v55  ;;  %v670_v59 = vmul.f32 0.0078125, %v657_v56  ;;  %v725_v40 = vsub.f32 %v5265_v5, %v669_v55 }
 0x143   : > { %v688_v60 = vpop.xlane.xlu0 %687 }
 0x144   : > { %4492 = vrsqrt.f32 %v732_v57  ;;  %v701_v61 = vmul.f32 0.0078125, %v688_v60  ;;  %v710_v63 = vmul.f32 %v670_v59, %v670_v59  ;;  %v726_v47 = vsub.f32 %v5269_v6, %v670_v59 }
 0x145   : > { %v690_v62 = vpop.xlane.xlu1 %689 }
 0x146   : > { %v717_v2 = vsub.f32 %v701_v61, %v709_v58  ;;  %v702_v3 = vmul.f32 0.0078125, %v690_v62 }
 0x147   : > { %v659_v4 = vpop.xlane.xlu0 %658 }
 0x148   : > { %v733_v7 = vadd.f32 1e-05, %v717_v2  ;;  %v718_v8 = vsub.f32 %v702_v3, %v710_v63  ;;  %v5302_v10 = vmul.f32 0.0078125, %v659_v4 }
 0x149   : > { %v661_v13 = vpop.xlane.xlu1 %660 }
 0x14a   : > { %v4491_v14 = vpop.eup %4490  ;;  %4494 = vrsqrt.f32 %v733_v7  ;;  %v734_v15 = vadd.f32 1e-05, %v718_v8  ;;  %v711_v17 = vmul.f32 %v5302_v10, %v5302_v10  ;;  %v672_v18 = vmul.f32 0.0078125, %v661_v13 }
 0x14b   : > { %v692_v19 = vpop.xlane.xlu0 %691  ;;  %v747_v21 = vmul.f32 %v4491_v14, %v723_v12  ;;  %v727_v59 = vsub.f32 %v5278_v9, %v5302_v10 }
 0x14c   : > { %4496 = vrsqrt.f32 %v734_v15  ;;  %v703_v22 = vmul.f32 0.0078125, %v692_v19  ;;  %v712_v26 = vmul.f32 %v672_v18, %v672_v18  ;;  %v728_v63 = vsub.f32 %v5281_v11, %v672_v18 }
 0x14d   : > { %v694_v0 = vpop.xlane.xlu1 %693  ;;  %v761_v31 = vmul.f32 %v5310_v23, %v747_v21 }
 0x14e   : > { %v4493_v25 = vpop.eup %4492  ;;  %v719_v27 = vsub.f32 %v703_v22, %v711_v17  ;;  %v704_v28 = vmul.f32 0.0078125, %v694_v0 }
 0x14f   : > { %v663_v29 = vpop.xlane.xlu0 %662  ;;  %v748_v30 = vmul.f32 %v4493_v25, %v724_v24  ;;  %v775_v43 = vadd.f32 %v3709_v35, %v761_v31 }
 0x150   : > { %v735_v32 = vadd.f32 1e-05, %v719_v27  ;;  %v720_v33 = vsub.f32 %v704_v28, %v712_v26  ;;  %v673_v34 = vmul.f32 0.0078125, %v663_v29 }
 0x151   : > { %v665_v36 = vpop.xlane.xlu1 %664  ;;  %v762_v37 = vmul.f32 %v5310_v23, %v748_v30 }
 0x152   : > { %4498 = vrsqrt.f32 %v735_v32  ;;  %v736_v1 = vadd.f32 1e-05, %v720_v33  ;;  %v713_v38 = vmul.f32 %v673_v34, %v673_v34  ;;  %v674_v41 = vmul.f32 0.0078125, %v665_v36 }
 0x153   : > { %v696_v42 = vpop.xlane.xlu0 %695  ;;  %v776_v44 = vadd.f32 %v3709_v35, %v762_v37  ;;  %v729_v9 = vsub.f32 %v5290_v16, %v673_v34 }
 0x154   : > { %v4495_v45 = vpop.eup %4494  ;;  %4500 = vrsqrt.f32 %v736_v1  ;;  %v705_v46 = vmul.f32 0.0078125, %v696_v42  ;;  %v714_v52 = vmul.f32 %v674_v41, %v674_v41  ;;  %v730_v15 = vsub.f32 %v5293_v20, %v674_v41 }
 0x155   : > { %v698_v48 = vpop.xlane.xlu1 %697  ;;  %v783_v49 = vpack.c.bf16 %v776_v44, %v775_v43  ;;  %v749_v50 = vmul.f32 %v4495_v45, %v725_v40 }
 0x156   : > { %v4497_v51 = vpop.eup %4496  ;;  %v721_v53 = vsub.f32 %v705_v46, %v713_v38  ;;  %v706_v54 = vmul.f32 0.0078125, %v698_v48 }
 0x157   : > { %948 = vmatmul.mubr.bf16.vlgmr.msra.gmra.mrb[0].mxu0 %v783_v49  ;;  %4033 = vmatprep.mubr.bf16.mxu1 %v783_v49  ;;  %v750_v56 = vmul.f32 %v4497_v51, %v726_v47  ;;  %v763_v5 = vmul.f32 %v5310_v23, %v749_v50 }
 0x158   : > { %v737_v55 = vadd.f32 1e-05, %v721_v53  ;;  %v722_v57 = vsub.f32 %v706_v54, %v714_v52  ;;  %957 = vmatprep.mubr.bf16.mxu0 %v4953_v39 }
 0x159   : > { %v764_v58 = vmul.f32 %v5310_v23, %v750_v56  ;;  %v777_v60 = vadd.f32 %v3709_v35, %v763_v5 }
 0x15a   : > { %4502 = vrsqrt.f32 %v737_v55  ;;  %v738_v6 = vadd.f32 1e-05, %v722_v57 }
 0x15b   : > { %v778_v61 = vadd.f32 %v3709_v35, %v764_v58 }
 0x15c   : > { %v4499_v62 = vpop.eup %4498  ;;  %4504 = vrsqrt.f32 %v738_v6 }
 0x15d   : > { %v784_v2 = vpack.c.bf16 %v778_v61, %v777_v60  ;;  %v751_v3 = vmul.f32 %v4499_v62, %v727_v59 }
 0x15e   : > { %v4501_v4 = vpop.eup %4500 }
 0x15f   : > { %958 = vmatmul.mubr.bf16.gmra.mrb[4].mxu0 %v784_v2  ;;  %4034 = vmatmul.mubr.bf16.vlgmr.msra.gmra.mrb[0].mxu1 %v784_v2  ;;  %v752_v7 = vmul.f32 %v4501_v4, %v728_v63  ;;  %v765_v8 = vmul.f32 %v5310_v23, %v751_v3 }
 0x160   : > { %967 = vmatprep.mubr.bf16.mxu0 %v4953_v39 }
 0x161   : > { %v766_v12 = vmul.f32 %v5310_v23, %v752_v7  ;;  %v779_v10 = vadd.f32 %v3709_v35, %v765_v8 }
 0x163   : > { %v780_v13 = vadd.f32 %v3709_v35, %v766_v12 }
 0x164   : > { %v4503_v14 = vpop.eup %4502 }
 0x165   : > { %v785_v11 = vpack.c.bf16 %v780_v13, %v779_v10  ;;  %v753_v17 = vmul.f32 %v4503_v14, %v729_v9 }
 0x166   : > { %v4505_v18 = vpop.eup %4504 }
 0x167   : > { %968 = vmatmul.mubr.bf16.gmra.mrb[8].mxu0 %v785_v11  ;;  %4037 = vmatprep.mubr.bf16.mxu1 %v785_v11  ;;  %v754_v19 = vmul.f32 %v4505_v18, %v730_v15  ;;  %v767_v21 = vmul.f32 %v5310_v23, %v753_v17 }
 0x168   : > { %977 = vmatprep.mubr.bf16.mxu0 %v4953_v39 }
 0x169   : > { %v768_v22 = vmul.f32 %v5310_v23, %v754_v19  ;;  %v781_v24 = vadd.f32 %v3709_v35, %v767_v21 }
 0x16b   : > { %v782_v0 = vadd.f32 %v3709_v35, %v768_v22 }
 0x16d   : > { %v786_v16 = vpack.c.bf16 %v782_v0, %v781_v24 }
 0x16f   : > { %978 = vmatmul.mubr.bf16.gmra.mrb[12].mxu0 %v786_v16  ;;  %4038 = vmatmul.mubr.bf16.gmra.mrb[4].mxu1 %v786_v16 }
 0x22a   : > { %v949_v25 = vpop.f32.mrb[0].mxu0 }
 0x22b   : > { %v951_v26 = vpop.f32.mrb[1].mxu0 }
 0x22c   : > { %v953_v20 = vpop.f32.mrb[2].mxu0 }
 0x22d   : > { %v5334_v27 = vpack.c.bf16 %v953_v20, %v949_v25  ;;  %v955_v28 = vpop.f32.mrb[3].mxu0 }
 0x22e   : > { %v5336_v29 = vpack.c.bf16 %v955_v28, %v951_v26 }
 0x22f   : > { %4049 = vmatprep.mubr.msk.bf16.mxu0 %vm1065_vm0, %v5334_v27 }
 0x230   : > { %4193 = vmatprep.subr.msk.bf16.mxu0 %vm1065_vm0, %v5336_v29  ;;  %v1079_v23 = vsel %vm1065_vm0, %v5336_v29, 0 }
 0x231   : > { %4042 = vmatpush3.bf16.xpose.msra.mxu0 %v1079_v23 }
 0x232   : > { %v959_v30 = vpop.f32.mrb[4].mxu0  ;;  %v4035_v31 = vpop.f32.mrb[0].mxu1 }
 0x233   : > { %v961_v32 = vpop.f32.mrb[5].mxu0  ;;  %v1022_v33 = vpop.f32.mrb[1].mxu1 }
 0x234   : > { %v963_v34 = vpop.f32.mrb[6].mxu0  ;;  %v4036_v35 = vpop.f32.mrb[2].mxu1 }
 0x235   : > { %v5344_v36 = vpack.c.bf16 %v963_v34, %v959_v30  ;;  %v5346_v37 = vpack.c.bf16 %v4036_v35, %v4035_v31  ;;  %v965_v1 = vpop.f32.mrb[7].mxu0  ;;  %v1025_v38 = vpop.f32.mrb[3].mxu1 }
 0x236   : > { %v5348_v40 = vpack.c.bf16 %v965_v1, %v961_v32  ;;  %v5350_v41 = vpack.c.bf16 %v1025_v38, %v1022_v33 }
 0x238   : > { %4194 = vmatprep.subr.msk.bf16.mxu0 %vm1065_vm0, %v5348_v40  ;;  %4057 = vmatprep.subr.bf16.mxu1 %v5350_v41  ;;  %v1082_v42 = vsel %vm1065_vm0, %v5348_v40, 0 }
 0x239   : > { %4044 = vmatpush3.bf16.xpose.msra.mxu0 %v1082_v42  ;;  %4058 = vmatpush3.bf16.msra.mxu1 %v5350_v41 }
 0x23a   : > { %v969_v43 = vpop.f32.mrb[8].mxu0  ;;  %4059 = vmatprep.subr.bf16.mxu1 %v5346_v37 }
 0x23b   : > { %v971_v44 = vpop.f32.mrb[9].mxu0 }
 0x23c   : > { %v973_v45 = vpop.f32.mrb[10].mxu0 }
 0x23d   : > { %v5359_v46 = vpack.c.bf16 %v973_v45, %v969_v43  ;;  %v975_v47 = vpop.f32.mrb[11].mxu0  ;;  %4060 = vmatpush3.bf16.msra.mxu1 %v5346_v37 }
 0x23e   : > { %v5362_v48 = vpack.c.bf16 %v975_v47, %v971_v44 }
 0x240   : > { %4195 = vmatprep.subr.msk.bf16.mxu0 %vm1065_vm0, %v5362_v48  ;;  %v1085_v49 = vsel %vm1065_vm0, %v5362_v48, 0 }
 0x241   : > { %4046 = vmatpush3.bf16.xpose.msra.mxu0 %v1085_v49 }
 0x242   : > { %v979_v50 = vpop.f32.mrb[12].mxu0  ;;  %v4039_v51 = vpop.f32.mrb[4].mxu1 }
 0x243   : > { %v981_v52 = vpop.f32.mrb[13].mxu0  ;;  %v1038_v53 = vpop.f32.mrb[5].mxu1 }
 0x244   : > { %v983_v54 = vpop.f32.mrb[14].mxu0  ;;  %v4040_v56 = vpop.f32.mrb[6].mxu1 }
 0x245   : > { %v5368_v5 = vpack.c.bf16 %v983_v54, %v979_v50  ;;  %v5370_v55 = vpack.c.bf16 %v4040_v56, %v4039_v51  ;;  %v985_v57 = vpop.f32.mrb[15].mxu0  ;;  %v1041_v58 = vpop.f32.mrb[7].mxu1 }
 0x246   : > { %v5372_v6 = vpack.c.bf16 %v985_v57, %v981_v52  ;;  %v5374_v59 = vpack.c.bf16 %v1041_v58, %v1038_v53 }
 0x248   : > { %4196 = vmatprep.subr.msk.bf16.mxu0 %vm1065_vm0, %v5372_v6  ;;  %4061 = vmatprep.subr.bf16.mxu1 %v5374_v59  ;;  %v1088_v60 = vsel %vm1065_vm0, %v5372_v6, 0 }
 0x249   : > { %4048 = vmatpush3.bf16.xpose.msra.mxu0 %v1088_v60  ;;  %4062 = vmatpush3.bf16.msra.mxu1 %v5374_v59 }
 0x24a   : > { %4063 = vmatprep.subr.bf16.mxu1 %v5370_v55 }
 0x24d   : > { %4064 = vmatpush3.bf16.msra.mxu1 %v5370_v55 }
 0x250   : > { %4050 = vmatmul.mubr.msk.bf16.vlgmr.msra.gmra.mrb[16].mxu0 %vm1065_vm0, %v5344_v36 }
 0x251   : > { %4053 = vmatprep.mubr.msk.bf16.mxu0 %vm1065_vm0, %v5359_v46 }
 0x258   : > { %4054 = vmatmul.mubr.msk.bf16.gmra.mrb[20].mxu0 %vm1065_vm0, %v5368_v5 }
 0x323   : > { %v4051_v61 = vpop.f32.mrb[16].mxu0 }
 0x324   : > { %v1124_v62 = vpop.f32.mrb[17].mxu0  ;;  %v1162_v7 = vsel %vm1155_vm1, %v4051_v61, -inf }
 0x325   : > { %v4052_v63 = vpop.f32.mrb[18].mxu0  ;;  %v1156_v2 = vsel %vm1155_vm1, %v1124_v62, -inf }
 0x326   : > { %1157 = vmax.xlane.f32.xlu0 %v1156_v2  ;;  %v1127_v3 = vpop.f32.mrb[19].mxu0  ;;  %v1165_v4 = vsel %vm1155_vm1, %v4052_v63, -inf }
 0x327   : > { %1166 = vmax.xlane.f32.xlu1 %v1165_v4  ;;  %v1159_v8 = vsel %vm1155_vm1, %v1127_v3, -inf }
 0x32a   : > { %1163 = vmax.xlane.f32.xlu0 %v1162_v7 }
 0x32b   : > { %1160 = vmax.xlane.f32.xlu1 %v1159_v8  ;;  %v4055_v12 = vpop.f32.mrb[20].mxu0 }
 0x32c   : > { %v1140_v9 = vpop.f32.mrb[21].mxu0  ;;  %v1174_v11 = vsel %vm1155_vm1, %v4055_v12, -inf }
 0x32d   : > { %v4056_v10 = vpop.f32.mrb[22].mxu0  ;;  %v1168_v13 = vsel %vm1155_vm1, %v1140_v9, -inf }
 0x32e   : > { %1169 = vmax.xlane.f32.xlu0 %v1168_v13  ;;  %v1143_v14 = vpop.f32.mrb[23].mxu0  ;;  %v1177_v15 = vsel %vm1155_vm1, %v4056_v10, -inf }
 0x32f   : > { %1178 = vmax.xlane.f32.xlu1 %v1177_v15  ;;  %v1171_v17 = vsel %vm1155_vm1, %v1143_v14, -inf }
 0x332   : > { %1175 = vmax.xlane.f32.xlu0 %v1174_v11 }
 0x333   : > { %1172 = vmax.xlane.f32.xlu1 %v1171_v17 }
 0x344   : > { %1343 = vrot.lane.b32.xlu1 %v5348_v40, %s4954_s28 }
 0x348   : > { %1345 = vrot.lane.b32.xlu1 %v5362_v48, %s4954_s28 }
 0x3b3   : > { %v1158_v18 = vpop.xlane.xlu0 %1157 }
 0x3b4   : > { %v1167_v19 = vpop.xlane.xlu1 %1166  ;;  %v1180_v22 = vsub.f32 %v1124_v62, %v1158_v18 }
 0x3b5   : > { %v1183_v21 = vsub.f32 %v4052_v63, %v1167_v19 }
 0x3b6   : > { %v1188_v20 = vmul.f32 1.442695, %v1180_v22 }
 0x3b7   : > { %v1194_v24 = vmul.f32 1.442695, %v1183_v21  ;;  %v1164_v0 = vpop.xlane.xlu0 %1163 }
 0x3b8   : > { %v1182_v16 = vsub.f32 %v4051_v61, %v1164_v0  ;;  %v1161_v25 = vpop.xlane.xlu1 %1160 }
 0x3b9   : > { %4506 = vpow2.f32 %v1194_v24  ;;  %v1181_v26 = vsub.f32 %v1127_v3, %v1161_v25 }
 0x3ba   : > { %v1192_v28 = vmul.f32 1.442695, %v1182_v16 }
 0x3bb   : > { %v1190_v23 = vmul.f32 1.442695, %v1181_v26  ;;  %v1170_v42 = vpop.xlane.xlu0 %1169 }
 0x3bc   : > { %4508 = vpow2.f32 %v1192_v28  ;;  %v1179_v43 = vpop.xlane.xlu1 %1178  ;;  %v1184_v52 = vsub.f32 %v1140_v9, %v1170_v42 }
 0x3bd   : > { %4510 = vpow2.f32 %v1190_v23  ;;  %v1187_v44 = vsub.f32 %v4056_v10, %v1179_v43 }
 0x3be   : > { %4512 = vpow2.f32 %v1188_v20  ;;  %v1196_v56 = vmul.f32 1.442695, %v1184_v52 }
 0x3bf   : > { %v1176_v45 = vpop.xlane.xlu0 %1175  ;;  %v1202_v50 = vmul.f32 1.442695, %v1187_v44 }
 0x3c0   : > { %v1173_v47 = vpop.xlane.xlu1 %1172  ;;  %v1186_v49 = vsub.f32 %v4055_v12, %v1176_v45 }
 0x3c1   : > { %v1185_v51 = vsub.f32 %v1143_v14, %v1173_v47  ;;  %4514 = vpow2.f32 %v1202_v50 }
 0x3c2   : > { %v1200_v53 = vmul.f32 1.442695, %v1186_v49 }
 0x3c3   : > { %v5402_v30 = vpop.eup %4506  ;;  %v1198_v54 = vmul.f32 1.442695, %v1185_v51 }
 0x3c4   : > { %v1213_v31 = vsel %vm1155_vm1, %v5402_v30, 0.0  ;;  %4516 = vpow2.f32 %v1200_v53  ;;  %v1344_v4 = vpop.permute.xlu1 %1343 }
 0x3c5   : > { %1214 = vadd.xlane.f32.xlu1 %v1213_v31  ;;  %4518 = vpow2.f32 %v1198_v54  ;;  %v1365_v20 = vsel %vm1065_vm0, %v1344_v4, 0 }
 0x3c6   : > { %v5406_v32 = vpop.eup %4508  ;;  %4520 = vpow2.f32 %v1196_v56 }
 0x3c7   : > { %v5408_v33 = vpop.eup %4510  ;;  %v1210_v34 = vsel %vm1155_vm1, %v5406_v32, 0.0 }
 0x3c8   : > { %v5412_v35 = vpop.eup %4512  ;;  %1211 = vadd.xlane.f32.xlu0 %v1210_v34  ;;  %v1207_v1 = vsel %vm1155_vm1, %v5408_v33, 0.0  ;;  %v1346_v7 = vpop.permute.xlu1 %1345 }
 0x3c9   : > { %1208 = vadd.xlane.f32.xlu1 %v1207_v1  ;;  %v1204_v38 = vsel %vm1155_vm1, %v5412_v35, 0.0  ;;  %v1368_v28 = vsel %vm1065_vm0, %v1346_v7, 0 }
 0x3cb   : > { %v5422_v57 = vpop.eup %4514 }
 0x3cc   : > { %1205 = vadd.xlane.f32.xlu0 %v1204_v38  ;;  %v1225_v60 = vsel %vm1155_vm1, %v5422_v57, 0.0 }
 0x3ce   : > { %v5424_v58 = vpop.eup %4516 }
 0x3cf   : > { %v5428_v61 = vpop.eup %4518  ;;  %v1222_v62 = vsel %vm1155_vm1, %v5424_v58, 0.0 }
 0x3d0   : > { %v5432_v63 = vpop.eup %4520  ;;  %v1219_v2 = vsel %vm1155_vm1, %v5428_v61, 0.0 }
 0x3d1   : > { %v1216_v3 = vsel %vm1155_vm1, %v5432_v63, 0.0 }
 0x3da   : > { %1631 = vrot.lane.b32.xlu1 %v5336_v29, %s4955_s3 }
 0x3e2   : > { %1341 = vrot.lane.b32.xlu0 %v5336_v29, %s4954_s28 }
 0x3fe   : > { %1226 = vadd.xlane.f32.xlu1 %v1225_v60 }
 0x401   : > { %1223 = vadd.xlane.f32.xlu0 %v1222_v62 }
 0x402   : > { %1220 = vadd.xlane.f32.xlu1 %v1219_v2 }
 0x405   : > { %1217 = vadd.xlane.f32.xlu0 %v1216_v3 }
 0x413   : > { %1633 = vrot.lane.b32.xlu1 %v5348_v40, %s4955_s3 }
 0x417   : > { %1331 = vrot.lane.b32.xlu1 %v5344_v36, %s4954_s28 }
 0x41b   : > { %1347 = vrot.lane.b32.xlu0 %v5372_v6, %s4954_s28  ;;  %1333 = vrot.lane.b32.xlu1 %v5359_v46, %s4954_s28 }
 0x41f   : > { %1329 = vrot.lane.b32.xlu0 %v5334_v27, %s4954_s28  ;;  %1637 = vrot.lane.b32.xlu1 %v5372_v6, %s4955_s3 }
 0x423   : > { %1635 = vrot.lane.b32.xlu0 %v5362_v48, %s4955_s3  ;;  %1625 = vrot.lane.b32.xlu1 %v5344_v36, %s4955_s3 }
 0x427   : > { %1335 = vrot.lane.b32.xlu0 %v5368_v5, %s4954_s28  ;;  %1629 = vrot.lane.b32.xlu1 %v5368_v5, %s4955_s3 }
 0x42b   : > { %1623 = vrot.lane.b32.xlu0 %v5334_v27, %s4955_s3 }
 0x42f   : > { %1627 = vrot.lane.b32.xlu0 %v5359_v46, %s4955_s3 }
 0x452   : > { %v1215_v8 = vpop.xlane.xlu1 %1214 }
 0x455   : > { %v1212_v12 = vpop.xlane.xlu0 %1211 }
 0x456   : > { %v1209_v9 = vpop.xlane.xlu1 %1208  ;;  %4522 = vrcp.f32 %v1212_v12 }
 0x457   : > { %4524 = vrcp.f32 %v1209_v9 }
 0x458   : > { %4526 = vrcp.f32 %v1215_v8 }
 0x459   : > { %v1206_v10 = vpop.xlane.xlu0 %1205 }
 0x45a   : > { %4528 = vrcp.f32 %v1206_v10  ;;  %v1632_v13 = vpop.permute.xlu1 %1631 }
 0x45b   : > { %4201 = vmatprep.subr.msk.bf16.mxu0 %vm1065_vm0, %v1632_v13  ;;  %v1652_v14 = vsel %vm1065_vm0, %v1632_v13, 0 }
 0x45c   : > { %4106 = vmatpush3.bf16.xpose.msra.mxu0 %v1652_v14 }
 0x45d   : > { %v1342_v15 = vpop.permute.xlu0 %1341 }
 0x45e   : > { %4197 = vmatprep.subr.msk.bf16.mxu1 %vm1065_vm0, %v1342_v15  ;;  %v1362_v26 = vsel %vm1065_vm0, %v1342_v15, 0 }
 0x460   : > { %v4523_v11 = vpop.eup %4522 }
 0x461   : > { %v4525_v17 = vpop.eup %4524  ;;  %v1238_v21 = vmul.f32 %v4523_v11, %v5406_v32 }
 0x462   : > { %v4527_v18 = vpop.eup %4526  ;;  %v1237_v24 = vmul.f32 %v4525_v17, %v5408_v33 }
 0x463   : > { %v1239_v0 = vmul.f32 %v4527_v18, %v5402_v30 }
 0x464   : > { %v4529_v19 = vpop.eup %4528 }
 0x465   : > { %v1236_v22 = vmul.f32 %v4529_v19, %v5412_v35  ;;  %v1245_v25 = vpack.c.bf16 %v1239_v0, %v1238_v21 }
 0x467   : > { %v1244_v16 = vpack.c.bf16 %v1237_v24, %v1236_v22 }
 0x469   : > { %4065 = vmatprep.mubr.msk.bf16.mxu1 %vm1155_vm1, %v1244_v16 }
 0x46a   : > { %4066 = vmatmul.mubr.msk.bf16.vlgmr.msra.gmra.mrb[8].mxu1 %vm1155_vm1, %v1245_v25 }
 0x46b   : > { %4074 = vmatpush3.bf16.xpose.msra.mxu1 %v1362_v26 }
 0x46c   : > { %4198 = vmatprep.subr.msk.bf16.mxu1 %vm1065_vm0, %v1344_v4 }
 0x473   : > { %4076 = vmatpush3.bf16.xpose.msra.mxu1 %v1365_v20 }
 0x474   : > { %4199 = vmatprep.subr.msk.bf16.mxu1 %vm1065_vm0, %v1346_v7 }
 0x47b   : > { %4078 = vmatpush3.bf16.xpose.msra.mxu1 %v1368_v28 }
 0x48b   : > { %v1227_v23 = vpop.xlane.xlu1 %1226 }
 0x48e   : > { %v1224_v30 = vpop.xlane.xlu0 %1223 }
 0x48f   : > { %v1221_v31 = vpop.xlane.xlu1 %1220  ;;  %4530 = vrcp.f32 %v1224_v30 }
 0x490   : > { %4532 = vrcp.f32 %v1221_v31 }
 0x491   : > { %4534 = vrcp.f32 %v1227_v23 }
 0x492   : > { %v1218_v32 = vpop.xlane.xlu0 %1217 }
 0x493   : > { %4536 = vrcp.f32 %v1218_v32  ;;  %v1634_v33 = vpop.permute.xlu1 %1633 }
 0x494   : > { %4202 = vmatprep.subr.msk.bf16.mxu0 %vm1065_vm0, %v1634_v33  ;;  %v1655_v34 = vsel %vm1065_vm0, %v1634_v33, 0 }
 0x495   : > { %4108 = vmatpush3.bf16.xpose.msra.mxu0 %v1655_v34 }
 0x496   : > { %v1348_v35 = vpop.permute.xlu0 %1347 }
 0x497   : > { %4200 = vmatprep.subr.msk.bf16.mxu1 %vm1065_vm0, %v1348_v35  ;;  %v1332_v1 = vpop.permute.xlu1 %1331  ;;  %v1371_v38 = vsel %vm1065_vm0, %v1348_v35, 0 }
 0x498   : > { %4080 = vmatpush3.bf16.xpose.msra.mxu1 %v1371_v38 }
 0x499   : > { %v4531_v42 = vpop.eup %4530 }
 0x49a   : > { %v1330_v43 = vpop.permute.xlu0 %1329  ;;  %v4533_v44 = vpop.eup %4532  ;;  %v1242_v50 = vmul.f32 %v4531_v42, %v5424_v58 }
 0x49b   : > { %v1334_v45 = vpop.permute.xlu1 %1333  ;;  %v4535_v47 = vpop.eup %4534  ;;  %v1241_v53 = vmul.f32 %v4533_v44, %v5428_v61 }
 0x49c   : > { %v1243_v60 = vmul.f32 %v4535_v47, %v5422_v57 }
 0x49d   : > { %v4537_v49 = vpop.eup %4536 }
 0x49e   : > { %v1636_v51 = vpop.permute.xlu0 %1635  ;;  %v1240_v52 = vmul.f32 %v4537_v49, %v5432_v63  ;;  %v1247_v2 = vpack.c.bf16 %v1243_v60, %v1242_v50 }
 0x49f   : > { %4203 = vmatprep.subr.msk.bf16.mxu0 %vm1065_vm0, %v1636_v51  ;;  %v1638_v54 = vpop.permute.xlu1 %1637  ;;  %v1658_v56 = vsel %vm1065_vm0, %v1636_v51, 0 }
 0x4a0   : > { %4110 = vmatpush3.bf16.xpose.msra.mxu0 %v1658_v56  ;;  %v1246_v62 = vpack.c.bf16 %v1241_v53, %v1240_v52  ;;  %v1661_v61 = vsel %vm1065_vm0, %v1638_v54, 0 }
 0x4a1   : > { %4204 = vmatprep.subr.msk.bf16.mxu0 %vm1065_vm0, %v1638_v54 }
 0x4a2   : > { %v1336_v3 = vpop.permute.xlu0 %1335  ;;  %4069 = vmatprep.mubr.msk.bf16.mxu1 %vm1155_vm1, %v1246_v62 }
 0x4a3   : > { %4070 = vmatmul.mubr.msk.bf16.gmra.mrb[12].mxu1 %vm1155_vm1, %v1247_v2  ;;  %v1626_v57 = vpop.permute.xlu1 %1625 }
 0x4a4   : > { %4081 = vmatprep.mubr.msk.bf16.mxu1 %vm1065_vm0, %v1330_v43 }
 0x4a6   : > { %v1624_v58 = vpop.permute.xlu0 %1623 }
 0x4a7   : > { %4113 = vmatprep.mubr.msk.bf16.mxu0 %vm1065_vm0, %v1624_v58  ;;  %v1630_v4 = vpop.permute.xlu1 %1629 }
 0x4a8   : > { %4112 = vmatpush3.bf16.xpose.msra.mxu0 %v1661_v61 }
 0x4aa   : > { %v1628_v63 = vpop.permute.xlu0 %1627 }
 0x4ab   : > { %4082 = vmatmul.mubr.msk.bf16.vlgmr.msra.gmra.mrb[16].mxu1 %vm1065_vm0, %v1332_v1 }
 0x4ac   : > { %4085 = vmatprep.mubr.msk.bf16.mxu1 %vm1065_vm0, %v1334_v45 }
 0x4af   : > { %4114 = vmatmul.mubr.msk.bf16.vlgmr.msra.gmra.mrb[24].mxu0 %vm1065_vm0, %v1626_v57 }
 0x4b0   : > { %4117 = vmatprep.mubr.msk.bf16.mxu0 %vm1065_vm0, %v1628_v63 }
 0x4b3   : > { %4086 = vmatmul.mubr.msk.bf16.gmra.mrb[20].mxu1 %vm1065_vm0, %v1336_v3 }
 0x4b7   : > { %4118 = vmatmul.mubr.msk.bf16.gmra.mrb[28].mxu0 %vm1065_vm0, %v1630_v4 }
 0x53d   : > { %v5498_v7 = vpop.f32.mrb[8].mxu1 }
 0x53e   : > { %v5500_v8 = vpop.f32.mrb[9].mxu1 }
 0x53f   : > { %v5502_v12 = vpop.f32.mrb[10].mxu1 }
 0x540   : > { %v5504_v9 = vpop.f32.mrb[11].mxu1 }
 0x576   : > { %v5506_v10 = vpop.f32.mrb[12].mxu1 }
 0x577   : > { %v5508_v13 = vpop.f32.mrb[13].mxu1 }
 0x578   : > { %v5510_v14 = vpop.f32.mrb[14].mxu1 }
 0x579   : > { %v5512_v15 = vpop.f32.mrb[15].mxu1 }
 0x57e   : > { %v5514_v11 = vpop.f32.mrb[16].mxu1 }
 0x57f   : > { %v5516_v17 = vpop.f32.mrb[17].mxu1  ;;  %v1444_v44 = vsel %vm1155_vm1, %v5514_v11, -inf }
 0x580   : > { %v5518_v18 = vpop.f32.mrb[18].mxu1  ;;  %v1438_v47 = vsel %vm1155_vm1, %v5516_v17, -inf }
 0x581   : > { %v5520_v19 = vpop.f32.mrb[19].mxu1  ;;  %v1447_v49 = vsel %vm1155_vm1, %v5518_v18, -inf }
 0x582   : > { %v4115_v21 = vpop.f32.mrb[24].mxu0  ;;  %v1441_v45 = vsel %vm1155_vm1, %v5520_v19, -inf }
 0x583   : > { %v1697_v22 = vpop.f32.mrb[25].mxu0  ;;  %v1734_v23 = vsel %vm1155_vm1, %v4115_v21, -inf }
 0x584   : > { %v4116_v24 = vpop.f32.mrb[26].mxu0  ;;  %v1728_v0 = vsel %vm1155_vm1, %v1697_v22, -inf }
 0x585   : > { %1729 = vmax.xlane.f32.xlu0 %v1728_v0  ;;  %v1700_v16 = vpop.f32.mrb[27].mxu0  ;;  %v1737_v32 = vsel %vm1155_vm1, %v4116_v24, -inf }
 0x586   : > { %v5523_v25 = vpop.f32.mrb[20].mxu1  ;;  %v1731_v26 = vsel %vm1155_vm1, %v1700_v16, -inf }
 0x587   : > { %v5526_v20 = vpop.f32.mrb[21].mxu1  ;;  %1732 = vmax.xlane.f32.xlu1 %v1731_v26  ;;  %v1456_v50 = vsel %vm1155_vm1, %v5523_v25, -inf }
 0x588   : > { %v5528_v28 = vpop.f32.mrb[22].mxu1  ;;  %v1450_v51 = vsel %vm1155_vm1, %v5526_v20, -inf }
 0x589   : > { %v5531_v30 = vpop.f32.mrb[23].mxu1  ;;  %1735 = vmax.xlane.f32.xlu0 %v1734_v23 }
 0x58a   : > { %v5533_v31 = vpop.f32.mrb[28].mxu0 }
 0x58b   : > { %1738 = vmax.xlane.f32.xlu1 %v1737_v32  ;;  %v5536_v33 = vpop.f32.mrb[29].mxu0  ;;  %v1746_v42 = vsel %vm1155_vm1, %v5533_v31, -inf }
 0x58c   : > { %v5538_v34 = vpop.f32.mrb[30].mxu0  ;;  %v1740_v35 = vsel %vm1155_vm1, %v5536_v33, -inf }
 0x58d   : > { %1741 = vmax.xlane.f32.xlu0 %v1740_v35  ;;  %v5542_v1 = vpop.f32.mrb[31].mxu0  ;;  %v1749_v43 = vsel %vm1155_vm1, %v5538_v34, -inf }
 0x58e   : > { %v1743_v38 = vsel %vm1155_vm1, %v5542_v1, -inf }
 0x58f   : > { %1744 = vmax.xlane.f32.xlu1 %v1743_v38 }
 0x591   : > { %1747 = vmax.xlane.f32.xlu0 %v1746_v42 }
 0x593   : > { %1750 = vmax.xlane.f32.xlu1 %v1749_v43 }
 0x5a4   : > { %1536 = vrot.lane.b32.xlu1 %v5346_v37, %s4954_s28 }
 0x5a7   : > { %1534 = vrot.lane.b32.xlu0 %v5350_v41, %s4954_s28 }
 0x5c6   : > { %1445 = vmax.xlane.f32.xlu0 %v1444_v44 }
 0x5c8   : > { %1442 = vmax.xlane.f32.xlu1 %v1441_v45 }
 0x5ca   : > { %1439 = vmax.xlane.f32.xlu0 %v1438_v47 }
 0x5ce   : > { %1448 = vmax.xlane.f32.xlu0 %v1447_v49 }
 0x5d2   : > { %1457 = vmax.xlane.f32.xlu0 %v1456_v50 }
 0x5d6   : > { %1451 = vmax.xlane.f32.xlu0 %v1450_v51 }
 0x5ec   : > { %1538 = vrot.lane.b32.xlu0 %v5374_v59, %s4954_s28 }
 0x612   : > { %v1730_v52 = vpop.xlane.xlu0 %1729 }
 0x613   : > { %v1752_v53 = vsub.f32 %v1697_v22, %v1730_v52 }
 0x614   : > { %v1733_v54 = vpop.xlane.xlu1 %1732 }
 0x615   : > { %v1760_v56 = vmul.f32 1.442695, %v1752_v53  ;;  %v1753_v60 = vsub.f32 %v1700_v16, %v1733_v54 }
 0x616   : > { %v1736_v62 = vpop.xlane.xlu0 %1735 }
 0x617   : > { %4538 = vpow2.f32 %v1760_v56  ;;  %v1762_v2 = vmul.f32 1.442695, %v1753_v60  ;;  %v1754_v3 = vsub.f32 %v4115_v21, %v1736_v62  ;;  %v1459_v56 = vsel %vm1155_vm1, %v5528_v28, -inf }
 0x618   : > { %v1739_v58 = vpop.xlane.xlu1 %1738 }
 0x619   : > { %4540 = vpow2.f32 %v1762_v2  ;;  %v1764_v61 = vmul.f32 1.442695, %v1754_v3  ;;  %v1755_v57 = vsub.f32 %v4116_v24, %v1739_v58  ;;  %v1453_v3 = vsel %vm1155_vm1, %v5531_v30, -inf }
 0x61a   : > { %v5568_v63 = vpop.xlane.xlu0 %1741 }
 0x61b   : > { %4542 = vpow2.f32 %v1764_v61  ;;  %v1766_v4 = vmul.f32 1.442695, %v1755_v57  ;;  %v1756_v0 = vsub.f32 %v5536_v33, %v5568_v63 }
 0x61c   : > { %v5572_v26 = vpop.xlane.xlu1 %1744 }
 0x61d   : > { %v1757_v22 = vsub.f32 %v5542_v1, %v5572_v26  ;;  %4544 = vpow2.f32 %v1766_v4 }
 0x61e   : > { %v5576_v16 = vpop.xlane.xlu0 %1747 }
 0x61f   : > { %v1758_v21 = vsub.f32 %v5533_v31, %v5576_v16 }
 0x620   : > { %v5580_v23 = vpop.xlane.xlu1 %1750 }
 0x621   : > { %v5582_v24 = vpop.eup %4538  ;;  %v1759_v32 = vsub.f32 %v5538_v34, %v5580_v23 }
 0x622   : > { %v1535_v35 = vpop.permute.xlu0 %1534  ;;  %v1776_v38 = vsel %vm1155_vm1, %v5582_v24, 0.0 }
 0x623   : > { %v5588_v42 = vpop.eup %4540  ;;  %4089 = vmatprep.subr.bf16.mxu1 %v1535_v35  ;;  %1777 = vadd.xlane.f32.xlu1 %v1776_v38  ;;  %v1774_v33 = vmul.f32 1.442695, %v1759_v32 }
 0x624   : > { %4090 = vmatpush3.bf16.msra.mxu1 %v1535_v35  ;;  %v1537_v43 = vpop.permute.xlu1 %1536  ;;  %v1779_v44 = vsel %vm1155_vm1, %v5588_v42, 0.0 }
 0x625   : > { %v5592_v45 = vpop.eup %4542  ;;  %1780 = vadd.xlane.f32.xlu0 %v1779_v44  ;;  %4091 = vmatprep.subr.bf16.mxu1 %v1537_v43 }
 0x626   : > { %v1782_v47 = vsel %vm1155_vm1, %v5592_v45, 0.0 }
 0x627   : > { %v5596_v49 = vpop.eup %4544 }
 0x628   : > { %4092 = vmatpush3.bf16.msra.mxu1 %v1537_v43  ;;  %v1785_v50 = vsel %vm1155_vm1, %v5596_v49, 0.0 }
 0x629   : > { %1783 = vadd.xlane.f32.xlu0 %v1782_v47 }
 0x62d   : > { %1786 = vadd.xlane.f32.xlu0 %v1785_v50 }
 0x634   : > { %1540 = vrot.lane.b32.xlu1 %v5370_v55, %s4954_s28 }
 0x653   : > { %v1446_v51 = vpop.xlane.xlu0 %1445 }
 0x654   : > { %v1464_v52 = vsub.f32 %v5514_v11, %v1446_v51 }
 0x655   : > { %v1443_v43 = vpop.xlane.xlu1 %1442 }
 0x656   : > { %v1474_v53 = vmul.f32 1.442695, %v1464_v52  ;;  %v1463_v44 = vsub.f32 %v5520_v19, %v1443_v43  ;;  %v1772_v19 = vmul.f32 1.442695, %v1758_v21 }
 0x657   : > { %v1440_v54 = vpop.xlane.xlu0 %1439 }
 0x658   : > { %4546 = vpow2.f32 %v1474_v53  ;;  %v1462_v60 = vsub.f32 %v5516_v17, %v1440_v54  ;;  %1460 = vmax.xlane.f32.xlu1 %v1459_v56  ;;  %v1472_v51 = vmul.f32 1.442695, %v1463_v44  ;;  %v1768_v56 = vmul.f32 1.442695, %v1756_v0 }
 0x65a   : > { %v1470_v62 = vmul.f32 1.442695, %v1462_v60 }
 0x65b   : > { %v1449_v2 = vpop.xlane.xlu0 %1448 }
 0x65c   : > { %4548 = vpow2.f32 %v1470_v62  ;;  %1454 = vmax.xlane.f32.xlu1 %v1453_v3  ;;  %v1465_v38 = vsub.f32 %v5518_v18, %v1449_v2 }
 0x65e   : > { %v1476_v47 = vmul.f32 1.442695, %v1465_v38 }
 0x65f   : > { %v1458_v58 = vpop.xlane.xlu0 %1457 }
 0x660   : > { %v1468_v50 = vsub.f32 %v5523_v25, %v1458_v58  ;;  %4550 = vpow2.f32 %v1476_v47 }
 0x661   : > { %4552 = vpow2.f32 %v1472_v51 }
 0x662   : > { %v5608_v61 = vpop.eup %4546  ;;  %v1482_v53 = vmul.f32 1.442695, %v1468_v50 }
 0x663   : > { %v1452_v11 = vpop.xlane.xlu0 %1451  ;;  %v1492_v57 = vsel %vm1155_vm1, %v5608_v61, 0.0 }
 0x664   : > { %1493 = vadd.xlane.f32.xlu0 %v1492_v57  ;;  %v1466_v52 = vsub.f32 %v5526_v20, %v1452_v11  ;;  %4554 = vpow2.f32 %v1482_v53 }
 0x666   : > { %v5612_v4 = vpop.eup %4548  ;;  %v1478_v54 = vmul.f32 1.442695, %v1466_v52 }
 0x667   : > { %v1539_v35 = vpop.permute.xlu0 %1538  ;;  %v1486_v17 = vsel %vm1155_vm1, %v5612_v4, 0.0 }
 0x668   : > { %1487 = vadd.xlane.f32.xlu0 %v1486_v17  ;;  %4093 = vmatprep.subr.bf16.mxu1 %v1539_v35  ;;  %4556 = vpow2.f32 %v1478_v54 }
 0x669   : > { %4094 = vmatpush3.bf16.msra.mxu1 %v1539_v35  ;;  %4558 = vpow2.f32 %v1768_v56 }
 0x66a   : > { %v5629_v18 = vpop.eup %4550  ;;  %4560 = vpow2.f32 %v1772_v19 }
 0x66b   : > { %v1495_v25 = vsel %vm1155_vm1, %v5629_v18, 0.0  ;;  %v5636_v20 = vpop.eup %4552  ;;  %4562 = vpow2.f32 %v1774_v33 }
 0x66c   : > { %v1489_v0 = vsel %vm1155_vm1, %v5636_v20, 0.0 }
 0x66d   : > { %1822 = vrot.lane.b32.xlu1 %v5346_v37, %s4955_s3 }
 0x66e   : > { %v5641_v63 = vpop.eup %4554 }
 0x66f   : > { %v1504_v16 = vsel %vm1155_vm1, %v5641_v63, 0.0 }
 0x671   : > { %1824 = vrot.lane.b32.xlu1 %v5374_v59, %s4955_s3 }
 0x672   : > { %v5645_v60 = vpop.eup %4556 }
 0x673   : > { %v1498_v31 = vsel %vm1155_vm1, %v5645_v60, 0.0  ;;  %v5651_v21 = vpop.eup %4558 }
 0x674   : > { %v1788_v34 = vsel %vm1155_vm1, %v5651_v21, 0.0  ;;  %v5655_v23 = vpop.eup %4560 }
 0x675   : > { %v1794_v32 = vsel %vm1155_vm1, %v5655_v23, 0.0  ;;  %v5659_v62 = vpop.eup %4562 }
 0x676   : > { %v1797_v2 = vsel %vm1155_vm1, %v5659_v62, 0.0 }
 0x67e   : > { %1820 = vrot.lane.b32.xlu0 %v5350_v41, %s4955_s3 }
 0x695   : > { %1496 = vadd.xlane.f32.xlu1 %v1495_v25 }
 0x699   : > { %1490 = vadd.xlane.f32.xlu1 %v1489_v0 }
 0x69d   : > { %1499 = vadd.xlane.f32.xlu0 %v1498_v31  ;;  %1505 = vadd.xlane.f32.xlu1 %v1504_v16  ;;  %v1770_v31 = vmul.f32 1.442695, %v1757_v22 }
 0x6a1   : > { %1789 = vadd.xlane.f32.xlu0 %v1788_v34 }
 0x6a5   : > { %1795 = vadd.xlane.f32.xlu0 %v1794_v32 }
 0x6a9   : > { %1798 = vadd.xlane.f32.xlu0 %v1797_v2 }
 0x6b0   : > { %v1778_v3 = vpop.xlane.xlu1 %1777 }
 0x6b1   : > { %4564 = vrcp.f32 %v1778_v3 }
 0x6b2   : > { %v1781_v58 = vpop.xlane.xlu0 %1780 }
 0x6b3   : > { %4566 = vrcp.f32 %v1781_v58 }
 0x6b4   : > { %v1541_v11 = vpop.permute.xlu1 %1540 }
 0x6b5   : > { %4095 = vmatprep.subr.bf16.mxu1 %v1541_v11 }
 0x6b6   : > { %v1784_v57 = vpop.xlane.xlu0 %1783  ;;  %4096 = vmatpush3.bf16.msra.mxu1 %v1541_v11 }
 0x6b7   : > { %4568 = vrcp.f32 %v1784_v57 }
 0x6ba   : > { %v1787_v35 = vpop.xlane.xlu0 %1786 }
 0x6bb   : > { %v4565_v17 = vpop.eup %4564  ;;  %4570 = vrcp.f32 %v1787_v35 }
 0x6bc   : > { %v5664_v43 = vmul.f32 %v4565_v17, %v5582_v24 }
 0x6bd   : > { %v4567_v38 = vpop.eup %4566 }
 0x6be   : > { %v5667_v44 = vmul.f32 %v4567_v38, %v5588_v42 }
 0x6bf   : > { %1917 = vrot.lane.b32.xlu0 %v5336_v29, %s4956_s18 }
 0x6c0   : > { %v1816_v47 = vpack.c.bf16 %v5667_v44, %v5664_v43 }
 0x6c1   : > { %v4569_v50 = vpop.eup %4568 }
 0x6c2   : > { %v5676_v52 = vmul.f32 %v4569_v50, %v5592_v45 }
 0x6c3   : > { %1909 = vrot.lane.b32.xlu0 %v5334_v27, %s4956_s18 }
 0x6c5   : > { %v4571_v51 = vpop.eup %4570 }
 0x6c6   : > { %v5679_v24 = vmul.f32 %v4571_v51, %v5596_v49 }
 0x6c7   : > { %1913 = vrot.lane.b32.xlu0 %v5359_v46, %s4956_s18 }
 0x6c8   : > { %v1817_v29 = vpack.c.bf16 %v5679_v24, %v5676_v52 }
 0x6e5   : > { %v1461_v42 = vpop.xlane.xlu1 %1460 }
 0x6e6   : > { %v1469_v53 = vsub.f32 %v5528_v28, %v1461_v42 }
 0x6e8   : > { %v1484_v54 = vmul.f32 1.442695, %v1469_v53 }
 0x6e9   : > { %v1455_v56 = vpop.xlane.xlu1 %1454 }
 0x6ea   : > { %4572 = vpow2.f32 %v1484_v54  ;;  %v1467_v27 = vsub.f32 %v5531_v30, %v1455_v56 }
 0x6ec   : > { %v1480_v19 = vmul.f32 1.442695, %v1467_v27 }
 0x6ed   : > { %v1823_v30 = vpop.permute.xlu1 %1822 }
 0x6ee   : > { %4574 = vpow2.f32 %v1480_v19 }
 0x6ef   : > { %4576 = vpow2.f32 %v1770_v31 }
 0x6f1   : > { %v1494_v45 = vpop.xlane.xlu0 %1493  ;;  %v1825_v16 = vpop.permute.xlu1 %1824 }
 0x6f4   : > { %v5687_v25 = vpop.eup %4572 }
 0x6f5   : > { %v1488_v49 = vpop.xlane.xlu0 %1487  ;;  %v1507_v46 = vsel %vm1155_vm1, %v5687_v25, 0.0 }
 0x6f6   : > { %1508 = vadd.xlane.f32.xlu1 %v1507_v46 }
 0x6f8   : > { %v5691_v33 = vpop.eup %4574 }
 0x6f9   : > { %v1821_v0 = vpop.permute.xlu0 %1820  ;;  %v1501_v28 = vsel %vm1155_vm1, %v5691_v33, 0.0  ;;  %v5700_v2 = vpop.eup %4576 }
 0x6fa   : > { %4121 = vmatprep.subr.bf16.mxu1 %v1821_v0  ;;  %1502 = vadd.xlane.f32.xlu1 %v1501_v28  ;;  %v1791_v58 = vsel %vm1155_vm1, %v5700_v2, 0.0 }
 0x70b   : > { %1826 = vrot.lane.b32.xlu1 %v5370_v55, %s4955_s3 }
 0x722   : > { %v1497_v34 = vpop.xlane.xlu1 %1496 }
 0x723   : > { %4578 = vrcp.f32 %v1497_v34 }
 0x724   : > { %4580 = vrcp.f32 %v1488_v49 }
 0x725   : > { %4582 = vrcp.f32 %v1494_v45 }
 0x726   : > { %v1491_v32 = vpop.xlane.xlu1 %1490 }
 0x727   : > { %4584 = vrcp.f32 %v1491_v32 }
 0x72d   : > { %v4579_v3 = vpop.eup %4578 }
 0x72e   : > { %v4581_v11 = vpop.eup %4580  ;;  %v1521_v1 = vmul.f32 %v4579_v3, %v5629_v18  ;;  %v1506_v18 = vpop.xlane.xlu1 %1505 }
 0x72f   : > { %1792 = vadd.xlane.f32.xlu1 %v1791_v58  ;;  %v4583_v57 = vpop.eup %4582  ;;  %v1518_v26 = vmul.f32 %v4581_v11, %v5612_v4 }
 0x730   : > { %v1520_v17 = vmul.f32 %v4583_v57, %v5608_v61  ;;  %v1500_v61 = vpop.xlane.xlu0 %1499 }
 0x731   : > { %v4585_v35 = vpop.eup %4584 }
 0x732   : > { %v1519_v22 = vmul.f32 %v4585_v35, %v5636_v20  ;;  %v1527_v50 = vpack.c.bf16 %v1521_v1, %v1520_v17 }
 0x734   : > { %v1526_v38 = vpack.c.bf16 %v1519_v22, %v1518_v26  ;;  %v1790_v4 = vpop.xlane.xlu0 %1789 }
 0x736   : > { %4097 = vmatprep.mubr.msk.bf16.mxu1 %vm1155_vm1, %v1526_v38 }
 0x737   : > { %4098 = vmatmul.mubr.msk.bf16.vlgmr.msra.gmra.mrb[24].mxu1 %vm1155_vm1, %v1527_v50 }
 0x738   : > { %4122 = vmatpush3.bf16.msra.mxu1 %v1821_v0  ;;  %v1796_v20 = vpop.xlane.xlu0 %1795 }
 0x739   : > { %4123 = vmatprep.subr.bf16.mxu1 %v1823_v30 }
 0x73c   : > { %4124 = vmatpush3.bf16.msra.mxu1 %v1823_v30 }
 0x73d   : > { %4125 = vmatprep.subr.bf16.mxu1 %v1825_v16 }
 0x740   : > { %4126 = vmatpush3.bf16.msra.mxu1 %v1825_v16  ;;  %1919 = vrot.lane.b32.xlu1 %v5348_v40, %s4956_s18  ;;  %v1799_v40 = vpop.xlane.xlu0 %1798 }
 0x744   : > { %1921 = vrot.lane.b32.xlu1 %v5362_v48, %s4956_s18 }
 0x748   : > { %1923 = vrot.lane.b32.xlu1 %v5372_v6, %s4956_s18  ;;  %v1918_v6 = vpop.permute.xlu0 %1917 }
 0x749   : > { %v1938_v0 = vsel %vm1065_vm0, %v1918_v6, 0 }
 0x74c   : > { %1911 = vrot.lane.b32.xlu1 %v5344_v36, %s4956_s18  ;;  %v1910_v3 = vpop.permute.xlu0 %1909 }
 0x750   : > { %1915 = vrot.lane.b32.xlu1 %v5368_v5, %s4956_s18 }
 0x783   : > { %v1509_v51 = vpop.xlane.xlu1 %1508 }
 0x784   : > { %4586 = vrcp.f32 %v1509_v51 }
 0x785   : > { %4588 = vrcp.f32 %v1500_v61 }
 0x786   : > { %4590 = vrcp.f32 %v1506_v18 }
 0x787   : > { %v1503_v42 = vpop.xlane.xlu1 %1502 }
 0x788   : > { %4592 = vrcp.f32 %v1503_v42 }
 0x789   : > { %4594 = vrcp.f32 %v1799_v40 }
 0x78a   : > { %4596 = vrcp.f32 %v1790_v4 }
 0x78b   : > { %v1827_v48 = vpop.permute.xlu1 %1826  ;;  %4598 = vrcp.f32 %v1796_v20 }
 0x78c   : > { %4127 = vmatprep.subr.bf16.mxu1 %v1827_v48 }
 0x78d   : > { %4128 = vmatpush3.bf16.msra.mxu1 %v1827_v48 }
 0x78e   : > { %4205 = vmatprep.subr.msk.bf16.mxu1 %vm1065_vm0, %v1918_v6  ;;  %v4587_v36 = vpop.eup %4586 }
 0x78f   : > { %v4589_v53 = vpop.eup %4588  ;;  %v1525_v56 = vmul.f32 %v4587_v36, %v5687_v25 }
 0x790   : > { %v4591_v5 = vpop.eup %4590  ;;  %v1522_v27 = vmul.f32 %v4589_v53, %v5645_v60 }
 0x791   : > { %v1524_v45 = vmul.f32 %v4591_v5, %v5641_v63 }
 0x792   : > { %v4593_v54 = vpop.eup %4592 }
 0x793   : > { %v1523_v19 = vmul.f32 %v4593_v54, %v5691_v33  ;;  %v1529_v46 = vpack.c.bf16 %v1525_v56, %v1524_v45  ;;  %v4595_v43 = vpop.eup %4594 }
 0x795   : > { %v1528_v49 = vpack.c.bf16 %v1523_v19, %v1522_v27 }
 0x797   : > { %4101 = vmatprep.mubr.msk.bf16.mxu1 %vm1155_vm1, %v1528_v49 }
 0x798   : > { %4102 = vmatmul.mubr.msk.bf16.gmra.mrb[28].mxu1 %vm1155_vm1, %v1529_v46 }
 0x799   : > { %4129 = vmatprep.mubr.msk.bf16.mxu1 %vm1155_vm1, %v1816_v47  ;;  %v4597_v47 = vpop.eup %4596 }
 0x79a   : > { %v4599_v52 = vpop.eup %4598  ;;  %v1812_v33 = vmul.f32 %v4597_v47, %v5651_v21 }
 0x79b   : > { %v1814_v31 = vmul.f32 %v4599_v52, %v5655_v23 }
 0x7a0   : > { %4130 = vmatmul.mubr.msk.bf16.vlgmr.msra.gmra.mrb[32].mxu1 %vm1155_vm1, %v1817_v29  ;;  %v1815_v29 = vmul.f32 %v4595_v43, %v5659_v62 }
 0x7a1   : > { %4138 = vmatpush3.bf16.xpose.msra.mxu1 %v1938_v0 }
 0x7a2   : > { %v1819_v32 = vpack.c.bf16 %v1815_v29, %v1814_v31 }
 0x7bc   : > { %v1793_v63 = vpop.xlane.xlu1 %1792 }
 0x7bd   : > { %4600 = vrcp.f32 %v1793_v63 }
 0x7c0   : > { %v1920_v60 = vpop.permute.xlu1 %1919 }
 0x7c1   : > { %v1941_v25 = vsel %vm1065_vm0, %v1920_v60, 0  ;;  %4206 = vmatprep.subr.msk.bf16.mxu1 %vm1065_vm0, %v1920_v60 }
 0x7c2   : > { %4140 = vmatpush3.bf16.xpose.msra.mxu1 %v1941_v25 }
 0x7c4   : > { %v1922_v44 = vpop.permute.xlu1 %1921 }
 0x7c5   : > { %4207 = vmatprep.subr.msk.bf16.mxu1 %vm1065_vm0, %v1922_v44  ;;  %v1944_v30 = vsel %vm1065_vm0, %v1922_v44, 0 }
 0x7c7   : > { %v4601_v24 = vpop.eup %4600 }
 0x7c8   : > { %v1813_v28 = vmul.f32 %v4601_v24, %v5700_v2  ;;  %v1924_v16 = vpop.permute.xlu1 %1923  ;;  %v1914_v2 = vpop.permute.xlu0 %1913 }
 0x7c9   : > { %v1947_v21 = vsel %vm1065_vm0, %v1924_v16, 0 }
 0x7ca   : > { %4142 = vmatpush3.bf16.xpose.msra.mxu1 %v1944_v30  ;;  %v1818_v34 = vpack.c.bf16 %v1813_v28, %v1812_v33 }
 0x7cb   : > { %4208 = vmatprep.subr.msk.bf16.mxu1 %vm1065_vm0, %v1924_v16 }
 0x7cc   : > { %4133 = vmatprep.mubr.msk.bf16.mxu1 %vm1155_vm1, %v1818_v34  ;;  %v1912_v62 = vpop.permute.xlu1 %1911 }
 0x7cd   : > { %4134 = vmatmul.mubr.msk.bf16.gmra.mrb[36].mxu1 %vm1155_vm1, %v1819_v32 }
 0x7ce   : > { %4145 = vmatprep.mubr.msk.bf16.mxu1 %vm1065_vm0, %v1910_v3 }
 0x7d0   : > { %v1916_v23 = vpop.permute.xlu1 %1915 }
 0x7d2   : > { %4144 = vmatpush3.bf16.xpose.msra.mxu1 %v1947_v21 }
 0x7d9   : > { %4146 = vmatmul.mubr.msk.bf16.vlgmr.msra.gmra.mrb[40].mxu1 %vm1065_vm0, %v1912_v62 }
 0x7da   : > { %4149 = vmatprep.mubr.msk.bf16.mxu1 %vm1065_vm0, %v1914_v2 }
 0x7e1   : > { %4150 = vmatmul.mubr.msk.bf16.gmra.mrb[44].mxu1 %vm1065_vm0, %v1916_v23 }
 0x7e2   : > { %2804 = vmatprep.mubr.bf16.mxu1 %v4953_v39 }
 0x80a   : > { %v5753_v58 = vpop.f32.mrb[24].mxu1 }
 0x80b   : > { %v5755_v11 = vpop.f32.mrb[25].mxu1 }
 0x80c   : > { %v5757_v57 = vpop.f32.mrb[26].mxu1 }
 0x80d   : > { %v4315_v35 = vpack.i.bf16 %v5757_v57, %v5753_v58  ;;  %v5761_v1 = vpop.f32.mrb[27].mxu1 }
 0x80e   : > { %v4310_v26 = vpack.i.bf16 %v5761_v1, %v5755_v11 }
 0x86b   : > { %v5765_v22 = vpop.f32.mrb[28].mxu1 }
 0x86c   : > { %v5767_v17 = vpop.f32.mrb[29].mxu1 }
 0x86d   : > { %v5769_v38 = vpop.f32.mrb[30].mxu1 }
 0x86e   : > { %v4345_v50 = vpack.i.bf16 %v5769_v38, %v5765_v22  ;;  %v5773_v61 = vpop.f32.mrb[31].mxu1 }
 0x86f   : > { %v4340_v4 = vpack.i.bf16 %v5773_v61, %v5767_v17 }
 0x873   : > { %v5777_v18 = vpop.f32.mrb[32].mxu1 }
 0x874   : > { %v5779_v20 = vpop.f32.mrb[33].mxu1 }
 0x875   : > { %v5781_v51 = vpop.f32.mrb[34].mxu1 }
 0x876   : > { %v4325_v40 = vpack.i.bf16 %v5781_v51, %v5777_v18  ;;  %v5785_v42 = vpop.f32.mrb[35].mxu1 }
 0x877   : > { %v4320_v48 = vpack.i.bf16 %v5785_v42, %v5779_v20 }
 0x8a0   : > { %v5789_v6 = vpop.f32.mrb[36].mxu1 }
 0x8a1   : > { %v5791_v36 = vpop.f32.mrb[37].mxu1 }
 0x8a2   : > { %v5793_v53 = vpop.f32.mrb[38].mxu1 }
 0x8a3   : > { %v4355_v5 = vpack.i.bf16 %v5793_v53, %v5789_v6  ;;  %v5797_v54 = vpop.f32.mrb[39].mxu1 }
 0x8a4   : > { %v4350_v56 = vpack.i.bf16 %v5797_v54, %v5791_v36 }
 0x8ac   : > { %v4147_v27 = vpop.f32.mrb[40].mxu1 }
 0x8ad   : > { %v1983_v19 = vpop.f32.mrb[41].mxu1  ;;  %v2020_v63 = vsel %vm1155_vm1, %v4147_v27, -inf }
 0x8ae   : > { %v4148_v45 = vpop.f32.mrb[42].mxu1  ;;  %v2014_v49 = vsel %vm1155_vm1, %v1983_v19, -inf }
 0x8af   : > { %2015 = vmax.xlane.f32.xlu0 %v2014_v49  ;;  %v1986_v46 = vpop.f32.mrb[43].mxu1  ;;  %v2023_v44 = vsel %vm1155_vm1, %v4148_v45, -inf }
 0x8b0   : > { %v2017_v0 = vsel %vm1155_vm1, %v1986_v46, -inf }
 0x8b1   : > { %2018 = vmax.xlane.f32.xlu1 %v2017_v0 }
 0x8b3   : > { %2021 = vmax.xlane.f32.xlu0 %v2020_v63 }
 0x8b4   : > { %v4151_v60 = vpop.f32.mrb[44].mxu1 }
 0x8b5   : > { %v1999_v25 = vpop.f32.mrb[45].mxu1  ;;  %v2032_v33 = vsel %vm1155_vm1, %v4151_v60, -inf }
 0x8b6   : > { %v4152_v43 = vpop.f32.mrb[46].mxu1  ;;  %v2026_v24 = vsel %vm1155_vm1, %v1999_v25, -inf }
 0x8b7   : > { %2024 = vmax.xlane.f32.xlu0 %v2023_v44  ;;  %v2002_v47 = vpop.f32.mrb[47].mxu1  ;;  %v2035_v29 = vsel %vm1155_vm1, %v4152_v43, -inf }
 0x8b8   : > { %v2029_v52 = vsel %vm1155_vm1, %v2002_v47, -inf }
 0x8b9   : > { %2030 = vmax.xlane.f32.xlu1 %v2029_v52 }
 0x8bb   : > { %2027 = vmax.xlane.f32.xlu0 %v2026_v24 }
 0x8bd   : > { %2036 = vmax.xlane.f32.xlu1 %v2035_v29 }
 0x8bf   : > { %2033 = vmax.xlane.f32.xlu0 %v2032_v33 }
 0x8d5   : > { %2106 = vrot.lane.b32.xlu0 %v5350_v41, %s4956_s18 }
 0x93c   : > { %v2016_v28 = vpop.xlane.xlu0 %2015 }
 0x93d   : > { %v2038_v30 = vsub.f32 %v1983_v19, %v2016_v28 }
 0x93e   : > { %v2019_v31 = vpop.xlane.xlu1 %2018 }
 0x93f   : > { %v2046_v32 = vmul.f32 1.442695, %v2038_v30  ;;  %v2039_v3 = vsub.f32 %v1986_v46, %v2019_v31 }
 0x940   : > { %v2022_v16 = vpop.xlane.xlu0 %2021 }
 0x941   : > { %v2040_v34 = vsub.f32 %v4147_v27, %v2022_v16  ;;  %v2048_v49 = vmul.f32 1.442695, %v2039_v3 }
 0x943   : > { %v2050_v21 = vmul.f32 1.442695, %v2040_v34 }
 0x944   : > { %v2025_v62 = vpop.xlane.xlu0 %2024 }
 0x945   : > { %4602 = vpow2.f32 %v2050_v21  ;;  %v2041_v2 = vsub.f32 %v4148_v45, %v2025_v62 }
 0x946   : > { %v2031_v23 = vpop.xlane.xlu1 %2030  ;;  %4604 = vpow2.f32 %v2046_v32 }
 0x947   : > { %v2052_v0 = vmul.f32 1.442695, %v2041_v2 }
 0x948   : > { %v2028_v63 = vpop.xlane.xlu0 %2027 }
 0x949   : > { %4606 = vpow2.f32 %v2052_v0  ;;  %v2042_v44 = vsub.f32 %v1999_v25, %v2028_v63  ;;  %v2043_v25 = vsub.f32 %v2002_v47, %v2031_v23 }
 0x94a   : > { %4608 = vpow2.f32 %v2048_v49  ;;  %v2037_v41 = vpop.xlane.xlu1 %2036 }
 0x94b   : > { %v2054_v27 = vmul.f32 1.442695, %v2042_v44  ;;  %v2045_v29 = vsub.f32 %v4152_v43, %v2037_v41  ;;  %v2056_v34 = vmul.f32 1.442695, %v2043_v25 }
 0x94c   : > { %v2034_v52 = vpop.xlane.xlu0 %2033 }
 0x94d   : > { %v2044_v19 = vsub.f32 %v4151_v60, %v2034_v52  ;;  %v2060_v31 = vmul.f32 1.442695, %v2045_v29 }
 0x94f   : > { %v5811_v24 = vpop.eup %4602  ;;  %v2058_v46 = vmul.f32 1.442695, %v2044_v19 }
 0x950   : > { %v2107_v33 = vpop.permute.xlu0 %2106  ;;  %v2068_v45 = vsel %vm1155_vm1, %v5811_v24, 0.0  ;;  %v4605_v28 = vpop.eup %4604 }
 0x951   : > { %4610 = vpow2.f32 %v2058_v46  ;;  %2069 = vadd.xlane.f32.xlu0 %v2068_v45  ;;  %4153 = vmatprep.subr.bf16.mxu0 %v2107_v33  ;;  %v2062_v60 = vsel %vm1155_vm1, %v4605_v28, 0.0 }
 0x952   : > { %4154 = vmatpush3.bf16.msra.mxu0 %v2107_v33  ;;  %4612 = vpow2.f32 %v2054_v27 }
 0x953   : > { %v5815_v30 = vpop.eup %4606  ;;  %4614 = vpow2.f32 %v2060_v31 }
 0x954   : > { %v2071_v43 = vsel %vm1155_vm1, %v5815_v30, 0.0  ;;  %v4609_v16 = vpop.eup %4608  ;;  %4616 = vpow2.f32 %v2056_v34  ;;  %v4403_v34 = vld [vmem:[#allocation7 + $0x8] sm:$0xff]  }
 0x955   : > { %2063 = vadd.xlane.f32.xlu0 %v2062_v60  ;;  %2072 = vadd.xlane.f32.xlu1 %v2071_v43  ;;  %v2065_v32 = vsel %vm1155_vm1, %v4609_v16, 0.0 }
 0x959   : > { %2066 = vadd.xlane.f32.xlu1 %v2065_v32  ;;  %v4405_v32 = vld [vmem:[#allocation7 + $0x18] sm:$0xff]  }
 0x95b   : > { %v5821_v3 = vpop.eup %4610 }
 0x95c   : > { %v2080_v47 = vsel %vm1155_vm1, %v5821_v3, 0.0  ;;  %v4613_v21 = vpop.eup %4612 }
 0x95d   : > { %2081 = vadd.xlane.f32.xlu1 %v2080_v47  ;;  %v2074_v62 = vsel %vm1155_vm1, %v4613_v21, 0.0  ;;  %v4615_v2 = vpop.eup %4614  ;;  %v4406_v47 = vld [vmem:[#allocation7 + $0x20] sm:$0xff]  }
 0x95e   : > { %v2083_v23 = vsel %vm1155_vm1, %v4615_v2, 0.0  ;;  %v4617_v49 = vpop.eup %4616 }
 0x95f   : > { %v2077_v0 = vsel %vm1155_vm1, %v4617_v49, 0.0 }
 0x961   : > { %2075 = vadd.xlane.f32.xlu1 %v2074_v62  ;;  %v4409_v62 = vld [vmem:[#allocation7 + $0x38] sm:$0xff]  }
 0x965   : > { %2084 = vadd.xlane.f32.xlu1 %v2083_v23 }
 0x969   : > { %2078 = vadd.xlane.f32.xlu1 %v2077_v0 }
 0x96b   : > { %2110 = vrot.lane.b32.xlu0 %v5374_v59, %s4956_s18 }
 0x96f   : > { %2112 = vrot.lane.b32.xlu0 %v5370_v55, %s4956_s18 }
 0x973   : > { %4311 = vrot.lane.b32.xlu0 %v4310_v26, %s4956_s18 }
 0x977   : > { %4321 = vrot.lane.b32.xlu0 %v4320_v48, %s4955_s3 }
 0x97a   : > { %2108 = vrot.lane.b32.xlu1 %v5346_v37, %s4956_s18 }
 0x97e   : > { %4316 = vrot.lane.b32.xlu1 %v4315_v35, %s4956_s18 }
 0x982   : > { %4326 = vrot.lane.b32.xlu1 %v4325_v40, %s4955_s3 }
 0x9de   : > { %v2070_v55 = vpop.xlane.xlu0 %2069 }
 0x9e2   : > { %v2064_v59 = vpop.xlane.xlu0 %2063  ;;  %v2073_v11 = vpop.xlane.xlu1 %2072 }
 0x9e3   : > { %4618 = vrcp.f32 %v2064_v59 }
 0x9e6   : > { %v2067_v1 = vpop.xlane.xlu1 %2066  ;;  %v2111_v35 = vpop.permute.xlu0 %2110 }
 0x9e7   : > { %4620 = vrcp.f32 %v2067_v1 }
 0x9e8   : > { %4622 = vrcp.f32 %v2073_v11 }
 0x9e9   : > { %4624 = vrcp.f32 %v2070_v55 }
 0x9ea   : > { %v2082_v26 = vpop.xlane.xlu1 %2081  ;;  %v2113_v52 = vpop.permute.xlu0 %2112 }
 0x9ed   : > { %v4619_v42 = vpop.eup %4618 }
 0x9ee   : > { %v2076_v20 = vpop.xlane.xlu1 %2075  ;;  %v2094_v63 = vmul.f32 %v4619_v42, %v4605_v28  ;;  %v4312_v17 = vpop.permute.xlu0 %4311 }
 0x9ef   : > { %4626 = vrcp.f32 %v2076_v20  ;;  %v4313_v61 = vunpack.i.l.bf16 %v4312_v17 }
 0x9f1   : > { %v4621_v37 = vpop.eup %4620  ;;  %v2291_v54 = vsel %vm1065_vm0, %v5500_v8, %v4313_v61 }
 0x9f2   : > { %v2085_v48 = vpop.xlane.xlu1 %2084  ;;  %v2095_v44 = vmul.f32 %v4621_v37, %v4609_v16  ;;  %v4623_v51 = vpop.eup %4622 }
 0x9f3   : > { %v4625_v40 = vpop.eup %4624  ;;  %v2097_v27 = vmul.f32 %v4623_v51, %v5815_v30  ;;  %v4402_v30 = vld [vmem:[#allocation7] sm:$0xff]  }
 0x9f4   : > { %v2102_v58 = vpack.c.bf16 %v2095_v44, %v2094_v63  ;;  %v2096_v46 = vmul.f32 %v4625_v40, %v5811_v24  ;;  %v4404_v24 = vld [vmem:[#allocation7 + $0x10] sm:$0xff]  }
 0x9f6   : > { %4161 = vmatprep.mubr.msk.bf16.mxu0 %vm1155_vm1, %v2102_v58  ;;  %v2079_v57 = vpop.xlane.xlu1 %2078  ;;  %v2103_v45 = vpack.c.bf16 %v2097_v27, %v2096_v46 }
 0x9f7   : > { %4628 = vrcp.f32 %v2079_v57 }
 0x9f8   : > { %4630 = vrcp.f32 %v2085_v48 }
 0x9f9   : > { %4632 = vrcp.f32 %v2082_v26  ;;  %v4627_v41 = vpop.eup %4626 }
 0x9fa   : > { %v2109_v18 = vpop.permute.xlu1 %2108  ;;  %v2098_v33 = vmul.f32 %v4627_v41, %v4613_v21  ;;  %v4407_v21 = vld [vmem:[#allocation7 + $0x28] sm:$0xff]  }
 0x9fb   : > { %4155 = vmatprep.subr.bf16.mxu0 %v2109_v18 }
 0x9fc   : > { %4156 = vmatpush3.bf16.msra.mxu0 %v2109_v18 }
 0x9fd   : > { %4157 = vmatprep.subr.bf16.mxu0 %v2111_v35 }
 0x9fe   : > { %v4317_v22 = vpop.permute.xlu1 %4316 }
 0x9ff   : > { %v4319_v48 = vunpack.i.h.bf16 %v4317_v22  ;;  %v4318_v63 = vunpack.i.l.bf16 %v4317_v22 }
 0xa00   : > { %4158 = vmatpush3.bf16.msra.mxu0 %v2111_v35 }
 0xa01   : > { %v4629_v19 = vpop.eup %4628  ;;  %4159 = vmatprep.subr.bf16.mxu0 %v2113_v52  ;;  %v2294_v58 = vsel %vm1065_vm0, %v5502_v12, %v4319_v48  ;;  %v2293_v57 = vsel %vm1065_vm0, %v5498_v7, %v4318_v63 }
 0xa02   : > { %v2099_v29 = vmul.f32 %v4629_v19, %v4617_v49  ;;  %v4631_v28 = vpop.eup %4630  ;;  %v4327_v38 = vpop.permute.xlu1 %4326 }
 0xa03   : > { %v4633_v31 = vpop.eup %4632  ;;  %v2101_v60 = vmul.f32 %v4631_v28, %v4615_v2  ;;  %v4329_v44 = vunpack.i.h.bf16 %v4327_v38  ;;  %v4328_v6 = vunpack.i.l.bf16 %v4327_v38  ;;  %v4714_v38 = vld [vmem:[%s5239_s26] sm:$0xff] }
 0xa04   : > { %4160 = vmatpush3.bf16.msra.mxu0 %v2113_v52  ;;  %v2104_v25 = vpack.c.bf16 %v2099_v29, %v2098_v33  ;;  %v2100_v43 = vmul.f32 %v4633_v31, %v5821_v3  ;;  %v4408_v3 = vld [vmem:[#allocation7 + $0x30] sm:$0xff]  }
 0xa05   : > { %4169 = vmatprep.subr.bf16.mxu0 %v4402_v30  ;;  %v2301_v40 = vsel %vm1155_vm1, %v2293_v57, %v4328_v6  ;;  %v2302_v41 = vsel %vm1155_vm1, %v2294_v58, %v4329_v44  ;;  %v4717_v57 = vld [vmem:[%s5239_s26 + $0x10] sm:$0xff] }
 0xa06   : > { %v2105_v16 = vpack.c.bf16 %v2101_v60, %v2100_v43 }
 0xa07   : > { %4162 = vmatmul.mubr.msk.bf16.vlgmr.msra.gmra.mrb[32].mxu0 %vm1155_vm1, %v2103_v45 }
 0xa08   : > { %4165 = vmatprep.mubr.msk.bf16.mxu0 %vm1155_vm1, %v2104_v25  ;;  %4170 = vmatpush3.bf16.msra.mxu0 %v4402_v30 }
 0xa09   : > { %4171 = vmatprep.subr.bf16.mxu0 %v4403_v34 }
 0xa0c   : > { %4172 = vmatpush3.bf16.msra.mxu0 %v4403_v34 }
 0xa0d   : > { %4173 = vmatprep.subr.bf16.mxu0 %v4404_v24 }
 0xa0f   : > { %4166 = vmatmul.mubr.msk.bf16.gmra.mrb[36].mxu0 %vm1155_vm1, %v2105_v16 }
 0xa10   : > { %4174 = vmatpush3.bf16.msra.mxu0 %v4404_v24 }
 0xa11   : > { %4175 = vmatprep.subr.bf16.mxu0 %v4405_v32 }
 0xa14   : > { %4176 = vmatpush3.bf16.msra.mxu0 %v4405_v32 }
 0xa15   : > { %4177 = vmatprep.subr.bf16.mxu0 %v4406_v47 }
 0xa18   : > { %4178 = vmatpush3.bf16.msra.mxu0 %v4406_v47 }
 0xa19   : > { %4179 = vmatprep.subr.bf16.mxu0 %v4407_v21 }
 0xa1c   : > { %4180 = vmatpush3.bf16.msra.mxu0 %v4407_v21 }
 0xa1d   : > { %4181 = vmatprep.subr.bf16.mxu0 %v4408_v3 }
 0xa20   : > { %4182 = vmatpush3.bf16.msra.mxu0 %v4408_v3 }
 0xa21   : > { %4183 = vmatprep.subr.bf16.mxu0 %v4409_v62 }
 0xa24   : > { %4184 = vmatpush3.bf16.msra.mxu0 %v4409_v62 }
 0xada   : > { %v4163_v2 = vpop.f32.mrb[32].mxu0 }
 0xadb   : > { %v2164_v23 = vpop.f32.mrb[33].mxu0 }
 0xadc   : > { %v4164_v49 = vpop.f32.mrb[34].mxu0 }
 0xadd   : > { %v4335_v0 = vpack.i.bf16 %v4164_v49, %v4163_v2  ;;  %v2167_v55 = vpop.f32.mrb[35].mxu0 }
 0xade   : > { %v4330_v59 = vpack.i.bf16 %v2167_v55, %v2164_v23 }
 0xadf   : > { %4336 = vrot.lane.b32.xlu1 %v4335_v0, %s4954_s28 }
 0xae0   : > { %4331 = vrot.lane.b32.xlu0 %v4330_v59, %s4954_s28 }
 0xae2   : > { %v4167_v11 = vpop.f32.mrb[36].mxu0 }
 0xae3   : > { %4346 = vrot.lane.b32.xlu1 %v4345_v50, %s4956_s18  ;;  %v2180_v1 = vpop.f32.mrb[37].mxu0  ;;  %v4314_v50 = vunpack.i.h.bf16 %v4312_v17  ;;  %v3766_v17 = vld [vmem:[%s6447_s5] ss:$0 sm:$0xff] }
 0xae4   : > { %4341 = vrot.lane.b32.xlu0 %v4340_v4, %s4956_s18  ;;  %v4168_v26 = vpop.f32.mrb[38].mxu0  ;;  %v4322_v4 = vpop.permute.xlu0 %4321  ;;  %s6368_s18 = scalar_lea.vmem [#allocation11], %s3702_s11  ;;  %s3848_s11 = sshll.u32 %s5046_s25, 10 }
 0xae5   : > { %v4365_v20 = vpack.i.bf16 %v4168_v26, %v4167_v11  ;;  %v2183_v42 = vpop.f32.mrb[39].mxu0  ;;  %v4324_v53 = vunpack.i.h.bf16 %v4322_v4  ;;  %v2292_v36 = vsel %vm1065_vm0, %v5504_v9, %v4314_v50  ;;  %v2326_v50 = vadd.f32 %v4714_v38, %v3766_v17  ;;  %v4443_v38 = vld [vmem:[#allocation8 + $0xa8] ss:$16 sps:$4 sm:$0xff]   ;;  %s3580_s13 = sshll.u32 %s6368_s18, 4  ;;  %s6393_s9 = scalar_lea.hbm %s6533_s14, %s3848_s11  ;;  %s6395_s13 = int_to_ptr.vmem [resolvable:$true] %s3580_s13 }
 0xae6   : > { %v4360_v37 = vpack.i.bf16 %v2183_v42, %v2180_v1  ;;  %s4864_s25 = scalar_lea.vmem %s6395_s13, 1024  ;;  %p4871_p12 = scmp.lt.s32.totalorder %s6395_s13, %s4869_s29 }
 0xae7   : > { %4356 = vrot.lane.b32.xlu1 %v4355_v5, %s4955_s3  ;;  %v4323_v5 = vunpack.i.l.bf16 %v4322_v4  ;;  %v2300_v8 = vsel %vm1155_vm1, %v2292_v36, %v4324_v53  ;;  %v4715_v4 = vld [vmem:[%s5239_s26 + $0x8] sm:$0xff]  ;;  %p4865_p3 = scmp.ne.s32.totalorder %s6395_s13, %s4864_s25 }
 0xae8   : > { %4351 = vrot.lane.b32.xlu0 %v4350_v56, %s4955_s3  ;;  %v2327_v48 = vadd.f32 %v4715_v4, %v3766_v17  ;;  %v4446_v4 = vld [vmem:[#allocation8 + $0xc0] ss:$16 sps:$4 sm:$0xff]   ;;  %s6525_s3 = sld [smem:[#allocation37_spill]] }
 0xae9   : > { %v2299_v19 = vsel %vm1155_vm1, %v2291_v54, %v4323_v5  ;;  %v4716_v5 = vld [vmem:[%s5239_s26 + $0x18] sm:$0xff]  ;;  %p4866_p5 = pnand %p4865_p3, %p5181_p10 }
 0xaea   : > { %v2329_v36 = vadd.f32 %v4716_v5, %v3766_v17  ;;  %v4455_v5 = vld [vmem:[#allocation8 + $0xe8] ss:$16 sps:$4 sm:$0xff]  }
 0xaeb   : > { %4366 = vrot.lane.b32.xlu1 %v4365_v20, %s4954_s28  ;;  %p4867_p7 = pneg %p4866_p5 }
 0xaec   : > { %4361 = vrot.lane.b32.xlu0 %v4360_v37, %s4954_s28 }
 0xb51   : > { %v4337_v56 = vpop.permute.xlu1 %4336 }
 0xb52   : > { %v4339_v35 = vunpack.i.h.bf16 %v4337_v56  ;;  %v4338_v18 = vunpack.i.l.bf16 %v4337_v56  ;;  %v4332_v51 = vpop.permute.xlu0 %4331 }
 0xb53   : > { %v4334_v52 = vunpack.i.h.bf16 %v4332_v51  ;;  %v4333_v9 = vunpack.i.l.bf16 %v4332_v51 }
 0xb54   : > { %v2310_v27 = vsel %vm2307_vm2, %v2301_v40, %v4338_v18  ;;  %v2311_v12 = vsel %vm2307_vm2, %v2302_v41, %v4339_v35  ;;  %v2328_v35 = vadd.f32 %v4717_v57, %v3766_v17  ;;  %v4718_v41 = vld [vmem:[%s5239_s26 + $0x28] sm:$0xff] }
 0xb55   : > { %v2317_v29 = vpack.c.bf16 %v2311_v12, %v2310_v27  ;;  %v4347_v46 = vpop.permute.xlu1 %4346  ;;  %v2308_v7 = vsel %vm2307_vm2, %v2299_v19, %v4333_v9  ;;  %v2309_v33 = vsel %vm2307_vm2, %v2300_v8, %v4334_v52  ;;  %v2331_v52 = vadd.f32 %v4718_v41, %v3766_v17 }
 0xb56   : > { %v4342_v45 = vpop.permute.xlu0 %4341  ;;  %v2316_v28 = vpack.c.bf16 %v2309_v33, %v2308_v7  ;;  %v4349_v25 = vunpack.i.h.bf16 %v4347_v46  ;;  %v4348_v31 = vunpack.i.l.bf16 %v4347_v46  ;;  %v4412_v33 = vld [vmem:[#allocation8 + $0x4] ss:$16 sps:$4 sm:$0xff]  }
 0xb57   : > { %v4344_v43 = vunpack.i.h.bf16 %v4342_v45  ;;  %v4343_v16 = vunpack.i.l.bf16 %v4342_v45  ;;  %v4415_v45 = vld [vmem:[#allocation8 + $0xc] ss:$16 sps:$4 sm:$0xff]   ;;  %2772 = vmatprep.subr.bf16.mxu1 %v4412_v33 }
 0xb58   : > { %4185 = vmatprep.mubr.bf16.mxu0 %v2316_v28  ;;  %v2298_v21 = vsel %vm1065_vm0, %v5510_v14, %v4349_v25  ;;  %v2297_v3 = vsel %vm1065_vm0, %v5506_v10, %v4348_v31  ;;  %v4410_v28 = vld [vmem:[#allocation8] ss:$16 sps:$4 sm:$0xff]   ;;  %v4413_v25 = vld [vmem:[#allocation8 + $0x8] ss:$16 sps:$4 sm:$0xff]   ;;  %2845 = vmatprep.subr.bf16.mxu0 %v4415_v45 }
 0xb59   : > { %v4357_v60 = vpop.permute.xlu1 %4356  ;;  %4186 = vmatmul.mubr.bf16.vlgmr.msra.gmra.mrb[40].mxu0 %v2317_v29  ;;  %v2296_v2 = vsel %vm1065_vm0, %v5512_v15, %v4344_v43  ;;  %v2295_v23 = vsel %vm1065_vm0, %v5508_v13, %v4343_v16  ;;  %v4719_v29 = vld [vmem:[%s5239_s26 + $0x20] sm:$0xff]  ;;  %v4720_v31 = vld [vmem:[%s5239_s26 + $0x38] sm:$0xff]  ;;  %2773 = vmatpush1.bf16.msra.mxu1 %v4410_v28 }
 0xb5a   : > { %v4352_v30 = vpop.permute.xlu0 %4351  ;;  %v4359_v34 = vunpack.i.h.bf16 %v4357_v60  ;;  %v4358_v24 = vunpack.i.l.bf16 %v4357_v60  ;;  %v2330_v46 = vadd.f32 %v4719_v29, %v3766_v17  ;;  %v2333_v60 = vadd.f32 %v4720_v31, %v3766_v17  ;;  %2846 = vmatpush1.bf16.msra.mxu0 %v4413_v25 }
 0xb5b   : > { %v4354_v32 = vunpack.i.h.bf16 %v4352_v30  ;;  %v4353_v47 = vunpack.i.l.bf16 %v4352_v30  ;;  %v4418_v30 = vld [vmem:[#allocation8 + $0x24] ss:$16 sps:$4 sm:$0xff]  }
 0xb5c   : > { %v2305_v59 = vsel %vm1155_vm1, %v2297_v3, %v4358_v24  ;;  %v2306_v11 = vsel %vm1155_vm1, %v2298_v21, %v4359_v34  ;;  %v4421_v34 = vld [vmem:[#allocation8 + $0x2c] ss:$16 sps:$4 sm:$0xff]   ;;  %v4416_v24 = vld [vmem:[#allocation8 + $0x20] ss:$16 sps:$4 sm:$0xff]   ;;  %2774 = vmatprep.subr.bf16.mxu1 %v4418_v30 }
 0xb5d   : > { %v4367_v62 = vpop.permute.xlu1 %4366  ;;  %v2303_v10 = vsel %vm1155_vm1, %v2295_v23, %v4353_v47  ;;  %v2304_v26 = vsel %vm1155_vm1, %v2296_v2, %v4354_v32  ;;  %v4419_v32 = vld [vmem:[#allocation8 + $0x28] ss:$16 sps:$4 sm:$0xff]   ;;  %2847 = vmatprep.subr.bf16.mxu0 %v4421_v34  ;;  %2775 = vmatpush1.bf16.msra.mxu1 %v4416_v24  ;;  %v4721_v21 = vld [vmem:[%s5239_s26 + $0x30] sm:$0xff]  ;;  %v4427_v23 = vld [vmem:[#allocation8 + $0x4c] ss:$16 sps:$4 sm:$0xff]   ;;  %s3567_s26 = scalar_lea.sflag [#allocation4], %s5233_s15 }
 0xb5e   : > { %v4369_v49 = vunpack.i.h.bf16 %v4367_v62  ;;  %v4368_v0 = vunpack.i.l.bf16 %v4367_v62  ;;  %v4362_v55 = vpop.permute.xlu0 %4361  ;;  %v2332_v3 = vadd.f32 %v4721_v21, %v3766_v17  ;;  %2848 = vmatpush1.bf16.msra.mxu0 %v4419_v32  ;;  %v4424_v2 = vld [vmem:[#allocation8 + $0x44] ss:$16 sps:$4 sm:$0xff]   ;;  %v4440_v17 = vld [vmem:[#allocation8 + $0xa0] ss:$16 sps:$4 sm:$0xff]  }
 0xb5f   : > { %v4364_v1 = vunpack.i.h.bf16 %v4362_v55  ;;  %v4363_v14 = vunpack.i.l.bf16 %v4362_v55  ;;  %2776 = vmatprep.subr.bf16.mxu1 %v4424_v2  ;;  %2849 = vmatprep.subr.bf16.mxu0 %v4427_v23 }
 0xb60   : > { %v2314_v15 = vsel %vm2307_vm2, %v2305_v59, %v4368_v0  ;;  %v2315_v20 = vsel %vm2307_vm2, %v2306_v11, %v4369_v49  ;;  %v4422_v49 = vld [vmem:[#allocation8 + $0x40] ss:$16 sps:$4 sm:$0xff]   ;;  %v4425_v0 = vld [vmem:[#allocation8 + $0x48] ss:$16 sps:$4 sm:$0xff]   ;;  %v4430_v11 = vld [vmem:[#allocation8 + $0x64] ss:$16 sps:$4 sm:$0xff]  }
 0xb61   : > { %v2312_v13 = vsel %vm2307_vm2, %v2303_v10, %v4363_v14  ;;  %v2313_v42 = vsel %vm2307_vm2, %v2304_v26, %v4364_v1  ;;  %v2319_v37 = vpack.c.bf16 %v2315_v20, %v2314_v15  ;;  %2777 = vmatpush1.bf16.msra.mxu1 %v4422_v49  ;;  %v4433_v1 = vld [vmem:[#allocation8 + $0x6c] ss:$16 sps:$4 sm:$0xff]   ;;  %v4428_v14 = vld [vmem:[#allocation8 + $0x60] ss:$16 sps:$4 sm:$0xff]   ;;  %v4431_v10 = vld [vmem:[#allocation8 + $0x68] ss:$16 sps:$4 sm:$0xff]  }
 0xb62   : > { %v2318_v22 = vpack.c.bf16 %v2313_v42, %v2312_v13  ;;  %2850 = vmatpush1.bf16.msra.mxu0 %v4425_v0  ;;  %2778 = vmatprep.subr.bf16.mxu1 %v4430_v11  ;;  %v4436_v15 = vld [vmem:[#allocation8 + $0x84] ss:$16 sps:$4 sm:$0xff]   ;;  %v4439_v20 = vld [vmem:[#allocation8 + $0x8c] ss:$16 sps:$4 sm:$0xff]   ;;  %v4434_v13 = vld [vmem:[#allocation8 + $0x80] ss:$16 sps:$4 sm:$0xff]  }
 0xb63   : > { %2851 = vmatprep.subr.bf16.mxu0 %v4433_v1  ;;  %v4437_v42 = vld [vmem:[#allocation8 + $0x88] ss:$16 sps:$4 sm:$0xff]  }
 0xb64   : > { %4189 = vmatprep.mubr.bf16.mxu0 %v2318_v22  ;;  %v4445_v22 = vld [vmem:[#allocation8 + $0xac] ss:$16 sps:$4 sm:$0xff]  }
 0xb65   : > { %4190 = vmatmul.mubr.bf16.gmra.mrb[44].mxu0 %v2319_v37  ;;  %2779 = vmatpush1.bf16.msra.mxu1 %v4428_v14  ;;  %v4442_v37 = vld [vmem:[#allocation8 + $0xa4] ss:$16 sps:$4 sm:$0xff]  }
 0xb66   : > { %2877 = vmatprep.mubr.bf16.mxu0 %v4953_v39  ;;  %2852 = vmatpush1.bf16.msra.mxu0 %v4431_v10 }
 0xb67   : > { %2780 = vmatprep.subr.bf16.mxu1 %v4436_v15  ;;  %2853 = vmatprep.subr.bf16.mxu0 %v4439_v20 }
 0xb69   : > { %2781 = vmatpush1.bf16.msra.mxu1 %v4434_v13  ;;  %v5969_v13 = vld [vmem:[%s6448_s6] ss:$0 sm:$0xff] }
 0xb6a   : > { %2854 = vmatpush1.bf16.msra.mxu0 %v4437_v42  ;;  %2782 = vmatprep.subr.bf16.mxu1 %v4442_v37 }
 0xb6b   : > { %2855 = vmatprep.subr.bf16.mxu0 %v4445_v22 }
 0xb6d   : > { %2783 = vmatpush1.bf16.msra.mxu1 %v4440_v17 }
 0xb6e   : > { %2856 = vmatpush1.bf16.msra.mxu0 %v4443_v38 }
 0xc2c   : > { %v4187_v61 = vpop.f32.mrb[40].mxu0 }
 0xc2d   : > { %v2416_v63 = vpop.f32.mrb[41].mxu0  ;;  %v5933_v19 = vadd.f32 %v4187_v61, %v2328_v35  ;;  %v4451_v61 = vld [vmem:[#allocation8 + $0xcc] ss:$16 sps:$4 sm:$0xff]  }
 0xc2e   : > { %v5915_v44 = vadd.f32 %v2416_v63, %v2326_v50  ;;  %v4188_v6 = vpop.f32.mrb[42].mxu0  ;;  %v4448_v50 = vld [vmem:[#allocation8 + $0xc4] ss:$16 sps:$4 sm:$0xff]   ;;  %2857 = vmatprep.subr.bf16.mxu0 %v4451_v61 }
 0xc2f   : > { %v2419_v53 = vpop.f32.mrb[43].mxu0  ;;  %v5924_v58 = vadd.f32 %v4188_v6, %v2329_v36  ;;  %6501 = vst [vmem:[#allocation21_spill] sm:$0xff] %v5933_v19  ;;  %v2481_v7 = vmul.f32 %v5933_v19, %v5933_v19  ;;  %2784 = vmatprep.subr.bf16.mxu1 %v4448_v50  ;;  %v4454_v63 = vld [vmem:[#allocation8 + $0xe4] ss:$16 sps:$4 sm:$0xff]   ;;  %v4457_v6 = vld [vmem:[#allocation8 + $0xec] ss:$16 sps:$4 sm:$0xff]  }
 0xc30   : > { %6498 = vst [vmem:[#allocation18_spill] sm:$0xff] %v5915_v44  ;;  %v5918_v54 = vadd.f32 %v2419_v53, %v2327_v48  ;;  %2455 = vadd.xlane.f32.xlu0 %v5915_v44  ;;  %v2479_v56 = vmul.f32 %v5915_v44, %v5915_v44  ;;  %v4449_v48 = vld [vmem:[#allocation8 + $0xc8] ss:$16 sps:$4 sm:$0xff]   ;;  %2785 = vmatpush1.bf16.msra.mxu1 %v4446_v4  ;;  %v4452_v53 = vld [vmem:[#allocation8 + $0xe0] ss:$16 sps:$4 sm:$0xff]  }
 0xc31   : > { %6500 = vst [vmem:[#allocation20_spill] sm:$0xff] %v5924_v58  ;;  %v2482_v40 = vmul.f32 %v5924_v58, %v5924_v58  ;;  %2858 = vmatpush1.bf16.msra.mxu0 %v4449_v48  ;;  %2786 = vmatprep.subr.bf16.mxu1 %v4454_v63 }
 0xc32   : > { %6499 = vst [vmem:[#allocation19_spill] sm:$0xff] %v5918_v54  ;;  %2457 = vadd.xlane.f32.xlu1 %v5918_v54  ;;  %v2480_v18 = vmul.f32 %v5918_v54, %v5918_v54  ;;  %2859 = vmatprep.subr.bf16.mxu0 %v4457_v6 }
 0xc34   : > { %2487 = vadd.xlane.f32.xlu0 %v2479_v56  ;;  %2787 = vmatpush1.bf16.msra.mxu1 %v4452_v53 }
 0xc35   : > { %2860 = vmatpush1.bf16.msra.mxu0 %v4455_v5 }
 0xc36   : > { %2461 = vadd.xlane.f32.xlu1 %v5924_v58 }
 0xc38   : > { %2489 = vadd.xlane.f32.xlu0 %v2480_v18  ;;  %v4191_v51 = vpop.f32.mrb[44].mxu0 }
 0xc39   : > { %v2432_v9 = vpop.f32.mrb[45].mxu0  ;;  %v5956_v59 = vadd.f32 %v4191_v51, %v2332_v3 }
 0xc3a   : > { %2493 = vadd.xlane.f32.xlu1 %v2482_v40  ;;  %v4192_v8 = vpop.f32.mrb[46].mxu0  ;;  %v5945_v16 = vadd.f32 %v2432_v9, %v2330_v46 }
 0xc3b   : > { %v2435_v27 = vpop.f32.mrb[47].mxu0  ;;  %v5947_v47 = vadd.f32 %v4192_v8, %v2333_v60  ;;  %6505 = vst [vmem:[#allocation25_spill] sm:$0xff] %v5956_v59  ;;  %v2485_v26 = vmul.f32 %v5956_v59, %v5956_v59 }
 0xc3c   : > { %v5935_v12 = vadd.f32 %v2435_v27, %v2331_v52  ;;  %2459 = vadd.xlane.f32.xlu0 %v5933_v19  ;;  %6503 = vst [vmem:[#allocation23_spill] sm:$0xff] %v5945_v16  ;;  %v2483_v62 = vmul.f32 %v5945_v16, %v5945_v16 }
 0xc3d   : > { %6504 = vst [vmem:[#allocation24_spill] sm:$0xff] %v5947_v47  ;;  %v2486_v55 = vmul.f32 %v5947_v47, %v5947_v47 }
 0xc3e   : > { %6502 = vst [vmem:[#allocation22_spill] sm:$0xff] %v5935_v12  ;;  %2465 = vadd.xlane.f32.xlu1 %v5935_v12  ;;  %v2484_v43 = vmul.f32 %v5935_v12, %v5935_v12 }
 0xc40   : > { %2491 = vadd.xlane.f32.xlu0 %v2481_v7 }
 0xc42   : > { %2497 = vadd.xlane.f32.xlu1 %v2484_v43 }
 0xc44   : > { %2463 = vadd.xlane.f32.xlu0 %v5945_v16 }
 0xc46   : > { %2469 = vadd.xlane.f32.xlu1 %v5947_v47 }
 0xc48   : > { %2495 = vadd.xlane.f32.xlu0 %v2483_v62 }
 0xc4a   : > { %2501 = vadd.xlane.f32.xlu1 %v2486_v55 }
 0xc4c   : > { %2467 = vadd.xlane.f32.xlu0 %v5956_v59 }
 0xc50   : > { %2499 = vadd.xlane.f32.xlu0 %v2485_v26 }
 0xcbd   : > { %v2456_v36 = vpop.xlane.xlu0 %2455 }
 0xcbe   : > { %v2471_v56 = vmul.f32 0.0078125, %v2456_v36  ;;  %v3776_v36 = vld [vmem:[%s6449_s7] ss:$0 sm:$0xff] }
 0xcbf   : > { %v2458_v57 = vpop.xlane.xlu1 %2457 }
 0xcc0   : > { %v2511_v18 = vmul.f32 %v2471_v56, %v2471_v56  ;;  %v2472_v51 = vmul.f32 0.0078125, %v2458_v57  ;;  %v2527_v0 = vsub.f32 %v5915_v44, %v2471_v56 }
 0xcc1   : > { %v2488_v35 = vpop.xlane.xlu0 %2487 }
 0xcc2   : > { %v2503_v40 = vmul.f32 0.0078125, %v2488_v35  ;;  %v2512_v27 = vmul.f32 %v2472_v51, %v2472_v51  ;;  %v2528_v42 = vsub.f32 %v5918_v54, %v2472_v51 }
 0xcc3   : > { %v2462_v41 = vpop.xlane.xlu1 %2461 }
 0xcc4   : > { %v2519_v52 = vsub.f32 %v2503_v40, %v2511_v18  ;;  %v2474_v9 = vmul.f32 0.0078125, %v2462_v41 }
 0xcc5   : > { %v2490_v8 = vpop.xlane.xlu0 %2489 }
 0xcc6   : > { %v2535_v29 = vadd.f32 1e-05, %v2519_v52  ;;  %v2504_v46 = vmul.f32 0.0078125, %v2490_v8  ;;  %v2514_v33 = vmul.f32 %v2474_v9, %v2474_v9  ;;  %v2530_v56 = vsub.f32 %v5924_v58, %v2474_v9 }
 0xcc7   : > { %v2494_v7 = vpop.xlane.xlu1 %2493 }
 0xcc8   : > { %4634 = vrsqrt.f32 %v2535_v29  ;;  %v2520_v45 = vsub.f32 %v2504_v46, %v2512_v27  ;;  %v2506_v28 = vmul.f32 0.0078125, %v2494_v7 }
 0xcc9   : > { %v2460_v25 = vpop.xlane.xlu0 %2459 }
 0xcca   : > { %v2536_v31 = vadd.f32 1e-05, %v2520_v45  ;;  %v2522_v60 = vsub.f32 %v2506_v28, %v2514_v33  ;;  %v2473_v43 = vmul.f32 0.0078125, %v2460_v25 }
 0xccb   : > { %v2466_v30 = vpop.xlane.xlu1 %2465 }
 0xccc   : > { %4636 = vrsqrt.f32 %v2536_v31  ;;  %v2538_v34 = vadd.f32 1e-05, %v2522_v60  ;;  %v5961_v24 = vmul.f32 0.0078125, %v2466_v30  ;;  %v2513_v21 = vmul.f32 %v2473_v43, %v2473_v43 }
 0xccd   : > { %v2492_v32 = vpop.xlane.xlu0 %2491  ;;  %v2529_v29 = vsub.f32 %v5933_v19, %v2473_v43 }
 0xcce   : > { %4638 = vrsqrt.f32 %v2538_v34  ;;  %v2505_v3 = vmul.f32 0.0078125, %v2492_v32  ;;  %v2516_v2 = vmul.f32 %v5961_v24, %v5961_v24  ;;  %v2532_v43 = vsub.f32 %v5935_v12, %v5961_v24 }
 0xccf   : > { %v2498_v62 = vpop.xlane.xlu1 %2497 }
 0xcd0   : > { %v2521_v23 = vsub.f32 %v2505_v3, %v2513_v21  ;;  %v2508_v49 = vmul.f32 0.0078125, %v2498_v62 }
 0xcd1   : > { %v2464_v55 = vpop.xlane.xlu0 %2463 }
 0xcd2   : > { %v4635_v11 = vpop.eup %4634  ;;  %v2537_v1 = vadd.f32 1e-05, %v2521_v23  ;;  %v2524_v14 = vsub.f32 %v2508_v49, %v2516_v2  ;;  %v2475_v10 = vmul.f32 0.0078125, %v2464_v55 }
 0xcd3   : > { %v2551_v26 = vmul.f32 %v4635_v11, %v2527_v0  ;;  %v2470_v15 = vpop.xlane.xlu1 %2469 }
 0xcd4   : > { %4640 = vrsqrt.f32 %v2537_v1  ;;  %v2540_v20 = vadd.f32 1e-05, %v2524_v14  ;;  %v2478_v37 = vmul.f32 0.0078125, %v2470_v15  ;;  %v2515_v38 = vmul.f32 %v2475_v10, %v2475_v10 }
 0xcd5   : > { %v2496_v22 = vpop.xlane.xlu0 %2495  ;;  %v2565_v48 = vmul.f32 %v5969_v13, %v2551_v26  ;;  %v2531_v62 = vsub.f32 %v5945_v16, %v2475_v10 }
 0xcd6   : > { %v4637_v17 = vpop.eup %4636  ;;  %4642 = vrsqrt.f32 %v2540_v20  ;;  %v2507_v50 = vmul.f32 0.0078125, %v2496_v22  ;;  %v2518_v6 = vmul.f32 %v2478_v37, %v2478_v37  ;;  %v2534_v24 = vsub.f32 %v5947_v47, %v2478_v37 }
 0xcd7   : > { %v2552_v61 = vmul.f32 %v4637_v17, %v2528_v42  ;;  %v2502_v4 = vpop.xlane.xlu1 %2501  ;;  %v2579_v41 = vadd.f32 %v3776_v36, %v2565_v48  ;;  %v4460_v48 = vld [vmem:[#allocation10] sm:$0xff]  }
 0xcd8   : > { %v4639_v63 = vpop.eup %4638  ;;  %v2523_v53 = vsub.f32 %v2507_v50, %v2515_v38  ;;  %v2510_v5 = vmul.f32 0.0078125, %v2502_v4  ;;  %v4459_v4 = vld [vmem:[#allocation10 + $0xc0] sm:$0xff]  }
 0xcd9   : > { %v2468_v57 = vpop.xlane.xlu0 %2467  ;;  %v2566_v35 = vmul.f32 %v5969_v13, %v2552_v61  ;;  %v2554_v8 = vmul.f32 %v4639_v63, %v2530_v56  ;;  %v4458_v61 = vld [vmem:[#allocation10 + $0x40] sm:$0xff]   ;;  %3977 = vmatprep.subr.bf16.mxu0 %v4459_v4  ;;  %v4465_v56 = vld [vmem:[#allocation10 + $0x88] sm:$0xff]  }
 0xcda   : > { %v2539_v18 = vadd.f32 1e-05, %v2523_v53  ;;  %v2526_v51 = vsub.f32 %v2510_v5, %v2518_v6  ;;  %v2477_v40 = vmul.f32 0.0078125, %v2468_v57  ;;  %3937 = vmatprep.subr.bf16.mxu1 %v4458_v61  ;;  %v4461_v63 = vld [vmem:[#allocation10 + $0x80] sm:$0xff]   ;;  %v4462_v6 = vld [vmem:[#allocation10 + $0x48] sm:$0xff]   ;;  %v4469_v57 = vld [vmem:[#allocation10 + $0x90] sm:$0xff]  }
 0xcdb   : > { %v2580_v52 = vadd.f32 %v3776_v36, %v2566_v35  ;;  %v2568_v25 = vmul.f32 %v5969_v13, %v2554_v8  ;;  %v4463_v53 = vld [vmem:[#allocation10 + $0xc8] sm:$0xff]   ;;  %v4470_v35 = vld [vmem:[#allocation10 + $0x58] sm:$0xff]   ;;  %v4476_v8 = vld [vmem:[#allocation10 + $0x20] sm:$0xff]  }
 0xcdc   : > { %4644 = vrsqrt.f32 %v2539_v18  ;;  %v2542_v27 = vadd.f32 1e-05, %v2526_v51  ;;  %v2517_v45 = vmul.f32 %v2477_v40, %v2477_v40  ;;  %v2533_v10 = vsub.f32 %v5956_v59, %v2477_v40  ;;  %v4464_v5 = vld [vmem:[#allocation10 + $0x8] sm:$0xff]   ;;  %v4471_v18 = vld [vmem:[#allocation10 + $0xd8] sm:$0xff]  }
 0xcdd   : > { %v2500_v46 = vpop.xlane.xlu0 %2499  ;;  %v2587_v7 = vpack.c.bf16 %v2580_v52, %v2579_v41  ;;  %v2582_v21 = vadd.f32 %v3776_v36, %v2568_v25  ;;  %v4472_v51 = vld [vmem:[#allocation10 + $0x18] sm:$0xff]   ;;  %v4474_v41 = vld [vmem:[#allocation10 + $0x60] sm:$0xff]   ;;  %v4485_v25 = vld [vmem:[#allocation10 + $0xb0] sm:$0xff]  }
 0xcde   : > { %v4641_v33 = vpop.eup %4640  ;;  %4646 = vrsqrt.f32 %v2542_v27  ;;  %v2509_v28 = vmul.f32 0.0078125, %v2500_v46  ;;  %v4473_v40 = vld [vmem:[#allocation10 + $0x98] sm:$0xff]   ;;  %v4475_v52 = vld [vmem:[#allocation10 + $0xe0] sm:$0xff]   ;;  %v4479_v46 = vld [vmem:[#allocation10 + $0xe8] sm:$0xff]  }
 0xcdf   : > { %2805 = vmatmul.mubr.bf16.vlgmr.msra.gmra.mrb[48].mxu1 %v2587_v7  ;;  %2878 = vmatmul.mubr.bf16.vlgmr.msra.gmra.mrb[48].mxu0 %v2587_v7  ;;  %v2553_v9 = vmul.f32 %v4641_v33, %v2529_v29  ;;  %v4477_v27 = vld [vmem:[#allocation10 + $0xa0] sm:$0xff]   ;;  %v4478_v29 = vld [vmem:[#allocation10 + $0x68] sm:$0xff]  }
 0xce0   : > { %v4643_v31 = vpop.eup %4642  ;;  %v2525_v60 = vsub.f32 %v2509_v28, %v2517_v45  ;;  %2814 = vmatprep.mubr.bf16.mxu1 %v4953_v39  ;;  %2887 = vmatprep.mubr.bf16.mxu0 %v4953_v39  ;;  %v4480_v7 = vld [vmem:[#allocation10 + $0x28] sm:$0xff]   ;;  %v4482_v45 = vld [vmem:[#allocation10 + $0x70] sm:$0xff]  }
 0xce1   : > { %v2567_v30 = vmul.f32 %v5969_v13, %v2553_v9  ;;  %v2556_v3 = vmul.f32 %v4643_v31, %v2532_v43  ;;  %3938 = vmatpush3.bf16.msra.mxu1 %v4460_v48  ;;  %3978 = vmatpush3.bf16.msra.mxu0 %v4461_v63  ;;  %v4481_v33 = vld [vmem:[#allocation10 + $0xa8] sm:$0xff]   ;;  %v4483_v28 = vld [vmem:[#allocation10 + $0xf0] sm:$0xff]   ;;  %v4486_v31 = vld [vmem:[#allocation10 + $0x78] sm:$0xff]  }
 0xce2   : > { %v2541_v34 = vadd.f32 1e-05, %v2525_v60  ;;  %3939 = vmatprep.subr.bf16.mxu1 %v4462_v6  ;;  %3979 = vmatprep.subr.bf16.mxu0 %v4463_v53  ;;  %v4484_v9 = vld [vmem:[#allocation10 + $0x30] sm:$0xff]   ;;  %v4487_v60 = vld [vmem:[#allocation10 + $0xf8] sm:$0xff]  }
 0xce3   : > { %v2581_v32 = vadd.f32 %v3776_v36, %v2567_v30  ;;  %v2570_v0 = vmul.f32 %v5969_v13, %v2556_v3  ;;  %v4488_v43 = vld [vmem:[#allocation10 + $0x38] sm:$0xff]  }
 0xce4   : > { %4648 = vrsqrt.f32 %v2541_v34  ;;  %v4489_v30 = vld [vmem:[#allocation10 + $0xb8] sm:$0xff]   ;;  %v2592_v34 = vlaneseq }
 0xce5   : > { %v2588_v2 = vpack.c.bf16 %v2582_v21, %v2581_v32  ;;  %v2584_v14 = vadd.f32 %v3776_v36, %v2570_v0  ;;  %3940 = vmatpush3.bf16.msra.mxu1 %v4464_v5  ;;  %3980 = vmatpush3.bf16.msra.mxu0 %v4465_v56 }
 0xce6   : > { %v4645_v23 = vpop.eup %4644  ;;  %v2593_v32 = vshrl.u32 %v2592_v34, 7 }
 0xce7   : > { %2815 = vmatmul.mubr.bf16.gmra.mrb[52].mxu1 %v2588_v2  ;;  %2888 = vmatmul.mubr.bf16.gmra.mrb[52].mxu0 %v2588_v2  ;;  %v2555_v49 = vmul.f32 %v4645_v23, %v2531_v62  ;;  %v504_v62 = vld [vmem:[%s6506_s17] sm:$0xf]  ;;  %s4870_s17 = scalar_lea.vmem %s4869_s29, 2048 }
 0xce8   : > { %v4647_v55 = vpop.eup %4646  ;;  %2824 = vmatprep.mubr.bf16.mxu1 %v4953_v39  ;;  %2897 = vmatprep.mubr.bf16.mxu0 %v4953_v39  ;;  %v2594_v21 = vsub.s32 0, %v2593_v32  ;;  %v2602_v3 = vsub.s32 2, %v2593_v32  ;;  %v2598_v2 = vsub.s32 1, %v2593_v32  ;;  %v2606_v23 = vsub.s32 3, %v2593_v32  ;;  %p4872_p2 = scmp.lt.s32.totalorder %s4870_s17, %s4864_s25 }
 0xce9   : > { %v2569_v11 = vmul.f32 %v5969_v13, %v2555_v49  ;;  %v2558_v26 = vmul.f32 %v4647_v55, %v2534_v24 }
 0xcea   : > { %v5999_v49 = vrot.slane %v504_v62, %v2594_v21  ;;  %v6001_v0 = vrot.slane %v504_v62, %v2602_v3  ;;  %v6003_v55 = vrot.slane %v504_v62, %v2598_v2  ;;  %v6005_v24 = vrot.slane %v504_v62, %v2606_v23  ;;  %p4873_p1 = por %p4872_p2, %p4871_p12 }
 0xceb   : > { %v2583_v1 = vadd.f32 %v3776_v36, %v2569_v11  ;;  %v2572_v22 = vmul.f32 %v5969_v13, %v2558_v26 }
 0xcec   : > { %p4874_p13 = pnand %p4873_p1, %p4867_p7 }
 0xced   : > { %v2589_v15 = vpack.c.bf16 %v2584_v14, %v2583_v1  ;;  %v2586_v38 = vadd.f32 %v3776_v36, %v2572_v22 }
 0xcee   : > { %v4649_v20 = vpop.eup %4648 }
 0xcef   : > { %2825 = vmatmul.mubr.bf16.gmra.mrb[56].mxu1 %v2589_v15  ;;  %2898 = vmatmul.mubr.bf16.gmra.mrb[56].mxu0 %v2589_v15  ;;  %v2557_v42 = vmul.f32 %v4649_v20, %v2533_v10 }
 0xcf0   : > { %2834 = vmatprep.mubr.bf16.mxu1 %v4953_v39  ;;  %2907 = vmatprep.mubr.bf16.mxu0 %v4953_v39  ;;  %v4466_v39 = vld [vmem:[#allocation10 + $0x50] sm:$0xff]  }
 0xcf1   : > { %v2571_v37 = vmul.f32 %v5969_v13, %v2557_v42  ;;  %v4467_v13 = vld [vmem:[#allocation10 + $0xd0] sm:$0xff]   ;;  %3941 = vmatprep.subr.bf16.mxu1 %v4466_v39 }
 0xcf2   : > { %3981 = vmatprep.subr.bf16.mxu0 %v4467_v13 }
 0xcf3   : > { %v2585_v17 = vadd.f32 %v3776_v36, %v2571_v37  ;;  %v4468_v36 = vld [vmem:[#allocation10 + $0x10] sm:$0xff]   ;;  %3982 = vmatpush3.bf16.msra.mxu0 %v4469_v57 }
 0xcf4   : > { %3942 = vmatpush3.bf16.msra.mxu1 %v4468_v36  ;;  %3983 = vmatprep.subr.bf16.mxu0 %v4471_v18 }
 0xcf5   : > { %v2590_v50 = vpack.c.bf16 %v2586_v38, %v2585_v17  ;;  %3943 = vmatprep.subr.bf16.mxu1 %v4470_v35 }
 0xcf7   : > { %2835 = vmatmul.mubr.bf16.gmra.mrb[60].mxu1 %v2590_v50  ;;  %2908 = vmatmul.mubr.bf16.gmra.mrb[60].mxu0 %v2590_v50 }
 0xcf8   : > { %3944 = vmatpush3.bf16.msra.mxu1 %v4472_v51  ;;  %3984 = vmatpush3.bf16.msra.mxu0 %v4473_v40 }
 0xcf9   : > { %3945 = vmatprep.subr.bf16.mxu1 %v4474_v41  ;;  %3985 = vmatprep.subr.bf16.mxu0 %v4475_v52 }
 0xcfc   : > { %3946 = vmatpush3.bf16.msra.mxu1 %v4476_v8  ;;  %3986 = vmatpush3.bf16.msra.mxu0 %v4477_v27 }
 0xcfd   : > { %3947 = vmatprep.subr.bf16.mxu1 %v4478_v29  ;;  %3987 = vmatprep.subr.bf16.mxu0 %v4479_v46 }
 0xd00   : > { %3948 = vmatpush3.bf16.msra.mxu1 %v4480_v7  ;;  %3988 = vmatpush3.bf16.msra.mxu0 %v4481_v33 }
 0xd01   : > { %3949 = vmatprep.subr.bf16.mxu1 %v4482_v45  ;;  %3989 = vmatprep.subr.bf16.mxu0 %v4483_v28 }
 0xd04   : > { %3950 = vmatpush3.bf16.msra.mxu1 %v4484_v9  ;;  %3990 = vmatpush3.bf16.msra.mxu0 %v4485_v25 }
 0xd05   : > { %3951 = vmatprep.subr.bf16.mxu1 %v4486_v31  ;;  %3991 = vmatprep.subr.bf16.mxu0 %v4487_v60 }
 0xd08   : > { %3952 = vmatpush3.bf16.msra.mxu1 %v4488_v43  ;;  %3992 = vmatpush3.bf16.msra.mxu0 %v4489_v30 }
 0xdb2   : > { %v2806_v11 = vpop.f32.mrb[48].mxu1  ;;  %v2879_v1 = vpop.f32.mrb[48].mxu0 }
 0xdb3   : > { %v2807_v14 = vadd.f32 %v2806_v11, %v5999_v49  ;;  %v2880_v26 = vadd.f32 %v2879_v1, %v6001_v0  ;;  %v2808_v10 = vpop.f32.mrb[49].mxu1  ;;  %v2881_v15 = vpop.f32.mrb[49].mxu0 }
 0xdb4   : > { %v6010_v20 = vadd.f32 %v2808_v10, %v6003_v55  ;;  %v6013_v42 = vadd.f32 %v2881_v15, %v6005_v24  ;;  %v2810_v22 = vpop.f32.mrb[50].mxu1  ;;  %v2883_v37 = vpop.f32.mrb[50].mxu0 }
 0xdb5   : > { %v2950_v17 = vmul.f32 0.044715, %v2807_v14  ;;  %v2952_v38 = vmul.f32 0.044715, %v2880_v26  ;;  %v2811_v61 = vadd.f32 %v2810_v22, %v5999_v49  ;;  %v2884_v4 = vadd.f32 %v2883_v37, %v6001_v0  ;;  %v2812_v48 = vpop.f32.mrb[51].mxu1  ;;  %v2885_v63 = vpop.f32.mrb[51].mxu0 }
 0xdb6   : > { %v2951_v50 = vmul.f32 0.044715, %v6010_v20  ;;  %v2953_v5 = vmul.f32 0.044715, %v6013_v42  ;;  %v6020_v56 = vadd.f32 %v2812_v48, %v6003_v55  ;;  %v6023_v35 = vadd.f32 %v2885_v63, %v6005_v24 }
 0xdb7   : > { %v2982_v6 = vmul.f32 %v2950_v17, %v2807_v14  ;;  %v2984_v53 = vmul.f32 %v2952_v38, %v2880_v26  ;;  %v2954_v39 = vmul.f32 0.044715, %v2811_v61  ;;  %v2956_v57 = vmul.f32 0.044715, %v2884_v4 }
 0xdb8   : > { %v2983_v18 = vmul.f32 %v2951_v50, %v6010_v20  ;;  %v2985_v8 = vmul.f32 %v2953_v5, %v6013_v42  ;;  %v2955_v29 = vmul.f32 0.044715, %v6020_v56  ;;  %v6034_v60 = vmul.f32 0.5, %v2807_v14 }
 0xdb9   : > { %v3014_v13 = vmul.f32 %v2982_v6, %v2807_v14  ;;  %v3016_v36 = vmul.f32 %v2984_v53, %v2880_v26  ;;  %v2986_v51 = vmul.f32 %v2954_v39, %v2811_v61  ;;  %v2988_v27 = vmul.f32 %v2956_v57, %v2884_v4 }
 0xdba   : > { %v2816_v40 = vpop.f32.mrb[52].mxu1  ;;  %v2889_v41 = vpop.f32.mrb[52].mxu0  ;;  %v6036_v43 = vmul.f32 0.5, %v2880_v26  ;;  %v2957_v34 = vmul.f32 0.044715, %v6023_v35  ;;  %v6039_v62 = vmul.f32 0.5, %v2811_v61  ;;  %v6049_v15 = vmul.f32 %v2983_v18, %v6010_v20 }
 0xdbb   : > { %v3046_v52 = vadd.f32 %v3014_v13, %v2807_v14  ;;  %v2818_v46 = vpop.f32.mrb[53].mxu1  ;;  %v2891_v7 = vpop.f32.mrb[53].mxu0  ;;  %v3048_v33 = vadd.f32 %v3016_v36, %v2880_v26  ;;  %v3018_v45 = vmul.f32 %v2986_v51, %v2811_v61  ;;  %v6029_v28 = vadd.f32 %v2816_v40, %v5999_v49 }
 0xdbc   : > { %v6032_v9 = vadd.f32 %v2889_v41, %v6001_v0  ;;  %v2820_v25 = vpop.f32.mrb[54].mxu1  ;;  %v2893_v31 = vpop.f32.mrb[54].mxu0  ;;  %v3020_v30 = vmul.f32 %v2988_v27, %v2884_v4  ;;  %v6041_v23 = vmul.f32 0.5, %v2884_v4  ;;  %v6046_v14 = vadd.f32 %v2818_v46, %v6003_v55 }
 0xdbd   : > { %v2822_v32 = vpop.f32.mrb[55].mxu1  ;;  %v2895_v21 = vpop.f32.mrb[55].mxu0  ;;  %v3078_v3 = vmul.f32 0.7978846, %v3046_v52  ;;  %v3050_v2 = vadd.f32 %v3018_v45, %v2811_v61  ;;  %v2958_v1 = vmul.f32 0.044715, %v6029_v28  ;;  %v6052_v22 = vmul.f32 %v2985_v8, %v6013_v42 }
 0xdbe   : > { %6507 = vst [vmem:[#allocation26_spill] sm:$0xff] %v6032_v9  ;;  %v3052_v11 = vadd.f32 %v3020_v30, %v2884_v4  ;;  %v2960_v10 = vmul.f32 0.044715, %v6032_v9  ;;  %v3080_v26 = vmul.f32 0.7978846, %v3048_v33  ;;  %v2987_v37 = vmul.f32 %v2955_v29, %v6020_v56 }
 0xdbf   : > { %v2989_v17 = vmul.f32 %v2957_v34, %v6023_v35  ;;  %v2959_v38 = vmul.f32 0.044715, %v6046_v14  ;;  %v6058_v50 = vadd.f32 %v2891_v7, %v6005_v24  ;;  %v6061_v61 = vadd.f32 %v2820_v25, %v5999_v49 }
 0xdc0   : > { %4650 = vtanh.f32 %v3078_v3  ;;  %v3082_v4 = vmul.f32 0.7978846, %v3050_v2  ;;  %v3084_v48 = vmul.f32 0.7978846, %v3052_v11  ;;  %v6064_v63 = vadd.f32 %v2893_v31, %v6001_v0 }
 0xdc1   : > { %6508 = vst [vmem:[#allocation27_spill] sm:$0xff] %v6061_v61  ;;  %v2990_v5 = vmul.f32 %v2958_v1, %v6029_v28  ;;  %v2992_v39 = vmul.f32 %v2960_v10, %v6032_v9  ;;  %v2961_v13 = vmul.f32 0.044715, %v6058_v50  ;;  %v2962_v36 = vmul.f32 0.044715, %v6061_v61 }
 0xdc2   : > { %6509 = vst [vmem:[#allocation28_spill] sm:$0xff] %v6064_v63  ;;  %v2826_v6 = vpop.f32.mrb[56].mxu1  ;;  %v2899_v53 = vpop.f32.mrb[56].mxu0  ;;  %v2991_v51 = vmul.f32 %v2959_v38, %v6046_v14  ;;  %v2964_v40 = vmul.f32 0.044715, %v6064_v63  ;;  %v6073_v41 = vadd.f32 %v2822_v32, %v6003_v55  ;;  %v6076_v52 = vadd.f32 %v2895_v21, %v6005_v24 }
 0xdc3   : > { %v2828_v57 = vpop.f32.mrb[57].mxu1  ;;  %v2901_v18 = vpop.f32.mrb[57].mxu0  ;;  %4652 = vtanh.f32 %v3080_v26  ;;  %v6079_v29 = vmul.f32 %v2987_v37, %v6020_v56  ;;  %v6082_v46 = vadd.f32 %v2826_v6, %v5999_v49  ;;  %v6085_v7 = vadd.f32 %v2899_v53, %v6001_v0 }
 0xdc4   : > { %v2830_v8 = vpop.f32.mrb[58].mxu1  ;;  %v2903_v27 = vpop.f32.mrb[58].mxu0  ;;  %4654 = vtanh.f32 %v3082_v4  ;;  %v6088_v25 = vmul.f32 %v2989_v17, %v6023_v35  ;;  %v2993_v31 = vmul.f32 %v2961_v13, %v6058_v50  ;;  %v2963_v30 = vmul.f32 0.044715, %v6073_v41 }
 0xdc5   : > { %v2832_v33 = vpop.f32.mrb[59].mxu1  ;;  %v2905_v45 = vpop.f32.mrb[59].mxu0  ;;  %v6093_v34 = vmul.f32 %v2990_v5, %v6029_v28  ;;  %v2994_v32 = vmul.f32 %v2962_v36, %v6061_v61  ;;  %v2965_v21 = vmul.f32 0.044715, %v6076_v52  ;;  %v6098_v3 = vadd.f32 %v2828_v57, %v6003_v55 }
 0xdc6   : > { %4656 = vtanh.f32 %v3084_v48  ;;  %v6101_v2 = vmul.f32 %v2992_v39, %v6032_v9  ;;  %v6104_v11 = vmul.f32 %v2991_v51, %v6046_v14  ;;  %v2996_v1 = vmul.f32 %v2964_v40, %v6064_v63 }
 0xdc7   : > { %6510 = vst [vmem:[#allocation29_spill] sm:$0xff] %v6093_v34  ;;  %v2966_v10 = vmul.f32 0.044715, %v6082_v46  ;;  %v2968_v26 = vmul.f32 0.044715, %v6085_v7  ;;  %v6110_v37 = vadd.f32 %v2901_v18, %v6005_v24  ;;  %v6113_v17 = vadd.f32 %v2830_v8, %v5999_v49 }
 0xdc8   : > { %6511 = vst [vmem:[#allocation30_spill] sm:$0xff] %v6101_v2  ;;  %v6116_v38 = vmul.f32 %v2993_v31, %v6058_v50  ;;  %v2995_v4 = vmul.f32 %v2963_v30, %v6073_v41  ;;  %v2967_v48 = vmul.f32 0.044715, %v6098_v3  ;;  %v6121_v6 = vadd.f32 %v2903_v27, %v6001_v0 }
 0xdc9   : > { %v6124_v39 = vmul.f32 %v2994_v32, %v6061_v61  ;;  %v2997_v13 = vmul.f32 %v2965_v21, %v6076_v52  ;;  %v2969_v36 = vmul.f32 0.044715, %v6110_v37  ;;  %v2970_v57 = vmul.f32 0.044715, %v6113_v17 }
 0xdca   : > { %v2836_v53 = vpop.f32.mrb[60].mxu1  ;;  %v2909_v5 = vpop.f32.mrb[60].mxu0  ;;  %v2972_v8 = vmul.f32 0.044715, %v6121_v6  ;;  %v6133_v27 = vadd.f32 %v2832_v33, %v6003_v55  ;;  %v6136_v31 = vadd.f32 %v2905_v45, %v6005_v24  ;;  %v6142_v47 = vmul.f32 %v2996_v1, %v6064_v63 }
 0xdcb   : > { %6512 = vst [vmem:[#allocation31_spill] sm:$0xff] %v6124_v39  ;;  %v2838_v18 = vpop.f32.mrb[61].mxu1  ;;  %v2911_v51 = vpop.f32.mrb[61].mxu0  ;;  %v6139_v30 = vadd.f32 %v2836_v53, %v5999_v49  ;;  %v2998_v59 = vmul.f32 %v2966_v10, %v6082_v46  ;;  %v3000_v12 = vmul.f32 %v2968_v26, %v6085_v7  ;;  %v6147_v16 = vadd.f32 %v2909_v5, %v6001_v0 }
 0xdcc   : > { %v6129_v40 = vpop.eup %4650  ;;  %v2840_v32 = vpop.f32.mrb[62].mxu1  ;;  %6513 = vst [vmem:[#allocation32_spill] sm:$0xff] %v6142_v47  ;;  %v6150_v45 = vmul.f32 %v2995_v4, %v6073_v41  ;;  %v2971_v53 = vmul.f32 0.044715, %v6133_v27  ;;  %v2973_v19 = vmul.f32 0.044715, %v6136_v31  ;;  %v6156_v44 = vmul.f32 %v2997_v13, %v6076_v52 }
 0xdcd   : > { %v2913_v21 = vpop.f32.mrb[62].mxu0  ;;  %6514 = vst [vmem:[#allocation33_spill] sm:$0xff] %v6147_v16  ;;  %v2842_v33 = vpop.f32.mrb[63].mxu1  ;;  %v2974_v54 = vmul.f32 0.044715, %v6139_v30  ;;  %v2999_v10 = vmul.f32 %v2967_v48, %v6098_v3  ;;  %v6161_v5 = vadd.f32 %v2838_v18, %v6003_v55  ;;  %v3001_v4 = vmul.f32 %v2969_v36, %v6110_v37 }
 0xdce   : > { %v2915_v58 = vpop.f32.mrb[63].mxu0  ;;  %v4653_v1 = vpop.eup %4652  ;;  %v2976_v26 = vmul.f32 0.044715, %v6147_v16  ;;  %v3002_v63 = vmul.f32 %v2970_v57, %v6113_v17  ;;  %v3004_v2 = vmul.f32 %v2972_v8, %v6121_v6  ;;  %v3003_v9 = vmul.f32 %v2971_v53, %v6133_v27 }
 0xdcf   : > { %v4655_v47 = vpop.eup %4654  ;;  %v3005_v39 = vmul.f32 %v2973_v19, %v6136_v31  ;;  %v2975_v13 = vmul.f32 0.044715, %v6161_v5  ;;  %v6170_v48 = vadd.f32 %v2911_v51, %v6005_v24  ;;  %v6173_v61 = vadd.f32 %v2840_v32, %v5999_v49 }
 0xdd0   : > { %v4657_v18 = vpop.eup %4656  ;;  %v6176_v34 = vmul.f32 %v2998_v59, %v6082_v46  ;;  %v6179_v36 = vmul.f32 %v3000_v12, %v6085_v7  ;;  %v3006_v57 = vmul.f32 %v2974_v54, %v6139_v30  ;;  %v6183_v8 = vadd.f32 %v2913_v21, %v6001_v0 }
 0xdd1   : > { %v6186_v19 = vmul.f32 %v2999_v10, %v6098_v3  ;;  %v3008_v51 = vmul.f32 %v2976_v26, %v6147_v16  ;;  %v3007_v49 = vmul.f32 %v2975_v13, %v6161_v5  ;;  %v2977_v32 = vmul.f32 0.044715, %v6170_v48 }
 0xdd2   : > { %v6192_v59 = vmul.f32 %v3001_v4, %v6110_v37  ;;  %v6195_v12 = vmul.f32 %v3002_v63, %v6113_v17  ;;  %v2978_v54 = vmul.f32 0.044715, %v6173_v61  ;;  %v2980_v0 = vmul.f32 0.044715, %v6183_v8 }
 0xdd3   : > { %v6200_v21 = vmul.f32 %v3004_v2, %v6121_v6  ;;  %v6203_v53 = vmul.f32 %v3003_v9, %v6133_v27  ;;  %v6206_v10 = vmul.f32 %v3005_v39, %v6136_v31  ;;  %v6209_v26 = vadd.f32 %v2842_v33, %v6003_v55 }
 0xdd4   : > { %v6212_v4 = vmul.f32 %v3006_v57, %v6139_v30  ;;  %v3009_v63 = vmul.f32 %v2977_v32, %v6170_v48  ;;  %v6216_v13 = vadd.f32 %v2915_v58, %v6005_v24  ;;  %v3047_v2 = vadd.f32 %v6049_v15, %v6010_v20 }
 0xdd5   : > { %v6221_v9 = vmul.f32 %v3008_v51, %v6147_v16  ;;  %v6224_v39 = vmul.f32 %v3007_v49, %v6161_v5  ;;  %v6227_v55 = vmul.f32 0.5, %v6010_v20  ;;  %v3051_v33 = vadd.f32 %v6079_v29, %v6020_v56 }
 0xdd6   : > { %v3010_v57 = vmul.f32 %v2978_v54, %v6173_v61  ;;  %v3012_v58 = vmul.f32 %v2980_v0, %v6183_v8  ;;  %v6234_v24 = vmul.f32 0.5, %v6020_v56  ;;  %v3079_v15 = vmul.f32 0.7978846, %v3047_v2 }
 0xdd7   : > { %6515 = vst [vmem:[#allocation34_spill] sm:$0xff] %v6221_v9  ;;  %v2979_v51 = vmul.f32 0.044715, %v6209_v26  ;;  %v3083_v32 = vmul.f32 0.7978846, %v3051_v33  ;;  %v3049_v49 = vadd.f32 %v6052_v22, %v6013_v42  ;;  %v3053_v20 = vadd.f32 %v6088_v25, %v6023_v35 }
 0xdd8   : > { %v6242_v9 = vmul.f32 %v3009_v63, %v6170_v48  ;;  %v2981_v29 = vmul.f32 0.044715, %v6216_v13  ;;  %4658 = vtanh.f32 %v3079_v15  ;;  %v3142_v54 = vadd.f32 1.0, %v6129_v40 }
 0xdd9   : > { %4660 = vtanh.f32 %v3083_v32  ;;  %v3081_v56 = vmul.f32 0.7978846, %v3049_v49  ;;  %v3085_v0 = vmul.f32 0.7978846, %v3053_v20  ;;  %v3146_v2 = vadd.f32 1.0, %v4655_v47 }
 0xdda   : > { %v6247_v33 = vmul.f32 %v3010_v57, %v6173_v61  ;;  %v6250_v22 = vmul.f32 0.5, %v6013_v42  ;;  %v3144_v16 = vadd.f32 1.0, %v4653_v1  ;;  %v3148_v25 = vadd.f32 1.0, %v4657_v18 }
 0xddb   : > { %4662 = vtanh.f32 %v3081_v56  ;;  %v6253_v63 = vmul.f32 %v3142_v54, %v6034_v60  ;;  %v6256_v15 = vmul.f32 %v3146_v2, %v6039_v62  ;;  %v3055_v40 = vadd.f32 %v6104_v11, %v6046_v14  ;;  %v6517_v54 = vld [vmem:[#allocation27_spill] sm:$0xff]  ;;  %v6519_v2 = vld [vmem:[#allocation26_spill] sm:$0xff] }
 0xddc   : > { %4664 = vtanh.f32 %v3085_v0  ;;  %v6261_v47 = vmul.f32 %v3144_v16, %v6036_v43  ;;  %v6264_v57 = vmul.f32 %v3148_v25, %v6041_v23  ;;  %v3059_v42 = vadd.f32 %v6150_v45, %v6073_v41  ;;  %v6518_v56 = vld [vmem:[#allocation31_spill] sm:$0xff]  ;;  %v6520_v25 = vld [vmem:[#allocation30_spill] sm:$0xff] }
 0xddd   : > { %v3011_v1 = vmul.f32 %v2979_v51, %v6209_v26  ;;  %v3013_v60 = vmul.f32 %v2981_v29, %v6216_v13  ;;  %v3206_v62 = vpack.c.bf16 %v6256_v15, %v6253_v63  ;;  %v3087_v18 = vmul.f32 0.7978846, %v3055_v40  ;;  %v6516_v51 = vld [vmem:[#allocation29_spill] sm:$0xff] }
 0xdde   : > { %v3208_v11 = vpack.c.bf16 %v6264_v57, %v6261_v47  ;;  %v3091_v32 = vmul.f32 0.7978846, %v3059_v42  ;;  %v3057_v16 = vadd.f32 %v6116_v38, %v6058_v50  ;;  %v3061_v43 = vadd.f32 %v6156_v44, %v6076_v52  ;;  %v6521_v42 = vld [vmem:[#allocation28_spill] sm:$0xff] }
 0xddf   : > { %v6279_v23 = vmul.f32 %v3012_v58, %v6183_v8  ;;  %v2925_v45 = vmul.f32 0.5, %v6023_v35  ;;  %4666 = vtanh.f32 %v3087_v18  ;;  %v3054_v49 = vadd.f32 %v6516_v51, %v6029_v28  ;;  %v6522_v18 = vld [vmem:[#allocation32_spill] sm:$0xff] }
 0xde0   : > { %4668 = vtanh.f32 %v3091_v32  ;;  %v3089_v20 = vmul.f32 0.7978846, %v3057_v16  ;;  %v3093_v29 = vmul.f32 0.7978846, %v3061_v43  ;;  %v3058_v0 = vadd.f32 %v6518_v56, %v6517_v54 }
 0xde1   : > { %v6287_v38 = vmul.f32 %v3011_v1, %v6209_v26  ;;  %v6290_v44 = vmul.f32 %v3013_v60, %v6216_v13  ;;  %v3086_v58 = vmul.f32 0.7978846, %v3054_v49  ;;  %v3056_v35 = vadd.f32 %v6520_v25, %v6519_v2 }
 0xde2   : > { %v4659_v63 = vpop.eup %4658  ;;  %v2927_v15 = vmul.f32 0.5, %v6046_v14  ;;  %4670 = vtanh.f32 %v3089_v20  ;;  %v3090_v40 = vmul.f32 0.7978846, %v3058_v0  ;;  %v3060_v32 = vadd.f32 %v6522_v18, %v6521_v42 }
 0xde3   : > { %v4661_v16 = vpop.eup %4660  ;;  %v3143_v43 = vadd.f32 1.0, %v4659_v63  ;;  %v2931_v1 = vmul.f32 0.5, %v6073_v41  ;;  %4672 = vtanh.f32 %v3093_v29  ;;  %v3088_v51 = vmul.f32 0.7978846, %v3056_v35 }
 0xde4   : > { %v3147_v60 = vadd.f32 1.0, %v4661_v16  ;;  %4674 = vtanh.f32 %v3086_v58  ;;  %v3092_v49 = vmul.f32 0.7978846, %v3060_v32  ;;  %v3063_v56 = vadd.f32 %v6186_v19, %v6098_v3 }
 0xde5   : > { %v4663_v25 = vpop.eup %4662  ;;  %v3175_v14 = vmul.f32 %v3143_v43, %v6227_v55  ;;  %v2929_v20 = vmul.f32 0.5, %v6058_v50  ;;  %4676 = vtanh.f32 %v3090_v40  ;;  %v3067_v0 = vadd.f32 %v6203_v53, %v6133_v27 }
 0xde6   : > { %v4665_v63 = vpop.eup %4664  ;;  %v3179_v41 = vmul.f32 %v3147_v60, %v6234_v24  ;;  %v3145_v29 = vadd.f32 1.0, %v4663_v25  ;;  %4678 = vtanh.f32 %v3088_v51  ;;  %v3095_v35 = vmul.f32 0.7978846, %v3063_v56 }
 0xde7   : > { %v3149_v58 = vadd.f32 1.0, %v4665_v63  ;;  %v2933_v18 = vmul.f32 0.5, %v6076_v52  ;;  %4680 = vtanh.f32 %v3092_v49  ;;  %v3099_v19 = vmul.f32 0.7978846, %v3067_v0 }
 0xde8   : > { %v3207_v32 = vpack.c.bf16 %v3179_v41, %v3175_v14  ;;  %v2926_v55 = vmul.f32 0.5, %v6029_v28  ;;  %4682 = vtanh.f32 %v3095_v35  ;;  %v3065_v50 = vadd.f32 %v6192_v59, %v6110_v37 }
 0xde9   : > { %v4667_v40 = vpop.eup %4666  ;;  %v3177_v53 = vmul.f32 %v3145_v29, %v6250_v22  ;;  %v3181_v16 = vmul.f32 %v3149_v58, %v2925_v45  ;;  %4684 = vtanh.f32 %v3099_v19  ;;  %v3069_v24 = vadd.f32 %v6206_v10, %v6136_v31 }
 0xdea   : > { %v4669_v43 = vpop.eup %4668  ;;  %3452 = vmatprep.mubr.bf16.mxu1 %v3207_v32  ;;  %v3151_v52 = vadd.f32 1.0, %v4667_v40  ;;  %v2930_v51 = vmul.f32 0.5, %v6517_v54  ;;  %v3097_v60 = vmul.f32 0.7978846, %v3065_v50  ;;  %v3062_v28 = vadd.f32 %v6176_v34, %v6082_v46 }
 0xdeb   : > { %v3209_v49 = vpack.c.bf16 %v3181_v16, %v3177_v53  ;;  %3453 = vmatmul.mubr.bf16.vlgmr.msra.gmra.mrb[64].mxu1 %v3206_v62  ;;  %v3155_v59 = vadd.f32 1.0, %v4669_v43  ;;  %v3101_v56 = vmul.f32 0.7978846, %v3069_v24  ;;  %v3066_v22 = vadd.f32 %v6195_v12, %v6113_v17 }
 0xdec   : > { %v4671_v45 = vpop.eup %4670  ;;  %v3183_v25 = vmul.f32 %v3151_v52, %v2927_v15  ;;  %v2928_v10 = vmul.f32 0.5, %v6519_v2  ;;  %4686 = vtanh.f32 %v3097_v60  ;;  %v3094_v14 = vmul.f32 0.7978846, %v3062_v28 }
 0xded   : > { %v4673_v0 = vpop.eup %4672  ;;  %3517 = vmatprep.mubr.bf16.mxu0 %v3209_v49  ;;  %v3187_v54 = vmul.f32 %v3155_v59, %v2931_v1  ;;  %v3153_v63 = vadd.f32 1.0, %v4671_v45  ;;  %4688 = vtanh.f32 %v3101_v56  ;;  %v3098_v41 = vmul.f32 0.7978846, %v3066_v22 }
 0xdee   : > { %v4675_v34 = vpop.eup %4674  ;;  %3518 = vmatmul.mubr.bf16.vlgmr.msra.gmra.mrb[64].mxu0 %v3208_v11  ;;  %v3157_v62 = vadd.f32 1.0, %v4673_v0  ;;  %v2932_v12 = vmul.f32 0.5, %v6521_v42  ;;  %4690 = vtanh.f32 %v3094_v14  ;;  %v3064_v2 = vadd.f32 %v6179_v36, %v6085_v7 }
 0xdef   : > { %v4677_v15 = vpop.eup %4676  ;;  %v3211_v29 = vpack.c.bf16 %v3187_v54, %v3183_v25  ;;  %v3185_v35 = vmul.f32 %v3153_v63, %v2929_v20  ;;  %v3150_v58 = vadd.f32 1.0, %v4675_v34  ;;  %4692 = vtanh.f32 %v3098_v41 }
 0xdf0   : > { %v4679_v1 = vpop.eup %4678  ;;  %v3189_v19 = vmul.f32 %v3157_v62, %v2933_v18  ;;  %v3154_v32 = vadd.f32 1.0, %v4677_v15  ;;  %v3068_v50 = vadd.f32 %v6200_v21, %v6121_v6  ;;  %v3096_v47 = vmul.f32 0.7978846, %v3064_v2 }
 0xdf1   : > { %v4681_v57 = vpop.eup %4680  ;;  %3460 = vmatprep.mubr.bf16.mxu1 %v3211_v29  ;;  %v3182_v11 = vmul.f32 %v3150_v58, %v2926_v55  ;;  %v3152_v42 = vadd.f32 1.0, %v4679_v1  ;;  %v2935_v40 = vmul.f32 0.5, %v6098_v3  ;;  %v2939_v36 = vmul.f32 0.5, %v6133_v27 }
 0xdf2   : > { %v4683_v53 = vpop.eup %4682  ;;  %v3213_v16 = vpack.c.bf16 %v3189_v19, %v3185_v35  ;;  %v3186_v20 = vmul.f32 %v3154_v32, %v2930_v51  ;;  %v3156_v24 = vadd.f32 1.0, %v4681_v57  ;;  %v3100_v43 = vmul.f32 0.7978846, %v3068_v50  ;;  %v6523_v50 = vld [vmem:[#allocation33_spill] sm:$0xff] }
 0xdf3   : > { %v4685_v52 = vpop.eup %4684  ;;  %v3184_v18 = vmul.f32 %v3152_v42, %v2928_v10  ;;  %v3159_v60 = vadd.f32 1.0, %v4683_v53  ;;  %4694 = vtanh.f32 %v3096_v47  ;;  %v3071_v21 = vadd.f32 %v6224_v39, %v6161_v5  ;;  %v6524_v47 = vld [vmem:[#allocation34_spill] sm:$0xff] }
 0xdf4   : > { %3525 = vmatprep.mubr.bf16.mxu0 %v3213_v16  ;;  %v3210_v28 = vpack.c.bf16 %v3186_v20, %v3182_v11  ;;  %v3188_v55 = vmul.f32 %v3156_v24, %v2932_v12  ;;  %v3163_v49 = vadd.f32 1.0, %v4685_v52  ;;  %4696 = vtanh.f32 %v3100_v43 }
 0xdf5   : > { %v2937_v3 = vmul.f32 0.5, %v6110_v37  ;;  %v2941_v27 = vmul.f32 0.5, %v6136_v31  ;;  %v3075_v51 = vadd.f32 %v6287_v38, %v6209_v26  ;;  %v3103_v59 = vmul.f32 0.7978846, %v3071_v21 }
 0xdf6   : > { %v4687_v56 = vpop.eup %4686  ;;  %3461 = vmatmul.mubr.bf16.gmra.mrb[68].mxu1 %v3210_v28  ;;  %v3212_v22 = vpack.c.bf16 %v3188_v55, %v3184_v18  ;;  %v3191_v45 = vmul.f32 %v3159_v60, %v2935_v40  ;;  %v3195_v25 = vmul.f32 %v3163_v49, %v2939_v36  ;;  %v3073_v39 = vadd.f32 %v6242_v9, %v6170_v48 }
 0xdf7   : > { %v4689_v10 = vpop.eup %4688  ;;  %v3161_v14 = vadd.f32 1.0, %v4687_v56  ;;  %v3107_v0 = vmul.f32 0.7978846, %v3075_v51  ;;  %4698 = vtanh.f32 %v3103_v59  ;;  %v3077_v37 = vadd.f32 %v6290_v44, %v6216_v13 }
 0xdf8   : > { %v4691_v31 = vpop.eup %4690  ;;  %3526 = vmatmul.mubr.bf16.gmra.mrb[68].mxu0 %v3212_v22  ;;  %v3215_v54 = vpack.c.bf16 %v3195_v25, %v3191_v45  ;;  %v3165_v38 = vadd.f32 1.0, %v4689_v10  ;;  %v2934_v63 = vmul.f32 0.5, %v6082_v46  ;;  %v3105_v41 = vmul.f32 0.7978846, %v3073_v39 }
 0xdf9   : > { %v4693_v34 = vpop.eup %4692  ;;  %v2938_v62 = vmul.f32 0.5, %v6113_v17  ;;  %v3158_v12 = vadd.f32 1.0, %v4691_v31  ;;  %4700 = vtanh.f32 %v3107_v0  ;;  %v3109_v9 = vmul.f32 0.7978846, %v3077_v37 }
 0xdfa   : > { %3468 = vmatprep.mubr.bf16.mxu1 %v3215_v54  ;;  %v3193_v2 = vmul.f32 %v3161_v14, %v2937_v3  ;;  %v3197_v15 = vmul.f32 %v3165_v38, %v2941_v27  ;;  %v3162_v29 = vadd.f32 1.0, %v4693_v34  ;;  %4702 = vtanh.f32 %v3105_v41 }
 0xdfb   : > { %4704 = vtanh.f32 %v3109_v9  ;;  %v3070_v44 = vadd.f32 %v6212_v4, %v6139_v30  ;;  %v3074_v35 = vadd.f32 %v6247_v33, %v6173_v61  ;;  %v3190_v58 = vmul.f32 %v3158_v12, %v2934_v63 }
 0xdfc   : > { %v3217_v46 = vpack.c.bf16 %v3197_v15, %v3193_v2  ;;  %v3194_v1 = vmul.f32 %v3162_v29, %v2938_v62  ;;  %v3072_v57 = vadd.f32 %v6524_v47, %v6523_v50  ;;  %v3076_v11 = vadd.f32 %v6279_v23, %v6183_v8 }
 0xdfd   : > { %v4695_v19 = vpop.eup %4694  ;;  %v3102_v17 = vmul.f32 0.7978846, %v3070_v44  ;;  %v3106_v32 = vmul.f32 0.7978846, %v3074_v35  ;;  %v2936_v4 = vmul.f32 0.5, %v6085_v7  ;;  %v2940_v36 = vmul.f32 0.5, %v6121_v6 }
 0xdfe   : > { %v4697_v42 = vpop.eup %4696  ;;  %3533 = vmatprep.mubr.bf16.mxu0 %v3217_v46  ;;  %v3214_v40 = vpack.c.bf16 %v3194_v1, %v3190_v58  ;;  %v3160_v33 = vadd.f32 1.0, %v4695_v19  ;;  %v3104_v16 = vmul.f32 0.7978846, %v3072_v57  ;;  %v3108_v20 = vmul.f32 0.7978846, %v3076_v11  ;;  %v6526_v11 = vld [vmem:[#allocation18_spill] sm:$0xff] }
 0xdff   : > { %v3164_v53 = vadd.f32 1.0, %v4697_v42  ;;  %4706 = vtanh.f32 %v3102_v17  ;;  %v2943_v7 = vmul.f32 0.5, %v6161_v5  ;;  %v2947_v6 = vmul.f32 0.5, %v6209_v26 }
 0xe00   : > { %3469 = vmatmul.mubr.bf16.gmra.mrb[72].mxu1 %v3214_v40  ;;  %4708 = vtanh.f32 %v3106_v32  ;;  %v3192_v43 = vmul.f32 %v3160_v33, %v2936_v4  ;;  %v2945_v49 = vmul.f32 0.5, %v6170_v48  ;;  %v2949_v59 = vmul.f32 0.5, %v6216_v13  ;;  %v6527_v4 = vld [vmem:[#allocation19_spill] sm:$0xff] }
 0xe01   : > { %v4699_v24 = vpop.eup %4698  ;;  %v3196_v52 = vmul.f32 %v3164_v53, %v2940_v36  ;;  %4710 = vtanh.f32 %v3104_v16  ;;  %v2942_v0 = vmul.f32 0.5, %v6139_v30  ;;  %v2946_v37 = vmul.f32 0.5, %v6173_v61  ;;  %v6361_v61 = vld [vmem:[%s6525_s3] ss:$0 sm:$0xff] }
 0xe02   : > { %v3167_v18 = vadd.f32 1.0, %v4699_v24  ;;  %4712 = vtanh.f32 %v3108_v20  ;;  %v2944_v54 = vmul.f32 0.5, %v6523_v50  ;;  %v2948_v41 = vmul.f32 0.5, %v6183_v8 }
 0xe03   : > { %v4701_v23 = vpop.eup %4700  ;;  %v3216_v60 = vpack.c.bf16 %v3196_v52, %v3192_v43 }
 0xe04   : > { %v4703_v21 = vpop.eup %4702  ;;  %v3171_v28 = vadd.f32 1.0, %v4701_v23  ;;  %v3199_v27 = vmul.f32 %v3167_v18, %v2943_v7 }
 0xe05   : > { %v4705_v55 = vpop.eup %4704  ;;  %3534 = vmatmul.mubr.bf16.gmra.mrb[72].mxu0 %v3216_v60  ;;  %v3169_v3 = vadd.f32 1.0, %v4703_v21 }
 0xe06   : > { %v3203_v51 = vmul.f32 %v3171_v28, %v2947_v6  ;;  %v3173_v56 = vadd.f32 1.0, %v4705_v55 }
 0xe07   : > { %v3201_v45 = vmul.f32 %v3169_v3, %v2945_v49  ;;  %v6528_v49 = vld [vmem:[#allocation21_spill] sm:$0xff] }
 0xe08   : > { %v3219_v22 = vpack.c.bf16 %v3203_v51, %v3199_v27  ;;  %v3205_v25 = vmul.f32 %v3173_v56, %v2949_v59  ;;  %v6529_v51 = vld [vmem:[#allocation20_spill] sm:$0xff] }
 0xe09   : > { %v4707_v39 = vpop.eup %4706 }
 0xe0a   : > { %v4709_v10 = vpop.eup %4708  ;;  %3476 = vmatprep.mubr.bf16.mxu1 %v3219_v22  ;;  %v3221_v5 = vpack.c.bf16 %v3205_v25, %v3201_v45  ;;  %v3166_v14 = vadd.f32 1.0, %v4707_v39 }
 0xe0b   : > { %v4711_v26 = vpop.eup %4710  ;;  %v3170_v48 = vadd.f32 1.0, %v4709_v10 }
 0xe0c   : > { %v4713_v31 = vpop.eup %4712  ;;  %3541 = vmatprep.mubr.bf16.mxu0 %v3221_v5  ;;  %v3168_v13 = vadd.f32 1.0, %v4711_v26  ;;  %v3198_v38 = vmul.f32 %v3166_v14, %v2942_v0 }
 0xe0d   : > { %v3202_v63 = vmul.f32 %v3170_v48, %v2946_v37  ;;  %v3172_v34 = vadd.f32 1.0, %v4713_v31 }
 0xe0e   : > { %v3200_v12 = vmul.f32 %v3168_v13, %v2944_v54 }
 0xe0f   : > { %v3218_v62 = vpack.c.bf16 %v3202_v63, %v3198_v38  ;;  %v3204_v9 = vmul.f32 %v3172_v34, %v2948_v41  ;;  %v6530_v38 = vld [vmem:[#allocation23_spill] sm:$0xff]  ;;  %v6531_v34 = vld [vmem:[#allocation22_spill] sm:$0xff] }
 0xe11   : > { %3477 = vmatmul.mubr.bf16.gmra.mrb[76].mxu1 %v3218_v62  ;;  %v3220_v2 = vpack.c.bf16 %v3204_v9, %v3200_v12 }
 0xe13   : > { %3542 = vmatmul.mubr.bf16.gmra.mrb[76].mxu0 %v3220_v2 }
 0xebe   : > { %v3953_v30 = vpop.f32.mrb[64].mxu1 }
 0xebf   : > { %v3954_v15 = vpop.f32.mrb[65].mxu1 }
 0xec0   : > { %v3955_v29 = vadd.f32 %v3954_v15, %v3953_v30  ;;  %v3956_v44 = vpop.f32.mrb[66].mxu1 }
 0xec1   : > { %v3993_v35 = vpop.f32.mrb[64].mxu0  ;;  %v3957_v46 = vpop.f32.mrb[67].mxu1 }
 0xec2   : > { %v3455_v8 = vadd.f32 %v3955_v29, %v6361_v61  ;;  %v3994_v58 = vpop.f32.mrb[65].mxu0  ;;  %v3958_v1 = vadd.f32 %v3957_v46, %v3956_v44 }
 0xec3   : > { %v3995_v19 = vadd.f32 %v3994_v58, %v3993_v35  ;;  %v3996_v17 = vpop.f32.mrb[66].mxu0 }
 0xec4   : > { %v3458_v32 = vadd.f32 %v3958_v1, %v6361_v61  ;;  %v3997_v50 = vpop.f32.mrb[67].mxu0 }
 0xec5   : > { %v3520_v47 = vadd.f32 %v3995_v19, %v3455_v8  ;;  %v3998_v57 = vadd.f32 %v3997_v50, %v3996_v17  ;;  %v6532_v50 = vld [vmem:[#allocation25_spill] sm:$0xff] }
 0xec7   : > { %v3550_v42 = vadd.f32 %v3520_v47, %v6526_v11  ;;  %v3523_v40 = vadd.f32 %v3998_v57, %v3458_v32  ;;  %v6534_v11 = vld [vmem:[#allocation24_spill] sm:$0xff] }
 0xec9   : > { %3558 = vst [vmem:[%s6368_s18] sm:$0xff] %v3550_v42  ;;  %v3551_v36 = vadd.f32 %v3523_v40, %v6527_v4  ;;  %v3959_v33 = vpop.f32.mrb[68].mxu1 }
 0xeca   : > { %v3960_v53 = vpop.f32.mrb[69].mxu1 }
 0xecb   : > { %3559 = vst [vmem:[%s6368_s18 + $0x8] sm:$0xff] %v3551_v36  ;;  %v3999_v16 = vpop.f32.mrb[68].mxu0  ;;  %v3961_v20 = vadd.f32 %v3960_v53, %v3959_v33  ;;  %v3962_v24 = vpop.f32.mrb[70].mxu1 }
 0xecc   : > { %v4000_v43 = vpop.f32.mrb[69].mxu0  ;;  %v3963_v52 = vpop.f32.mrb[71].mxu1 }
 0xecd   : > { %v3463_v18 = vadd.f32 %v3961_v20, %v6361_v61  ;;  %v4001_v23 = vadd.f32 %v4000_v43, %v3999_v16  ;;  %v4002_v60 = vpop.f32.mrb[70].mxu0  ;;  %v3964_v21 = vadd.f32 %v3963_v52, %v3962_v24 }
 0xece   : > { %v4003_v7 = vpop.f32.mrb[71].mxu0 }
 0xecf   : > { %v3528_v6 = vadd.f32 %v4001_v23, %v3463_v18  ;;  %v3466_v28 = vadd.f32 %v3964_v21, %v6361_v61  ;;  %v4004_v55 = vadd.f32 %v4003_v7, %v4002_v60 }
 0xed1   : > { %v3552_v3 = vadd.f32 %v3528_v6, %v6528_v49  ;;  %v3531_v27 = vadd.f32 %v4004_v55, %v3466_v28 }
 0xed3   : > { %3560 = vst [vmem:[%s6368_s18 + $0x10] sm:$0xff] %v3552_v3  ;;  %v3553_v59 = vadd.f32 %v3531_v27, %v6529_v51  ;;  %v3965_v56 = vpop.f32.mrb[72].mxu1 }
 0xed4   : > { %v3966_v22 = vpop.f32.mrb[73].mxu1 }
 0xed5   : > { %3561 = vst [vmem:[%s6368_s18 + $0x18] sm:$0xff] %v3553_v59  ;;  %v3967_v45 = vadd.f32 %v3966_v22, %v3965_v56  ;;  %v3968_v25 = vpop.f32.mrb[74].mxu1 }
 0xed6   : > { %v3969_v39 = vpop.f32.mrb[75].mxu1 }
 0xed7   : > { %v3970_v10 = vadd.f32 %v3969_v39, %v3968_v25  ;;  %v3471_v14 = vadd.f32 %v3967_v45, %v6361_v61 }
 0xed8   : > { %v4005_v5 = vpop.f32.mrb[72].mxu0 }
 0xed9   : > { %v4006_v26 = vpop.f32.mrb[73].mxu0  ;;  %v3474_v48 = vadd.f32 %v3970_v10, %v6361_v61 }
 0xeda   : > { %v4007_v0 = vadd.f32 %v4006_v26, %v4005_v5  ;;  %v4008_v37 = vpop.f32.mrb[74].mxu0 }
 0xedb   : > { %v4009_v31 = vpop.f32.mrb[75].mxu0 }
 0xedc   : > { %v3536_v54 = vadd.f32 %v4007_v0, %v3471_v14  ;;  %v4010_v13 = vadd.f32 %v4009_v31, %v4008_v37 }
 0xede   : > { %v3554_v63 = vadd.f32 %v3536_v54, %v6530_v38  ;;  %v3539_v41 = vadd.f32 %v4010_v13, %v3474_v48 }
 0xee0   : > { %3562 = vst [vmem:[%s6368_s18 + $0x20] sm:$0xff] %v3554_v63  ;;  %v3555_v62 = vadd.f32 %v3539_v41, %v6531_v34 }
 0xee2   : > { %3563 = vst [vmem:[%s6368_s18 + $0x28] sm:$0xff] %v3555_v62 }
 0xee4   : > { %v3971_v12 = vpop.f32.mrb[76].mxu1 }
 0xee5   : > { %v3972_v9 = vpop.f32.mrb[77].mxu1 }
 0xee6   : > { %v4011_v2 = vpop.f32.mrb[76].mxu0  ;;  %v3973_v30 = vadd.f32 %v3972_v9, %v3971_v12  ;;  %v3974_v15 = vpop.f32.mrb[78].mxu1 }
 0xee7   : > { %v4012_v29 = vpop.f32.mrb[77].mxu0  ;;  %v3975_v44 = vpop.f32.mrb[79].mxu1 }
 0xee8   : > { %v3479_v35 = vadd.f32 %v3973_v30, %v6361_v61  ;;  %v4013_v46 = vadd.f32 %v4012_v29, %v4011_v2  ;;  %v4014_v8 = vpop.f32.mrb[78].mxu0  ;;  %v3976_v58 = vadd.f32 %v3975_v44, %v3974_v15 }
 0xee9   : > { %v4015_v1 = vpop.f32.mrb[79].mxu0 }
 0xeea   : > { %v3544_v19 = vadd.f32 %v4013_v46, %v3479_v35  ;;  %v3482_v17 = vadd.f32 %v3976_v58, %v6361_v61  ;;  %v4016_v32 = vadd.f32 %v4015_v1, %v4014_v8 }
 0xeec   : > { %v3556_v47 = vadd.f32 %v3544_v19, %v6532_v50  ;;  %v3547_v57 = vadd.f32 %v4016_v32, %v3482_v17 }
 0xeee   : > { %3564 = vst [vmem:[%s6368_s18 + $0x30] sm:$0xff] %v3556_v47  ;;  %v3557_v42 = vadd.f32 %v3547_v57, %v6534_v11 }
 0xef0   : > { %3565 = vst [vmem:[%s6368_s18 + $0x38] sm:$0xff] %v3557_v42 }
 0xef1   : > { %4877 = shalt.err (!%p4874_p13)
}
 0xef2   : > { %s4878_s16 = scalar_lea.hbm %s6393_s9, 1024  ;;  %s4882_s18 = scalar_lea.hbm %s6533_s14, 2048 }
 0xef3   : > { %p4879_p9 = scmp.ne.s32.totalorder %s6393_s9, %s4878_s16  ;;  %p4883_p4 = scmp.lt.u32.totalorder %s6393_s9, %s6533_s14 }
 0xef4   : > { %p4884_p8 = scmp.lt.u32.totalorder %s4882_s18, %s4878_s16  ;;  %p4886_p3 = scmp.lt.u32.totalorder %s4878_s16, %s6393_s9 }
 0xef5   : > { %p4880_p0 = pnand %p4879_p9, %p5181_p10 }
 0xef6   : > { %p4885_p6 = por %p4884_p8, %p4883_p4 }
 0xef7   : > { %p4881_p11 = pneg %p4880_p0 }
 0xef8   : > { %p4887_p5 = por %p4886_p3, %p4885_p6 }
 0xefa   : > { %p4888_p7 = pnand %p4887_p5, %p4881_p11 }
 0xefc   : > { %4891 = shalt.err (!%p4888_p7)
}
 0xefd   : > { %s4958_s12 = smov 128   ;;  %s4959_s25 = smov 8  }
 0xefe   : > { %4227 = dma.vmem_to_hbm [thread:$0]  (%p5181_p10), %s6395_s13, 1024, %s6393_s9, %s3567_s26, %s4958_s12, %s4958_s12, %s4959_s25  }
 0xeff PF: > { %s6535_s27 = sld [smem:[#allocation16_spill]]  ;;  %s6536_s29 = sld [smem:[#allocation17_spill]] }
 0xf00   : > { %p6538_p2 = scmp.ge.s32.totalorder %s4938_s24, 2 }
 0xf05   : > { %s3595_s17 = sand.u32 1, %s6535_s27   ;;  %p6537_p12 = scmp.ne.s32.totalorder %s6536_s29, 0 }
 0xf06   : > { %s3596_s16 = scalar_lea.sflag [#allocation4], %s3595_s17 }
 0xf07   : > { %p4247_p1 = pnand %p6538_p2, %p6537_p12 }
 0xf09   : > { %4921 = dma.done.wait (!%p4247_p1), %s3596_s16, 1024  }
 0xf0a   : > { %4923 = vsyncadd (!%p4247_p1), %s3596_s16, 4294966272  ;;  %p27_p13 = scmp.ge.s32.totalorder %s5171_s30, 4   ;;  %s6539_s21 = smov %s4930_s22 }
 0xf0b   : > { %s6540_s22 = smov %s4934_s23  ;;  %s6541_s23 = smov %s5187_s20 }
 0xf0c   : > { %s6542_s24 = smov %s5171_s30  ;;  %29 = sbr.rel (!%p27_p13) target bundleno = 12 (0xc), region = 129 }
 0xf13   :  { %3601 = vsyncpa [#allocation3], 1 }
 0xf14   :  { %3603 = vsyncpa [#allocation3 + $0x1], 1 }
 0xf15   :  { %3604 = vsyncpa [#allocation6], 1 }
 0xf16   :  { %3605 = vsyncpa [#allocation9], 1 }
 0xf17   :  { %3606 = vsyncpa [#allocation4], 1 }
 0xf18   :  { %3608 = vsyncpa [#allocation4 + $0x1], 1 }

// kernel: tpu_custom_call.1
= control target key start
LH: loop header
LB: loop body
LE: loop exit
PB: predicated region body
PF: predicated region fallthrough
CT: control target
= control target key end

     0   :  { %s6442_s0 = inlined_call_operand.hbm [shape: f32[2,64,128], index: 0, kind: input, shape index: {}]   ;;  %s6443_s1 = inlined_call_operand.vmem [shape: f32[1,128], index: 1, kind: input, shape index: {}]   ;;  %s6444_s2 = inlined_call_operand.vmem [shape: f32[1,128], index: 2, kind: input, shape index: {}]   ;;  %s6445_s3 = inlined_call_operand.hbm [shape: bf16[128,384], index: 3, kind: input, shape index: {}]   ;;  %s6446_s4 = inlined_call_operand.hbm [shape: bf16[128,128], index: 4, kind: input, shape index: {}]   ;;  %s6447_s5 = inlined_call_operand.vmem [shape: f32[1,128], index: 5, kind: input, shape index: {}]   ;;  %s6448_s6 = inlined_call_operand.vmem [shape: f32[1,128], index: 6, kind: input, shape index: {}]   ;;  %s6449_s7 = inlined_call_operand.vmem [shape: f32[1,128], index: 7, kind: input, shape index: {}]   ;;  %s6450_s8 = inlined_call_operand.hbm [shape: bf16[128,512], index: 8, kind: input, shape index: {}]   ;;  %s6451_s9 = inlined_call_operand.vmem [shape: f32[1,512], index: 9, kind: input, shape index: {}]   ;;  %s6452_s10 = inlined_call_operand.hbm [shape: bf16[512,128], index: 10, kind: input, shape index: {}]   ;;  %s6453_s11 = inlined_call_operand.vmem [shape: f32[1,128], index: 11, kind: input, shape index: {}]   ;;  %s6454_s12 = inlined_call_operand.hbm [shape: f32[2,64,128], index: 12, kind: output, shape index: {}]  }
   0x1   :  { %6477 = sst [smem:[#allocation35_spill]] %s6445_s3 }
   0x2   :  { %6478 = sst [smem:[#allocation36_spill]] %s6451_s9 }
   0x3   :  { %6479 = sst [smem:[#allocation37_spill]] %s6453_s11 }
   0x4   :  { %6480 = sst [smem:[#allocation38_spill]] %s6454_s12 }
   0x5   :  { %17 = vsyncpa [#allocation3], 0 }
   0x6   :  { %19 = vsyncpa [#allocation3 + $0x1], 0 }
   0x7   :  { %20 = vsyncpa [#allocation6], 0 }
   0x8   :  { %21 = vsyncpa [#allocation9], 0 }
   0x9   :  { %22 = vsyncpa [#allocation4], 0 }
   0xa   :  { %24 = vsyncpa [#allocation4 + $0x1], 0  ;;  %s5025_s21 = smov 0   ;;  %s5027_s22 = smov 0  }
   0xb   :  { %s5029_s23 = smov 0   ;;  %s5031_s24 = smov 0  }
   0xc LB: > { %6481 = sst [smem:[#allocation16_spill]] %s4926_s21  ;;  %s5046_s25 = sadd.s32 4294967295, %s4938_s24   ;;  %s4938_s24 = sphi %s5031_s24, %s6542_s24   ;;  %s4934_s23 = sphi %s5029_s23, %s6541_s23   ;;  %s4930_s22 = sphi %s5027_s22, %s6540_s22   ;;  %s4926_s21 = sphi %s5025_s21, %s6539_s21  }
   0xd   : > { %s3691_s26 = sadd.s32 4294967294, %s4938_s24   ;;  %p50_p0 = scmp.ne.s32.totalorder %s4930_s22, %s4926_s21 }
   0xe   : > { %p6456_p1 = scmp.eq.s32.totalorder %s5046_s25, 0  ;;  %p311_p3 = scmp.eq.s32.totalorder %s3691_s26, 1 }
   0xf   : > { %p3692_p5 = scmp.ge.s32.totalorder %s4938_s24, 1  ;;  %p318_p7 = scmp.lt.s32.totalorder %s4938_s24, 3 }
  0x10   : > { %p5055_p4 = por %p6456_p1, %p50_p0  ;;  %p5060_p6 = por %p311_p3, %p50_p0 }
  0x11   : > { %p5065_p8 = pnand %p3692_p5, %p318_p7  ;;  %s4940_s30 = smov [#allocation5]  }
  0x12   : > { %s6482_s27 = scalar_select %p5055_p4, 1, 0 }
  0x13   : > { %s6483_s28 = scalar_select %p5060_p6, 1, 0 }
  0x14   : > { %s6485_s29 = scalar_select %p5065_p8, 1, 0 }
  0x15   : > { %6484 = sst [smem:[#allocation17_spill]] %s6483_s28  ;;  %s336_s13 = sshll.u32 %s4940_s30, 4  ;;  %s5069_s13 = int_to_ptr.vmem [resolvable:$true] %s336_s13 }
  0x16   : > { %p4229_p9 = pneg %p5065_p8  ;;  %s4941_s15 = smov [#allocation8]  }
  0x17   : > { %s371_s16 = sshll.u32 %s4941_s15, 4  ;;  %s6487_s3 = sld [smem:[#allocation35_spill]]  ;;  %s5080_s16 = int_to_ptr.vmem [resolvable:$true] %s371_s16 }
  0x18   : > { %p5076_p11 = pnand %p4229_p9, %p6456_p1 }
  0x1a   : > { %p5090_p13 = pneg %p5076_p11 }
  0x1d   : > { %s4722_s19 = scalar_lea.hbm %s6487_s3, 3072 }
  0x1e   : > { %p4723_p12 = scmp.ne.s32.totalorder %s6487_s3, %s4722_s19  ;;  %p4729_p5 = scmp.lt.u32.totalorder %s4722_s19, %s6487_s3 }
  0x20   : > { %p4725_p0 = pnand %p5090_p13, %p4723_p12 }
  0x22   : > { %p4726_p3 = pneg %p4725_p0 }
  0x24   : > { %p4731_p7 = pnand %p4729_p5, %p4726_p3 }
  0x26   : > { %4734 = shalt.err (!%p4731_p7)
}
  0x27   : > { %s4735_s17 = scalar_lea.vmem %s5069_s13, 3072  ;;  %p4743_p2 = scmp.lt.s32.totalorder %s5069_s13, %s5069_s13 }
  0x28   : > { %p4736_p9 = scmp.ne.s32.totalorder %s5069_s13, %s4735_s17  ;;  %p4744_p6 = scmp.lt.s32.totalorder %s4735_s17, %s4735_s17 }
  0x2a   : > { %p4738_p10 = pnand %p4736_p9, %p5090_p13  ;;  %p4745_p12 = por %p4744_p6, %p4743_p2 }
  0x2c   : > { %p4739_p1 = pneg %p4738_p10 }
  0x2e   : > { %p4746_p0 = pnand %p4745_p12, %p4739_p1 }
  0x30   : > { %4749 = shalt.err (!%p4746_p0)
}
  0x31   : > { %s4942_s18 = smov 192   ;;  %s4943_s28 = smov 12  }
  0x32   : > { %4232 = dma.hbm_to_vmem [thread:$0]  (!%p5076_p11), %s6487_s3, 3072, %s5069_s13, [#allocation6], %s4942_s18, %s4942_s18, %s4943_s28  }
  0x33   : > { %s4750_s21 = scalar_lea.hbm %s6450_s8, 4096 }
  0x34   : > { %p4751_p2 = scmp.ne.s32.totalorder %s6450_s8, %s4750_s21  ;;  %p4757_p10 = scmp.lt.u32.totalorder %s4750_s21, %s6450_s8 }
  0x36   : > { %p4753_p1 = pnand %p4751_p2, %p5090_p13 }
  0x38   : > { %p4754_p6 = pneg %p4753_p1 }
  0x3a   : > { %p4759_p3 = pnand %p4757_p10, %p4754_p6 }
  0x3c   : > { %4762 = shalt.err (!%p4759_p3)
}
  0x3d   : > { %s4763_s13 = scalar_lea.vmem %s5080_s16, 4096  ;;  %p4771_p12 = scmp.lt.s32.totalorder %s5080_s16, %s5080_s16 }
  0x3e   : > { %p4764_p5 = scmp.ne.s32.totalorder %s5080_s16, %s4763_s13  ;;  %p4772_p0 = scmp.lt.s32.totalorder %s4763_s13, %s4763_s13 }
  0x40   : > { %p4766_p7 = pnand %p4764_p5, %p5090_p13  ;;  %p4773_p2 = por %p4772_p0, %p4771_p12 }
  0x42   : > { %p4767_p9 = pneg %p4766_p7 }
  0x44   : > { %p4774_p1 = pnand %p4773_p2, %p4767_p9 }
  0x46   : > { %4777 = shalt.err (!%p4774_p1)
}
  0x47   : > { %s4944_s11 = smov 256   ;;  %s4945_s9 = smov 16  }
  0x48   : > { %4238 = dma.hbm_to_vmem [thread:$0]  (!%p5076_p11), %s6450_s8, 4096, %s5080_s16, [#allocation9], %s4944_s11, %s4944_s11, %s4945_s9  }
  0x49   : > { %s4946_s18 = smov [#allocation7]   ;;  %s4778_s26 = scalar_lea.hbm %s6446_s4, 1024 }
  0x4a   : > { %s349_s28 = sshll.u32 %s4946_s18, 4  ;;  %p4779_p6 = scmp.ne.s32.totalorder %s6446_s4, %s4778_s26  ;;  %s350_s28 = int_to_ptr.vmem [resolvable:$true] %s349_s28 }
  0x4b   : > { %p4785_p5 = scmp.lt.u32.totalorder %s4778_s26, %s6446_s4 }
  0x4c   : > { %p4781_p10 = pnand %p4779_p6, %p5090_p13 }
  0x4e   : > { %p4782_p3 = pneg %p4781_p10 }
  0x50   : > { %p4787_p7 = pnand %p4785_p5, %p4782_p3 }
  0x52   : > { %4790 = shalt.err (!%p4787_p7)
}
  0x53   : > { %s4791_s16 = scalar_lea.vmem %s350_s28, 1024  ;;  %p4799_p2 = scmp.lt.s32.totalorder %s350_s28, %s350_s28 }
  0x54   : > { %p4792_p9 = scmp.ne.s32.totalorder %s350_s28, %s4791_s16  ;;  %p4800_p1 = scmp.lt.s32.totalorder %s4791_s16, %s4791_s16 }
  0x56   : > { %p4794_p12 = pnand %p4792_p9, %p5090_p13  ;;  %p4801_p4 = por %p4800_p1, %p4799_p2 }
  0x58   : > { %p4795_p0 = pneg %p4794_p12 }
  0x5a   : > { %p4802_p8 = pnand %p4801_p4, %p4795_p0 }
  0x5c   : > { %4805 = shalt.err (!%p4802_p8)
}
  0x5d   : > { %s4947_s11 = smov 64   ;;  %s4948_s9 = smov 4  }
  0x5e   : > { %4235 = dma.hbm_to_vmem [thread:$0]  (!%p5076_p11), %s6446_s4, 1024, %s350_s28, [#allocation6], %s4947_s11, %s4947_s11, %s4948_s9  }
  0x5f   : > { %s4949_s21 = smov [#allocation10]   ;;  %s4806_s26 = scalar_lea.hbm %s6452_s10, 4096 }
  0x60   : > { %s387_s18 = sshll.u32 %s4949_s21, 4  ;;  %p4807_p4 = scmp.ne.s32.totalorder %s6452_s10, %s4806_s26  ;;  %s388_s18 = int_to_ptr.vmem [resolvable:$true] %s387_s18 }
  0x61   : > { %p4813_p10 = scmp.lt.u32.totalorder %s4806_s26, %s6452_s10 }
  0x62   : > { %p4809_p8 = pnand %p4807_p4, %p5090_p13 }
  0x64   : > { %p4810_p6 = pneg %p4809_p8 }
  0x66   : > { %p4815_p3 = pnand %p4813_p10, %p4810_p6 }
  0x68   : > { %4818 = shalt.err (!%p4815_p3)
}
  0x69   : > { %s4819_s28 = scalar_lea.vmem %s388_s18, 4096  ;;  %p4827_p12 = scmp.lt.s32.totalorder %s388_s18, %s388_s18 }
  0x6a   : > { %p4820_p5 = scmp.ne.s32.totalorder %s388_s18, %s4819_s28  ;;  %p4828_p0 = scmp.lt.s32.totalorder %s4819_s28, %s4819_s28 }
  0x6c   : > { %p4822_p7 = pnand %p4820_p5, %p5090_p13  ;;  %p4829_p2 = por %p4828_p0, %p4827_p12 }
  0x6e   : > { %p4823_p9 = pneg %p4822_p7 }
  0x70   : > { %p4830_p1 = pnand %p4829_p2, %p4823_p9 }
  0x72   : > { %4833 = shalt.err (!%p4830_p1)
}
  0x73   : > { %4241 = dma.hbm_to_vmem [thread:$0]  (!%p5076_p11), %s6452_s10, 4096, %s388_s18, [#allocation9], %s4947_s11, %s4947_s11, %s4948_s9  }
  0x74   : > { %s5171_s30 = sadd.s32 1, %s4938_s24   ;;  %s37_s21 = sadd.s32 1, %s4934_s23 }
  0x75   : > { %s34_s14 = ssub.s32 %s4938_s24, %s5171_s30  ;;  %p44_p13 = scmp.ne.s32.totalorder %s4934_s23, %s4930_s22 }
  0x76   : > { %p35_p4 = scmp.eq.s32.totalorder %s34_s14, 0  ;;  %p45_p8 = scmp.eq.s32.totalorder %s4938_s24, 0 }
  0x77   : > { %p6489_p6 = scmp.eq.s32.totalorder %s5046_s25, 1  ;;  %p4254_p3 = scmp.lt.s32.totalorder %s4938_s24, 2 }
  0x78   : > { %s5187_s20 = scalar_select %p35_p4, %s4934_s23, %s37_s21  }
  0x79   : > { %p5181_p10 = por %p6489_p6, %p44_p13  ;;  %p46_p5 = por %p45_p8, %p44_p13 }
  0x7a   : > { %s404_s26 = sand.u32 1, %s4934_s23   ;;  %s3847_s11 = sshll.u32 %s4938_s24, 10 }
  0x7b   : > { %s3698_s15 = sshll.u32 %s404_s26, 6  ;;  %s5194_s17 = scalar_lea.hbm %s6442_s0, %s3847_s11 }
  0x7c   : > { %s408_s13 = scalar_lea.vmem [#allocation2], %s3698_s15  ;;  %p5198_p11 = pnand %p4254_p3, %p46_p5 }
  0x7d   : > { %s415_s16 = sshll.u32 %s408_s13, 4  ;;  %s5202_s3 = scalar_lea.sflag [#allocation3], %s404_s26  ;;  %s5196_s16 = int_to_ptr.vmem [resolvable:$true] %s415_s16 }
  0x7e   : > { %s4834_s12 = scalar_lea.hbm %s5194_s17, 1024  ;;  %p4836_p9 = pneg %p5198_p11 }
  0x7f   : > { %p4835_p7 = scmp.ne.s32.totalorder %s5194_s17, %s4834_s12  ;;  %s4839_s15 = scalar_lea.hbm %s6442_s0, 2048 }
  0x80   : > { %p4840_p2 = scmp.lt.u32.totalorder %s5194_s17, %s6442_s0  ;;  %p4841_p1 = scmp.lt.u32.totalorder %s4839_s15, %s4834_s12 }
  0x81   : > { %p4837_p12 = pnand %p4836_p9, %p4835_p7  ;;  %p4843_p4 = scmp.lt.u32.totalorder %s4834_s12, %s5194_s17 }
  0x82   : > { %p4842_p13 = por %p4841_p1, %p4840_p2 }
  0x83   : > { %p4838_p0 = pneg %p4837_p12 }
  0x84   : > { %p4844_p8 = por %p4843_p4, %p4842_p13 }
  0x86   : > { %p4845_p6 = pnand %p4844_p8, %p4838_p0 }
  0x88   : > { %4848 = shalt.err (!%p4845_p6)
}
  0x89   : > { %s4849_s26 = scalar_lea.vmem %s5196_s16, 1024  ;;  %s4950_s18 = smov [#allocation2]  }
  0x8a   : > { %p4850_p3 = scmp.ne.s32.totalorder %s5196_s16, %s4849_s26  ;;  %s4854_s13 = sshll.u32 %s4950_s18, 4  ;;  %s4855_s13 = int_to_ptr.vmem [resolvable:$false] %s4854_s13 }
  0x8b   : > { %s4856_s21 = scalar_lea.vmem %s4855_s13, 2048  ;;  %p4857_p12 = scmp.lt.s32.totalorder %s5196_s16, %s4855_s13 }
  0x8c   : > { %p4852_p5 = pnand %p4850_p3, %p4836_p9  ;;  %p4858_p2 = scmp.lt.s32.totalorder %s4856_s21, %s4849_s26 }
  0x8e   : > { %p4853_p7 = pneg %p4852_p5  ;;  %p4859_p1 = por %p4858_p2, %p4857_p12 }
  0x90   : > { %p4860_p13 = pnand %p4859_p1, %p4853_p7 }
  0x92   : > { %4863 = shalt.err (!%p4860_p13)
}
  0x93   : > { %s4951_s12 = smov 128   ;;  %s4952_s14 = smov 8  }
  0x94   : > { %4245 = dma.hbm_to_vmem [thread:$0]  (!%p5198_p11), %s5194_s17, 1024, %s5196_s16, %s5202_s3, %s4951_s12, %s4951_s12, %s4952_s14  }
  0x95   : > { %p6492_p9 = scmp.ne.s32.totalorder %s6485_s29, 0 }
  0x97   : > { %427 = sbr.rel (%p6492_p9) target bundleno = 3839 (0xeff), region = 68 }
  0x9e   : > { %s5233_s15 = sand.u32 1, %s4930_s22   ;;  %p6493_p0 = scmp.ne.s32.totalorder %s6482_s27, 0 }
  0x9f   : > { %s3702_s11 = sshll.u32 %s5233_s15, 6  ;;  %s430_s9 = scalar_lea.sflag [#allocation3], %s5233_s15 }
  0xa0   : > { %s5239_s26 = scalar_lea.vmem [#allocation2], %s3702_s11 }
  0xa1   : > { %4909 = dma.done.wait (%p6493_p0), %s430_s9, 1024  }
  0xa2   : > { %4911 = vsyncadd (%p6493_p0), %s430_s9, 4294966272  ;;  %p6494_p11 = scmp.eq.s32.totalorder %s5046_s25, 0 }
  0xa4   : > { %4913 = dma.done.wait (%p6494_p11), [#allocation6], 4096   ;;  %p6495_p4 = pmov %p6494_p11 }
  0xa6   : > { %4915 = vsyncadd (%p6495_p4), [#allocation6], 4294963200  ;;  %p6496_p8 = pmov %p6495_p4 }
  0xa7   : > { %p6497_p6 = pmov %p6495_p4 }
  0xa8   : > { %4917 = dma.done.wait (%p6496_p8), [#allocation9], 8192  }
  0xa9   : > { %4919 = vsyncadd (%p6497_p6), [#allocation9], 4294959104  ;;  %v5254_v0 = vld [vmem:[%s5239_s26] sm:$0xff]  ;;  %v5257_v1 = vld [vmem:[%s5239_s26 + $0x8] sm:$0xff]  ;;  %v4953_v39 = vmov 0   ;;  %vm1065_vm0 = vcmask 261120  }
  0xaa   : > { %650 = vadd.xlane.f32.xlu0 %v5254_v0  ;;  %v675_v2 = vmul.f32 %v5254_v0, %v5254_v0  ;;  %v676_v3 = vmul.f32 %v5257_v1, %v5257_v1  ;;  %v4370_v4 = vld [vmem:[#allocation5 + $0x4] ss:$12 sps:$4 sm:$0xff]   ;;  %v5269_v6 = vld [vmem:[%s5239_s26 + $0x18] sm:$0xff]  ;;  %v4372_v10 = vld [vmem:[#allocation5] ss:$12 sps:$4 sm:$0xff]   ;;  %947 = vmatprep.mubr.bf16.mxu0 %v4953_v39  ;;  %vm1155_vm1 = vcmask 523264  }
  0xab   : > { %v5265_v5 = vld [vmem:[%s5239_s26 + $0x10] sm:$0xff]  ;;  %915 = vmatprep.subr.bf16.mxu0 %v4370_v4  ;;  %v678_v8 = vmul.f32 %v5269_v6, %v5269_v6  ;;  %v5278_v9 = vld [vmem:[%s5239_s26 + $0x20] sm:$0xff]  ;;  %v5281_v11 = vld [vmem:[%s5239_s26 + $0x28] sm:$0xff]  ;;  %s4954_s28 = smov 96   ;;  %s4955_s3 = smov 64   ;;  %vm2307_vm2 = vcmask 785408  }
  0xac   : > { %683 = vadd.xlane.f32.xlu1 %v675_v2  ;;  %v677_v7 = vmul.f32 %v5265_v5, %v5265_v5  ;;  %916 = vmatpush1.bf16.msra.mxu0 %v4372_v10  ;;  %v4373_v12 = vld [vmem:[#allocation5 + $0x1c] ss:$12 sps:$4 sm:$0xff]   ;;  %v679_v13 = vmul.f32 %v5278_v9, %v5278_v9  ;;  %v4375_v14 = vld [vmem:[#allocation5 + $0x18] ss:$12 sps:$4 sm:$0xff]   ;;  %v680_v15 = vmul.f32 %v5281_v11, %v5281_v11  ;;  %v5290_v16 = vld [vmem:[%s5239_s26 + $0x30] sm:$0xff]  ;;  %s4956_s18 = smov 32  }
  0xad   : > { %917 = vmatprep.subr.bf16.mxu0 %v4373_v12  ;;  %v4376_v17 = vld [vmem:[#allocation5 + $0x34] ss:$12 sps:$4 sm:$0xff]   ;;  %v4379_v19 = vld [vmem:[#allocation5 + $0x30] ss:$12 sps:$4 sm:$0xff]   ;;  %v4380_v21 = vld [vmem:[#allocation5 + $0x4c] ss:$12 sps:$4 sm:$0xff]   ;;  %v681_v23 = vmul.f32 %v5290_v16, %v5290_v16 }
  0xae   : > { %652 = vadd.xlane.f32.xlu0 %v5257_v1  ;;  %v4378_v18 = vld [vmem:[#allocation5 + $0x8] ss:$12 sps:$4 sm:$0xff]   ;;  %v5293_v20 = vld [vmem:[%s5239_s26 + $0x38] sm:$0xff]  ;;  %v4382_v22 = vld [vmem:[#allocation5 + $0x20] ss:$12 sps:$4 sm:$0xff]   ;;  %s6506_s17 = sld [smem:[#allocation36_spill]] }
  0xaf   : > { %4017 = vmatprep.subr.bf16.mxu1 %v4378_v18  ;;  %v4383_v24 = vld [vmem:[#allocation5 + $0x48] ss:$12 sps:$4 sm:$0xff]   ;;  %v682_v25 = vmul.f32 %v5293_v20, %v5293_v20  ;;  %v4384_v26 = vld [vmem:[#allocation5 + $0x64] ss:$12 sps:$4 sm:$0xff]   ;;  %v4387_v28 = vld [vmem:[#allocation5 + $0x60] ss:$12 sps:$4 sm:$0xff]  }
  0xb0   : > { %685 = vadd.xlane.f32.xlu1 %v676_v3  ;;  %918 = vmatpush1.bf16.msra.mxu0 %v4375_v14  ;;  %v4386_v27 = vld [vmem:[#allocation5 + $0x38] ss:$12 sps:$4 sm:$0xff]   ;;  %v4388_v29 = vld [vmem:[#allocation5 + $0x7c] ss:$12 sps:$4 sm:$0xff]   ;;  %v4392_v32 = vld [vmem:[#allocation5 + $0x94] ss:$12 sps:$4 sm:$0xff]  }
  0xb1   : > { %919 = vmatprep.subr.bf16.mxu0 %v4376_v17  ;;  %4018 = vmatpush3.bf16.msra.mxu1 %v4378_v18  ;;  %v4390_v30 = vld [vmem:[#allocation5 + $0x50] ss:$12 sps:$4 sm:$0xff]   ;;  %v4391_v31 = vld [vmem:[#allocation5 + $0x78] ss:$12 sps:$4 sm:$0xff]   ;;  %v4394_v33 = vld [vmem:[#allocation5 + $0x68] ss:$12 sps:$4 sm:$0xff]  }
  0xb2   : > { %654 = vadd.xlane.f32.xlu0 %v5265_v5  ;;  %4019 = vmatprep.subr.bf16.mxu1 %v4382_v22  ;;  %v4395_v34 = vld [vmem:[#allocation5 + $0x90] ss:$12 sps:$4 sm:$0xff]   ;;  %v4396_v35 = vld [vmem:[#allocation5 + $0xac] ss:$12 sps:$4 sm:$0xff]   ;;  %v4399_v37 = vld [vmem:[#allocation5 + $0xa8] ss:$12 sps:$4 sm:$0xff]  }
  0xb3   : > { %v4398_v36 = vld [vmem:[#allocation5 + $0x80] ss:$12 sps:$4 sm:$0xff]   ;;  %v4400_v38 = vld [vmem:[#allocation5 + $0x98] ss:$12 sps:$4 sm:$0xff]   ;;  %v4401_v40 = vld [vmem:[#allocation5 + $0xb0] ss:$12 sps:$4 sm:$0xff]  }
  0xb4   : > { %656 = vadd.xlane.f32.xlu1 %v5269_v6  ;;  %920 = vmatpush1.bf16.msra.mxu0 %v4379_v19  ;;  %s6533_s14 = sld [smem:[#allocation38_spill]]  ;;  %s4957_s27 = smov [#allocation11]  }
  0xb5   : > { %921 = vmatprep.subr.bf16.mxu0 %v4380_v21  ;;  %4020 = vmatpush3.bf16.msra.mxu1 %v4382_v22  ;;  %s4868_s29 = sshll.u32 %s4957_s27, 4  ;;  %s4869_s29 = int_to_ptr.vmem [resolvable:$false] %s4868_s29 }
  0xb6   : > { %687 = vadd.xlane.f32.xlu0 %v677_v7  ;;  %4021 = vmatprep.subr.bf16.mxu1 %v4386_v27 }
  0xb8   : > { %689 = vadd.xlane.f32.xlu1 %v678_v8  ;;  %922 = vmatpush1.bf16.msra.mxu0 %v4383_v24 }
  0xb9   : > { %923 = vmatprep.subr.bf16.mxu0 %v4384_v26  ;;  %4022 = vmatpush3.bf16.msra.mxu1 %v4386_v27 }
  0xba   : > { %658 = vadd.xlane.f32.xlu0 %v5278_v9  ;;  %4023 = vmatprep.subr.bf16.mxu1 %v4390_v30 }
  0xbc   : > { %660 = vadd.xlane.f32.xlu1 %v5281_v11  ;;  %924 = vmatpush1.bf16.msra.mxu0 %v4387_v28 }
  0xbd   : > { %925 = vmatprep.subr.bf16.mxu0 %v4388_v29  ;;  %4024 = vmatpush3.bf16.msra.mxu1 %v4390_v30 }
  0xbe   : > { %691 = vadd.xlane.f32.xlu0 %v679_v13  ;;  %4025 = vmatprep.subr.bf16.mxu1 %v4394_v33 }
  0xc0   : > { %693 = vadd.xlane.f32.xlu1 %v680_v15  ;;  %926 = vmatpush1.bf16.msra.mxu0 %v4391_v31 }
  0xc1   : > { %927 = vmatprep.subr.bf16.mxu0 %v4392_v32  ;;  %4026 = vmatpush3.bf16.msra.mxu1 %v4394_v33 }
  0xc2   : > { %662 = vadd.xlane.f32.xlu0 %v5290_v16  ;;  %4027 = vmatprep.subr.bf16.mxu1 %v4398_v36 }
  0xc4   : > { %664 = vadd.xlane.f32.xlu1 %v5293_v20  ;;  %928 = vmatpush1.bf16.msra.mxu0 %v4395_v34 }
  0xc5   : > { %929 = vmatprep.subr.bf16.mxu0 %v4396_v35  ;;  %4028 = vmatpush3.bf16.msra.mxu1 %v4398_v36  ;;  %v3709_v35 = vld [vmem:[%s6444_s2] ss:$0 sm:$0xff] }
  0xc6   : > { %695 = vadd.xlane.f32.xlu0 %v681_v23  ;;  %4029 = vmatprep.subr.bf16.mxu1 %v4400_v38  ;;  %v5310_v23 = vld [vmem:[%s6443_s1] ss:$0 sm:$0xff] }
  0xc8   : > { %697 = vadd.xlane.f32.xlu1 %v682_v25  ;;  %930 = vmatpush1.bf16.msra.mxu0 %v4399_v37 }
  0xc9   : > { %4030 = vmatpush3.bf16.msra.mxu1 %v4400_v38 }
  0xca   : > { %4031 = vmatprep.subr.bf16.mxu1 %v4401_v40 }
  0xcd   : > { %4032 = vmatpush3.bf16.msra.mxu1 %v4401_v40 }
 0x137   : > { %v651_v41 = vpop.xlane.xlu0 %650 }
 0x138   : > { %v667_v42 = vmul.f32 0.0078125, %v651_v41 }
 0x139   : > { %v684_v43 = vpop.xlane.xlu1 %683 }
 0x13a   : > { %v707_v44 = vmul.f32 %v667_v42, %v667_v42  ;;  %v699_v45 = vmul.f32 0.0078125, %v684_v43  ;;  %v723_v12 = vsub.f32 %v5254_v0, %v667_v42 }
 0x13b   : > { %v653_v46 = vpop.xlane.xlu0 %652 }
 0x13c   : > { %v715_v47 = vsub.f32 %v699_v45, %v707_v44  ;;  %v668_v48 = vmul.f32 0.0078125, %v653_v46 }
 0x13d   : > { %v686_v49 = vpop.xlane.xlu1 %685 }
 0x13e   : > { %v731_v50 = vadd.f32 1e-05, %v715_v47  ;;  %v708_v51 = vmul.f32 %v668_v48, %v668_v48  ;;  %v700_v52 = vmul.f32 0.0078125, %v686_v49  ;;  %v724_v24 = vsub.f32 %v5257_v1, %v668_v48 }
 0x13f   : > { %v655_v53 = vpop.xlane.xlu0 %654 }
 0x140   : > { %4490 = vrsqrt.f32 %v731_v50  ;;  %v716_v54 = vsub.f32 %v700_v52, %v708_v51  ;;  %v669_v55 = vmul.f32 0.0078125, %v655_v53 }
 0x141   : > { %v657_v56 = vpop.xlane.xlu1 %656 }
 0x142   : > { %v732_v57 = vadd.f32 1e-05, %v716_v54  ;;  %v709_v58 = vmul.f32 %v669_v55, %v669_v55  ;;  %v670_v59 = vmul.f32 0.0078125, %v657_v56  ;;  %v725_v40 = vsub.f32 %v5265_v5, %v669_v55 }
 0x143   : > { %v688_v60 = vpop.xlane.xlu0 %687 }
 0x144   : > { %4492 = vrsqrt.f32 %v732_v57  ;;  %v701_v61 = vmul.f32 0.0078125, %v688_v60  ;;  %v710_v63 = vmul.f32 %v670_v59, %v670_v59  ;;  %v726_v47 = vsub.f32 %v5269_v6, %v670_v59 }
 0x145   : > { %v690_v62 = vpop.xlane.xlu1 %689 }
 0x146   : > { %v717_v2 = vsub.f32 %v701_v61, %v709_v58  ;;  %v702_v3 = vmul.f32 0.0078125, %v690_v62 }
 0x147   : > { %v659_v4 = vpop.xlane.xlu0 %658 }
 0x148   : > { %v733_v7 = vadd.f32 1e-05, %v717_v2  ;;  %v718_v8 = vsub.f32 %v702_v3, %v710_v63  ;;  %v5302_v10 = vmul.f32 0.0078125, %v659_v4 }
 0x149   : > { %v661_v13 = vpop.xlane.xlu1 %660 }
 0x14a   : > { %v4491_v14 = vpop.eup %4490  ;;  %4494 = vrsqrt.f32 %v733_v7  ;;  %v734_v15 = vadd.f32 1e-05, %v718_v8  ;;  %v711_v17 = vmul.f32 %v5302_v10, %v5302_v10  ;;  %v672_v18 = vmul.f32 0.0078125, %v661_v13 }
 0x14b   : > { %v692_v19 = vpop.xlane.xlu0 %691  ;;  %v747_v21 = vmul.f32 %v4491_v14, %v723_v12  ;;  %v727_v59 = vsub.f32 %v5278_v9, %v5302_v10 }
 0x14c   : > { %4496 = vrsqrt.f32 %v734_v15  ;;  %v703_v22 = vmul.f32 0.0078125, %v692_v19  ;;  %v712_v26 = vmul.f32 %v672_v18, %v672_v18  ;;  %v728_v63 = vsub.f32 %v5281_v11, %v672_v18 }
 0x14d   : > { %v694_v0 = vpop.xlane.xlu1 %693  ;;  %v761_v31 = vmul.f32 %v5310_v23, %v747_v21 }
 0x14e   : > { %v4493_v25 = vpop.eup %4492  ;;  %v719_v27 = vsub.f32 %v703_v22, %v711_v17  ;;  %v704_v28 = vmul.f32 0.0078125, %v694_v0 }
 0x14f   : > { %v663_v29 = vpop.xlane.xlu0 %662  ;;  %v748_v30 = vmul.f32 %v4493_v25, %v724_v24  ;;  %v775_v43 = vadd.f32 %v3709_v35, %v761_v31 }
 0x150   : > { %v735_v32 = vadd.f32 1e-05, %v719_v27  ;;  %v720_v33 = vsub.f32 %v704_v28, %v712_v26  ;;  %v673_v34 = vmul.f32 0.0078125, %v663_v29 }
 0x151   : > { %v665_v36 = vpop.xlane.xlu1 %664  ;;  %v762_v37 = vmul.f32 %v5310_v23, %v748_v30 }
 0x152   : > { %4498 = vrsqrt.f32 %v735_v32  ;;  %v736_v1 = vadd.f32 1e-05, %v720_v33  ;;  %v713_v38 = vmul.f32 %v673_v34, %v673_v34  ;;  %v674_v41 = vmul.f32 0.0078125, %v665_v36 }
 0x153   : > { %v696_v42 = vpop.xlane.xlu0 %695  ;;  %v776_v44 = vadd.f32 %v3709_v35, %v762_v37  ;;  %v729_v9 = vsub.f32 %v5290_v16, %v673_v34 }
 0x154   : > { %v4495_v45 = vpop.eup %4494  ;;  %4500 = vrsqrt.f32 %v736_v1  ;;  %v705_v46 = vmul.f32 0.0078125, %v696_v42  ;;  %v714_v52 = vmul.f32 %v674_v41, %v674_v41  ;;  %v730_v15 = vsub.f32 %v5293_v20, %v674_v41 }
 0x155   : > { %v698_v48 = vpop.xlane.xlu1 %697  ;;  %v783_v49 = vpack.c.bf16 %v776_v44, %v775_v43  ;;  %v749_v50 = vmul.f32 %v4495_v45, %v725_v40 }
 0x156   : > { %v4497_v51 = vpop.eup %4496  ;;  %v721_v53 = vsub.f32 %v705_v46, %v713_v38  ;;  %v706_v54 = vmul.f32 0.0078125, %v698_v48 }
 0x157   : > { %948 = vmatmul.mubr.bf16.vlgmr.msra.gmra.mrb[0].mxu0 %v783_v49  ;;  %4033 = vmatprep.mubr.bf16.mxu1 %v783_v49  ;;  %v750_v56 = vmul.f32 %v4497_v51, %v726_v47  ;;  %v763_v5 = vmul.f32 %v5310_v23, %v749_v50 }
 0x158   : > { %v737_v55 = vadd.f32 1e-05, %v721_v53  ;;  %v722_v57 = vsub.f32 %v706_v54, %v714_v52  ;;  %957 = vmatprep.mubr.bf16.mxu0 %v4953_v39 }
 0x159   : > { %v764_v58 = vmul.f32 %v5310_v23, %v750_v56  ;;  %v777_v60 = vadd.f32 %v3709_v35, %v763_v5 }
 0x15a   : > { %4502 = vrsqrt.f32 %v737_v55  ;;  %v738_v6 = vadd.f32 1e-05, %v722_v57 }
 0x15b   : > { %v778_v61 = vadd.f32 %v3709_v35, %v764_v58 }
 0x15c   : > { %v4499_v62 = vpop.eup %4498  ;;  %4504 = vrsqrt.f32 %v738_v6 }
 0x15d   : > { %v784_v2 = vpack.c.bf16 %v778_v61, %v777_v60  ;;  %v751_v3 = vmul.f32 %v4499_v62, %v727_v59 }
 0x15e   : > { %v4501_v4 = vpop.eup %4500 }
 0x15f   : > { %958 = vmatmul.mubr.bf16.gmra.mrb[4].mxu0 %v784_v2  ;;  %4034 = vmatmul.mubr.bf16.vlgmr.msra.gmra.mrb[0].mxu1 %v784_v2  ;;  %v752_v7 = vmul.f32 %v4501_v4, %v728_v63  ;;  %v765_v8 = vmul.f32 %v5310_v23, %v751_v3 }
 0x160   : > { %967 = vmatprep.mubr.bf16.mxu0 %v4953_v39 }
 0x161   : > { %v766_v12 = vmul.f32 %v5310_v23, %v752_v7  ;;  %v779_v10 = vadd.f32 %v3709_v35, %v765_v8 }
 0x163   : > { %v780_v13 = vadd.f32 %v3709_v35, %v766_v12 }
 0x164   : > { %v4503_v14 = vpop.eup %4502 }
 0x165   : > { %v785_v11 = vpack.c.bf16 %v780_v13, %v779_v10  ;;  %v753_v17 = vmul.f32 %v4503_v14, %v729_v9 }
 0x166   : > { %v4505_v18 = vpop.eup %4504 }
 0x167   : > { %968 = vmatmul.mubr.bf16.gmra.mrb[8].mxu0 %v785_v11  ;;  %4037 = vmatprep.mubr.bf16.mxu1 %v785_v11  ;;  %v754_v19 = vmul.f32 %v4505_v18, %v730_v15  ;;  %v767_v21 = vmul.f32 %v5310_v23, %v753_v17 }
 0x168   : > { %977 = vmatprep.mubr.bf16.mxu0 %v4953_v39 }
 0x169   : > { %v768_v22 = vmul.f32 %v5310_v23, %v754_v19  ;;  %v781_v24 = vadd.f32 %v3709_v35, %v767_v21 }
 0x16b   : > { %v782_v0 = vadd.f32 %v3709_v35, %v768_v22 }
 0x16d   : > { %v786_v16 = vpack.c.bf16 %v782_v0, %v781_v24 }
 0x16f   : > { %978 = vmatmul.mubr.bf16.gmra.mrb[12].mxu0 %v786_v16  ;;  %4038 = vmatmul.mubr.bf16.gmra.mrb[4].mxu1 %v786_v16 }
 0x22a   : > { %v949_v25 = vpop.f32.mrb[0].mxu0 }
 0x22b   : > { %v951_v26 = vpop.f32.mrb[1].mxu0 }
 0x22c   : > { %v953_v20 = vpop.f32.mrb[2].mxu0 }
 0x22d   : > { %v5334_v27 = vpack.c.bf16 %v953_v20, %v949_v25  ;;  %v955_v28 = vpop.f32.mrb[3].mxu0 }
 0x22e   : > { %v5336_v29 = vpack.c.bf16 %v955_v28, %v951_v26 }
 0x22f   : > { %4049 = vmatprep.mubr.msk.bf16.mxu0 %vm1065_vm0, %v5334_v27 }
 0x230   : > { %4193 = vmatprep.subr.msk.bf16.mxu0 %vm1065_vm0, %v5336_v29  ;;  %v1079_v23 = vsel %vm1065_vm0, %v5336_v29, 0 }
 0x231   : > { %4042 = vmatpush3.bf16.xpose.msra.mxu0 %v1079_v23 }
 0x232   : > { %v959_v30 = vpop.f32.mrb[4].mxu0  ;;  %v4035_v31 = vpop.f32.mrb[0].mxu1 }
 0x233   : > { %v961_v32 = vpop.f32.mrb[5].mxu0  ;;  %v1022_v33 = vpop.f32.mrb[1].mxu1 }
 0x234   : > { %v963_v34 = vpop.f32.mrb[6].mxu0  ;;  %v4036_v35 = vpop.f32.mrb[2].mxu1 }
 0x235   : > { %v5344_v36 = vpack.c.bf16 %v963_v34, %v959_v30  ;;  %v5346_v37 = vpack.c.bf16 %v4036_v35, %v4035_v31  ;;  %v965_v1 = vpop.f32.mrb[7].mxu0  ;;  %v1025_v38 = vpop.f32.mrb[3].mxu1 }
 0x236   : > { %v5348_v40 = vpack.c.bf16 %v965_v1, %v961_v32  ;;  %v5350_v41 = vpack.c.bf16 %v1025_v38, %v1022_v33 }
 0x238   : > { %4194 = vmatprep.subr.msk.bf16.mxu0 %vm1065_vm0, %v5348_v40  ;;  %4057 = vmatprep.subr.bf16.mxu1 %v5350_v41  ;;  %v1082_v42 = vsel %vm1065_vm0, %v5348_v40, 0 }
 0x239   : > { %4044 = vmatpush3.bf16.xpose.msra.mxu0 %v1082_v42  ;;  %4058 = vmatpush3.bf16.msra.mxu1 %v5350_v41 }
 0x23a   : > { %v969_v43 = vpop.f32.mrb[8].mxu0  ;;  %4059 = vmatprep.subr.bf16.mxu1 %v5346_v37 }
 0x23b   : > { %v971_v44 = vpop.f32.mrb[9].mxu0 }
 0x23c   : > { %v973_v45 = vpop.f32.mrb[10].mxu0 }
 0x23d   : > { %v5359_v46 = vpack.c.bf16 %v973_v45, %v969_v43  ;;  %v975_v47 = vpop.f32.mrb[11].mxu0  ;;  %4060 = vmatpush3.bf16.msra.mxu1 %v5346_v37 }
 0x23e   : > { %v5362_v48 = vpack.c.bf16 %v975_v47, %v971_v44 }
 0x240   : > { %4195 = vmatprep.subr.msk.bf16.mxu0 %vm1065_vm0, %v5362_v48  ;;  %v1085_v49 = vsel %vm1065_vm0, %v5362_v48, 0 }
 0x241   : > { %4046 = vmatpush3.bf16.xpose.msra.mxu0 %v1085_v49 }
 0x242   : > { %v979_v50 = vpop.f32.mrb[12].mxu0  ;;  %v4039_v51 = vpop.f32.mrb[4].mxu1 }
 0x243   : > { %v981_v52 = vpop.f32.mrb[13].mxu0  ;;  %v1038_v53 = vpop.f32.mrb[5].mxu1 }
 0x244   : > { %v983_v54 = vpop.f32.mrb[14].mxu0  ;;  %v4040_v56 = vpop.f32.mrb[6].mxu1 }
 0x245   : > { %v5368_v5 = vpack.c.bf16 %v983_v54, %v979_v50  ;;  %v5370_v55 = vpack.c.bf16 %v4040_v56, %v4039_v51  ;;  %v985_v57 = vpop.f32.mrb[15].mxu0  ;;  %v1041_v58 = vpop.f32.mrb[7].mxu1 }
 0x246   : > { %v5372_v6 = vpack.c.bf16 %v985_v57, %v981_v52  ;;  %v5374_v59 = vpack.c.bf16 %v1041_v58, %v1038_v53 }
 0x248   : > { %4196 = vmatprep.subr.msk.bf16.mxu0 %vm1065_vm0, %v5372_v6  ;;  %4061 = vmatprep.subr.bf16.mxu1 %v5374_v59  ;;  %v1088_v60 = vsel %vm1065_vm0, %v5372_v6, 0 }
 0x249   : > { %4048 = vmatpush3.bf16.xpose.msra.mxu0 %v1088_v60  ;;  %4062 = vmatpush3.bf16.msra.mxu1 %v5374_v59 }
 0x24a   : > { %4063 = vmatprep.subr.bf16.mxu1 %v5370_v55 }
 0x24d   : > { %4064 = vmatpush3.bf16.msra.mxu1 %v5370_v55 }
 0x250   : > { %4050 = vmatmul.mubr.msk.bf16.vlgmr.msra.gmra.mrb[16].mxu0 %vm1065_vm0, %v5344_v36 }
 0x251   : > { %4053 = vmatprep.mubr.msk.bf16.mxu0 %vm1065_vm0, %v5359_v46 }
 0x258   : > { %4054 = vmatmul.mubr.msk.bf16.gmra.mrb[20].mxu0 %vm1065_vm0, %v5368_v5 }
 0x323   : > { %v4051_v61 = vpop.f32.mrb[16].mxu0 }
 0x324   : > { %v1124_v62 = vpop.f32.mrb[17].mxu0  ;;  %v1162_v7 = vsel %vm1155_vm1, %v4051_v61, -inf }
 0x325   : > { %v4052_v63 = vpop.f32.mrb[18].mxu0  ;;  %v1156_v2 = vsel %vm1155_vm1, %v1124_v62, -inf }
 0x326   : > { %1157 = vmax.xlane.f32.xlu0 %v1156_v2  ;;  %v1127_v3 = vpop.f32.mrb[19].mxu0  ;;  %v1165_v4 = vsel %vm1155_vm1, %v4052_v63, -inf }
 0x327   : > { %1166 = vmax.xlane.f32.xlu1 %v1165_v4  ;;  %v1159_v8 = vsel %vm1155_vm1, %v1127_v3, -inf }
 0x32a   : > { %1163 = vmax.xlane.f32.xlu0 %v1162_v7 }
 0x32b   : > { %1160 = vmax.xlane.f32.xlu1 %v1159_v8  ;;  %v4055_v12 = vpop.f32.mrb[20].mxu0 }
 0x32c   : > { %v1140_v9 = vpop.f32.mrb[21].mxu0  ;;  %v1174_v11 = vsel %vm1155_vm1, %v4055_v12, -inf }
 0x32d   : > { %v4056_v10 = vpop.f32.mrb[22].mxu0  ;;  %v1168_v13 = vsel %vm1155_vm1, %v1140_v9, -inf }
 0x32e   : > { %1169 = vmax.xlane.f32.xlu0 %v1168_v13  ;;  %v1143_v14 = vpop.f32.mrb[23].mxu0  ;;  %v1177_v15 = vsel %vm1155_vm1, %v4056_v10, -inf }
 0x32f   : > { %1178 = vmax.xlane.f32.xlu1 %v1177_v15  ;;  %v1171_v17 = vsel %vm1155_vm1, %v1143_v14, -inf }
 0x332   : > { %1175 = vmax.xlane.f32.xlu0 %v1174_v11 }
 0x333   : > { %1172 = vmax.xlane.f32.xlu1 %v1171_v17 }
 0x344   : > { %1343 = vrot.lane.b32.xlu1 %v5348_v40, %s4954_s28 }
 0x348   : > { %1345 = vrot.lane.b32.xlu1 %v5362_v48, %s4954_s28 }
 0x3b3   : > { %v1158_v18 = vpop.xlane.xlu0 %1157 }
 0x3b4   : > { %v1167_v19 = vpop.xlane.xlu1 %1166  ;;  %v1180_v22 = vsub.f32 %v1124_v62, %v1158_v18 }
 0x3b5   : > { %v1183_v21 = vsub.f32 %v4052_v63, %v1167_v19 }
 0x3b6   : > { %v1188_v20 = vmul.f32 1.442695, %v1180_v22 }
 0x3b7   : > { %v1194_v24 = vmul.f32 1.442695, %v1183_v21  ;;  %v1164_v0 = vpop.xlane.xlu0 %1163 }
 0x3b8   : > { %v1182_v16 = vsub.f32 %v4051_v61, %v1164_v0  ;;  %v1161_v25 = vpop.xlane.xlu1 %1160 }
 0x3b9   : > { %4506 = vpow2.f32 %v1194_v24  ;;  %v1181_v26 = vsub.f32 %v1127_v3, %v1161_v25 }
 0x3ba   : > { %v1192_v28 = vmul.f32 1.442695, %v1182_v16 }
 0x3bb   : > { %v1190_v23 = vmul.f32 1.442695, %v1181_v26  ;;  %v1170_v42 = vpop.xlane.xlu0 %1169 }
 0x3bc   : > { %4508 = vpow2.f32 %v1192_v28  ;;  %v1179_v43 = vpop.xlane.xlu1 %1178  ;;  %v1184_v52 = vsub.f32 %v1140_v9, %v1170_v42 }
 0x3bd   : > { %4510 = vpow2.f32 %v1190_v23  ;;  %v1187_v44 = vsub.f32 %v4056_v10, %v1179_v43 }
 0x3be   : > { %4512 = vpow2.f32 %v1188_v20  ;;  %v1196_v56 = vmul.f32 1.442695, %v1184_v52 }
 0x3bf   : > { %v1176_v45 = vpop.xlane.xlu0 %1175  ;;  %v1202_v50 = vmul.f32 1.442695, %v1187_v44 }
 0x3c0   : > { %v1173_v47 = vpop.xlane.xlu1 %1172  ;;  %v1186_v49 = vsub.f32 %v4055_v12, %v1176_v45 }
 0x3c1   : > { %v1185_v51 = vsub.f32 %v1143_v14, %v1173_v47  ;;  %4514 = vpow2.f32 %v1202_v50 }
 0x3c2   : > { %v1200_v53 = vmul.f32 1.442695, %v1186_v49 }
 0x3c3   : > { %v5402_v30 = vpop.eup %4506  ;;  %v1198_v54 = vmul.f32 1.442695, %v1185_v51 }
 0x3c4   : > { %v1213_v31 = vsel %vm1155_vm1, %v5402_v30, 0.0  ;;  %4516 = vpow2.f32 %v1200_v53  ;;  %v1344_v4 = vpop.permute.xlu1 %1343 }
 0x3c5   : > { %1214 = vadd.xlane.f32.xlu1 %v1213_v31  ;;  %4518 = vpow2.f32 %v1198_v54  ;;  %v1365_v20 = vsel %vm1065_vm0, %v1344_v4, 0 }
 0x3c6   : > { %v5406_v32 = vpop.eup %4508  ;;  %4520 = vpow2.f32 %v1196_v56 }
 0x3c7   : > { %v5408_v33 = vpop.eup %4510  ;;  %v1210_v34 = vsel %vm1155_vm1, %v5406_v32, 0.0 }
 0x3c8   : > { %v5412_v35 = vpop.eup %4512  ;;  %1211 = vadd.xlane.f32.xlu0 %v1210_v34  ;;  %v1207_v1 = vsel %vm1155_vm1, %v5408_v33, 0.0  ;;  %v1346_v7 = vpop.permute.xlu1 %1345 }
 0x3c9   : > { %1208 = vadd.xlane.f32.xlu1 %v1207_v1  ;;  %v1204_v38 = vsel %vm1155_vm1, %v5412_v35, 0.0  ;;  %v1368_v28 = vsel %vm1065_vm0, %v1346_v7, 0 }
 0x3cb   : > { %v5422_v57 = vpop.eup %4514 }
 0x3cc   : > { %1205 = vadd.xlane.f32.xlu0 %v1204_v38  ;;  %v1225_v60 = vsel %vm1155_vm1, %v5422_v57, 0.0 }
 0x3ce   : > { %v5424_v58 = vpop.eup %4516 }
 0x3cf   : > { %v5428_v61 = vpop.eup %4518  ;;  %v1222_v62 = vsel %vm1155_vm1, %v5424_v58, 0.0 }
 0x3d0   : > { %v5432_v63 = vpop.eup %4520  ;;  %v1219_v2 = vsel %vm1155_vm1, %v5428_v61, 0.0 }
 0x3d1   : > { %v1216_v3 = vsel %vm1155_vm1, %v5432_v63, 0.0 }
 0x3da   : > { %1631 = vrot.lane.b32.xlu1 %v5336_v29, %s4955_s3 }
 0x3e2   : > { %1341 = vrot.lane.b32.xlu0 %v5336_v29, %s4954_s28 }
 0x3fe   : > { %1226 = vadd.xlane.f32.xlu1 %v1225_v60 }
 0x401   : > { %1223 = vadd.xlane.f32.xlu0 %v1222_v62 }
 0x402   : > { %1220 = vadd.xlane.f32.xlu1 %v1219_v2 }
 0x405   : > { %1217 = vadd.xlane.f32.xlu0 %v1216_v3 }
 0x413   : > { %1633 = vrot.lane.b32.xlu1 %v5348_v40, %s4955_s3 }
 0x417   : > { %1331 = vrot.lane.b32.xlu1 %v5344_v36, %s4954_s28 }
 0x41b   : > { %1347 = vrot.lane.b32.xlu0 %v5372_v6, %s4954_s28  ;;  %1333 = vrot.lane.b32.xlu1 %v5359_v46, %s4954_s28 }
 0x41f   : > { %1329 = vrot.lane.b32.xlu0 %v5334_v27, %s4954_s28  ;;  %1637 = vrot.lane.b32.xlu1 %v5372_v6, %s4955_s3 }
 0x423   : > { %1635 = vrot.lane.b32.xlu0 %v5362_v48, %s4955_s3  ;;  %1625 = vrot.lane.b32.xlu1 %v5344_v36, %s4955_s3 }
 0x427   : > { %1335 = vrot.lane.b32.xlu0 %v5368_v5, %s4954_s28  ;;  %1629 = vrot.lane.b32.xlu1 %v5368_v5, %s4955_s3 }
 0x42b   : > { %1623 = vrot.lane.b32.xlu0 %v5334_v27, %s4955_s3 }
 0x42f   : > { %1627 = vrot.lane.b32.xlu0 %v5359_v46, %s4955_s3 }
 0x452   : > { %v1215_v8 = vpop.xlane.xlu1 %1214 }
 0x455   : > { %v1212_v12 = vpop.xlane.xlu0 %1211 }
 0x456   : > { %v1209_v9 = vpop.xlane.xlu1 %1208  ;;  %4522 = vrcp.f32 %v1212_v12 }
 0x457   : > { %4524 = vrcp.f32 %v1209_v9 }
 0x458   : > { %4526 = vrcp.f32 %v1215_v8 }
 0x459   : > { %v1206_v10 = vpop.xlane.xlu0 %1205 }
 0x45a   : > { %4528 = vrcp.f32 %v1206_v10  ;;  %v1632_v13 = vpop.permute.xlu1 %1631 }
 0x45b   : > { %4201 = vmatprep.subr.msk.bf16.mxu0 %vm1065_vm0, %v1632_v13  ;;  %v1652_v14 = vsel %vm1065_vm0, %v1632_v13, 0 }
 0x45c   : > { %4106 = vmatpush3.bf16.xpose.msra.mxu0 %v1652_v14 }
 0x45d   : > { %v1342_v15 = vpop.permute.xlu0 %1341 }
 0x45e   : > { %4197 = vmatprep.subr.msk.bf16.mxu1 %vm1065_vm0, %v1342_v15  ;;  %v1362_v26 = vsel %vm1065_vm0, %v1342_v15, 0 }
 0x460   : > { %v4523_v11 = vpop.eup %4522 }
 0x461   : > { %v4525_v17 = vpop.eup %4524  ;;  %v1238_v21 = vmul.f32 %v4523_v11, %v5406_v32 }
 0x462   : > { %v4527_v18 = vpop.eup %4526  ;;  %v1237_v24 = vmul.f32 %v4525_v17, %v5408_v33 }
 0x463   : > { %v1239_v0 = vmul.f32 %v4527_v18, %v5402_v30 }
 0x464   : > { %v4529_v19 = vpop.eup %4528 }
 0x465   : > { %v1236_v22 = vmul.f32 %v4529_v19, %v5412_v35  ;;  %v1245_v25 = vpack.c.bf16 %v1239_v0, %v1238_v21 }
 0x467   : > { %v1244_v16 = vpack.c.bf16 %v1237_v24, %v1236_v22 }
 0x469   : > { %4065 = vmatprep.mubr.msk.bf16.mxu1 %vm1155_vm1, %v1244_v16 }
 0x46a   : > { %4066 = vmatmul.mubr.msk.bf16.vlgmr.msra.gmra.mrb[8].mxu1 %vm1155_vm1, %v1245_v25 }
 0x46b   : > { %4074 = vmatpush3.bf16.xpose.msra.mxu1 %v1362_v26 }
 0x46c   : > { %4198 = vmatprep.subr.msk.bf16.mxu1 %vm1065_vm0, %v1344_v4 }
 0x473   : > { %4076 = vmatpush3.bf16.xpose.msra.mxu1 %v1365_v20 }
 0x474   : > { %4199 = vmatprep.subr.msk.bf16.mxu1 %vm1065_vm0, %v1346_v7 }
 0x47b   : > { %4078 = vmatpush3.bf16.xpose.msra.mxu1 %v1368_v28 }
 0x48b   : > { %v1227_v23 = vpop.xlane.xlu1 %1226 }
 0x48e   : > { %v1224_v30 = vpop.xlane.xlu0 %1223 }
 0x48f   : > { %v1221_v31 = vpop.xlane.xlu1 %1220  ;;  %4530 = vrcp.f32 %v1224_v30 }
 0x490   : > { %4532 = vrcp.f32 %v1221_v31 }
 0x491   : > { %4534 = vrcp.f32 %v1227_v23 }
 0x492   : > { %v1218_v32 = vpop.xlane.xlu0 %1217 }
 0x493   : > { %4536 = vrcp.f32 %v1218_v32  ;;  %v1634_v33 = vpop.permute.xlu1 %1633 }
 0x494   : > { %4202 = vmatprep.subr.msk.bf16.mxu0 %vm1065_vm0, %v1634_v33  ;;  %v1655_v34 = vsel %vm1065_vm0, %v1634_v33, 0 }
 0x495   : > { %4108 = vmatpush3.bf16.xpose.msra.mxu0 %v1655_v34 }
 0x496   : > { %v1348_v35 = vpop.permute.xlu0 %1347 }
 0x497   : > { %4200 = vmatprep.subr.msk.bf16.mxu1 %vm1065_vm0, %v1348_v35  ;;  %v1332_v1 = vpop.permute.xlu1 %1331  ;;  %v1371_v38 = vsel %vm1065_vm0, %v1348_v35, 0 }
 0x498   : > { %4080 = vmatpush3.bf16.xpose.msra.mxu1 %v1371_v38 }
 0x499   : > { %v4531_v42 = vpop.eup %4530 }
 0x49a   : > { %v1330_v43 = vpop.permute.xlu0 %1329  ;;  %v4533_v44 = vpop.eup %4532  ;;  %v1242_v50 = vmul.f32 %v4531_v42, %v5424_v58 }
 0x49b   : > { %v1334_v45 = vpop.permute.xlu1 %1333  ;;  %v4535_v47 = vpop.eup %4534  ;;  %v1241_v53 = vmul.f32 %v4533_v44, %v5428_v61 }
 0x49c   : > { %v1243_v60 = vmul.f32 %v4535_v47, %v5422_v57 }
 0x49d   : > { %v4537_v49 = vpop.eup %4536 }
 0x49e   : > { %v1636_v51 = vpop.permute.xlu0 %1635  ;;  %v1240_v52 = vmul.f32 %v4537_v49, %v5432_v63  ;;  %v1247_v2 = vpack.c.bf16 %v1243_v60, %v1242_v50 }
 0x49f   : > { %4203 = vmatprep.subr.msk.bf16.mxu0 %vm1065_vm0, %v1636_v51  ;;  %v1638_v54 = vpop.permute.xlu1 %1637  ;;  %v1658_v56 = vsel %vm1065_vm0, %v1636_v51, 0 }
 0x4a0   : > { %4110 = vmatpush3.bf16.xpose.msra.mxu0 %v1658_v56  ;;  %v1246_v62 = vpack.c.bf16 %v1241_v53, %v1240_v52  ;;  %v1661_v61 = vsel %vm1065_vm0, %v1638_v54, 0 }
 0x4a1   : > { %4204 = vmatprep.subr.msk.bf16.mxu0 %vm1065_vm0, %v1638_v54 }
 0x4a2   : > { %v1336_v3 = vpop.permute.xlu0 %1335  ;;  %4069 = vmatprep.mubr.msk.bf16.mxu1 %vm1155_vm1, %v1246_v62 }
 0x4a3   : > { %4070 = vmatmul.mubr.msk.bf16.gmra.mrb[12].mxu1 %vm1155_vm1, %v1247_v2  ;;  %v1626_v57 = vpop.permute.xlu1 %1625 }
 0x4a4   : > { %4081 = vmatprep.mubr.msk.bf16.mxu1 %vm1065_vm0, %v1330_v43 }
 0x4a6   : > { %v1624_v58 = vpop.permute.xlu0 %1623 }
 0x4a7   : > { %4113 = vmatprep.mubr.msk.bf16.mxu0 %vm1065_vm0, %v1624_v58  ;;  %v1630_v4 = vpop.permute.xlu1 %1629 }
 0x4a8   : > { %4112 = vmatpush3.bf16.xpose.msra.mxu0 %v1661_v61 }
 0x4aa   : > { %v1628_v63 = vpop.permute.xlu0 %1627 }
 0x4ab   : > { %4082 = vmatmul.mubr.msk.bf16.vlgmr.msra.gmra.mrb[16].mxu1 %vm1065_vm0, %v1332_v1 }
 0x4ac   : > { %4085 = vmatprep.mubr.msk.bf16.mxu1 %vm1065_vm0, %v1334_v45 }
 0x4af   : > { %4114 = vmatmul.mubr.msk.bf16.vlgmr.msra.gmra.mrb[24].mxu0 %vm1065_vm0, %v1626_v57 }
 0x4b0   : > { %4117 = vmatprep.mubr.msk.bf16.mxu0 %vm1065_vm0, %v1628_v63 }
 0x4b3   : > { %4086 = vmatmul.mubr.msk.bf16.gmra.mrb[20].mxu1 %vm1065_vm0, %v1336_v3 }
 0x4b7   : > { %4118 = vmatmul.mubr.msk.bf16.gmra.mrb[28].mxu0 %vm1065_vm0, %v1630_v4 }
 0x53d   : > { %v5498_v7 = vpop.f32.mrb[8].mxu1 }
 0x53e   : > { %v5500_v8 = vpop.f32.mrb[9].mxu1 }
 0x53f   : > { %v5502_v12 = vpop.f32.mrb[10].mxu1 }
 0x540   : > { %v5504_v9 = vpop.f32.mrb[11].mxu1 }
 0x576   : > { %v5506_v10 = vpop.f32.mrb[12].mxu1 }
 0x577   : > { %v5508_v13 = vpop.f32.mrb[13].mxu1 }
 0x578   : > { %v5510_v14 = vpop.f32.mrb[14].mxu1 }
 0x579   : > { %v5512_v15 = vpop.f32.mrb[15].mxu1 }
 0x57e   : > { %v5514_v11 = vpop.f32.mrb[16].mxu1 }
 0x57f   : > { %v5516_v17 = vpop.f32.mrb[17].mxu1  ;;  %v1444_v44 = vsel %vm1155_vm1, %v5514_v11, -inf }
 0x580   : > { %v5518_v18 = vpop.f32.mrb[18].mxu1  ;;  %v1438_v47 = vsel %vm1155_vm1, %v5516_v17, -inf }
 0x581   : > { %v5520_v19 = vpop.f32.mrb[19].mxu1  ;;  %v1447_v49 = vsel %vm1155_vm1, %v5518_v18, -inf }
 0x582   : > { %v4115_v21 = vpop.f32.mrb[24].mxu0  ;;  %v1441_v45 = vsel %vm1155_vm1, %v5520_v19, -inf }
 0x583   : > { %v1697_v22 = vpop.f32.mrb[25].mxu0  ;;  %v1734_v23 = vsel %vm1155_vm1, %v4115_v21, -inf }
 0x584   : > { %v4116_v24 = vpop.f32.mrb[26].mxu0  ;;  %v1728_v0 = vsel %vm1155_vm1, %v1697_v22, -inf }
 0x585   : > { %1729 = vmax.xlane.f32.xlu0 %v1728_v0  ;;  %v1700_v16 = vpop.f32.mrb[27].mxu0  ;;  %v1737_v32 = vsel %vm1155_vm1, %v4116_v24, -inf }
 0x586   : > { %v5523_v25 = vpop.f32.mrb[20].mxu1  ;;  %v1731_v26 = vsel %vm1155_vm1, %v1700_v16, -inf }
 0x587   : > { %v5526_v20 = vpop.f32.mrb[21].mxu1  ;;  %1732 = vmax.xlane.f32.xlu1 %v1731_v26  ;;  %v1456_v50 = vsel %vm1155_vm1, %v5523_v25, -inf }
 0x588   : > { %v5528_v28 = vpop.f32.mrb[22].mxu1  ;;  %v1450_v51 = vsel %vm1155_vm1, %v5526_v20, -inf }
 0x589   : > { %v5531_v30 = vpop.f32.mrb[23].mxu1  ;;  %1735 = vmax.xlane.f32.xlu0 %v1734_v23 }
 0x58a   : > { %v5533_v31 = vpop.f32.mrb[28].mxu0 }
 0x58b   : > { %1738 = vmax.xlane.f32.xlu1 %v1737_v32  ;;  %v5536_v33 = vpop.f32.mrb[29].mxu0  ;;  %v1746_v42 = vsel %vm1155_vm1, %v5533_v31, -inf }
 0x58c   : > { %v5538_v34 = vpop.f32.mrb[30].mxu0  ;;  %v1740_v35 = vsel %vm1155_vm1, %v5536_v33, -inf }
 0x58d   : > { %1741 = vmax.xlane.f32.xlu0 %v1740_v35  ;;  %v5542_v1 = vpop.f32.mrb[31].mxu0  ;;  %v1749_v43 = vsel %vm1155_vm1, %v5538_v34, -inf }
 0x58e   : > { %v1743_v38 = vsel %vm1155_vm1, %v5542_v1, -inf }
 0x58f   : > { %1744 = vmax.xlane.f32.xlu1 %v1743_v38 }
 0x591   : > { %1747 = vmax.xlane.f32.xlu0 %v1746_v42 }
 0x593   : > { %1750 = vmax.xlane.f32.xlu1 %v1749_v43 }
 0x5a4   : > { %1536 = vrot.lane.b32.xlu1 %v5346_v37, %s4954_s28 }
 0x5a7   : > { %1534 = vrot.lane.b32.xlu0 %v5350_v41, %s4954_s28 }
 0x5c6   : > { %1445 = vmax.xlane.f32.xlu0 %v1444_v44 }
 0x5c8   : > { %1442 = vmax.xlane.f32.xlu1 %v1441_v45 }
 0x5ca   : > { %1439 = vmax.xlane.f32.xlu0 %v1438_v47 }
 0x5ce   : > { %1448 = vmax.xlane.f32.xlu0 %v1447_v49 }
 0x5d2   : > { %1457 = vmax.xlane.f32.xlu0 %v1456_v50 }
 0x5d6   : > { %1451 = vmax.xlane.f32.xlu0 %v1450_v51 }
 0x5ec   : > { %1538 = vrot.lane.b32.xlu0 %v5374_v59, %s4954_s28 }
 0x612   : > { %v1730_v52 = vpop.xlane.xlu0 %1729 }
 0x613   : > { %v1752_v53 = vsub.f32 %v1697_v22, %v1730_v52 }
 0x614   : > { %v1733_v54 = vpop.xlane.xlu1 %1732 }
 0x615   : > { %v1760_v56 = vmul.f32 1.442695, %v1752_v53  ;;  %v1753_v60 = vsub.f32 %v1700_v16, %v1733_v54 }
 0x616   : > { %v1736_v62 = vpop.xlane.xlu0 %1735 }
 0x617   : > { %4538 = vpow2.f32 %v1760_v56  ;;  %v1762_v2 = vmul.f32 1.442695, %v1753_v60  ;;  %v1754_v3 = vsub.f32 %v4115_v21, %v1736_v62  ;;  %v1459_v56 = vsel %vm1155_vm1, %v5528_v28, -inf }
 0x618   : > { %v1739_v58 = vpop.xlane.xlu1 %1738 }
 0x619   : > { %4540 = vpow2.f32 %v1762_v2  ;;  %v1764_v61 = vmul.f32 1.442695, %v1754_v3  ;;  %v1755_v57 = vsub.f32 %v4116_v24, %v1739_v58  ;;  %v1453_v3 = vsel %vm1155_vm1, %v5531_v30, -inf }
 0x61a   : > { %v5568_v63 = vpop.xlane.xlu0 %1741 }
 0x61b   : > { %4542 = vpow2.f32 %v1764_v61  ;;  %v1766_v4 = vmul.f32 1.442695, %v1755_v57  ;;  %v1756_v0 = vsub.f32 %v5536_v33, %v5568_v63 }
 0x61c   : > { %v5572_v26 = vpop.xlane.xlu1 %1744 }
 0x61d   : > { %v1757_v22 = vsub.f32 %v5542_v1, %v5572_v26  ;;  %4544 = vpow2.f32 %v1766_v4 }
 0x61e   : > { %v5576_v16 = vpop.xlane.xlu0 %1747 }
 0x61f   : > { %v1758_v21 = vsub.f32 %v5533_v31, %v5576_v16 }
 0x620   : > { %v5580_v23 = vpop.xlane.xlu1 %1750 }
 0x621   : > { %v5582_v24 = vpop.eup %4538  ;;  %v1759_v32 = vsub.f32 %v5538_v34, %v5580_v23 }
 0x622   : > { %v1535_v35 = vpop.permute.xlu0 %1534  ;;  %v1776_v38 = vsel %vm1155_vm1, %v5582_v24, 0.0 }
 0x623   : > { %v5588_v42 = vpop.eup %4540  ;;  %4089 = vmatprep.subr.bf16.mxu1 %v1535_v35  ;;  %1777 = vadd.xlane.f32.xlu1 %v1776_v38  ;;  %v1774_v33 = vmul.f32 1.442695, %v1759_v32 }
 0x624   : > { %4090 = vmatpush3.bf16.msra.mxu1 %v1535_v35  ;;  %v1537_v43 = vpop.permute.xlu1 %1536  ;;  %v1779_v44 = vsel %vm1155_vm1, %v5588_v42, 0.0 }
 0x625   : > { %v5592_v45 = vpop.eup %4542  ;;  %1780 = vadd.xlane.f32.xlu0 %v1779_v44  ;;  %4091 = vmatprep.subr.bf16.mxu1 %v1537_v43 }
 0x626   : > { %v1782_v47 = vsel %vm1155_vm1, %v5592_v45, 0.0 }
 0x627   : > { %v5596_v49 = vpop.eup %4544 }
 0x628   : > { %4092 = vmatpush3.bf16.msra.mxu1 %v1537_v43  ;;  %v1785_v50 = vsel %vm1155_vm1, %v5596_v49, 0.0 }
 0x629   : > { %1783 = vadd.xlane.f32.xlu0 %v1782_v47 }
 0x62d   : > { %1786 = vadd.xlane.f32.xlu0 %v1785_v50 }
 0x634   : > { %1540 = vrot.lane.b32.xlu1 %v5370_v55, %s4954_s28 }
 0x653   : > { %v1446_v51 = vpop.xlane.xlu0 %1445 }
 0x654   : > { %v1464_v52 = vsub.f32 %v5514_v11, %v1446_v51 }
 0x655   : > { %v1443_v43 = vpop.xlane.xlu1 %1442 }
 0x656   : > { %v1474_v53 = vmul.f32 1.442695, %v1464_v52  ;;  %v1463_v44 = vsub.f32 %v5520_v19, %v1443_v43  ;;  %v1772_v19 = vmul.f32 1.442695, %v1758_v21 }
 0x657   : > { %v1440_v54 = vpop.xlane.xlu0 %1439 }
 0x658   : > { %4546 = vpow2.f32 %v1474_v53  ;;  %v1462_v60 = vsub.f32 %v5516_v17, %v1440_v54  ;;  %1460 = vmax.xlane.f32.xlu1 %v1459_v56  ;;  %v1472_v51 = vmul.f32 1.442695, %v1463_v44  ;;  %v1768_v56 = vmul.f32 1.442695, %v1756_v0 }
 0x65a   : > { %v1470_v62 = vmul.f32 1.442695, %v1462_v60 }
 0x65b   : > { %v1449_v2 = vpop.xlane.xlu0 %1448 }
 0x65c   : > { %4548 = vpow2.f32 %v1470_v62  ;;  %1454 = vmax.xlane.f32.xlu1 %v1453_v3  ;;  %v1465_v38 = vsub.f32 %v5518_v18, %v1449_v2 }
 0x65e   : > { %v1476_v47 = vmul.f32 1.442695, %v1465_v38 }
 0x65f   : > { %v1458_v58 = vpop.xlane.xlu0 %1457 }
 0x660   : > { %v1468_v50 = vsub.f32 %v5523_v25, %v1458_v58  ;;  %4550 = vpow2.f32 %v1476_v47 }
 0x661   : > { %4552 = vpow2.f32 %v1472_v51 }
 0x662   : > { %v5608_v61 = vpop.eup %4546  ;;  %v1482_v53 = vmul.f32 1.442695, %v1468_v50 }
 0x663   : > { %v1452_v11 = vpop.xlane.xlu0 %1451  ;;  %v1492_v57 = vsel %vm1155_vm1, %v5608_v61, 0.0 }
 0x664   : > { %1493 = vadd.xlane.f32.xlu0 %v1492_v57  ;;  %v1466_v52 = vsub.f32 %v5526_v20, %v1452_v11  ;;  %4554 = vpow2.f32 %v1482_v53 }
 0x666   : > { %v5612_v4 = vpop.eup %4548  ;;  %v1478_v54 = vmul.f32 1.442695, %v1466_v52 }
 0x667   : > { %v1539_v35 = vpop.permute.xlu0 %1538  ;;  %v1486_v17 = vsel %vm1155_vm1, %v5612_v4, 0.0 }
 0x668   : > { %1487 = vadd.xlane.f32.xlu0 %v1486_v17  ;;  %4093 = vmatprep.subr.bf16.mxu1 %v1539_v35  ;;  %4556 = vpow2.f32 %v1478_v54 }
 0x669   : > { %4094 = vmatpush3.bf16.msra.mxu1 %v1539_v35  ;;  %4558 = vpow2.f32 %v1768_v56 }
 0x66a   : > { %v5629_v18 = vpop.eup %4550  ;;  %4560 = vpow2.f32 %v1772_v19 }
 0x66b   : > { %v1495_v25 = vsel %vm1155_vm1, %v5629_v18, 0.0  ;;  %v5636_v20 = vpop.eup %4552  ;;  %4562 = vpow2.f32 %v1774_v33 }
 0x66c   : > { %v1489_v0 = vsel %vm1155_vm1, %v5636_v20, 0.0 }
 0x66d   : > { %1822 = vrot.lane.b32.xlu1 %v5346_v37, %s4955_s3 }
 0x66e   : > { %v5641_v63 = vpop.eup %4554 }
 0x66f   : > { %v1504_v16 = vsel %vm1155_vm1, %v5641_v63, 0.0 }
 0x671   : > { %1824 = vrot.lane.b32.xlu1 %v5374_v59, %s4955_s3 }
 0x672   : > { %v5645_v60 = vpop.eup %4556 }
 0x673   : > { %v1498_v31 = vsel %vm1155_vm1, %v5645_v60, 0.0  ;;  %v5651_v21 = vpop.eup %4558 }
 0x674   : > { %v1788_v34 = vsel %vm1155_vm1, %v5651_v21, 0.0  ;;  %v5655_v23 = vpop.eup %4560 }
 0x675   : > { %v1794_v32 = vsel %vm1155_vm1, %v5655_v23, 0.0  ;;  %v5659_v62 = vpop.eup %4562 }
 0x676   : > { %v1797_v2 = vsel %vm1155_vm1, %v5659_v62, 0.0 }
 0x67e   : > { %1820 = vrot.lane.b32.xlu0 %v5350_v41, %s4955_s3 }
 0x695   : > { %1496 = vadd.xlane.f32.xlu1 %v1495_v25 }
 0x699   : > { %1490 = vadd.xlane.f32.xlu1 %v1489_v0 }
 0x69d   : > { %1499 = vadd.xlane.f32.xlu0 %v1498_v31  ;;  %1505 = vadd.xlane.f32.xlu1 %v1504_v16  ;;  %v1770_v31 = vmul.f32 1.442695, %v1757_v22 }
 0x6a1   : > { %1789 = vadd.xlane.f32.xlu0 %v1788_v34 }
 0x6a5   : > { %1795 = vadd.xlane.f32.xlu0 %v1794_v32 }
 0x6a9   : > { %1798 = vadd.xlane.f32.xlu0 %v1797_v2 }
 0x6b0   : > { %v1778_v3 = vpop.xlane.xlu1 %1777 }
 0x6b1   : > { %4564 = vrcp.f32 %v1778_v3 }
 0x6b2   : > { %v1781_v58 = vpop.xlane.xlu0 %1780 }
 0x6b3   : > { %4566 = vrcp.f32 %v1781_v58 }
 0x6b4   : > { %v1541_v11 = vpop.permute.xlu1 %1540 }
 0x6b5   : > { %4095 = vmatprep.subr.bf16.mxu1 %v1541_v11 }
 0x6b6   : > { %v1784_v57 = vpop.xlane.xlu0 %1783  ;;  %4096 = vmatpush3.bf16.msra.mxu1 %v1541_v11 }
 0x6b7   : > { %4568 = vrcp.f32 %v1784_v57 }
 0x6ba   : > { %v1787_v35 = vpop.xlane.xlu0 %1786 }
 0x6bb   : > { %v4565_v17 = vpop.eup %4564  ;;  %4570 = vrcp.f32 %v1787_v35 }
 0x6bc   : > { %v5664_v43 = vmul.f32 %v4565_v17, %v5582_v24 }
 0x6bd   : > { %v4567_v38 = vpop.eup %4566 }
 0x6be   : > { %v5667_v44 = vmul.f32 %v4567_v38, %v5588_v42 }
 0x6bf   : > { %1917 = vrot.lane.b32.xlu0 %v5336_v29, %s4956_s18 }
 0x6c0   : > { %v1816_v47 = vpack.c.bf16 %v5667_v44, %v5664_v43 }
 0x6c1   : > { %v4569_v50 = vpop.eup %4568 }
 0x6c2   : > { %v5676_v52 = vmul.f32 %v4569_v50, %v5592_v45 }
 0x6c3   : > { %1909 = vrot.lane.b32.xlu0 %v5334_v27, %s4956_s18 }
 0x6c5   : > { %v4571_v51 = vpop.eup %4570 }
 0x6c6   : > { %v5679_v24 = vmul.f32 %v4571_v51, %v5596_v49 }
 0x6c7   : > { %1913 = vrot.lane.b32.xlu0 %v5359_v46, %s4956_s18 }
 0x6c8   : > { %v1817_v29 = vpack.c.bf16 %v5679_v24, %v5676_v52 }
 0x6e5   : > { %v1461_v42 = vpop.xlane.xlu1 %1460 }
 0x6e6   : > { %v1469_v53 = vsub.f32 %v5528_v28, %v1461_v42 }
 0x6e8   : > { %v1484_v54 = vmul.f32 1.442695, %v1469_v53 }
 0x6e9   : > { %v1455_v56 = vpop.xlane.xlu1 %1454 }
 0x6ea   : > { %4572 = vpow2.f32 %v1484_v54  ;;  %v1467_v27 = vsub.f32 %v5531_v30, %v1455_v56 }
 0x6ec   : > { %v1480_v19 = vmul.f32 1.442695, %v1467_v27 }
 0x6ed   : > { %v1823_v30 = vpop.permute.xlu1 %1822 }
 0x6ee   : > { %4574 = vpow2.f32 %v1480_v19 }
 0x6ef   : > { %4576 = vpow2.f32 %v1770_v31 }
 0x6f1   : > { %v1494_v45 = vpop.xlane.xlu0 %1493  ;;  %v1825_v16 = vpop.permute.xlu1 %1824 }
 0x6f4   : > { %v5687_v25 = vpop.eup %4572 }
 0x6f5   : > { %v1488_v49 = vpop.xlane.xlu0 %1487  ;;  %v1507_v46 = vsel %vm1155_vm1, %v5687_v25, 0.0 }
 0x6f6   : > { %1508 = vadd.xlane.f32.xlu1 %v1507_v46 }
 0x6f8   : > { %v5691_v33 = vpop.eup %4574 }
 0x6f9   : > { %v1821_v0 = vpop.permute.xlu0 %1820  ;;  %v1501_v28 = vsel %vm1155_vm1, %v5691_v33, 0.0  ;;  %v5700_v2 = vpop.eup %4576 }
 0x6fa   : > { %4121 = vmatprep.subr.bf16.mxu1 %v1821_v0  ;;  %1502 = vadd.xlane.f32.xlu1 %v1501_v28  ;;  %v1791_v58 = vsel %vm1155_vm1, %v5700_v2, 0.0 }
 0x70b   : > { %1826 = vrot.lane.b32.xlu1 %v5370_v55, %s4955_s3 }
 0x722   : > { %v1497_v34 = vpop.xlane.xlu1 %1496 }
 0x723   : > { %4578 = vrcp.f32 %v1497_v34 }
 0x724   : > { %4580 = vrcp.f32 %v1488_v49 }
 0x725   : > { %4582 = vrcp.f32 %v1494_v45 }
 0x726   : > { %v1491_v32 = vpop.xlane.xlu1 %1490 }
 0x727   : > { %4584 = vrcp.f32 %v1491_v32 }
 0x72d   : > { %v4579_v3 = vpop.eup %4578 }
 0x72e   : > { %v4581_v11 = vpop.eup %4580  ;;  %v1521_v1 = vmul.f32 %v4579_v3, %v5629_v18  ;;  %v1506_v18 = vpop.xlane.xlu1 %1505 }
 0x72f   : > { %1792 = vadd.xlane.f32.xlu1 %v1791_v58  ;;  %v4583_v57 = vpop.eup %4582  ;;  %v1518_v26 = vmul.f32 %v4581_v11, %v5612_v4 }
 0x730   : > { %v1520_v17 = vmul.f32 %v4583_v57, %v5608_v61  ;;  %v1500_v61 = vpop.xlane.xlu0 %1499 }
 0x731   : > { %v4585_v35 = vpop.eup %4584 }
 0x732   : > { %v1519_v22 = vmul.f32 %v4585_v35, %v5636_v20  ;;  %v1527_v50 = vpack.c.bf16 %v1521_v1, %v1520_v17 }
 0x734   : > { %v1526_v38 = vpack.c.bf16 %v1519_v22, %v1518_v26  ;;  %v1790_v4 = vpop.xlane.xlu0 %1789 }
 0x736   : > { %4097 = vmatprep.mubr.msk.bf16.mxu1 %vm1155_vm1, %v1526_v38 }
 0x737   : > { %4098 = vmatmul.mubr.msk.bf16.vlgmr.msra.gmra.mrb[24].mxu1 %vm1155_vm1, %v1527_v50 }
 0x738   : > { %4122 = vmatpush3.bf16.msra.mxu1 %v1821_v0  ;;  %v1796_v20 = vpop.xlane.xlu0 %1795 }
 0x739   : > { %4123 = vmatprep.subr.bf16.mxu1 %v1823_v30 }
 0x73c   : > { %4124 = vmatpush3.bf16.msra.mxu1 %v1823_v30 }
 0x73d   : > { %4125 = vmatprep.subr.bf16.mxu1 %v1825_v16 }
 0x740   : > { %4126 = vmatpush3.bf16.msra.mxu1 %v1825_v16  ;;  %1919 = vrot.lane.b32.xlu1 %v5348_v40, %s4956_s18  ;;  %v1799_v40 = vpop.xlane.xlu0 %1798 }
 0x744   : > { %1921 = vrot.lane.b32.xlu1 %v5362_v48, %s4956_s18 }
 0x748   : > { %1923 = vrot.lane.b32.xlu1 %v5372_v6, %s4956_s18  ;;  %v1918_v6 = vpop.permute.xlu0 %1917 }
 0x749   : > { %v1938_v0 = vsel %vm1065_vm0, %v1918_v6, 0 }
 0x74c   : > { %1911 = vrot.lane.b32.xlu1 %v5344_v36, %s4956_s18  ;;  %v1910_v3 = vpop.permute.xlu0 %1909 }
 0x750   : > { %1915 = vrot.lane.b32.xlu1 %v5368_v5, %s4956_s18 }
 0x783   : > { %v1509_v51 = vpop.xlane.xlu1 %1508 }
 0x784   : > { %4586 = vrcp.f32 %v1509_v51 }
 0x785   : > { %4588 = vrcp.f32 %v1500_v61 }
 0x786   : > { %4590 = vrcp.f32 %v1506_v18 }
 0x787   : > { %v1503_v42 = vpop.xlane.xlu1 %1502 }
 0x788   : > { %4592 = vrcp.f32 %v1503_v42 }
 0x789   : > { %4594 = vrcp.f32 %v1799_v40 }
 0x78a   : > { %4596 = vrcp.f32 %v1790_v4 }
 0x78b   : > { %v1827_v48 = vpop.permute.xlu1 %1826  ;;  %4598 = vrcp.f32 %v1796_v20 }
 0x78c   : > { %4127 = vmatprep.subr.bf16.mxu1 %v1827_v48 }
 0x78d   : > { %4128 = vmatpush3.bf16.msra.mxu1 %v1827_v48 }
 0x78e   : > { %4205 = vmatprep.subr.msk.bf16.mxu1 %vm1065_vm0, %v1918_v6  ;;  %v4587_v36 = vpop.eup %4586 }
 0x78f   : > { %v4589_v53 = vpop.eup %4588  ;;  %v1525_v56 = vmul.f32 %v4587_v36, %v5687_v25 }
 0x790   : > { %v4591_v5 = vpop.eup %4590  ;;  %v1522_v27 = vmul.f32 %v4589_v53, %v5645_v60 }
 0x791   : > { %v1524_v45 = vmul.f32 %v4591_v5, %v5641_v63 }
 0x792   : > { %v4593_v54 = vpop.eup %4592 }
 0x793   : > { %v1523_v19 = vmul.f32 %v4593_v54, %v5691_v33  ;;  %v1529_v46 = vpack.c.bf16 %v1525_v56, %v1524_v45  ;;  %v4595_v43 = vpop.eup %4594 }
 0x795   : > { %v1528_v49 = vpack.c.bf16 %v1523_v19, %v1522_v27 }
 0x797   : > { %4101 = vmatprep.mubr.msk.bf16.mxu1 %vm1155_vm1, %v1528_v49 }
 0x798   : > { %4102 = vmatmul.mubr.msk.bf16.gmra.mrb[28].mxu1 %vm1155_vm1, %v1529_v46 }
 0x799   : > { %4129 = vmatprep.mubr.msk.bf16.mxu1 %vm1155_vm1, %v1816_v47  ;;  %v4597_v47 = vpop.eup %4596 }
 0x79a   : > { %v4599_v52 = vpop.eup %4598  ;;  %v1812_v33 = vmul.f32 %v4597_v47, %v5651_v21 }
 0x79b   : > { %v1814_v31 = vmul.f32 %v4599_v52, %v5655_v23 }
 0x7a0   : > { %4130 = vmatmul.mubr.msk.bf16.vlgmr.msra.gmra.mrb[32].mxu1 %vm1155_vm1, %v1817_v29  ;;  %v1815_v29 = vmul.f32 %v4595_v43, %v5659_v62 }
 0x7a1   : > { %4138 = vmatpush3.bf16.xpose.msra.mxu1 %v1938_v0 }
 0x7a2   : > { %v1819_v32 = vpack.c.bf16 %v1815_v29, %v1814_v31 }
 0x7bc   : > { %v1793_v63 = vpop.xlane.xlu1 %1792 }
 0x7bd   : > { %4600 = vrcp.f32 %v1793_v63 }
 0x7c0   : > { %v1920_v60 = vpop.permute.xlu1 %1919 }
 0x7c1   : > { %v1941_v25 = vsel %vm1065_vm0, %v1920_v60, 0  ;;  %4206 = vmatprep.subr.msk.bf16.mxu1 %vm1065_vm0, %v1920_v60 }
 0x7c2   : > { %4140 = vmatpush3.bf16.xpose.msra.mxu1 %v1941_v25 }
 0x7c4   : > { %v1922_v44 = vpop.permute.xlu1 %1921 }
 0x7c5   : > { %4207 = vmatprep.subr.msk.bf16.mxu1 %vm1065_vm0, %v1922_v44  ;;  %v1944_v30 = vsel %vm1065_vm0, %v1922_v44, 0 }
 0x7c7   : > { %v4601_v24 = vpop.eup %4600 }
 0x7c8   : > { %v1813_v28 = vmul.f32 %v4601_v24, %v5700_v2  ;;  %v1924_v16 = vpop.permute.xlu1 %1923  ;;  %v1914_v2 = vpop.permute.xlu0 %1913 }
 0x7c9   : > { %v1947_v21 = vsel %vm1065_vm0, %v1924_v16, 0 }
 0x7ca   : > { %4142 = vmatpush3.bf16.xpose.msra.mxu1 %v1944_v30  ;;  %v1818_v34 = vpack.c.bf16 %v1813_v28, %v1812_v33 }
 0x7cb   : > { %4208 = vmatprep.subr.msk.bf16.mxu1 %vm1065_vm0, %v1924_v16 }
 0x7cc   : > { %4133 = vmatprep.mubr.msk.bf16.mxu1 %vm1155_vm1, %v1818_v34  ;;  %v1912_v62 = vpop.permute.xlu1 %1911 }
 0x7cd   : > { %4134 = vmatmul.mubr.msk.bf16.gmra.mrb[36].mxu1 %vm1155_vm1, %v1819_v32 }
 0x7ce   : > { %4145 = vmatprep.mubr.msk.bf16.mxu1 %vm1065_vm0, %v1910_v3 }
 0x7d0   : > { %v1916_v23 = vpop.permute.xlu1 %1915 }
 0x7d2   : > { %4144 = vmatpush3.bf16.xpose.msra.mxu1 %v1947_v21 }
 0x7d9   : > { %4146 = vmatmul.mubr.msk.bf16.vlgmr.msra.gmra.mrb[40].mxu1 %vm1065_vm0, %v1912_v62 }
 0x7da   : > { %4149 = vmatprep.mubr.msk.bf16.mxu1 %vm1065_vm0, %v1914_v2 }
 0x7e1   : > { %4150 = vmatmul.mubr.msk.bf16.gmra.mrb[44].mxu1 %vm1065_vm0, %v1916_v23 }
 0x7e2   : > { %2804 = vmatprep.mubr.bf16.mxu1 %v4953_v39 }
 0x80a   : > { %v5753_v58 = vpop.f32.mrb[24].mxu1 }
 0x80b   : > { %v5755_v11 = vpop.f32.mrb[25].mxu1 }
 0x80c   : > { %v5757_v57 = vpop.f32.mrb[26].mxu1 }
 0x80d   : > { %v4315_v35 = vpack.i.bf16 %v5757_v57, %v5753_v58  ;;  %v5761_v1 = vpop.f32.mrb[27].mxu1 }
 0x80e   : > { %v4310_v26 = vpack.i.bf16 %v5761_v1, %v5755_v11 }
 0x86b   : > { %v5765_v22 = vpop.f32.mrb[28].mxu1 }
 0x86c   : > { %v5767_v17 = vpop.f32.mrb[29].mxu1 }
 0x86d   : > { %v5769_v38 = vpop.f32.mrb[30].mxu1 }
 0x86e   : > { %v4345_v50 = vpack.i.bf16 %v5769_v38, %v5765_v22  ;;  %v5773_v61 = vpop.f32.mrb[31].mxu1 }
 0x86f   : > { %v4340_v4 = vpack.i.bf16 %v5773_v61, %v5767_v17 }
 0x873   : > { %v5777_v18 = vpop.f32.mrb[32].mxu1 }
 0x874   : > { %v5779_v20 = vpop.f32.mrb[33].mxu1 }
 0x875   : > { %v5781_v51 = vpop.f32.mrb[34].mxu1 }
 0x876   : > { %v4325_v40 = vpack.i.bf16 %v5781_v51, %v5777_v18  ;;  %v5785_v42 = vpop.f32.mrb[35].mxu1 }
 0x877   : > { %v4320_v48 = vpack.i.bf16 %v5785_v42, %v5779_v20 }
 0x8a0   : > { %v5789_v6 = vpop.f32.mrb[36].mxu1 }
 0x8a1   : > { %v5791_v36 = vpop.f32.mrb[37].mxu1 }
 0x8a2   : > { %v5793_v53 = vpop.f32.mrb[38].mxu1 }
 0x8a3   : > { %v4355_v5 = vpack.i.bf16 %v5793_v53, %v5789_v6  ;;  %v5797_v54 = vpop.f32.mrb[39].mxu1 }
 0x8a4   : > { %v4350_v56 = vpack.i.bf16 %v5797_v54, %v5791_v36 }
 0x8ac   : > { %v4147_v27 = vpop.f32.mrb[40].mxu1 }
 0x8ad   : > { %v1983_v19 = vpop.f32.mrb[41].mxu1  ;;  %v2020_v63 = vsel %vm1155_vm1, %v4147_v27, -inf }
 0x8ae   : > { %v4148_v45 = vpop.f32.mrb[42].mxu1  ;;  %v2014_v49 = vsel %vm1155_vm1, %v1983_v19, -inf }
 0x8af   : > { %2015 = vmax.xlane.f32.xlu0 %v2014_v49  ;;  %v1986_v46 = vpop.f32.mrb[43].mxu1  ;;  %v2023_v44 = vsel %vm1155_vm1, %v4148_v45, -inf }
 0x8b0   : > { %v2017_v0 = vsel %vm1155_vm1, %v1986_v46, -inf }
 0x8b1   : > { %2018 = vmax.xlane.f32.xlu1 %v2017_v0 }
 0x8b3   : > { %2021 = vmax.xlane.f32.xlu0 %v2020_v63 }
 0x8b4   : > { %v4151_v60 = vpop.f32.mrb[44].mxu1 }
 0x8b5   : > { %v1999_v25 = vpop.f32.mrb[45].mxu1  ;;  %v2032_v33 = vsel %vm1155_vm1, %v4151_v60, -inf }
 0x8b6   : > { %v4152_v43 = vpop.f32.mrb[46].mxu1  ;;  %v2026_v24 = vsel %vm1155_vm1, %v1999_v25, -inf }
 0x8b7   : > { %2024 = vmax.xlane.f32.xlu0 %v2023_v44  ;;  %v2002_v47 = vpop.f32.mrb[47].mxu1  ;;  %v2035_v29 = vsel %vm1155_vm1, %v4152_v43, -inf }
 0x8b8   : > { %v2029_v52 = vsel %vm1155_vm1, %v2002_v47, -inf }
 0x8b9   : > { %2030 = vmax.xlane.f32.xlu1 %v2029_v52 }
 0x8bb   : > { %2027 = vmax.xlane.f32.xlu0 %v2026_v24 }
 0x8bd   : > { %2036 = vmax.xlane.f32.xlu1 %v2035_v29 }
 0x8bf   : > { %2033 = vmax.xlane.f32.xlu0 %v2032_v33 }
 0x8d5   : > { %2106 = vrot.lane.b32.xlu0 %v5350_v41, %s4956_s18 }
 0x93c   : > { %v2016_v28 = vpop.xlane.xlu0 %2015 }
 0x93d   : > { %v2038_v30 = vsub.f32 %v1983_v19, %v2016_v28 }
 0x93e   : > { %v2019_v31 = vpop.xlane.xlu1 %2018 }
 0x93f   : > { %v2046_v32 = vmul.f32 1.442695, %v2038_v30  ;;  %v2039_v3 = vsub.f32 %v1986_v46, %v2019_v31 }
 0x940   : > { %v2022_v16 = vpop.xlane.xlu0 %2021 }
 0x941   : > { %v2040_v34 = vsub.f32 %v4147_v27, %v2022_v16  ;;  %v2048_v49 = vmul.f32 1.442695, %v2039_v3 }
 0x943   : > { %v2050_v21 = vmul.f32 1.442695, %v2040_v34 }
 0x944   : > { %v2025_v62 = vpop.xlane.xlu0 %2024 }
 0x945   : > { %4602 = vpow2.f32 %v2050_v21  ;;  %v2041_v2 = vsub.f32 %v4148_v45, %v2025_v62 }
 0x946   : > { %v2031_v23 = vpop.xlane.xlu1 %2030  ;;  %4604 = vpow2.f32 %v2046_v32 }
 0x947   : > { %v2052_v0 = vmul.f32 1.442695, %v2041_v2 }
 0x948   : > { %v2028_v63 = vpop.xlane.xlu0 %2027 }
 0x949   : > { %4606 = vpow2.f32 %v2052_v0  ;;  %v2042_v44 = vsub.f32 %v1999_v25, %v2028_v63  ;;  %v2043_v25 = vsub.f32 %v2002_v47, %v2031_v23 }
 0x94a   : > { %4608 = vpow2.f32 %v2048_v49  ;;  %v2037_v41 = vpop.xlane.xlu1 %2036 }
 0x94b   : > { %v2054_v27 = vmul.f32 1.442695, %v2042_v44  ;;  %v2045_v29 = vsub.f32 %v4152_v43, %v2037_v41  ;;  %v2056_v34 = vmul.f32 1.442695, %v2043_v25 }
 0x94c   : > { %v2034_v52 = vpop.xlane.xlu0 %2033 }
 0x94d   : > { %v2044_v19 = vsub.f32 %v4151_v60, %v2034_v52  ;;  %v2060_v31 = vmul.f32 1.442695, %v2045_v29 }
 0x94f   : > { %v5811_v24 = vpop.eup %4602  ;;  %v2058_v46 = vmul.f32 1.442695, %v2044_v19 }
 0x950   : > { %v2107_v33 = vpop.permute.xlu0 %2106  ;;  %v2068_v45 = vsel %vm1155_vm1, %v5811_v24, 0.0  ;;  %v4605_v28 = vpop.eup %4604 }
 0x951   : > { %4610 = vpow2.f32 %v2058_v46  ;;  %2069 = vadd.xlane.f32.xlu0 %v2068_v45  ;;  %4153 = vmatprep.subr.bf16.mxu0 %v2107_v33  ;;  %v2062_v60 = vsel %vm1155_vm1, %v4605_v28, 0.0 }
 0x952   : > { %4154 = vmatpush3.bf16.msra.mxu0 %v2107_v33  ;;  %4612 = vpow2.f32 %v2054_v27 }
 0x953   : > { %v5815_v30 = vpop.eup %4606  ;;  %4614 = vpow2.f32 %v2060_v31 }
 0x954   : > { %v2071_v43 = vsel %vm1155_vm1, %v5815_v30, 0.0  ;;  %v4609_v16 = vpop.eup %4608  ;;  %4616 = vpow2.f32 %v2056_v34  ;;  %v4403_v34 = vld [vmem:[#allocation7 + $0x8] sm:$0xff]  }
 0x955   : > { %2063 = vadd.xlane.f32.xlu0 %v2062_v60  ;;  %2072 = vadd.xlane.f32.xlu1 %v2071_v43  ;;  %v2065_v32 = vsel %vm1155_vm1, %v4609_v16, 0.0 }
 0x959   : > { %2066 = vadd.xlane.f32.xlu1 %v2065_v32  ;;  %v4405_v32 = vld [vmem:[#allocation7 + $0x18] sm:$0xff]  }
 0x95b   : > { %v5821_v3 = vpop.eup %4610 }
 0x95c   : > { %v2080_v47 = vsel %vm1155_vm1, %v5821_v3, 0.0  ;;  %v4613_v21 = vpop.eup %4612 }
 0x95d   : > { %2081 = vadd.xlane.f32.xlu1 %v2080_v47  ;;  %v2074_v62 = vsel %vm1155_vm1, %v4613_v21, 0.0  ;;  %v4615_v2 = vpop.eup %4614  ;;  %v4406_v47 = vld [vmem:[#allocation7 + $0x20] sm:$0xff]  }
 0x95e   : > { %v2083_v23 = vsel %vm1155_vm1, %v4615_v2, 0.0  ;;  %v4617_v49 = vpop.eup %4616 }
 0x95f   : > { %v2077_v0 = vsel %vm1155_vm1, %v4617_v49, 0.0 }
 0x961   : > { %2075 = vadd.xlane.f32.xlu1 %v2074_v62  ;;  %v4409_v62 = vld [vmem:[#allocation7 + $0x38] sm:$0xff]  }
 0x965   : > { %2084 = vadd.xlane.f32.xlu1 %v2083_v23 }
 0x969   : > { %2078 = vadd.xlane.f32.xlu1 %v2077_v0 }
 0x96b   : > { %2110 = vrot.lane.b32.xlu0 %v5374_v59, %s4956_s18 }
 0x96f   : > { %2112 = vrot.lane.b32.xlu0 %v5370_v55, %s4956_s18 }
 0x973   : > { %4311 = vrot.lane.b32.xlu0 %v4310_v26, %s4956_s18 }
 0x977   : > { %4321 = vrot.lane.b32.xlu0 %v4320_v48, %s4955_s3 }
 0x97a   : > { %2108 = vrot.lane.b32.xlu1 %v5346_v37, %s4956_s18 }
 0x97e   : > { %4316 = vrot.lane.b32.xlu1 %v4315_v35, %s4956_s18 }
 0x982   : > { %4326 = vrot.lane.b32.xlu1 %v4325_v40, %s4955_s3 }
 0x9de   : > { %v2070_v55 = vpop.xlane.xlu0 %2069 }
 0x9e2   : > { %v2064_v59 = vpop.xlane.xlu0 %2063  ;;  %v2073_v11 = vpop.xlane.xlu1 %2072 }
 0x9e3   : > { %4618 = vrcp.f32 %v2064_v59 }
 0x9e6   : > { %v2067_v1 = vpop.xlane.xlu1 %2066  ;;  %v2111_v35 = vpop.permute.xlu0 %2110 }
 0x9e7   : > { %4620 = vrcp.f32 %v2067_v1 }
 0x9e8   : > { %4622 = vrcp.f32 %v2073_v11 }
 0x9e9   : > { %4624 = vrcp.f32 %v2070_v55 }
 0x9ea   : > { %v2082_v26 = vpop.xlane.xlu1 %2081  ;;  %v2113_v52 = vpop.permute.xlu0 %2112 }
 0x9ed   : > { %v4619_v42 = vpop.eup %4618 }
 0x9ee   : > { %v2076_v20 = vpop.xlane.xlu1 %2075  ;;  %v2094_v63 = vmul.f32 %v4619_v42, %v4605_v28  ;;  %v4312_v17 = vpop.permute.xlu0 %4311 }
 0x9ef   : > { %4626 = vrcp.f32 %v2076_v20  ;;  %v4313_v61 = vunpack.i.l.bf16 %v4312_v17 }
 0x9f1   : > { %v4621_v37 = vpop.eup %4620  ;;  %v2291_v54 = vsel %vm1065_vm0, %v5500_v8, %v4313_v61 }
 0x9f2   : > { %v2085_v48 = vpop.xlane.xlu1 %2084  ;;  %v2095_v44 = vmul.f32 %v4621_v37, %v4609_v16  ;;  %v4623_v51 = vpop.eup %4622 }
 0x9f3   : > { %v4625_v40 = vpop.eup %4624  ;;  %v2097_v27 = vmul.f32 %v4623_v51, %v5815_v30  ;;  %v4402_v30 = vld [vmem:[#allocation7] sm:$0xff]  }
 0x9f4   : > { %v2102_v58 = vpack.c.bf16 %v2095_v44, %v2094_v63  ;;  %v2096_v46 = vmul.f32 %v4625_v40, %v5811_v24  ;;  %v4404_v24 = vld [vmem:[#allocation7 + $0x10] sm:$0xff]  }
 0x9f6   : > { %4161 = vmatprep.mubr.msk.bf16.mxu0 %vm1155_vm1, %v2102_v58  ;;  %v2079_v57 = vpop.xlane.xlu1 %2078  ;;  %v2103_v45 = vpack.c.bf16 %v2097_v27, %v2096_v46 }
 0x9f7   : > { %4628 = vrcp.f32 %v2079_v57 }
 0x9f8   : > { %4630 = vrcp.f32 %v2085_v48 }
 0x9f9   : > { %4632 = vrcp.f32 %v2082_v26  ;;  %v4627_v41 = vpop.eup %4626 }
 0x9fa   : > { %v2109_v18 = vpop.permute.xlu1 %2108  ;;  %v2098_v33 = vmul.f32 %v4627_v41, %v4613_v21  ;;  %v4407_v21 = vld [vmem:[#allocation7 + $0x28] sm:$0xff]  }
 0x9fb   : > { %4155 = vmatprep.subr.bf16.mxu0 %v2109_v18 }
 0x9fc   : > { %4156 = vmatpush3.bf16.msra.mxu0 %v2109_v18 }
 0x9fd   : > { %4157 = vmatprep.subr.bf16.mxu0 %v2111_v35 }
 0x9fe   : > { %v4317_v22 = vpop.permute.xlu1 %4316 }
 0x9ff   : > { %v4319_v48 = vunpack.i.h.bf16 %v4317_v22  ;;  %v4318_v63 = vunpack.i.l.bf16 %v4317_v22 }
 0xa00   : > { %4158 = vmatpush3.bf16.msra.mxu0 %v2111_v35 }
 0xa01   : > { %v4629_v19 = vpop.eup %4628  ;;  %4159 = vmatprep.subr.bf16.mxu0 %v2113_v52  ;;  %v2294_v58 = vsel %vm1065_vm0, %v5502_v12, %v4319_v48  ;;  %v2293_v57 = vsel %vm1065_vm0, %v5498_v7, %v4318_v63 }
 0xa02   : > { %v2099_v29 = vmul.f32 %v4629_v19, %v4617_v49  ;;  %v4631_v28 = vpop.eup %4630  ;;  %v4327_v38 = vpop.permute.xlu1 %4326 }
 0xa03   : > { %v4633_v31 = vpop.eup %4632  ;;  %v2101_v60 = vmul.f32 %v4631_v28, %v4615_v2  ;;  %v4329_v44 = vunpack.i.h.bf16 %v4327_v38  ;;  %v4328_v6 = vunpack.i.l.bf16 %v4327_v38  ;;  %v4714_v38 = vld [vmem:[%s5239_s26] sm:$0xff] }
 0xa04   : > { %4160 = vmatpush3.bf16.msra.mxu0 %v2113_v52  ;;  %v2104_v25 = vpack.c.bf16 %v2099_v29, %v2098_v33  ;;  %v2100_v43 = vmul.f32 %v4633_v31, %v5821_v3  ;;  %v4408_v3 = vld [vmem:[#allocation7 + $0x30] sm:$0xff]  }
 0xa05   : > { %4169 = vmatprep.subr.bf16.mxu0 %v4402_v30  ;;  %v2301_v40 = vsel %vm1155_vm1, %v2293_v57, %v4328_v6  ;;  %v2302_v41 = vsel %vm1155_vm1, %v2294_v58, %v4329_v44  ;;  %v4717_v57 = vld [vmem:[%s5239_s26 + $0x10] sm:$0xff] }
 0xa06   : > { %v2105_v16 = vpack.c.bf16 %v2101_v60, %v2100_v43 }
 0xa07   : > { %4162 = vmatmul.mubr.msk.bf16.vlgmr.msra.gmra.mrb[32].mxu0 %vm1155_vm1, %v2103_v45 }
 0xa08   : > { %4165 = vmatprep.mubr.msk.bf16.mxu0 %vm1155_vm1, %v2104_v25  ;;  %4170 = vmatpush3.bf16.msra.mxu0 %v4402_v30 }
 0xa09   : > { %4171 = vmatprep.subr.bf16.mxu0 %v4403_v34 }
 0xa0c   : > { %4172 = vmatpush3.bf16.msra.mxu0 %v4403_v34 }
 0xa0d   : > { %4173 = vmatprep.subr.bf16.mxu0 %v4404_v24 }
 0xa0f   : > { %4166 = vmatmul.mubr.msk.bf16.gmra.mrb[36].mxu0 %vm1155_vm1, %v2105_v16 }
 0xa10   : > { %4174 = vmatpush3.bf16.msra.mxu0 %v4404_v24 }
 0xa11   : > { %4175 = vmatprep.subr.bf16.mxu0 %v4405_v32 }
 0xa14   : > { %4176 = vmatpush3.bf16.msra.mxu0 %v4405_v32 }
 0xa15   : > { %4177 = vmatprep.subr.bf16.mxu0 %v4406_v47 }
 0xa18   : > { %4178 = vmatpush3.bf16.msra.mxu0 %v4406_v47 }
 0xa19   : > { %4179 = vmatprep.subr.bf16.mxu0 %v4407_v21 }
 0xa1c   : > { %4180 = vmatpush3.bf16.msra.mxu0 %v4407_v21 }
 0xa1d   : > { %4181 = vmatprep.subr.bf16.mxu0 %v4408_v3 }
 0xa20   : > { %4182 = vmatpush3.bf16.msra.mxu0 %v4408_v3 }
 0xa21   : > { %4183 = vmatprep.subr.bf16.mxu0 %v4409_v62 }
 0xa24   : > { %4184 = vmatpush3.bf16.msra.mxu0 %v4409_v62 }
 0xada   : > { %v4163_v2 = vpop.f32.mrb[32].mxu0 }
 0xadb   : > { %v2164_v23 = vpop.f32.mrb[33].mxu0 }
 0xadc   : > { %v4164_v49 = vpop.f32.mrb[34].mxu0 }
 0xadd   : > { %v4335_v0 = vpack.i.bf16 %v4164_v49, %v4163_v2  ;;  %v2167_v55 = vpop.f32.mrb[35].mxu0 }
 0xade   : > { %v4330_v59 = vpack.i.bf16 %v2167_v55, %v2164_v23 }
 0xadf   : > { %4336 = vrot.lane.b32.xlu1 %v4335_v0, %s4954_s28 }
 0xae0   : > { %4331 = vrot.lane.b32.xlu0 %v4330_v59, %s4954_s28 }
 0xae2   : > { %v4167_v11 = vpop.f32.mrb[36].mxu0 }
 0xae3   : > { %4346 = vrot.lane.b32.xlu1 %v4345_v50, %s4956_s18  ;;  %v2180_v1 = vpop.f32.mrb[37].mxu0  ;;  %v4314_v50 = vunpack.i.h.bf16 %v4312_v17  ;;  %v3766_v17 = vld [vmem:[%s6447_s5] ss:$0 sm:$0xff] }
 0xae4   : > { %4341 = vrot.lane.b32.xlu0 %v4340_v4, %s4956_s18  ;;  %v4168_v26 = vpop.f32.mrb[38].mxu0  ;;  %v4322_v4 = vpop.permute.xlu0 %4321  ;;  %s6368_s18 = scalar_lea.vmem [#allocation11], %s3702_s11  ;;  %s3848_s11 = sshll.u32 %s5046_s25, 10 }
 0xae5   : > { %v4365_v20 = vpack.i.bf16 %v4168_v26, %v4167_v11  ;;  %v2183_v42 = vpop.f32.mrb[39].mxu0  ;;  %v4324_v53 = vunpack.i.h.bf16 %v4322_v4  ;;  %v2292_v36 = vsel %vm1065_vm0, %v5504_v9, %v4314_v50  ;;  %v2326_v50 = vadd.f32 %v4714_v38, %v3766_v17  ;;  %v4443_v38 = vld [vmem:[#allocation8 + $0xa8] ss:$16 sps:$4 sm:$0xff]   ;;  %s3580_s13 = sshll.u32 %s6368_s18, 4  ;;  %s6393_s9 = scalar_lea.hbm %s6533_s14, %s3848_s11  ;;  %s6395_s13 = int_to_ptr.vmem [resolvable:$true] %s3580_s13 }
 0xae6   : > { %v4360_v37 = vpack.i.bf16 %v2183_v42, %v2180_v1  ;;  %s4864_s25 = scalar_lea.vmem %s6395_s13, 1024  ;;  %p4871_p12 = scmp.lt.s32.totalorder %s6395_s13, %s4869_s29 }
 0xae7   : > { %4356 = vrot.lane.b32.xlu1 %v4355_v5, %s4955_s3  ;;  %v4323_v5 = vunpack.i.l.bf16 %v4322_v4  ;;  %v2300_v8 = vsel %vm1155_vm1, %v2292_v36, %v4324_v53  ;;  %v4715_v4 = vld [vmem:[%s5239_s26 + $0x8] sm:$0xff]  ;;  %p4865_p3 = scmp.ne.s32.totalorder %s6395_s13, %s4864_s25 }
 0xae8   : > { %4351 = vrot.lane.b32.xlu0 %v4350_v56, %s4955_s3  ;;  %v2327_v48 = vadd.f32 %v4715_v4, %v3766_v17  ;;  %v4446_v4 = vld [vmem:[#allocation8 + $0xc0] ss:$16 sps:$4 sm:$0xff]   ;;  %s6525_s3 = sld [smem:[#allocation37_spill]] }
 0xae9   : > { %v2299_v19 = vsel %vm1155_vm1, %v2291_v54, %v4323_v5  ;;  %v4716_v5 = vld [vmem:[%s5239_s26 + $0x18] sm:$0xff]  ;;  %p4866_p5 = pnand %p4865_p3, %p5181_p10 }
 0xaea   : > { %v2329_v36 = vadd.f32 %v4716_v5, %v3766_v17  ;;  %v4455_v5 = vld [vmem:[#allocation8 + $0xe8] ss:$16 sps:$4 sm:$0xff]  }
 0xaeb   : > { %4366 = vrot.lane.b32.xlu1 %v4365_v20, %s4954_s28  ;;  %p4867_p7 = pneg %p4866_p5 }
 0xaec   : > { %4361 = vrot.lane.b32.xlu0 %v4360_v37, %s4954_s28 }
 0xb51   : > { %v4337_v56 = vpop.permute.xlu1 %4336 }
 0xb52   : > { %v4339_v35 = vunpack.i.h.bf16 %v4337_v56  ;;  %v4338_v18 = vunpack.i.l.bf16 %v4337_v56  ;;  %v4332_v51 = vpop.permute.xlu0 %4331 }
 0xb53   : > { %v4334_v52 = vunpack.i.h.bf16 %v4332_v51  ;;  %v4333_v9 = vunpack.i.l.bf16 %v4332_v51 }
 0xb54   : > { %v2310_v27 = vsel %vm2307_vm2, %v2301_v40, %v4338_v18  ;;  %v2311_v12 = vsel %vm2307_vm2, %v2302_v41, %v4339_v35  ;;  %v2328_v35 = vadd.f32 %v4717_v57, %v3766_v17  ;;  %v4718_v41 = vld [vmem:[%s5239_s26 + $0x28] sm:$0xff] }
 0xb55   : > { %v2317_v29 = vpack.c.bf16 %v2311_v12, %v2310_v27  ;;  %v4347_v46 = vpop.permute.xlu1 %4346  ;;  %v2308_v7 = vsel %vm2307_vm2, %v2299_v19, %v4333_v9  ;;  %v2309_v33 = vsel %vm2307_vm2, %v2300_v8, %v4334_v52  ;;  %v2331_v52 = vadd.f32 %v4718_v41, %v3766_v17 }
 0xb56   : > { %v4342_v45 = vpop.permute.xlu0 %4341  ;;  %v2316_v28 = vpack.c.bf16 %v2309_v33, %v2308_v7  ;;  %v4349_v25 = vunpack.i.h.bf16 %v4347_v46  ;;  %v4348_v31 = vunpack.i.l.bf16 %v4347_v46  ;;  %v4412_v33 = vld [vmem:[#allocation8 + $0x4] ss:$16 sps:$4 sm:$0xff]  }
 0xb57   : > { %v4344_v43 = vunpack.i.h.bf16 %v4342_v45  ;;  %v4343_v16 = vunpack.i.l.bf16 %v4342_v45  ;;  %v4415_v45 = vld [vmem:[#allocation8 + $0xc] ss:$16 sps:$4 sm:$0xff]   ;;  %2772 = vmatprep.subr.bf16.mxu1 %v4412_v33 }
 0xb58   : > { %4185 = vmatprep.mubr.bf16.mxu0 %v2316_v28  ;;  %v2298_v21 = vsel %vm1065_vm0, %v5510_v14, %v4349_v25  ;;  %v2297_v3 = vsel %vm1065_vm0, %v5506_v10, %v4348_v31  ;;  %v4410_v28 = vld [vmem:[#allocation8] ss:$16 sps:$4 sm:$0xff]   ;;  %v4413_v25 = vld [vmem:[#allocation8 + $0x8] ss:$16 sps:$4 sm:$0xff]   ;;  %2845 = vmatprep.subr.bf16.mxu0 %v4415_v45 }
 0xb59   : > { %v4357_v60 = vpop.permute.xlu1 %4356  ;;  %4186 = vmatmul.mubr.bf16.vlgmr.msra.gmra.mrb[40].mxu0 %v2317_v29  ;;  %v2296_v2 = vsel %vm1065_vm0, %v5512_v15, %v4344_v43  ;;  %v2295_v23 = vsel %vm1065_vm0, %v5508_v13, %v4343_v16  ;;  %v4719_v29 = vld [vmem:[%s5239_s26 + $0x20] sm:$0xff]  ;;  %v4720_v31 = vld [vmem:[%s5239_s26 + $0x38] sm:$0xff]  ;;  %2773 = vmatpush1.bf16.msra.mxu1 %v4410_v28 }
 0xb5a   : > { %v4352_v30 = vpop.permute.xlu0 %4351  ;;  %v4359_v34 = vunpack.i.h.bf16 %v4357_v60  ;;  %v4358_v24 = vunpack.i.l.bf16 %v4357_v60  ;;  %v2330_v46 = vadd.f32 %v4719_v29, %v3766_v17  ;;  %v2333_v60 = vadd.f32 %v4720_v31, %v3766_v17  ;;  %2846 = vmatpush1.bf16.msra.mxu0 %v4413_v25 }
 0xb5b   : > { %v4354_v32 = vunpack.i.h.bf16 %v4352_v30  ;;  %v4353_v47 = vunpack.i.l.bf16 %v4352_v30  ;;  %v4418_v30 = vld [vmem:[#allocation8 + $0x24] ss:$16 sps:$4 sm:$0xff]  }
 0xb5c   : > { %v2305_v59 = vsel %vm1155_vm1, %v2297_v3, %v4358_v24  ;;  %v2306_v11 = vsel %vm1155_vm1, %v2298_v21, %v4359_v34  ;;  %v4421_v34 = vld [vmem:[#allocation8 + $0x2c] ss:$16 sps:$4 sm:$0xff]   ;;  %v4416_v24 = vld [vmem:[#allocation8 + $0x20] ss:$16 sps:$4 sm:$0xff]   ;;  %2774 = vmatprep.subr.bf16.mxu1 %v4418_v30 }
 0xb5d   : > { %v4367_v62 = vpop.permute.xlu1 %4366  ;;  %v2303_v10 = vsel %vm1155_vm1, %v2295_v23, %v4353_v47  ;;  %v2304_v26 = vsel %vm1155_vm1, %v2296_v2, %v4354_v32  ;;  %v4419_v32 = vld [vmem:[#allocation8 + $0x28] ss:$16 sps:$4 sm:$0xff]   ;;  %2847 = vmatprep.subr.bf16.mxu0 %v4421_v34  ;;  %2775 = vmatpush1.bf16.msra.mxu1 %v4416_v24  ;;  %v4721_v21 = vld [vmem:[%s5239_s26 + $0x30] sm:$0xff]  ;;  %v4427_v23 = vld [vmem:[#allocation8 + $0x4c] ss:$16 sps:$4 sm:$0xff]   ;;  %s3567_s26 = scalar_lea.sflag [#allocation4], %s5233_s15 }
 0xb5e   : > { %v4369_v49 = vunpack.i.h.bf16 %v4367_v62  ;;  %v4368_v0 = vunpack.i.l.bf16 %v4367_v62  ;;  %v4362_v55 = vpop.permute.xlu0 %4361  ;;  %v2332_v3 = vadd.f32 %v4721_v21, %v3766_v17  ;;  %2848 = vmatpush1.bf16.msra.mxu0 %v4419_v32  ;;  %v4424_v2 = vld [vmem:[#allocation8 + $0x44] ss:$16 sps:$4 sm:$0xff]   ;;  %v4440_v17 = vld [vmem:[#allocation8 + $0xa0] ss:$16 sps:$4 sm:$0xff]  }
 0xb5f   : > { %v4364_v1 = vunpack.i.h.bf16 %v4362_v55  ;;  %v4363_v14 = vunpack.i.l.bf16 %v4362_v55  ;;  %2776 = vmatprep.subr.bf16.mxu1 %v4424_v2  ;;  %2849 = vmatprep.subr.bf16.mxu0 %v4427_v23 }
 0xb60   : > { %v2314_v15 = vsel %vm2307_vm2, %v2305_v59, %v4368_v0  ;;  %v2315_v20 = vsel %vm2307_vm2, %v2306_v11, %v4369_v49  ;;  %v4422_v49 = vld [vmem:[#allocation8 + $0x40] ss:$16 sps:$4 sm:$0xff]   ;;  %v4425_v0 = vld [vmem:[#allocation8 + $0x48] ss:$16 sps:$4 sm:$0xff]   ;;  %v4430_v11 = vld [vmem:[#allocation8 + $0x64] ss:$16 sps:$4 sm:$0xff]  }
 0xb61   : > { %v2312_v13 = vsel %vm2307_vm2, %v2303_v10, %v4363_v14  ;;  %v2313_v42 = vsel %vm2307_vm2, %v2304_v26, %v4364_v1  ;;  %v2319_v37 = vpack.c.bf16 %v2315_v20, %v2314_v15  ;;  %2777 = vmatpush1.bf16.msra.mxu1 %v4422_v49  ;;  %v4433_v1 = vld [vmem:[#allocation8 + $0x6c] ss:$16 sps:$4 sm:$0xff]   ;;  %v4428_v14 = vld [vmem:[#allocation8 + $0x60] ss:$16 sps:$4 sm:$0xff]   ;;  %v4431_v10 = vld [vmem:[#allocation8 + $0x68] ss:$16 sps:$4 sm:$0xff]  }
 0xb62   : > { %v2318_v22 = vpack.c.bf16 %v2313_v42, %v2312_v13  ;;  %2850 = vmatpush1.bf16.msra.mxu0 %v4425_v0  ;;  %2778 = vmatprep.subr.bf16.mxu1 %v4430_v11  ;;  %v4436_v15 = vld [vmem:[#allocation8 + $0x84] ss:$16 sps:$4 sm:$0xff]   ;;  %v4439_v20 = vld [vmem:[#allocation8 + $0x8c] ss:$16 sps:$4 sm:$0xff]   ;;  %v4434_v13 = vld [vmem:[#allocation8 + $0x80] ss:$16 sps:$4 sm:$0xff]  }
 0xb63   : > { %2851 = vmatprep.subr.bf16.mxu0 %v4433_v1  ;;  %v4437_v42 = vld [vmem:[#allocation8 + $0x88] ss:$16 sps:$4 sm:$0xff]  }
 0xb64   : > { %4189 = vmatprep.mubr.bf16.mxu0 %v2318_v22  ;;  %v4445_v22 = vld [vmem:[#allocation8 + $0xac] ss:$16 sps:$4 sm:$0xff]  }
 0xb65   : > { %4190 = vmatmul.mubr.bf16.gmra.mrb[44].mxu0 %v2319_v37  ;;  %2779 = vmatpush1.bf16.msra.mxu1 %v4428_v14  ;;  %v4442_v37 = vld [vmem:[#allocation8 + $0xa4] ss:$16 sps:$4 sm:$0xff]  }
 0xb66   : > { %2877 = vmatprep.mubr.bf16.mxu0 %v4953_v39  ;;  %2852 = vmatpush1.bf16.msra.mxu0 %v4431_v10 }
 0xb67   : > { %2780 = vmatprep.subr.bf16.mxu1 %v4436_v15  ;;  %2853 = vmatprep.subr.bf16.mxu0 %v4439_v20 }
 0xb69   : > { %2781 = vmatpush1.bf16.msra.mxu1 %v4434_v13  ;;  %v5969_v13 = vld [vmem:[%s6448_s6] ss:$0 sm:$0xff] }
 0xb6a   : > { %2854 = vmatpush1.bf16.msra.mxu0 %v4437_v42  ;;  %2782 = vmatprep.subr.bf16.mxu1 %v4442_v37 }
 0xb6b   : > { %2855 = vmatprep.subr.bf16.mxu0 %v4445_v22 }
 0xb6d   : > { %2783 = vmatpush1.bf16.msra.mxu1 %v4440_v17 }
 0xb6e   : > { %2856 = vmatpush1.bf16.msra.mxu0 %v4443_v38 }
 0xc2c   : > { %v4187_v61 = vpop.f32.mrb[40].mxu0 }
 0xc2d   : > { %v2416_v63 = vpop.f32.mrb[41].mxu0  ;;  %v5933_v19 = vadd.f32 %v4187_v61, %v2328_v35  ;;  %v4451_v61 = vld [vmem:[#allocation8 + $0xcc] ss:$16 sps:$4 sm:$0xff]  }
 0xc2e   : > { %v5915_v44 = vadd.f32 %v2416_v63, %v2326_v50  ;;  %v4188_v6 = vpop.f32.mrb[42].mxu0  ;;  %v4448_v50 = vld [vmem:[#allocation8 + $0xc4] ss:$16 sps:$4 sm:$0xff]   ;;  %2857 = vmatprep.subr.bf16.mxu0 %v4451_v61 }
 0xc2f   : > { %v2419_v53 = vpop.f32.mrb[43].mxu0  ;;  %v5924_v58 = vadd.f32 %v4188_v6, %v2329_v36  ;;  %6501 = vst [vmem:[#allocation21_spill] sm:$0xff] %v5933_v19  ;;  %v2481_v7 = vmul.f32 %v5933_v19, %v5933_v19  ;;  %2784 = vmatprep.subr.bf16.mxu1 %v4448_v50  ;;  %v4454_v63 = vld [vmem:[#allocation8 + $0xe4] ss:$16 sps:$4 sm:$0xff]   ;;  %v4457_v6 = vld [vmem:[#allocation8 + $0xec] ss:$16 sps:$4 sm:$0xff]  }
 0xc30   : > { %6498 = vst [vmem:[#allocation18_spill] sm:$0xff] %v5915_v44  ;;  %v5918_v54 = vadd.f32 %v2419_v53, %v2327_v48  ;;  %2455 = vadd.xlane.f32.xlu0 %v5915_v44  ;;  %v2479_v56 = vmul.f32 %v5915_v44, %v5915_v44  ;;  %v4449_v48 = vld [vmem:[#allocation8 + $0xc8] ss:$16 sps:$4 sm:$0xff]   ;;  %2785 = vmatpush1.bf16.msra.mxu1 %v4446_v4  ;;  %v4452_v53 = vld [vmem:[#allocation8 + $0xe0] ss:$16 sps:$4 sm:$0xff]  }
 0xc31   : > { %6500 = vst [vmem:[#allocation20_spill] sm:$0xff] %v5924_v58  ;;  %v2482_v40 = vmul.f32 %v5924_v58, %v5924_v58  ;;  %2858 = vmatpush1.bf16.msra.mxu0 %v4449_v48  ;;  %2786 = vmatprep.subr.bf16.mxu1 %v4454_v63 }
 0xc32   : > { %6499 = vst [vmem:[#allocation19_spill] sm:$0xff] %v5918_v54  ;;  %2457 = vadd.xlane.f32.xlu1 %v5918_v54  ;;  %v2480_v18 = vmul.f32 %v5918_v54, %v5918_v54  ;;  %2859 = vmatprep.subr.bf16.mxu0 %v4457_v6 }
 0xc34   : > { %2487 = vadd.xlane.f32.xlu0 %v2479_v56  ;;  %2787 = vmatpush1.bf16.msra.mxu1 %v4452_v53 }
 0xc35   : > { %2860 = vmatpush1.bf16.msra.mxu0 %v4455_v5 }
 0xc36   : > { %2461 = vadd.xlane.f32.xlu1 %v5924_v58 }
 0xc38   : > { %2489 = vadd.xlane.f32.xlu0 %v2480_v18  ;;  %v4191_v51 = vpop.f32.mrb[44].mxu0 }
 0xc39   : > { %v2432_v9 = vpop.f32.mrb[45].mxu0  ;;  %v5956_v59 = vadd.f32 %v4191_v51, %v2332_v3 }
 0xc3a   : > { %2493 = vadd.xlane.f32.xlu1 %v2482_v40  ;;  %v4192_v8 = vpop.f32.mrb[46].mxu0  ;;  %v5945_v16 = vadd.f32 %v2432_v9, %v2330_v46 }
 0xc3b   : > { %v2435_v27 = vpop.f32.mrb[47].mxu0  ;;  %v5947_v47 = vadd.f32 %v4192_v8, %v2333_v60  ;;  %6505 = vst [vmem:[#allocation25_spill] sm:$0xff] %v5956_v59  ;;  %v2485_v26 = vmul.f32 %v5956_v59, %v5956_v59 }
 0xc3c   : > { %v5935_v12 = vadd.f32 %v2435_v27, %v2331_v52  ;;  %2459 = vadd.xlane.f32.xlu0 %v5933_v19  ;;  %6503 = vst [vmem:[#allocation23_spill] sm:$0xff] %v5945_v16  ;;  %v2483_v62 = vmul.f32 %v5945_v16, %v5945_v16 }
 0xc3d   : > { %6504 = vst [vmem:[#allocation24_spill] sm:$0xff] %v5947_v47  ;;  %v2486_v55 = vmul.f32 %v5947_v47, %v5947_v47 }
 0xc3e   : > { %6502 = vst [vmem:[#allocation22_spill] sm:$0xff] %v5935_v12  ;;  %2465 = vadd.xlane.f32.xlu1 %v5935_v12  ;;  %v2484_v43 = vmul.f32 %v5935_v12, %v5935_v12 }
 0xc40   : > { %2491 = vadd.xlane.f32.xlu0 %v2481_v7 }
 0xc42   : > { %2497 = vadd.xlane.f32.xlu1 %v2484_v43 }
 0xc44   : > { %2463 = vadd.xlane.f32.xlu0 %v5945_v16 }
 0xc46   : > { %2469 = vadd.xlane.f32.xlu1 %v5947_v47 }
 0xc48   : > { %2495 = vadd.xlane.f32.xlu0 %v2483_v62 }
 0xc4a   : > { %2501 = vadd.xlane.f32.xlu1 %v2486_v55 }
 0xc4c   : > { %2467 = vadd.xlane.f32.xlu0 %v5956_v59 }
 0xc50   : > { %2499 = vadd.xlane.f32.xlu0 %v2485_v26 }
 0xcbd   : > { %v2456_v36 = vpop.xlane.xlu0 %2455 }
 0xcbe   : > { %v2471_v56 = vmul.f32 0.0078125, %v2456_v36  ;;  %v3776_v36 = vld [vmem:[%s6449_s7] ss:$0 sm:$0xff] }
 0xcbf   : > { %v2458_v57 = vpop.xlane.xlu1 %2457 }
 0xcc0   : > { %v2511_v18 = vmul.f32 %v2471_v56, %v2471_v56  ;;  %v2472_v51 = vmul.f32 0.0078125, %v2458_v57  ;;  %v2527_v0 = vsub.f32 %v5915_v44, %v2471_v56 }
 0xcc1   : > { %v2488_v35 = vpop.xlane.xlu0 %2487 }
 0xcc2   : > { %v2503_v40 = vmul.f32 0.0078125, %v2488_v35  ;;  %v2512_v27 = vmul.f32 %v2472_v51, %v2472_v51  ;;  %v2528_v42 = vsub.f32 %v5918_v54, %v2472_v51 }
 0xcc3   : > { %v2462_v41 = vpop.xlane.xlu1 %2461 }
 0xcc4   : > { %v2519_v52 = vsub.f32 %v2503_v40, %v2511_v18  ;;  %v2474_v9 = vmul.f32 0.0078125, %v2462_v41 }
 0xcc5   : > { %v2490_v8 = vpop.xlane.xlu0 %2489 }
 0xcc6   : > { %v2535_v29 = vadd.f32 1e-05, %v2519_v52  ;;  %v2504_v46 = vmul.f32 0.0078125, %v2490_v8  ;;  %v2514_v33 = vmul.f32 %v2474_v9, %v2474_v9  ;;  %v2530_v56 = vsub.f32 %v5924_v58, %v2474_v9 }
 0xcc7   : > { %v2494_v7 = vpop.xlane.xlu1 %2493 }
 0xcc8   : > { %4634 = vrsqrt.f32 %v2535_v29  ;;  %v2520_v45 = vsub.f32 %v2504_v46, %v2512_v27  ;;  %v2506_v28 = vmul.f32 0.0078125, %v2494_v7 }
 0xcc9   : > { %v2460_v25 = vpop.xlane.xlu0 %2459 }
 0xcca   : > { %v2536_v31 = vadd.f32 1e-05, %v2520_v45  ;;  %v2522_v60 = vsub.f32 %v2506_v28, %v2514_v33  ;;  %v2473_v43 = vmul.f32 0.0078125, %v2460_v25 }
 0xccb   : > { %v2466_v30 = vpop.xlane.xlu1 %2465 }
 0xccc   : > { %4636 = vrsqrt.f32 %v2536_v31  ;;  %v2538_v34 = vadd.f32 1e-05, %v2522_v60  ;;  %v5961_v24 = vmul.f32 0.0078125, %v2466_v30  ;;  %v2513_v21 = vmul.f32 %v2473_v43, %v2473_v43 }
 0xccd   : > { %v2492_v32 = vpop.xlane.xlu0 %2491  ;;  %v2529_v29 = vsub.f32 %v5933_v19, %v2473_v43 }
 0xcce   : > { %4638 = vrsqrt.f32 %v2538_v34  ;;  %v2505_v3 = vmul.f32 0.0078125, %v2492_v32  ;;  %v2516_v2 = vmul.f32 %v5961_v24, %v5961_v24  ;;  %v2532_v43 = vsub.f32 %v5935_v12, %v5961_v24 }
 0xccf   : > { %v2498_v62 = vpop.xlane.xlu1 %2497 }
 0xcd0   : > { %v2521_v23 = vsub.f32 %v2505_v3, %v2513_v21  ;;  %v2508_v49 = vmul.f32 0.0078125, %v2498_v62 }
 0xcd1   : > { %v2464_v55 = vpop.xlane.xlu0 %2463 }
 0xcd2   : > { %v4635_v11 = vpop.eup %4634  ;;  %v2537_v1 = vadd.f32 1e-05, %v2521_v23  ;;  %v2524_v14 = vsub.f32 %v2508_v49, %v2516_v2  ;;  %v2475_v10 = vmul.f32 0.0078125, %v2464_v55 }
 0xcd3   : > { %v2551_v26 = vmul.f32 %v4635_v11, %v2527_v0  ;;  %v2470_v15 = vpop.xlane.xlu1 %2469 }
 0xcd4   : > { %4640 = vrsqrt.f32 %v2537_v1  ;;  %v2540_v20 = vadd.f32 1e-05, %v2524_v14  ;;  %v2478_v37 = vmul.f32 0.0078125, %v2470_v15  ;;  %v2515_v38 = vmul.f32 %v2475_v10, %v2475_v10 }
 0xcd5   : > { %v2496_v22 = vpop.xlane.xlu0 %2495  ;;  %v2565_v48 = vmul.f32 %v5969_v13, %v2551_v26  ;;  %v2531_v62 = vsub.f32 %v5945_v16, %v2475_v10 }
 0xcd6   : > { %v4637_v17 = vpop.eup %4636  ;;  %4642 = vrsqrt.f32 %v2540_v20  ;;  %v2507_v50 = vmul.f32 0.0078125, %v2496_v22  ;;  %v2518_v6 = vmul.f32 %v2478_v37, %v2478_v37  ;;  %v2534_v24 = vsub.f32 %v5947_v47, %v2478_v37 }
 0xcd7   : > { %v2552_v61 = vmul.f32 %v4637_v17, %v2528_v42  ;;  %v2502_v4 = vpop.xlane.xlu1 %2501  ;;  %v2579_v41 = vadd.f32 %v3776_v36, %v2565_v48  ;;  %v4460_v48 = vld [vmem:[#allocation10] sm:$0xff]  }
 0xcd8   : > { %v4639_v63 = vpop.eup %4638  ;;  %v2523_v53 = vsub.f32 %v2507_v50, %v2515_v38  ;;  %v2510_v5 = vmul.f32 0.0078125, %v2502_v4  ;;  %v4459_v4 = vld [vmem:[#allocation10 + $0xc0] sm:$0xff]  }
 0xcd9   : > { %v2468_v57 = vpop.xlane.xlu0 %2467  ;;  %v2566_v35 = vmul.f32 %v5969_v13, %v2552_v61  ;;  %v2554_v8 = vmul.f32 %v4639_v63, %v2530_v56  ;;  %v4458_v61 = vld [vmem:[#allocation10 + $0x40] sm:$0xff]   ;;  %3977 = vmatprep.subr.bf16.mxu0 %v4459_v4  ;;  %v4465_v56 = vld [vmem:[#allocation10 + $0x88] sm:$0xff]  }
 0xcda   : > { %v2539_v18 = vadd.f32 1e-05, %v2523_v53  ;;  %v2526_v51 = vsub.f32 %v2510_v5, %v2518_v6  ;;  %v2477_v40 = vmul.f32 0.0078125, %v2468_v57  ;;  %3937 = vmatprep.subr.bf16.mxu1 %v4458_v61  ;;  %v4461_v63 = vld [vmem:[#allocation10 + $0x80] sm:$0xff]   ;;  %v4462_v6 = vld [vmem:[#allocation10 + $0x48] sm:$0xff]   ;;  %v4469_v57 = vld [vmem:[#allocation10 + $0x90] sm:$0xff]  }
 0xcdb   : > { %v2580_v52 = vadd.f32 %v3776_v36, %v2566_v35  ;;  %v2568_v25 = vmul.f32 %v5969_v13, %v2554_v8  ;;  %v4463_v53 = vld [vmem:[#allocation10 + $0xc8] sm:$0xff]   ;;  %v4470_v35 = vld [vmem:[#allocation10 + $0x58] sm:$0xff]   ;;  %v4476_v8 = vld [vmem:[#allocation10 + $0x20] sm:$0xff]  }
 0xcdc   : > { %4644 = vrsqrt.f32 %v2539_v18  ;;  %v2542_v27 = vadd.f32 1e-05, %v2526_v51  ;;  %v2517_v45 = vmul.f32 %v2477_v40, %v2477_v40  ;;  %v2533_v10 = vsub.f32 %v5956_v59, %v2477_v40  ;;  %v4464_v5 = vld [vmem:[#allocation10 + $0x8] sm:$0xff]   ;;  %v4471_v18 = vld [vmem:[#allocation10 + $0xd8] sm:$0xff]  }
 0xcdd   : > { %v2500_v46 = vpop.xlane.xlu0 %2499  ;;  %v2587_v7 = vpack.c.bf16 %v2580_v52, %v2579_v41  ;;  %v2582_v21 = vadd.f32 %v3776_v36, %v2568_v25  ;;  %v4472_v51 = vld [vmem:[#allocation10 + $0x18] sm:$0xff]   ;;  %v4474_v41 = vld [vmem:[#allocation10 + $0x60] sm:$0xff]   ;;  %v4485_v25 = vld [vmem:[#allocation10 + $0xb0] sm:$0xff]  }
 0xcde   : > { %v4641_v33 = vpop.eup %4640  ;;  %4646 = vrsqrt.f32 %v2542_v27  ;;  %v2509_v28 = vmul.f32 0.0078125, %v2500_v46  ;;  %v4473_v40 = vld [vmem:[#allocation10 + $0x98] sm:$0xff]   ;;  %v4475_v52 = vld [vmem:[#allocation10 + $0xe0] sm:$0xff]   ;;  %v4479_v46 = vld [vmem:[#allocation10 + $0xe8] sm:$0xff]  }
 0xcdf   : > { %2805 = vmatmul.mubr.bf16.vlgmr.msra.gmra.mrb[48].mxu1 %v2587_v7  ;;  %2878 = vmatmul.mubr.bf16.vlgmr.msra.gmra.mrb[48].mxu0 %v2587_v7  ;;  %v2553_v9 = vmul.f32 %v4641_v33, %v2529_v29  ;;  %v4477_v27 = vld [vmem:[#allocation10 + $0xa0] sm:$0xff]   ;;  %v4478_v29 = vld [vmem:[#allocation10 + $0x68] sm:$0xff]  }
 0xce0   : > { %v4643_v31 = vpop.eup %4642  ;;  %v2525_v60 = vsub.f32 %v2509_v28, %v2517_v45  ;;  %2814 = vmatprep.mubr.bf16.mxu1 %v4953_v39  ;;  %2887 = vmatprep.mubr.bf16.mxu0 %v4953_v39  ;;  %v4480_v7 = vld [vmem:[#allocation10 + $0x28] sm:$0xff]   ;;  %v4482_v45 = vld [vmem:[#allocation10 + $0x70] sm:$0xff]  }
 0xce1   : > { %v2567_v30 = vmul.f32 %v5969_v13, %v2553_v9  ;;  %v2556_v3 = vmul.f32 %v4643_v31, %v2532_v43  ;;  %3938 = vmatpush3.bf16.msra.mxu1 %v4460_v48  ;;  %3978 = vmatpush3.bf16.msra.mxu0 %v4461_v63  ;;  %v4481_v33 = vld [vmem:[#allocation10 + $0xa8] sm:$0xff]   ;;  %v4483_v28 = vld [vmem:[#allocation10 + $0xf0] sm:$0xff]   ;;  %v4486_v31 = vld [vmem:[#allocation10 + $0x78] sm:$0xff]  }
 0xce2   : > { %v2541_v34 = vadd.f32 1e-05, %v2525_v60  ;;  %3939 = vmatprep.subr.bf16.mxu1 %v4462_v6  ;;  %3979 = vmatprep.subr.bf16.mxu0 %v4463_v53  ;;  %v4484_v9 = vld [vmem:[#allocation10 + $0x30] sm:$0xff]   ;;  %v4487_v60 = vld [vmem:[#allocation10 + $0xf8] sm:$0xff]  }
 0xce3   : > { %v2581_v32 = vadd.f32 %v3776_v36, %v2567_v30  ;;  %v2570_v0 = vmul.f32 %v5969_v13, %v2556_v3  ;;  %v4488_v43 = vld [vmem:[#allocation10 + $0x38] sm:$0xff]  }
 0xce4   : > { %4648 = vrsqrt.f32 %v2541_v34  ;;  %v4489_v30 = vld [vmem:[#allocation10 + $0xb8] sm:$0xff]   ;;  %v2592_v34 = vlaneseq }
 0xce5   : > { %v2588_v2 = vpack.c.bf16 %v2582_v21, %v2581_v32  ;;  %v2584_v14 = vadd.f32 %v3776_v36, %v2570_v0  ;;  %3940 = vmatpush3.bf16.msra.mxu1 %v4464_v5  ;;  %3980 = vmatpush3.bf16.msra.mxu0 %v4465_v56 }
 0xce6   : > { %v4645_v23 = vpop.eup %4644  ;;  %v2593_v32 = vshrl.u32 %v2592_v34, 7 }
 0xce7   : > { %2815 = vmatmul.mubr.bf16.gmra.mrb[52].mxu1 %v2588_v2  ;;  %2888 = vmatmul.mubr.bf16.gmra.mrb[52].mxu0 %v2588_v2  ;;  %v2555_v49 = vmul.f32 %v4645_v23, %v2531_v62  ;;  %v504_v62 = vld [vmem:[%s6506_s17] sm:$0xf]  ;;  %s4870_s17 = scalar_lea.vmem %s4869_s29, 2048 }
 0xce8   : > { %v4647_v55 = vpop.eup %4646  ;;  %2824 = vmatprep.mubr.bf16.mxu1 %v4953_v39  ;;  %2897 = vmatprep.mubr.bf16.mxu0 %v4953_v39  ;;  %v2594_v21 = vsub.s32 0, %v2593_v32  ;;  %v2602_v3 = vsub.s32 2, %v2593_v32  ;;  %v2598_v2 = vsub.s32 1, %v2593_v32  ;;  %v2606_v23 = vsub.s32 3, %v2593_v32  ;;  %p4872_p2 = scmp.lt.s32.totalorder %s4870_s17, %s4864_s25 }
 0xce9   : > { %v2569_v11 = vmul.f32 %v5969_v13, %v2555_v49  ;;  %v2558_v26 = vmul.f32 %v4647_v55, %v2534_v24 }
 0xcea   : > { %v5999_v49 = vrot.slane %v504_v62, %v2594_v21  ;;  %v6001_v0 = vrot.slane %v504_v62, %v2602_v3  ;;  %v6003_v55 = vrot.slane %v504_v62, %v2598_v2  ;;  %v6005_v24 = vrot.slane %v504_v62, %v2606_v23  ;;  %p4873_p1 = por %p4872_p2, %p4871_p12 }
 0xceb   : > { %v2583_v1 = vadd.f32 %v3776_v36, %v2569_v11  ;;  %v2572_v22 = vmul.f32 %v5969_v13, %v2558_v26 }
 0xcec   : > { %p4874_p13 = pnand %p4873_p1, %p4867_p7 }
 0xced   : > { %v2589_v15 = vpack.c.bf16 %v2584_v14, %v2583_v1  ;;  %v2586_v38 = vadd.f32 %v3776_v36, %v2572_v22 }
 0xcee   : > { %v4649_v20 = vpop.eup %4648 }
 0xcef   : > { %2825 = vmatmul.mubr.bf16.gmra.mrb[56].mxu1 %v2589_v15  ;;  %2898 = vmatmul.mubr.bf16.gmra.mrb[56].mxu0 %v2589_v15  ;;  %v2557_v42 = vmul.f32 %v4649_v20, %v2533_v10 }
 0xcf0   : > { %2834 = vmatprep.mubr.bf16.mxu1 %v4953_v39  ;;  %2907 = vmatprep.mubr.bf16.mxu0 %v4953_v39  ;;  %v4466_v39 = vld [vmem:[#allocation10 + $0x50] sm:$0xff]  }
 0xcf1   : > { %v2571_v37 = vmul.f32 %v5969_v13, %v2557_v42  ;;  %v4467_v13 = vld [vmem:[#allocation10 + $0xd0] sm:$0xff]   ;;  %3941 = vmatprep.subr.bf16.mxu1 %v4466_v39 }
 0xcf2   : > { %3981 = vmatprep.subr.bf16.mxu0 %v4467_v13 }
 0xcf3   : > { %v2585_v17 = vadd.f32 %v3776_v36, %v2571_v37  ;;  %v4468_v36 = vld [vmem:[#allocation10 + $0x10] sm:$0xff]   ;;  %3982 = vmatpush3.bf16.msra.mxu0 %v4469_v57 }
 0xcf4   : > { %3942 = vmatpush3.bf16.msra.mxu1 %v4468_v36  ;;  %3983 = vmatprep.subr.bf16.mxu0 %v4471_v18 }
 0xcf5   : > { %v2590_v50 = vpack.c.bf16 %v2586_v38, %v2585_v17  ;;  %3943 = vmatprep.subr.bf16.mxu1 %v4470_v35 }
 0xcf7   : > { %2835 = vmatmul.mubr.bf16.gmra.mrb[60].mxu1 %v2590_v50  ;;  %2908 = vmatmul.mubr.bf16.gmra.mrb[60].mxu0 %v2590_v50 }
 0xcf8   : > { %3944 = vmatpush3.bf16.msra.mxu1 %v4472_v51  ;;  %3984 = vmatpush3.bf16.msra.mxu0 %v4473_v40 }
 0xcf9   : > { %3945 = vmatprep.subr.bf16.mxu1 %v4474_v41  ;;  %3985 = vmatprep.subr.bf16.mxu0 %v4475_v52 }
 0xcfc   : > { %3946 = vmatpush3.bf16.msra.mxu1 %v4476_v8  ;;  %3986 = vmatpush3.bf16.msra.mxu0 %v4477_v27 }
 0xcfd   : > { %3947 = vmatprep.subr.bf16.mxu1 %v4478_v29  ;;  %3987 = vmatprep.subr.bf16.mxu0 %v4479_v46 }
 0xd00   : > { %3948 = vmatpush3.bf16.msra.mxu1 %v4480_v7  ;;  %3988 = vmatpush3.bf16.msra.mxu0 %v4481_v33 }
 0xd01   : > { %3949 = vmatprep.subr.bf16.mxu1 %v4482_v45  ;;  %3989 = vmatprep.subr.bf16.mxu0 %v4483_v28 }
 0xd04   : > { %3950 = vmatpush3.bf16.msra.mxu1 %v4484_v9  ;;  %3990 = vmatpush3.bf16.msra.mxu0 %v4485_v25 }
 0xd05   : > { %3951 = vmatprep.subr.bf16.mxu1 %v4486_v31  ;;  %3991 = vmatprep.subr.bf16.mxu0 %v4487_v60 }
 0xd08   : > { %3952 = vmatpush3.bf16.msra.mxu1 %v4488_v43  ;;  %3992 = vmatpush3.bf16.msra.mxu0 %v4489_v30 }
 0xdb2   : > { %v2806_v11 = vpop.f32.mrb[48].mxu1  ;;  %v2879_v1 = vpop.f32.mrb[48].mxu0 }
 0xdb3   : > { %v2807_v14 = vadd.f32 %v2806_v11, %v5999_v49  ;;  %v2880_v26 = vadd.f32 %v2879_v1, %v6001_v0  ;;  %v2808_v10 = vpop.f32.mrb[49].mxu1  ;;  %v2881_v15 = vpop.f32.mrb[49].mxu0 }
 0xdb4   : > { %v6010_v20 = vadd.f32 %v2808_v10, %v6003_v55  ;;  %v6013_v42 = vadd.f32 %v2881_v15, %v6005_v24  ;;  %v2810_v22 = vpop.f32.mrb[50].mxu1  ;;  %v2883_v37 = vpop.f32.mrb[50].mxu0 }
 0xdb5   : > { %v2950_v17 = vmul.f32 0.044715, %v2807_v14  ;;  %v2952_v38 = vmul.f32 0.044715, %v2880_v26  ;;  %v2811_v61 = vadd.f32 %v2810_v22, %v5999_v49  ;;  %v2884_v4 = vadd.f32 %v2883_v37, %v6001_v0  ;;  %v2812_v48 = vpop.f32.mrb[51].mxu1  ;;  %v2885_v63 = vpop.f32.mrb[51].mxu0 }
 0xdb6   : > { %v2951_v50 = vmul.f32 0.044715, %v6010_v20  ;;  %v2953_v5 = vmul.f32 0.044715, %v6013_v42  ;;  %v6020_v56 = vadd.f32 %v2812_v48, %v6003_v55  ;;  %v6023_v35 = vadd.f32 %v2885_v63, %v6005_v24 }
 0xdb7   : > { %v2982_v6 = vmul.f32 %v2950_v17, %v2807_v14  ;;  %v2984_v53 = vmul.f32 %v2952_v38, %v2880_v26  ;;  %v2954_v39 = vmul.f32 0.044715, %v2811_v61  ;;  %v2956_v57 = vmul.f32 0.044715, %v2884_v4 }
 0xdb8   : > { %v2983_v18 = vmul.f32 %v2951_v50, %v6010_v20  ;;  %v2985_v8 = vmul.f32 %v2953_v5, %v6013_v42  ;;  %v2955_v29 = vmul.f32 0.044715, %v6020_v56  ;;  %v6034_v60 = vmul.f32 0.5, %v2807_v14 }
 0xdb9   : > { %v3014_v13 = vmul.f32 %v2982_v6, %v2807_v14  ;;  %v3016_v36 = vmul.f32 %v2984_v53, %v2880_v26  ;;  %v2986_v51 = vmul.f32 %v2954_v39, %v2811_v61  ;;  %v2988_v27 = vmul.f32 %v2956_v57, %v2884_v4 }
 0xdba   : > { %v2816_v40 = vpop.f32.mrb[52].mxu1  ;;  %v2889_v41 = vpop.f32.mrb[52].mxu0  ;;  %v6036_v43 = vmul.f32 0.5, %v2880_v26  ;;  %v2957_v34 = vmul.f32 0.044715, %v6023_v35  ;;  %v6039_v62 = vmul.f32 0.5, %v2811_v61  ;;  %v6049_v15 = vmul.f32 %v2983_v18, %v6010_v20 }
 0xdbb   : > { %v3046_v52 = vadd.f32 %v3014_v13, %v2807_v14  ;;  %v2818_v46 = vpop.f32.mrb[53].mxu1  ;;  %v2891_v7 = vpop.f32.mrb[53].mxu0  ;;  %v3048_v33 = vadd.f32 %v3016_v36, %v2880_v26  ;;  %v3018_v45 = vmul.f32 %v2986_v51, %v2811_v61  ;;  %v6029_v28 = vadd.f32 %v2816_v40, %v5999_v49 }
 0xdbc   : > { %v6032_v9 = vadd.f32 %v2889_v41, %v6001_v0  ;;  %v2820_v25 = vpop.f32.mrb[54].mxu1  ;;  %v2893_v31 = vpop.f32.mrb[54].mxu0  ;;  %v3020_v30 = vmul.f32 %v2988_v27, %v2884_v4  ;;  %v6041_v23 = vmul.f32 0.5, %v2884_v4  ;;  %v6046_v14 = vadd.f32 %v2818_v46, %v6003_v55 }
 0xdbd   : > { %v2822_v32 = vpop.f32.mrb[55].mxu1  ;;  %v2895_v21 = vpop.f32.mrb[55].mxu0  ;;  %v3078_v3 = vmul.f32 0.7978846, %v3046_v52  ;;  %v3050_v2 = vadd.f32 %v3018_v45, %v2811_v61  ;;  %v2958_v1 = vmul.f32 0.044715, %v6029_v28  ;;  %v6052_v22 = vmul.f32 %v2985_v8, %v6013_v42 }
 0xdbe   : > { %6507 = vst [vmem:[#allocation26_spill] sm:$0xff] %v6032_v9  ;;  %v3052_v11 = vadd.f32 %v3020_v30, %v2884_v4  ;;  %v2960_v10 = vmul.f32 0.044715, %v6032_v9  ;;  %v3080_v26 = vmul.f32 0.7978846, %v3048_v33  ;;  %v2987_v37 = vmul.f32 %v2955_v29, %v6020_v56 }
 0xdbf   : > { %v2989_v17 = vmul.f32 %v2957_v34, %v6023_v35  ;;  %v2959_v38 = vmul.f32 0.044715, %v6046_v14  ;;  %v6058_v50 = vadd.f32 %v2891_v7, %v6005_v24  ;;  %v6061_v61 = vadd.f32 %v2820_v25, %v5999_v49 }
 0xdc0   : > { %4650 = vtanh.f32 %v3078_v3  ;;  %v3082_v4 = vmul.f32 0.7978846, %v3050_v2  ;;  %v3084_v48 = vmul.f32 0.7978846, %v3052_v11  ;;  %v6064_v63 = vadd.f32 %v2893_v31, %v6001_v0 }
 0xdc1   : > { %6508 = vst [vmem:[#allocation27_spill] sm:$0xff] %v6061_v61  ;;  %v2990_v5 = vmul.f32 %v2958_v1, %v6029_v28  ;;  %v2992_v39 = vmul.f32 %v2960_v10, %v6032_v9  ;;  %v2961_v13 = vmul.f32 0.044715, %v6058_v50  ;;  %v2962_v36 = vmul.f32 0.044715, %v6061_v61 }
 0xdc2   : > { %6509 = vst [vmem:[#allocation28_spill] sm:$0xff] %v6064_v63  ;;  %v2826_v6 = vpop.f32.mrb[56].mxu1  ;;  %v2899_v53 = vpop.f32.mrb[56].mxu0  ;;  %v2991_v51 = vmul.f32 %v2959_v38, %v6046_v14  ;;  %v2964_v40 = vmul.f32 0.044715, %v6064_v63  ;;  %v6073_v41 = vadd.f32 %v2822_v32, %v6003_v55  ;;  %v6076_v52 = vadd.f32 %v2895_v21, %v6005_v24 }
 0xdc3   : > { %v2828_v57 = vpop.f32.mrb[57].mxu1  ;;  %v2901_v18 = vpop.f32.mrb[57].mxu0  ;;  %4652 = vtanh.f32 %v3080_v26  ;;  %v6079_v29 = vmul.f32 %v2987_v37, %v6020_v56  ;;  %v6082_v46 = vadd.f32 %v2826_v6, %v5999_v49  ;;  %v6085_v7 = vadd.f32 %v2899_v53, %v6001_v0 }
 0xdc4   : > { %v2830_v8 = vpop.f32.mrb[58].mxu1  ;;  %v2903_v27 = vpop.f32.mrb[58].mxu0  ;;  %4654 = vtanh.f32 %v3082_v4  ;;  %v6088_v25 = vmul.f32 %v2989_v17, %v6023_v35  ;;  %v2993_v31 = vmul.f32 %v2961_v13, %v6058_v50  ;;  %v2963_v30 = vmul.f32 0.044715, %v6073_v41 }
 0xdc5   : > { %v2832_v33 = vpop.f32.mrb[59].mxu1  ;;  %v2905_v45 = vpop.f32.mrb[59].mxu0  ;;  %v6093_v34 = vmul.f32 %v2990_v5, %v6029_v28  ;;  %v2994_v32 = vmul.f32 %v2962_v36, %v6061_v61  ;;  %v2965_v21 = vmul.f32 0.044715, %v6076_v52  ;;  %v6098_v3 = vadd.f32 %v2828_v57, %v6003_v55 }
 0xdc6   : > { %4656 = vtanh.f32 %v3084_v48  ;;  %v6101_v2 = vmul.f32 %v2992_v39, %v6032_v9  ;;  %v6104_v11 = vmul.f32 %v2991_v51, %v6046_v14  ;;  %v2996_v1 = vmul.f32 %v2964_v40, %v6064_v63 }
 0xdc7   : > { %6510 = vst [vmem:[#allocation29_spill] sm:$0xff] %v6093_v34  ;;  %v2966_v10 = vmul.f32 0.044715, %v6082_v46  ;;  %v2968_v26 = vmul.f32 0.044715, %v6085_v7  ;;  %v6110_v37 = vadd.f32 %v2901_v18, %v6005_v24  ;;  %v6113_v17 = vadd.f32 %v2830_v8, %v5999_v49 }
 0xdc8   : > { %6511 = vst [vmem:[#allocation30_spill] sm:$0xff] %v6101_v2  ;;  %v6116_v38 = vmul.f32 %v2993_v31, %v6058_v50  ;;  %v2995_v4 = vmul.f32 %v2963_v30, %v6073_v41  ;;  %v2967_v48 = vmul.f32 0.044715, %v6098_v3  ;;  %v6121_v6 = vadd.f32 %v2903_v27, %v6001_v0 }
 0xdc9   : > { %v6124_v39 = vmul.f32 %v2994_v32, %v6061_v61  ;;  %v2997_v13 = vmul.f32 %v2965_v21, %v6076_v52  ;;  %v2969_v36 = vmul.f32 0.044715, %v6110_v37  ;;  %v2970_v57 = vmul.f32 0.044715, %v6113_v17 }
 0xdca   : > { %v2836_v53 = vpop.f32.mrb[60].mxu1  ;;  %v2909_v5 = vpop.f32.mrb[60].mxu0  ;;  %v2972_v8 = vmul.f32 0.044715, %v6121_v6  ;;  %v6133_v27 = vadd.f32 %v2832_v33, %v6003_v55  ;;  %v6136_v31 = vadd.f32 %v2905_v45, %v6005_v24  ;;  %v6142_v47 = vmul.f32 %v2996_v1, %v6064_v63 }
 0xdcb   : > { %6512 = vst [vmem:[#allocation31_spill] sm:$0xff] %v6124_v39  ;;  %v2838_v18 = vpop.f32.mrb[61].mxu1  ;;  %v2911_v51 = vpop.f32.mrb[61].mxu0  ;;  %v6139_v30 = vadd.f32 %v2836_v53, %v5999_v49  ;;  %v2998_v59 = vmul.f32 %v2966_v10, %v6082_v46  ;;  %v3000_v12 = vmul.f32 %v2968_v26, %v6085_v7  ;;  %v6147_v16 = vadd.f32 %v2909_v5, %v6001_v0 }
 0xdcc   : > { %v6129_v40 = vpop.eup %4650  ;;  %v2840_v32 = vpop.f32.mrb[62].mxu1  ;;  %6513 = vst [vmem:[#allocation32_spill] sm:$0xff] %v6142_v47  ;;  %v6150_v45 = vmul.f32 %v2995_v4, %v6073_v41  ;;  %v2971_v53 = vmul.f32 0.044715, %v6133_v27  ;;  %v2973_v19 = vmul.f32 0.044715, %v6136_v31  ;;  %v6156_v44 = vmul.f32 %v2997_v13, %v6076_v52 }
 0xdcd   : > { %v2913_v21 = vpop.f32.mrb[62].mxu0  ;;  %6514 = vst [vmem:[#allocation33_spill] sm:$0xff] %v6147_v16  ;;  %v2842_v33 = vpop.f32.mrb[63].mxu1  ;;  %v2974_v54 = vmul.f32 0.044715, %v6139_v30  ;;  %v2999_v10 = vmul.f32 %v2967_v48, %v6098_v3  ;;  %v6161_v5 = vadd.f32 %v2838_v18, %v6003_v55  ;;  %v3001_v4 = vmul.f32 %v2969_v36, %v6110_v37 }
 0xdce   : > { %v2915_v58 = vpop.f32.mrb[63].mxu0  ;;  %v4653_v1 = vpop.eup %4652  ;;  %v2976_v26 = vmul.f32 0.044715, %v6147_v16  ;;  %v3002_v63 = vmul.f32 %v2970_v57, %v6113_v17  ;;  %v3004_v2 = vmul.f32 %v2972_v8, %v6121_v6  ;;  %v3003_v9 = vmul.f32 %v2971_v53, %v6133_v27 }
 0xdcf   : > { %v4655_v47 = vpop.eup %4654  ;;  %v3005_v39 = vmul.f32 %v2973_v19, %v6136_v31  ;;  %v2975_v13 = vmul.f32 0.044715, %v6161_v5  ;;  %v6170_v48 = vadd.f32 %v2911_v51, %v6005_v24  ;;  %v6173_v61 = vadd.f32 %v2840_v32, %v5999_v49 }
 0xdd0   : > { %v4657_v18 = vpop.eup %4656  ;;  %v6176_v34 = vmul.f32 %v2998_v59, %v6082_v46  ;;  %v6179_v36 = vmul.f32 %v3000_v12, %v6085_v7  ;;  %v3006_v57 = vmul.f32 %v2974_v54, %v6139_v30  ;;  %v6183_v8 = vadd.f32 %v2913_v21, %v6001_v0 }
 0xdd1   : > { %v6186_v19 = vmul.f32 %v2999_v10, %v6098_v3  ;;  %v3008_v51 = vmul.f32 %v2976_v26, %v6147_v16  ;;  %v3007_v49 = vmul.f32 %v2975_v13, %v6161_v5  ;;  %v2977_v32 = vmul.f32 0.044715, %v6170_v48 }
 0xdd2   : > { %v6192_v59 = vmul.f32 %v3001_v4, %v6110_v37  ;;  %v6195_v12 = vmul.f32 %v3002_v63, %v6113_v17  ;;  %v2978_v54 = vmul.f32 0.044715, %v6173_v61  ;;  %v2980_v0 = vmul.f32 0.044715, %v6183_v8 }
 0xdd3   : > { %v6200_v21 = vmul.f32 %v3004_v2, %v6121_v6  ;;  %v6203_v53 = vmul.f32 %v3003_v9, %v6133_v27  ;;  %v6206_v10 = vmul.f32 %v3005_v39, %v6136_v31  ;;  %v6209_v26 = vadd.f32 %v2842_v33, %v6003_v55 }
 0xdd4   : > { %v6212_v4 = vmul.f32 %v3006_v57, %v6139_v30  ;;  %v3009_v63 = vmul.f32 %v2977_v32, %v6170_v48  ;;  %v6216_v13 = vadd.f32 %v2915_v58, %v6005_v24  ;;  %v3047_v2 = vadd.f32 %v6049_v15, %v6010_v20 }
 0xdd5   : > { %v6221_v9 = vmul.f32 %v3008_v51, %v6147_v16  ;;  %v6224_v39 = vmul.f32 %v3007_v49, %v6161_v5  ;;  %v6227_v55 = vmul.f32 0.5, %v6010_v20  ;;  %v3051_v33 = vadd.f32 %v6079_v29, %v6020_v56 }
 0xdd6   : > { %v3010_v57 = vmul.f32 %v2978_v54, %v6173_v61  ;;  %v3012_v58 = vmul.f32 %v2980_v0, %v6183_v8  ;;  %v6234_v24 = vmul.f32 0.5, %v6020_v56  ;;  %v3079_v15 = vmul.f32 0.7978846, %v3047_v2 }
 0xdd7   : > { %6515 = vst [vmem:[#allocation34_spill] sm:$0xff] %v6221_v9  ;;  %v2979_v51 = vmul.f32 0.044715, %v6209_v26  ;;  %v3083_v32 = vmul.f32 0.7978846, %v3051_v33  ;;  %v3049_v49 = vadd.f32 %v6052_v22, %v6013_v42  ;;  %v3053_v20 = vadd.f32 %v6088_v25, %v6023_v35 }
 0xdd8   : > { %v6242_v9 = vmul.f32 %v3009_v63, %v6170_v48  ;;  %v2981_v29 = vmul.f32 0.044715, %v6216_v13  ;;  %4658 = vtanh.f32 %v3079_v15  ;;  %v3142_v54 = vadd.f32 1.0, %v6129_v40 }
 0xdd9   : > { %4660 = vtanh.f32 %v3083_v32  ;;  %v3081_v56 = vmul.f32 0.7978846, %v3049_v49  ;;  %v3085_v0 = vmul.f32 0.7978846, %v3053_v20  ;;  %v3146_v2 = vadd.f32 1.0, %v4655_v47 }
 0xdda   : > { %v6247_v33 = vmul.f32 %v3010_v57, %v6173_v61  ;;  %v6250_v22 = vmul.f32 0.5, %v6013_v42  ;;  %v3144_v16 = vadd.f32 1.0, %v4653_v1  ;;  %v3148_v25 = vadd.f32 1.0, %v4657_v18 }
 0xddb   : > { %4662 = vtanh.f32 %v3081_v56  ;;  %v6253_v63 = vmul.f32 %v3142_v54, %v6034_v60  ;;  %v6256_v15 = vmul.f32 %v3146_v2, %v6039_v62  ;;  %v3055_v40 = vadd.f32 %v6104_v11, %v6046_v14  ;;  %v6517_v54 = vld [vmem:[#allocation27_spill] sm:$0xff]  ;;  %v6519_v2 = vld [vmem:[#allocation26_spill] sm:$0xff] }
 0xddc   : > { %4664 = vtanh.f32 %v3085_v0  ;;  %v6261_v47 = vmul.f32 %v3144_v16, %v6036_v43  ;;  %v6264_v57 = vmul.f32 %v3148_v25, %v6041_v23  ;;  %v3059_v42 = vadd.f32 %v6150_v45, %v6073_v41  ;;  %v6518_v56 = vld [vmem:[#allocation31_spill] sm:$0xff]  ;;  %v6520_v25 = vld [vmem:[#allocation30_spill] sm:$0xff] }
 0xddd   : > { %v3011_v1 = vmul.f32 %v2979_v51, %v6209_v26  ;;  %v3013_v60 = vmul.f32 %v2981_v29, %v6216_v13  ;;  %v3206_v62 = vpack.c.bf16 %v6256_v15, %v6253_v63  ;;  %v3087_v18 = vmul.f32 0.7978846, %v3055_v40  ;;  %v6516_v51 = vld [vmem:[#allocation29_spill] sm:$0xff] }
 0xdde   : > { %v3208_v11 = vpack.c.bf16 %v6264_v57, %v6261_v47  ;;  %v3091_v32 = vmul.f32 0.7978846, %v3059_v42  ;;  %v3057_v16 = vadd.f32 %v6116_v38, %v6058_v50  ;;  %v3061_v43 = vadd.f32 %v6156_v44, %v6076_v52  ;;  %v6521_v42 = vld [vmem:[#allocation28_spill] sm:$0xff] }
 0xddf   : > { %v6279_v23 = vmul.f32 %v3012_v58, %v6183_v8  ;;  %v2925_v45 = vmul.f32 0.5, %v6023_v35  ;;  %4666 = vtanh.f32 %v3087_v18  ;;  %v3054_v49 = vadd.f32 %v6516_v51, %v6029_v28  ;;  %v6522_v18 = vld [vmem:[#allocation32_spill] sm:$0xff] }
 0xde0   : > { %4668 = vtanh.f32 %v3091_v32  ;;  %v3089_v20 = vmul.f32 0.7978846, %v3057_v16  ;;  %v3093_v29 = vmul.f32 0.7978846, %v3061_v43  ;;  %v3058_v0 = vadd.f32 %v6518_v56, %v6517_v54 }
 0xde1   : > { %v6287_v38 = vmul.f32 %v3011_v1, %v6209_v26  ;;  %v6290_v44 = vmul.f32 %v3013_v60, %v6216_v13  ;;  %v3086_v58 = vmul.f32 0.7978846, %v3054_v49  ;;  %v3056_v35 = vadd.f32 %v6520_v25, %v6519_v2 }
 0xde2   : > { %v4659_v63 = vpop.eup %4658  ;;  %v2927_v15 = vmul.f32 0.5, %v6046_v14  ;;  %4670 = vtanh.f32 %v3089_v20  ;;  %v3090_v40 = vmul.f32 0.7978846, %v3058_v0  ;;  %v3060_v32 = vadd.f32 %v6522_v18, %v6521_v42 }
 0xde3   : > { %v4661_v16 = vpop.eup %4660  ;;  %v3143_v43 = vadd.f32 1.0, %v4659_v63  ;;  %v2931_v1 = vmul.f32 0.5, %v6073_v41  ;;  %4672 = vtanh.f32 %v3093_v29  ;;  %v3088_v51 = vmul.f32 0.7978846, %v3056_v35 }
 0xde4   : > { %v3147_v60 = vadd.f32 1.0, %v4661_v16  ;;  %4674 = vtanh.f32 %v3086_v58  ;;  %v3092_v49 = vmul.f32 0.7978846, %v3060_v32  ;;  %v3063_v56 = vadd.f32 %v6186_v19, %v6098_v3 }
 0xde5   : > { %v4663_v25 = vpop.eup %4662  ;;  %v3175_v14 = vmul.f32 %v3143_v43, %v6227_v55  ;;  %v2929_v20 = vmul.f32 0.5, %v6058_v50  ;;  %4676 = vtanh.f32 %v3090_v40  ;;  %v3067_v0 = vadd.f32 %v6203_v53, %v6133_v27 }
 0xde6   : > { %v4665_v63 = vpop.eup %4664  ;;  %v3179_v41 = vmul.f32 %v3147_v60, %v6234_v24  ;;  %v3145_v29 = vadd.f32 1.0, %v4663_v25  ;;  %4678 = vtanh.f32 %v3088_v51  ;;  %v3095_v35 = vmul.f32 0.7978846, %v3063_v56 }
 0xde7   : > { %v3149_v58 = vadd.f32 1.0, %v4665_v63  ;;  %v2933_v18 = vmul.f32 0.5, %v6076_v52  ;;  %4680 = vtanh.f32 %v3092_v49  ;;  %v3099_v19 = vmul.f32 0.7978846, %v3067_v0 }
 0xde8   : > { %v3207_v32 = vpack.c.bf16 %v3179_v41, %v3175_v14  ;;  %v2926_v55 = vmul.f32 0.5, %v6029_v28  ;;  %4682 = vtanh.f32 %v3095_v35  ;;  %v3065_v50 = vadd.f32 %v6192_v59, %v6110_v37 }
 0xde9   : > { %v4667_v40 = vpop.eup %4666  ;;  %v3177_v53 = vmul.f32 %v3145_v29, %v6250_v22  ;;  %v3181_v16 = vmul.f32 %v3149_v58, %v2925_v45  ;;  %4684 = vtanh.f32 %v3099_v19  ;;  %v3069_v24 = vadd.f32 %v6206_v10, %v6136_v31 }
 0xdea   : > { %v4669_v43 = vpop.eup %4668  ;;  %3452 = vmatprep.mubr.bf16.mxu1 %v3207_v32  ;;  %v3151_v52 = vadd.f32 1.0, %v4667_v40  ;;  %v2930_v51 = vmul.f32 0.5, %v6517_v54  ;;  %v3097_v60 = vmul.f32 0.7978846, %v3065_v50  ;;  %v3062_v28 = vadd.f32 %v6176_v34, %v6082_v46 }
 0xdeb   : > { %v3209_v49 = vpack.c.bf16 %v3181_v16, %v3177_v53  ;;  %3453 = vmatmul.mubr.bf16.vlgmr.msra.gmra.mrb[64].mxu1 %v3206_v62  ;;  %v3155_v59 = vadd.f32 1.0, %v4669_v43  ;;  %v3101_v56 = vmul.f32 0.7978846, %v3069_v24  ;;  %v3066_v22 = vadd.f32 %v6195_v12, %v6113_v17 }
 0xdec   : > { %v4671_v45 = vpop.eup %4670  ;;  %v3183_v25 = vmul.f32 %v3151_v52, %v2927_v15  ;;  %v2928_v10 = vmul.f32 0.5, %v6519_v2  ;;  %4686 = vtanh.f32 %v3097_v60  ;;  %v3094_v14 = vmul.f32 0.7978846, %v3062_v28 }
 0xded   : > { %v4673_v0 = vpop.eup %4672  ;;  %3517 = vmatprep.mubr.bf16.mxu0 %v3209_v49  ;;  %v3187_v54 = vmul.f32 %v3155_v59, %v2931_v1  ;;  %v3153_v63 = vadd.f32 1.0, %v4671_v45  ;;  %4688 = vtanh.f32 %v3101_v56  ;;  %v3098_v41 = vmul.f32 0.7978846, %v3066_v22 }
 0xdee   : > { %v4675_v34 = vpop.eup %4674  ;;  %3518 = vmatmul.mubr.bf16.vlgmr.msra.gmra.mrb[64].mxu0 %v3208_v11  ;;  %v3157_v62 = vadd.f32 1.0, %v4673_v0  ;;  %v2932_v12 = vmul.f32 0.5, %v6521_v42  ;;  %4690 = vtanh.f32 %v3094_v14  ;;  %v3064_v2 = vadd.f32 %v6179_v36, %v6085_v7 }
 0xdef   : > { %v4677_v15 = vpop.eup %4676  ;;  %v3211_v29 = vpack.c.bf16 %v3187_v54, %v3183_v25  ;;  %v3185_v35 = vmul.f32 %v3153_v63, %v2929_v20  ;;  %v3150_v58 = vadd.f32 1.0, %v4675_v34  ;;  %4692 = vtanh.f32 %v3098_v41 }
 0xdf0   : > { %v4679_v1 = vpop.eup %4678  ;;  %v3189_v19 = vmul.f32 %v3157_v62, %v2933_v18  ;;  %v3154_v32 = vadd.f32 1.0, %v4677_v15  ;;  %v3068_v50 = vadd.f32 %v6200_v21, %v6121_v6  ;;  %v3096_v47 = vmul.f32 0.7978846, %v3064_v2 }
 0xdf1   : > { %v4681_v57 = vpop.eup %4680  ;;  %3460 = vmatprep.mubr.bf16.mxu1 %v3211_v29  ;;  %v3182_v11 = vmul.f32 %v3150_v58, %v2926_v55  ;;  %v3152_v42 = vadd.f32 1.0, %v4679_v1  ;;  %v2935_v40 = vmul.f32 0.5, %v6098_v3  ;;  %v2939_v36 = vmul.f32 0.5, %v6133_v27 }
 0xdf2   : > { %v4683_v53 = vpop.eup %4682  ;;  %v3213_v16 = vpack.c.bf16 %v3189_v19, %v3185_v35  ;;  %v3186_v20 = vmul.f32 %v3154_v32, %v2930_v51  ;;  %v3156_v24 = vadd.f32 1.0, %v4681_v57  ;;  %v3100_v43 = vmul.f32 0.7978846, %v3068_v50  ;;  %v6523_v50 = vld [vmem:[#allocation33_spill] sm:$0xff] }
 0xdf3   : > { %v4685_v52 = vpop.eup %4684  ;;  %v3184_v18 = vmul.f32 %v3152_v42, %v2928_v10  ;;  %v3159_v60 = vadd.f32 1.0, %v4683_v53  ;;  %4694 = vtanh.f32 %v3096_v47  ;;  %v3071_v21 = vadd.f32 %v6224_v39, %v6161_v5  ;;  %v6524_v47 = vld [vmem:[#allocation34_spill] sm:$0xff] }
 0xdf4   : > { %3525 = vmatprep.mubr.bf16.mxu0 %v3213_v16  ;;  %v3210_v28 = vpack.c.bf16 %v3186_v20, %v3182_v11  ;;  %v3188_v55 = vmul.f32 %v3156_v24, %v2932_v12  ;;  %v3163_v49 = vadd.f32 1.0, %v4685_v52  ;;  %4696 = vtanh.f32 %v3100_v43 }
 0xdf5   : > { %v2937_v3 = vmul.f32 0.5, %v6110_v37  ;;  %v2941_v27 = vmul.f32 0.5, %v6136_v31  ;;  %v3075_v51 = vadd.f32 %v6287_v38, %v6209_v26  ;;  %v3103_v59 = vmul.f32 0.7978846, %v3071_v21 }
 0xdf6   : > { %v4687_v56 = vpop.eup %4686  ;;  %3461 = vmatmul.mubr.bf16.gmra.mrb[68].mxu1 %v3210_v28  ;;  %v3212_v22 = vpack.c.bf16 %v3188_v55, %v3184_v18  ;;  %v3191_v45 = vmul.f32 %v3159_v60, %v2935_v40  ;;  %v3195_v25 = vmul.f32 %v3163_v49, %v2939_v36  ;;  %v3073_v39 = vadd.f32 %v6242_v9, %v6170_v48 }
 0xdf7   : > { %v4689_v10 = vpop.eup %4688  ;;  %v3161_v14 = vadd.f32 1.0, %v4687_v56  ;;  %v3107_v0 = vmul.f32 0.7978846, %v3075_v51  ;;  %4698 = vtanh.f32 %v3103_v59  ;;  %v3077_v37 = vadd.f32 %v6290_v44, %v6216_v13 }
 0xdf8   : > { %v4691_v31 = vpop.eup %4690  ;;  %3526 = vmatmul.mubr.bf16.gmra.mrb[68].mxu0 %v3212_v22  ;;  %v3215_v54 = vpack.c.bf16 %v3195_v25, %v3191_v45  ;;  %v3165_v38 = vadd.f32 1.0, %v4689_v10  ;;  %v2934_v63 = vmul.f32 0.5, %v6082_v46  ;;  %v3105_v41 = vmul.f32 0.7978846, %v3073_v39 }
 0xdf9   : > { %v4693_v34 = vpop.eup %4692  ;;  %v2938_v62 = vmul.f32 0.5, %v6113_v17  ;;  %v3158_v12 = vadd.f32 1.0, %v4691_v31  ;;  %4700 = vtanh.f32 %v3107_v0  ;;  %v3109_v9 = vmul.f32 0.7978846, %v3077_v37 }
 0xdfa   : > { %3468 = vmatprep.mubr.bf16.mxu1 %v3215_v54  ;;  %v3193_v2 = vmul.f32 %v3161_v14, %v2937_v3  ;;  %v3197_v15 = vmul.f32 %v3165_v38, %v2941_v27  ;;  %v3162_v29 = vadd.f32 1.0, %v4693_v34  ;;  %4702 = vtanh.f32 %v3105_v41 }
 0xdfb   : > { %4704 = vtanh.f32 %v3109_v9  ;;  %v3070_v44 = vadd.f32 %v6212_v4, %v6139_v30  ;;  %v3074_v35 = vadd.f32 %v6247_v33, %v6173_v61  ;;  %v3190_v58 = vmul.f32 %v3158_v12, %v2934_v63 }
 0xdfc   : > { %v3217_v46 = vpack.c.bf16 %v3197_v15, %v3193_v2  ;;  %v3194_v1 = vmul.f32 %v3162_v29, %v2938_v62  ;;  %v3072_v57 = vadd.f32 %v6524_v47, %v6523_v50  ;;  %v3076_v11 = vadd.f32 %v6279_v23, %v6183_v8 }
 0xdfd   : > { %v4695_v19 = vpop.eup %4694  ;;  %v3102_v17 = vmul.f32 0.7978846, %v3070_v44  ;;  %v3106_v32 = vmul.f32 0.7978846, %v3074_v35  ;;  %v2936_v4 = vmul.f32 0.5, %v6085_v7  ;;  %v2940_v36 = vmul.f32 0.5, %v6121_v6 }
 0xdfe   : > { %v4697_v42 = vpop.eup %4696  ;;  %3533 = vmatprep.mubr.bf16.mxu0 %v3217_v46  ;;  %v3214_v40 = vpack.c.bf16 %v3194_v1, %v3190_v58  ;;  %v3160_v33 = vadd.f32 1.0, %v4695_v19  ;;  %v3104_v16 = vmul.f32 0.7978846, %v3072_v57  ;;  %v3108_v20 = vmul.f32 0.7978846, %v3076_v11  ;;  %v6526_v11 = vld [vmem:[#allocation18_spill] sm:$0xff] }
 0xdff   : > { %v3164_v53 = vadd.f32 1.0, %v4697_v42  ;;  %4706 = vtanh.f32 %v3102_v17  ;;  %v2943_v7 = vmul.f32 0.5, %v6161_v5  ;;  %v2947_v6 = vmul.f32 0.5, %v6209_v26 }
 0xe00   : > { %3469 = vmatmul.mubr.bf16.gmra.mrb[72].mxu1 %v3214_v40  ;;  %4708 = vtanh.f32 %v3106_v32  ;;  %v3192_v43 = vmul.f32 %v3160_v33, %v2936_v4  ;;  %v2945_v49 = vmul.f32 0.5, %v6170_v48  ;;  %v2949_v59 = vmul.f32 0.5, %v6216_v13  ;;  %v6527_v4 = vld [vmem:[#allocation19_spill] sm:$0xff] }
 0xe01   : > { %v4699_v24 = vpop.eup %4698  ;;  %v3196_v52 = vmul.f32 %v3164_v53, %v2940_v36  ;;  %4710 = vtanh.f32 %v3104_v16  ;;  %v2942_v0 = vmul.f32 0.5, %v6139_v30  ;;  %v2946_v37 = vmul.f32 0.5, %v6173_v61  ;;  %v6361_v61 = vld [vmem:[%s6525_s3] ss:$0 sm:$0xff] }
 0xe02   : > { %v3167_v18 = vadd.f32 1.0, %v4699_v24  ;;  %4712 = vtanh.f32 %v3108_v20  ;;  %v2944_v54 = vmul.f32 0.5, %v6523_v50  ;;  %v2948_v41 = vmul.f32 0.5, %v6183_v8 }
 0xe03   : > { %v4701_v23 = vpop.eup %4700  ;;  %v3216_v60 = vpack.c.bf16 %v3196_v52, %v3192_v43 }
 0xe04   : > { %v4703_v21 = vpop.eup %4702  ;;  %v3171_v28 = vadd.f32 1.0, %v4701_v23  ;;  %v3199_v27 = vmul.f32 %v3167_v18, %v2943_v7 }
 0xe05   : > { %v4705_v55 = vpop.eup %4704  ;;  %3534 = vmatmul.mubr.bf16.gmra.mrb[72].mxu0 %v3216_v60  ;;  %v3169_v3 = vadd.f32 1.0, %v4703_v21 }
 0xe06   : > { %v3203_v51 = vmul.f32 %v3171_v28, %v2947_v6  ;;  %v3173_v56 = vadd.f32 1.0, %v4705_v55 }
 0xe07   : > { %v3201_v45 = vmul.f32 %v3169_v3, %v2945_v49  ;;  %v6528_v49 = vld [vmem:[#allocation21_spill] sm:$0xff] }
 0xe08   : > { %v3219_v22 = vpack.c.bf16 %v3203_v51, %v3199_v27  ;;  %v3205_v25 = vmul.f32 %v3173_v56, %v2949_v59  ;;  %v6529_v51 = vld [vmem:[#allocation20_spill] sm:$0xff] }
 0xe09   : > { %v4707_v39 = vpop.eup %4706 }
 0xe0a   : > { %v4709_v10 = vpop.eup %4708  ;;  %3476 = vmatprep.mubr.bf16.mxu1 %v3219_v22  ;;  %v3221_v5 = vpack.c.bf16 %v3205_v25, %v3201_v45  ;;  %v3166_v14 = vadd.f32 1.0, %v4707_v39 }
 0xe0b   : > { %v4711_v26 = vpop.eup %4710  ;;  %v3170_v48 = vadd.f32 1.0, %v4709_v10 }
 0xe0c   : > { %v4713_v31 = vpop.eup %4712  ;;  %3541 = vmatprep.mubr.bf16.mxu0 %v3221_v5  ;;  %v3168_v13 = vadd.f32 1.0, %v4711_v26  ;;  %v3198_v38 = vmul.f32 %v3166_v14, %v2942_v0 }
 0xe0d   : > { %v3202_v63 = vmul.f32 %v3170_v48, %v2946_v37  ;;  %v3172_v34 = vadd.f32 1.0, %v4713_v31 }
 0xe0e   : > { %v3200_v12 = vmul.f32 %v3168_v13, %v2944_v54 }
 0xe0f   : > { %v3218_v62 = vpack.c.bf16 %v3202_v63, %v3198_v38  ;;  %v3204_v9 = vmul.f32 %v3172_v34, %v2948_v41  ;;  %v6530_v38 = vld [vmem:[#allocation23_spill] sm:$0xff]  ;;  %v6531_v34 = vld [vmem:[#allocation22_spill] sm:$0xff] }
 0xe11   : > { %3477 = vmatmul.mubr.bf16.gmra.mrb[76].mxu1 %v3218_v62  ;;  %v3220_v2 = vpack.c.bf16 %v3204_v9, %v3200_v12 }
 0xe13   : > { %3542 = vmatmul.mubr.bf16.gmra.mrb[76].mxu0 %v3220_v2 }
 0xebe   : > { %v3953_v30 = vpop.f32.mrb[64].mxu1 }
 0xebf   : > { %v3954_v15 = vpop.f32.mrb[65].mxu1 }
 0xec0   : > { %v3955_v29 = vadd.f32 %v3954_v15, %v3953_v30  ;;  %v3956_v44 = vpop.f32.mrb[66].mxu1 }
 0xec1   : > { %v3993_v35 = vpop.f32.mrb[64].mxu0  ;;  %v3957_v46 = vpop.f32.mrb[67].mxu1 }
 0xec2   : > { %v3455_v8 = vadd.f32 %v3955_v29, %v6361_v61  ;;  %v3994_v58 = vpop.f32.mrb[65].mxu0  ;;  %v3958_v1 = vadd.f32 %v3957_v46, %v3956_v44 }
 0xec3   : > { %v3995_v19 = vadd.f32 %v3994_v58, %v3993_v35  ;;  %v3996_v17 = vpop.f32.mrb[66].mxu0 }
 0xec4   : > { %v3458_v32 = vadd.f32 %v3958_v1, %v6361_v61  ;;  %v3997_v50 = vpop.f32.mrb[67].mxu0 }
 0xec5   : > { %v3520_v47 = vadd.f32 %v3995_v19, %v3455_v8  ;;  %v3998_v57 = vadd.f32 %v3997_v50, %v3996_v17  ;;  %v6532_v50 = vld [vmem:[#allocation25_spill] sm:$0xff] }
 0xec7   : > { %v3550_v42 = vadd.f32 %v3520_v47, %v6526_v11  ;;  %v3523_v40 = vadd.f32 %v3998_v57, %v3458_v32  ;;  %v6534_v11 = vld [vmem:[#allocation24_spill] sm:$0xff] }
 0xec9   : > { %3558 = vst [vmem:[%s6368_s18] sm:$0xff] %v3550_v42  ;;  %v3551_v36 = vadd.f32 %v3523_v40, %v6527_v4  ;;  %v3959_v33 = vpop.f32.mrb[68].mxu1 }
 0xeca   : > { %v3960_v53 = vpop.f32.mrb[69].mxu1 }
 0xecb   : > { %3559 = vst [vmem:[%s6368_s18 + $0x8] sm:$0xff] %v3551_v36  ;;  %v3999_v16 = vpop.f32.mrb[68].mxu0  ;;  %v3961_v20 = vadd.f32 %v3960_v53, %v3959_v33  ;;  %v3962_v24 = vpop.f32.mrb[70].mxu1 }
 0xecc   : > { %v4000_v43 = vpop.f32.mrb[69].mxu0  ;;  %v3963_v52 = vpop.f32.mrb[71].mxu1 }
 0xecd   : > { %v3463_v18 = vadd.f32 %v3961_v20, %v6361_v61  ;;  %v4001_v23 = vadd.f32 %v4000_v43, %v3999_v16  ;;  %v4002_v60 = vpop.f32.mrb[70].mxu0  ;;  %v3964_v21 = vadd.f32 %v3963_v52, %v3962_v24 }
 0xece   : > { %v4003_v7 = vpop.f32.mrb[71].mxu0 }
 0xecf   : > { %v3528_v6 = vadd.f32 %v4001_v23, %v3463_v18  ;;  %v3466_v28 = vadd.f32 %v3964_v21, %v6361_v61  ;;  %v4004_v55 = vadd.f32 %v4003_v7, %v4002_v60 }
 0xed1   : > { %v3552_v3 = vadd.f32 %v3528_v6, %v6528_v49  ;;  %v3531_v27 = vadd.f32 %v4004_v55, %v3466_v28 }
 0xed3   : > { %3560 = vst [vmem:[%s6368_s18 + $0x10] sm:$0xff] %v3552_v3  ;;  %v3553_v59 = vadd.f32 %v3531_v27, %v6529_v51  ;;  %v3965_v56 = vpop.f32.mrb[72].mxu1 }
 0xed4   : > { %v3966_v22 = vpop.f32.mrb[73].mxu1 }
 0xed5   : > { %3561 = vst [vmem:[%s6368_s18 + $0x18] sm:$0xff] %v3553_v59  ;;  %v3967_v45 = vadd.f32 %v3966_v22, %v3965_v56  ;;  %v3968_v25 = vpop.f32.mrb[74].mxu1 }
 0xed6   : > { %v3969_v39 = vpop.f32.mrb[75].mxu1 }
 0xed7   : > { %v3970_v10 = vadd.f32 %v3969_v39, %v3968_v25  ;;  %v3471_v14 = vadd.f32 %v3967_v45, %v6361_v61 }
 0xed8   : > { %v4005_v5 = vpop.f32.mrb[72].mxu0 }
 0xed9   : > { %v4006_v26 = vpop.f32.mrb[73].mxu0  ;;  %v3474_v48 = vadd.f32 %v3970_v10, %v6361_v61 }
 0xeda   : > { %v4007_v0 = vadd.f32 %v4006_v26, %v4005_v5  ;;  %v4008_v37 = vpop.f32.mrb[74].mxu0 }
 0xedb   : > { %v4009_v31 = vpop.f32.mrb[75].mxu0 }
 0xedc   : > { %v3536_v54 = vadd.f32 %v4007_v0, %v3471_v14  ;;  %v4010_v13 = vadd.f32 %v4009_v31, %v4008_v37 }
 0xede   : > { %v3554_v63 = vadd.f32 %v3536_v54, %v6530_v38  ;;  %v3539_v41 = vadd.f32 %v4010_v13, %v3474_v48 }
 0xee0   : > { %3562 = vst [vmem:[%s6368_s18 + $0x20] sm:$0xff] %v3554_v63  ;;  %v3555_v62 = vadd.f32 %v3539_v41, %v6531_v34 }
 0xee2   : > { %3563 = vst [vmem:[%s6368_s18 + $0x28] sm:$0xff] %v3555_v62 }
 0xee4   : > { %v3971_v12 = vpop.f32.mrb[76].mxu1 }
 0xee5   : > { %v3972_v9 = vpop.f32.mrb[77].mxu1 }
 0xee6   : > { %v4011_v2 = vpop.f32.mrb[76].mxu0  ;;  %v3973_v30 = vadd.f32 %v3972_v9, %v3971_v12  ;;  %v3974_v15 = vpop.f32.mrb[78].mxu1 }
 0xee7   : > { %v4012_v29 = vpop.f32.mrb[77].mxu0  ;;  %v3975_v44 = vpop.f32.mrb[79].mxu1 }
 0xee8   : > { %v3479_v35 = vadd.f32 %v3973_v30, %v6361_v61  ;;  %v4013_v46 = vadd.f32 %v4012_v29, %v4011_v2  ;;  %v4014_v8 = vpop.f32.mrb[78].mxu0  ;;  %v3976_v58 = vadd.f32 %v3975_v44, %v3974_v15 }
 0xee9   : > { %v4015_v1 = vpop.f32.mrb[79].mxu0 }
 0xeea   : > { %v3544_v19 = vadd.f32 %v4013_v46, %v3479_v35  ;;  %v3482_v17 = vadd.f32 %v3976_v58, %v6361_v61  ;;  %v4016_v32 = vadd.f32 %v4015_v1, %v4014_v8 }
 0xeec   : > { %v3556_v47 = vadd.f32 %v3544_v19, %v6532_v50  ;;  %v3547_v57 = vadd.f32 %v4016_v32, %v3482_v17 }
 0xeee   : > { %3564 = vst [vmem:[%s6368_s18 + $0x30] sm:$0xff] %v3556_v47  ;;  %v3557_v42 = vadd.f32 %v3547_v57, %v6534_v11 }
 0xef0   : > { %3565 = vst [vmem:[%s6368_s18 + $0x38] sm:$0xff] %v3557_v42 }
 0xef1   : > { %4877 = shalt.err (!%p4874_p13)
}
 0xef2   : > { %s4878_s16 = scalar_lea.hbm %s6393_s9, 1024  ;;  %s4882_s18 = scalar_lea.hbm %s6533_s14, 2048 }
 0xef3   : > { %p4879_p9 = scmp.ne.s32.totalorder %s6393_s9, %s4878_s16  ;;  %p4883_p4 = scmp.lt.u32.totalorder %s6393_s9, %s6533_s14 }
 0xef4   : > { %p4884_p8 = scmp.lt.u32.totalorder %s4882_s18, %s4878_s16  ;;  %p4886_p3 = scmp.lt.u32.totalorder %s4878_s16, %s6393_s9 }
 0xef5   : > { %p4880_p0 = pnand %p4879_p9, %p5181_p10 }
 0xef6   : > { %p4885_p6 = por %p4884_p8, %p4883_p4 }
 0xef7   : > { %p4881_p11 = pneg %p4880_p0 }
 0xef8   : > { %p4887_p5 = por %p4886_p3, %p4885_p6 }
 0xefa   : > { %p4888_p7 = pnand %p4887_p5, %p4881_p11 }
 0xefc   : > { %4891 = shalt.err (!%p4888_p7)
}
 0xefd   : > { %s4958_s12 = smov 128   ;;  %s4959_s25 = smov 8  }
 0xefe   : > { %4227 = dma.vmem_to_hbm [thread:$0]  (%p5181_p10), %s6395_s13, 1024, %s6393_s9, %s3567_s26, %s4958_s12, %s4958_s12, %s4959_s25  }
 0xeff PF: > { %s6535_s27 = sld [smem:[#allocation16_spill]]  ;;  %s6536_s29 = sld [smem:[#allocation17_spill]] }
 0xf00   : > { %p6538_p2 = scmp.ge.s32.totalorder %s4938_s24, 2 }
 0xf05   : > { %s3595_s17 = sand.u32 1, %s6535_s27   ;;  %p6537_p12 = scmp.ne.s32.totalorder %s6536_s29, 0 }
 0xf06   : > { %s3596_s16 = scalar_lea.sflag [#allocation4], %s3595_s17 }
 0xf07   : > { %p4247_p1 = pnand %p6538_p2, %p6537_p12 }
 0xf09   : > { %4921 = dma.done.wait (!%p4247_p1), %s3596_s16, 1024  }
 0xf0a   : > { %4923 = vsyncadd (!%p4247_p1), %s3596_s16, 4294966272  ;;  %p27_p13 = scmp.ge.s32.totalorder %s5171_s30, 4   ;;  %s6539_s21 = smov %s4930_s22 }
 0xf0b   : > { %s6540_s22 = smov %s4934_s23  ;;  %s6541_s23 = smov %s5187_s20 }
 0xf0c   : > { %s6542_s24 = smov %s5171_s30  ;;  %29 = sbr.rel (!%p27_p13) target bundleno = 12 (0xc), region = 129 }
 0xf13   :  { %3601 = vsyncpa [#allocation3], 1 }
 0xf14   :  { %3603 = vsyncpa [#allocation3 + $0x1], 1 }
 0xf15   :  { %3604 = vsyncpa [#allocation6], 1 }
 0xf16   :  { %3605 = vsyncpa [#allocation9], 1 }
 0xf17   :  { %3606 = vsyncpa [#allocation4], 1 }
 0xf18   :  { %3608 = vsyncpa [#allocation4 + $0x1], 1 }

</bundles_post_ra>
